<compile_context>
chip_gen: v7x
topology: tpu7x:2x2x1
jax: 0.10.0
libtpu: 0.0.40
codegen_flags: <defaults>
</compile_context>

<pallas_src>
import functools

import jax
import jax.numpy as jnp
from jax.experimental import pallas as pl
from jax.experimental.pallas import tpu as pltpu


# ----------------------------------------------------------------------------
# Helpers
# ----------------------------------------------------------------------------
def _round_up(x, m):
    return (x + m - 1) // m * m


def _cdiv(a, b):
    return -(-a // b)


def _dual_tensorcore():
    """True on megacore / dual-TensorCore generations (v4, v5p, v7x)."""
    try:
        kind = jax.devices()[0].device_kind.lower()
    except Exception:
        return False
    return any(t in kind for t in ("v4", "v5p", "v7", "7x"))


_SPLIT_M = _dual_tensorcore()


def _m_tiling(M):
    """(n_m, tm, Mp). 2-way M split only on dual-TC chips; else one full block."""
    if _SPLIT_M and M >= 256:
        tm = _round_up(_cdiv(M, 2), 16)          # 16-aligned for bf16 sublane packing
        return 2, tm, 2 * tm
    return 1, M, M


# ----------------------------------------------------------------------------
# Pallas kernels
# ----------------------------------------------------------------------------
def _gemm_bias_act_kernel(a_ref, b_ref, bias_ref, o_ref, *, act):
    """Single-K-block GEMM: (tm,K)@(K,N) + bias(1,N), optional act, cast at store."""
    r = jnp.dot(a_ref[...], b_ref[...], preferred_element_type=jnp.float32)
    r = r + bias_ref[...]
    if act == "relu":
        r = jnp.maximum(r, 0.0)
    elif act == "sigmoid":
        r = jax.nn.sigmoid(r)
    o_ref[...] = r.astype(o_ref.dtype)


def _fused_latent_kernel(a_ref, b_ref, bias_ref, eps_ref, stats_ref, noise_ref,
                         *, latent):
    """Fused fc_mu + fc_var GEMM + eps*exp(0.5*log_var) epilogue.

    Result lanes [0, latent) hold mu, [latent, 2*latent) hold log_var.
    eps arrives pre-shifted into lanes [latent, 2*latent), so the scaled noise
    lands on the log_var lanes; the (tiny) mu + noise add happens outside.
    """
    r = jnp.dot(a_ref[...], b_ref[...], preferred_element_type=jnp.float32)
    r = r + bias_ref[...]
    stats_ref[...] = r                                       # [mu | log_var]
    lane = jax.lax.broadcasted_iota(jnp.int32, r.shape, dimension=1)
    log_var = jnp.where(lane >= latent, r, 0.0)              # mask mu lanes (no 0*inf)
    noise_ref[...] = eps_ref[...] * jnp.exp(0.5 * log_var)   # EUP exp


def _matvec_bias_sigmoid_kernel(a_ref, w_ref, b_ref, o_ref):
    """Cout==1 conv as a VPU multiply + lane reduction; writes only (tm, 1)."""
    prod = a_ref[...].astype(jnp.float32) * w_ref[...]
    r = jnp.sum(prod, axis=1, keepdims=True) + b_ref[...]
    o_ref[...] = jax.nn.sigmoid(r)


# ----------------------------------------------------------------------------
# GEMM wrappers (single K and N blocks, bf16 operands, f32 epilogue)
# ----------------------------------------------------------------------------
def matmul_bias_act(a, b, bias, act=None, out_dtype=jnp.bfloat16):
    """a:(M,K) @ b:(K,N) + bias(1,N), optional activation. One fused MXU kernel."""
    if a.dtype != jnp.bfloat16:
        a = a.astype(jnp.bfloat16)
    M, K = a.shape
    Kb, N = b.shape
    assert K == Kb
    n_m, tm, Mp = _m_tiling(M)
    if Mp != M:
        a = jnp.pad(a, ((0, Mp - M), (0, 0)))

    out = pl.pallas_call(
        functools.partial(_gemm_bias_act_kernel, act=act),
        out_shape=jax.ShapeDtypeStruct((Mp, N), out_dtype),
        grid=(n_m,),
        in_specs=[
            pl.BlockSpec((tm, K), lambda i: (i, 0)),
            pl.BlockSpec((K, N), lambda i: (0, 0)),
            pl.BlockSpec((1, N), lambda i: (0, 0)),
        ],
        out_specs=pl.BlockSpec((tm, N), lambda i: (i, 0)),
        compiler_params=pltpu.CompilerParams(
            dimension_semantics=("parallel",)),
        cost_estimate=pl.CostEstimate(
            flops=2 * M * N * K,
            transcendentals=M * N if act == "sigmoid" else 0,
            bytes_accessed=(M * K * 2 + K * N * 2 + N * 4
                            + M * N * jnp.dtype(out_dtype).itemsize)),
    )(a, b, bias)
    return out if Mp == M else out[:M]


def fused_latent_projection(flat, w_cat, b_cat, eps, latent):
    """mu = flat@Wmu.T+bmu ; log_var = flat@Wvar.T+bvar ; z = mu+eps*exp(.5*lv).

    One GEMM over the pre-concatenated [W_mu | W_var]; exp/scale fused in the
    epilogue; the tiny (B, latent) add happens outside the kernel.
    """
    if flat.dtype != jnp.bfloat16:
        flat = flat.astype(jnp.bfloat16)
    M, K = flat.shape
    N = 2 * latent
    eps_sh = jnp.pad(eps.astype(jnp.float32), ((0, 0), (latent, 0)))  # lanes [L,2L)

    stats, noise = pl.pallas_call(
        functools.partial(_fused_latent_kernel, latent=latent),
        out_shape=(jax.ShapeDtypeStruct((M, N), jnp.float32),
                   jax.ShapeDtypeStruct((M, N), jnp.float32)),
        grid=(1,),
        in_specs=[
            pl.BlockSpec((M, K), lambda i: (0, 0)),
            pl.BlockSpec((K, N), lambda i: (0, 0)),
            pl.BlockSpec((1, N), lambda i: (0, 0)),
            pl.BlockSpec((M, N), lambda i: (0, 0)),
        ],
        out_specs=(pl.BlockSpec((M, N), lambda i: (0, 0)),
                   pl.BlockSpec((M, N), lambda i: (0, 0))),
        compiler_params=pltpu.CompilerParams(
            dimension_semantics=("parallel",)),
        cost_estimate=pl.CostEstimate(
            flops=2 * M * N * K,
            transcendentals=M * N,
            bytes_accessed=M * K * 2 + K * N * 2 + 3 * M * N * 4 + N * 4),
    )(flat, w_cat, b_cat, eps_sh)

    mu = stats[:, :latent]
    log_var = stats[:, latent:]
    z = mu + noise[:, latent:]                    # z = mu + eps * exp(0.5 * log_var)
    return mu, log_var, z


# ----------------------------------------------------------------------------
# Conv glue (NHWC activations; im2col is XLA data movement, GEMM is the kernel)
# ----------------------------------------------------------------------------
def _im2col_nhwc(x, kh, kw, stride, pad):
    """x: (B,H,W,C). Returns (B*Ho*Wo, kh*kw*C) with element order (ki,kj,c)."""
    B, H, W, C = x.shape
    xp = jnp.pad(x, ((0, 0), pad[0], pad[1], (0, 0)))
    Hp = H + pad[0][0] + pad[0][1]
    Wp = W + pad[1][0] + pad[1][1]
    Ho = (Hp - kh) // stride + 1
    Wo = (Wp - kw) // stride + 1
    cols = []
    for i in range(kh):
        for j in range(kw):
            cols.append(xp[:, i:i + stride * (Ho - 1) + 1:stride,
                              j:j + stride * (Wo - 1) + 1:stride, :])
    patches = jnp.stack(cols, axis=3)             # (B, Ho, Wo, kh*kw, C)
    return patches.reshape(B * Ho * Wo, kh * kw * C), Ho, Wo


def conv2d_nhwc(x, layer, stride, pad, act=None):
    """PyTorch-semantics Conv2d on NHWC bf16 activations; pre-packed weights."""
    k = layer["k"]
    cols, Ho, Wo = _im2col_nhwc(x, k, k, stride, ((pad, pad), (pad, pad)))
    out = matmul_bias_act(cols, layer["w"], layer["b"], act=act)
    return out.reshape(x.shape[0], Ho, Wo, layer["w"].shape[1])


def deconv_s2_nhwc(x, layer, act=None):
    """ConvTranspose2d(k=3, s=2, p=1, op=1) via sub-pixel (phase) GEMM:
    2x2 im2col on the UNDILATED input against a pre-packed (4*Cin, 4*Cout)
    block weight -> no zero-stuffed input, N widened to 4*Cout for the MXU."""
    B, H, W, _ = x.shape
    cout = layer["cout"]
    cols, _, _ = _im2col_nhwc(x, 2, 2, 1, ((0, 1), (0, 1)))   # (B*H*W, 4*Cin)
    out = matmul_bias_act(cols, layer["w"], layer["b"], act=act)  # (B*H*W, 4*Cout)
    out = out.reshape(B, H, W, 2, 2, cout).transpose(0, 1, 3, 2, 4, 5)
    return out.reshape(B, 2 * H, 2 * W, cout)


def conv1x_out_sigmoid(x, w_vec, bias):
    """Final ConvTranspose2d(32,1,k=3,s=1,p=1) + Sigmoid. Cout==1, so instead of
    a GEMM with a 128x-padded N we do a VPU multiply + lane-reduce and write
    only the (M, 1) useful column (f32)."""
    B, H, W, _ = x.shape
    cols, Ho, Wo = _im2col_nhwc(x, 3, 3, 1, ((1, 1), (1, 1)))
    M, K = cols.shape
    tm = 112 if M % 112 == 0 else M               # 112 divides B*28*28 for any B
    n_m = M // tm

    out = pl.pallas_call(
        _matvec_bias_sigmoid_kernel,
        out_shape=jax.ShapeDtypeStruct((M, 1), jnp.float32),
        grid=(n_m,),
        in_specs=[
            pl.BlockSpec((tm, K), lambda i: (i, 0)),
            pl.BlockSpec((1, K), lambda i: (0, 0)),
            pl.BlockSpec((1, 1), lambda i: (0, 0)),
        ],
        out_specs=pl.BlockSpec((tm, 1), lambda i: (i, 0)),
        compiler_params=pltpu.CompilerParams(
            dimension_semantics=("parallel",)),
        cost_estimate=pl.CostEstimate(
            flops=2 * M * K,
            transcendentals=M,
            bytes_accessed=M * K * 2 + K * 4 + M * 4 + 4),
    )(cols, w_vec, bias)
    return out.reshape(B, Ho, Wo, 1)


# ----------------------------------------------------------------------------
# Parameters: PyTorch-layout init + one-time GEMM packing (outside jit)
# ----------------------------------------------------------------------------
def init_params(key, latent_dim):
    ks = jax.random.split(key, 10)
    s = 0.05
    flat = 64 * 7 * 7
    p = {}
    p["c1w"] = s * jax.random.normal(ks[0], (32, 1, 3, 3), jnp.float32)
    p["c1b"] = jnp.zeros((32,), jnp.float32)
    p["c2w"] = s * jax.random.normal(ks[1], (64, 32, 3, 3), jnp.float32)
    p["c2b"] = jnp.zeros((64,), jnp.float32)
    p["c3w"] = s * jax.random.normal(ks[2], (64, 64, 3, 3), jnp.float32)
    p["c3b"] = jnp.zeros((64,), jnp.float32)
    p["mu_w"] = s * jax.random.normal(ks[3], (latent_dim, flat), jnp.float32)
    p["mu_b"] = jnp.zeros((latent_dim,), jnp.float32)
    p["var_w"] = s * jax.random.normal(ks[4], (latent_dim, flat), jnp.float32)
    p["var_b"] = jnp.zeros((latent_dim,), jnp.float32)
    p["dec_w"] = s * jax.random.normal(ks[5], (flat, latent_dim), jnp.float32)
    p["dec_b"] = jnp.zeros((flat,), jnp.float32)
    p["t1w"] = s * jax.random.normal(ks[6], (64, 64, 3, 3), jnp.float32)
    p["t1b"] = jnp.zeros((64,), jnp.float32)
    p["t2w"] = s * jax.random.normal(ks[7], (64, 32, 3, 3), jnp.float32)
    p["t2b"] = jnp.zeros((32,), jnp.float32)
    p["t3w"] = s * jax.random.normal(ks[8], (32, 1, 3, 3), jnp.float32)
    p["t3b"] = jnp.zeros((1,), jnp.float32)
    return p


def pack_params(p, latent_dim):
    """One-time repack of PyTorch-layout weights into GEMM-ready bf16 form."""
    def conv_gemm(w, b):                           # w: (Cout, Cin, kh, kw)
        cout, cin, kh, kw = w.shape
        wm = w.transpose(2, 3, 1, 0).reshape(kh * kw * cin, cout)   # (ki,kj,c) x o
        return dict(w=wm.astype(jnp.bfloat16),
                    b=b.reshape(1, cout).astype(jnp.float32), k=kh)

    def deconv_s2_gemm(w, b):                      # w: (Cin, Cout, 3, 3)
        cin, cout = w.shape[0], w.shape[1]
        tap = {(0, 0): 1, (1, 0): 2, (1, 1): 0}    # (phase, patch-delta) -> kernel tap
        w_big = jnp.zeros((2, 2, cin, 2, 2, cout), jnp.float32)
        for (py, di), ki in tap.items():
            for (px, dj), kj in tap.items():
                w_big = w_big.at[di, dj, :, py, px, :].set(w[:, :, ki, kj])
        return dict(w=w_big.reshape(4 * cin, 4 * cout).astype(jnp.bfloat16),
                    b=jnp.tile(b, 4).reshape(1, 4 * cout).astype(jnp.float32),
                    cout=cout)

    packed = {"latent": latent_dim}
    packed["c1"] = conv_gemm(p["c1w"], p["c1b"])
    packed["c2"] = conv_gemm(p["c2w"], p["c2b"])
    packed["c3"] = conv_gemm(p["c3w"], p["c3b"])
    packed["lat_w"] = jnp.concatenate([p["mu_w"].T, p["var_w"].T],
                                      axis=1).astype(jnp.bfloat16)
    packed["lat_b"] = jnp.concatenate([p["mu_b"], p["var_b"]]
                                      ).reshape(1, -1).astype(jnp.float32)
    packed["dec_w"] = p["dec_w"].T.astype(jnp.bfloat16)              # (latent, 3136)
    packed["dec_b"] = p["dec_b"].reshape(1, -1).astype(jnp.float32)
    packed["t1"] = deconv_s2_gemm(p["t1w"], p["t1b"])
    packed["t2"] = deconv_s2_gemm(p["t2w"], p["t2b"])
    # t3: ConvTranspose2d stride=1 == Conv2d with flipped/swapped kernel, pad=k-1-p
    w_eq = jnp.flip(p["t3w"], axis=(2, 3)).transpose(1, 0, 2, 3)     # (1, 32, 3, 3)
    packed["t3_w"] = w_eq.transpose(2, 3, 1, 0).reshape(1, 9 * 32).astype(jnp.float32)
    packed["t3_b"] = p["t3b"].reshape(1, 1).astype(jnp.float32)
    return packed


# ----------------------------------------------------------------------------
# VAE forward
# ----------------------------------------------------------------------------
def vae_forward(packed, x, eps):
    """x: NCHW (B,1,28,28) f32; eps: (B, latent). Returns (x_recon NCHW, mu, log_var)."""
    B = x.shape[0]
    latent = packed["latent"]

    h = x.transpose(0, 2, 3, 1).astype(jnp.bfloat16)          # NHWC, bf16 activations
    # encoder
    h = conv2d_nhwc(h, packed["c1"], stride=1, pad=1, act="relu")
    h = conv2d_nhwc(h, packed["c2"], stride=2, pad=1, act="relu")
    h = conv2d_nhwc(h, packed["c3"], stride=2, pad=1, act="relu")
    flat = h.transpose(0, 3, 1, 2).reshape(B, -1)             # PyTorch NCHW flatten

    # fused fc_mu + fc_var + reparameterization epilogue (one Pallas kernel)
    mu, log_var, z = fused_latent_projection(flat, packed["lat_w"], packed["lat_b"],
                                             eps, latent)

    # decoder
    d = matmul_bias_act(z.astype(jnp.bfloat16), packed["dec_w"], packed["dec_b"])
    d = d.reshape(B, 64, 7, 7).transpose(0, 2, 3, 1)          # NCHW unflatten -> NHWC
    d = deconv_s2_nhwc(d, packed["t1"], act="relu")
    d = deconv_s2_nhwc(d, packed["t2"], act="relu")
    d = conv1x_out_sigmoid(d, packed["t3_w"], packed["t3_b"]) # (B,28,28,1) f32
    x_recon = d.transpose(0, 3, 1, 2)                         # back to NCHW
    return x_recon, mu, log_var


if __name__ == "__main__":
    latent_dim = 16
    key = jax.random.PRNGKey(0)
    pkey, xkey, ekey = jax.random.split(key, 3)

    params = init_params(pkey, latent_dim)
    packed = pack_params(params, latent_dim)                  # one-time weight packing

    # flatten_size = 64*7*7 hard-codes 28x28 single-channel inputs
    x = jax.random.normal(xkey, (2, 1, 28, 28), jnp.float32)
    eps = jax.random.normal(ekey, (2, latent_dim), jnp.float32)

    fwd = jax.jit(functools.partial(vae_forward, packed))
    x_recon, mu, log_var = fwd(x, eps)
    jax.block_until_ready((x_recon, mu, log_var))

    assert x_recon.shape == (2, 1, 28, 28)
    assert mu.shape == (2, latent_dim) and log_var.shape == (2, latent_dim)
    assert bool(jnp.all(jnp.isfinite(x_recon)))
    assert bool(jnp.all((x_recon >= 0.0) & (x_recon <= 1.0)))
    assert bool(jnp.all(jnp.isfinite(mu))) and bool(jnp.all(jnp.isfinite(log_var)))
    print("KERNEL_OK")
</pallas_src>

<mosaic_0001>
module attributes {stable_mosaic.version = 11 : i64} {
  func.func @_gemm_bias_act_kernel(%arg0: i32, %arg1: memref<1568x9xbf16, #tpu.memory_space<vmem>>, %arg2: memref<9x32xbf16, #tpu.memory_space<vmem>>, %arg3: memref<1x32xf32, #tpu.memory_space<vmem>>, %arg4: memref<1568x32xbf16, #tpu.memory_space<vmem>>) attributes {dimension_semantics = [#tpu.dimension_semantics<parallel>], iteration_bounds = array<i64: 1>, scalar_prefetch = 0 : i64, scratch_operands = 0 : i64, tpu.core_type = #tpu.core_type<tc>, window_params = [{transform_indices = @transform_0, window_bounds = array<i64: 1568, 9>}, {pipeline_mode = #tpu.pipeline_mode<synchronous>, transform_indices = @transform_1, window_bounds = array<i64: 9, 32>}, {pipeline_mode = #tpu.pipeline_mode<synchronous>, transform_indices = @transform_2, window_bounds = array<i64: 1, 32>}, {transform_indices = @transform_3, window_bounds = array<i64: 1568, 32>}]} {
    %c0 = arith.constant 0 : index
    %c0_0 = arith.constant 0 : index
    %0 = vector.load %arg1[%c0, %c0_0] : memref<1568x9xbf16, #tpu.memory_space<vmem>>, vector<1568x9xbf16>
    %c0_1 = arith.constant 0 : index
    %c0_2 = arith.constant 0 : index
    %1 = vector.load %arg2[%c0_1, %c0_2] : memref<9x32xbf16, #tpu.memory_space<vmem>>, vector<9x32xbf16>
    %cst = arith.constant dense<0.000000e+00> : vector<1568x32xf32>
    %2 = tpu.matmul %0, %1, %cst {dimension_numbers = #tpu.dot_dimension_numbers<[1], [0], [0], [1], [0, 0, 1, 1], [], []>} : vector<1568x9xbf16>, vector<9x32xbf16>, vector<1568x32xf32> -> vector<1568x32xf32>
    %c0_3 = arith.constant 0 : index
    %c0_4 = arith.constant 0 : index
    %3 = vector.load %arg3[%c0_3, %c0_4] : memref<1x32xf32, #tpu.memory_space<vmem>>, vector<1x32xf32>
    %4 = vector.broadcast %3 : vector<1x32xf32> to vector<1568x32xf32>
    %5 = arith.addf %2, %4 : vector<1568x32xf32>
    %cst_5 = arith.constant 0.000000e+00 : f32
    %6 = vector.broadcast %cst_5 : f32 to vector<1568x32xf32>
    %7 = arith.maximumf %5, %6 : vector<1568x32xf32>
    %8 = arith.truncf %7 : vector<1568x32xf32> to vector<1568x32xbf16>
    %c0_6 = arith.constant 0 : index
    %c0_7 = arith.constant 0 : index
    %9 = vector.load %arg4[%c0_6, %c0_7] : memref<1568x32xbf16, #tpu.memory_space<vmem>>, vector<1568x32xbf16>
    tpu.vector_store %arg4[%c0_6, %c0_7], %8 {strides = array<i32>} : memref<1568x32xbf16, #tpu.memory_space<vmem>>, vector<1568x32xbf16>,
    return
  }
  func.func @transform_0(%arg0: i32) -> (i32, i32) {
    %c0_i32 = arith.constant 0 : i32
    %c0_i32_0 = arith.constant 0 : i32
    return %arg0, %c0_i32 : i32, i32
  }
  func.func @transform_1(%arg0: i32) -> (i32, i32) {
    %c0_i32 = arith.constant 0 : i32
    %c0_i32_0 = arith.constant 0 : i32
    %c0_i32_1 = arith.constant 0 : i32
    return %c0_i32, %c0_i32_0 : i32, i32
  }
  func.func @transform_2(%arg0: i32) -> (i32, i32) {
    %c0_i32 = arith.constant 0 : i32
    %c0_i32_0 = arith.constant 0 : i32
    %c0_i32_1 = arith.constant 0 : i32
    return %c0_i32, %c0_i32_0 : i32, i32
  }
  func.func @transform_3(%arg0: i32) -> (i32, i32) {
    %c0_i32 = arith.constant 0 : i32
    %c0_i32_0 = arith.constant 0 : i32
    return %arg0, %c0_i32 : i32, i32
  }
}

module attributes {stable_mosaic.version = 11 : i64} {
  func.func @_gemm_bias_act_kernel(%arg0: i32, %arg1: memref<392x288xbf16, #tpu.memory_space<vmem>>, %arg2: memref<288x64xbf16, #tpu.memory_space<vmem>>, %arg3: memref<1x64xf32, #tpu.memory_space<vmem>>, %arg4: memref<392x64xbf16, #tpu.memory_space<vmem>>) attributes {dimension_semantics = [#tpu.dimension_semantics<parallel>], iteration_bounds = array<i64: 1>, scalar_prefetch = 0 : i64, scratch_operands = 0 : i64, tpu.core_type = #tpu.core_type<tc>, window_params = [{transform_indices = @transform_0, window_bounds = array<i64: 392, 288>}, {pipeline_mode = #tpu.pipeline_mode<synchronous>, transform_indices = @transform_1, window_bounds = array<i64: 288, 64>}, {pipeline_mode = #tpu.pipeline_mode<synchronous>, transform_indices = @transform_2, window_bounds = array<i64: 1, 64>}, {transform_indices = @transform_3, window_bounds = array<i64: 392, 64>}]} {
    %c0 = arith.constant 0 : index
    %c0_0 = arith.constant 0 : index
    %0 = vector.load %arg1[%c0, %c0_0] : memref<392x288xbf16, #tpu.memory_space<vmem>>, vector<392x288xbf16>
    %c0_1 = arith.constant 0 : index
    %c0_2 = arith.constant 0 : index
    %1 = vector.load %arg2[%c0_1, %c0_2] : memref<288x64xbf16, #tpu.memory_space<vmem>>, vector<288x64xbf16>
    %cst = arith.constant dense<0.000000e+00> : vector<392x64xf32>
    %2 = tpu.matmul %0, %1, %cst {dimension_numbers = #tpu.dot_dimension_numbers<[1], [0], [0], [1], [0, 0, 1, 1], [], []>} : vector<392x288xbf16>, vector<288x64xbf16>, vector<392x64xf32> -> vector<392x64xf32>
    %c0_3 = arith.constant 0 : index
    %c0_4 = arith.constant 0 : index
    %3 = vector.load %arg3[%c0_3, %c0_4] : memref<1x64xf32, #tpu.memory_space<vmem>>, vector<1x64xf32>
    %4 = vector.broadcast %3 : vector<1x64xf32> to vector<392x64xf32>
    %5 = arith.addf %2, %4 : vector<392x64xf32>
    %cst_5 = arith.constant 0.000000e+00 : f32
    %6 = vector.broadcast %cst_5 : f32 to vector<392x64xf32>
    %7 = arith.maximumf %5, %6 : vector<392x64xf32>
    %8 = arith.truncf %7 : vector<392x64xf32> to vector<392x64xbf16>
    %c0_6 = arith.constant 0 : index
    %c0_7 = arith.constant 0 : index
    %9 = vector.load %arg4[%c0_6, %c0_7] : memref<392x64xbf16, #tpu.memory_space<vmem>>, vector<392x64xbf16>
    tpu.vector_store %arg4[%c0_6, %c0_7], %8 {strides = array<i32>} : memref<392x64xbf16, #tpu.memory_space<vmem>>, vector<392x64xbf16>,
    return
  }
  func.func @transform_0(%arg0: i32) -> (i32, i32) {
    %c0_i32 = arith.constant 0 : i32
    %c0_i32_0 = arith.constant 0 : i32
    return %arg0, %c0_i32 : i32, i32
  }
  func.func @transform_1(%arg0: i32) -> (i32, i32) {
    %c0_i32 = arith.constant 0 : i32
    %c0_i32_0 = arith.constant 0 : i32
    %c0_i32_1 = arith.constant 0 : i32
    return %c0_i32, %c0_i32_0 : i32, i32
  }
  func.func @transform_2(%arg0: i32) -> (i32, i32) {
    %c0_i32 = arith.constant 0 : i32
    %c0_i32_0 = arith.constant 0 : i32
    %c0_i32_1 = arith.constant 0 : i32
    return %c0_i32, %c0_i32_0 : i32, i32
  }
  func.func @transform_3(%arg0: i32) -> (i32, i32) {
    %c0_i32 = arith.constant 0 : i32
    %c0_i32_0 = arith.constant 0 : i32
    return %arg0, %c0_i32 : i32, i32
  }
}

module attributes {stable_mosaic.version = 11 : i64} {
  func.func @_gemm_bias_act_kernel(%arg0: i32, %arg1: memref<98x576xbf16, #tpu.memory_space<vmem>>, %arg2: memref<576x64xbf16, #tpu.memory_space<vmem>>, %arg3: memref<1x64xf32, #tpu.memory_space<vmem>>, %arg4: memref<98x64xbf16, #tpu.memory_space<vmem>>) attributes {dimension_semantics = [#tpu.dimension_semantics<parallel>], iteration_bounds = array<i64: 1>, scalar_prefetch = 0 : i64, scratch_operands = 0 : i64, tpu.core_type = #tpu.core_type<tc>, window_params = [{transform_indices = @transform_0, window_bounds = array<i64: 98, 576>}, {pipeline_mode = #tpu.pipeline_mode<synchronous>, transform_indices = @transform_1, window_bounds = array<i64: 576, 64>}, {pipeline_mode = #tpu.pipeline_mode<synchronous>, transform_indices = @transform_2, window_bounds = array<i64: 1, 64>}, {transform_indices = @transform_3, window_bounds = array<i64: 98, 64>}]} {
    %c0 = arith.constant 0 : index
    %c0_0 = arith.constant 0 : index
    %0 = vector.load %arg1[%c0, %c0_0] : memref<98x576xbf16, #tpu.memory_space<vmem>>, vector<98x576xbf16>
    %c0_1 = arith.constant 0 : index
    %c0_2 = arith.constant 0 : index
    %1 = vector.load %arg2[%c0_1, %c0_2] : memref<576x64xbf16, #tpu.memory_space<vmem>>, vector<576x64xbf16>
    %cst = arith.constant dense<0.000000e+00> : vector<98x64xf32>
    %2 = tpu.matmul %0, %1, %cst {dimension_numbers = #tpu.dot_dimension_numbers<[1], [0], [0], [1], [0, 0, 1, 1], [], []>} : vector<98x576xbf16>, vector<576x64xbf16>, vector<98x64xf32> -> vector<98x64xf32>
    %c0_3 = arith.constant 0 : index
    %c0_4 = arith.constant 0 : index
    %3 = vector.load %arg3[%c0_3, %c0_4] : memref<1x64xf32, #tpu.memory_space<vmem>>, vector<1x64xf32>
    %4 = vector.broadcast %3 : vector<1x64xf32> to vector<98x64xf32>
    %5 = arith.addf %2, %4 : vector<98x64xf32>
    %cst_5 = arith.constant 0.000000e+00 : f32
    %6 = vector.broadcast %cst_5 : f32 to vector<98x64xf32>
    %7 = arith.maximumf %5, %6 : vector<98x64xf32>
    %8 = arith.truncf %7 : vector<98x64xf32> to vector<98x64xbf16>
    %c0_6 = arith.constant 0 : index
    %c0_7 = arith.constant 0 : index
    %9 = vector.load %arg4[%c0_6, %c0_7] : memref<98x64xbf16, #tpu.memory_space<vmem>>, vector<98x64xbf16>
    tpu.vector_store %arg4[%c0_6, %c0_7], %8 {strides = array<i32>} : memref<98x64xbf16, #tpu.memory_space<vmem>>, vector<98x64xbf16>,
    return
  }
  func.func @transform_0(%arg0: i32) -> (i32, i32) {
    %c0_i32 = arith.constant 0 : i32
    %c0_i32_0 = arith.constant 0 : i32
    return %arg0, %c0_i32 : i32, i32
  }
  func.func @transform_1(%arg0: i32) -> (i32, i32) {
    %c0_i32 = arith.constant 0 : i32
    %c0_i32_0 = arith.constant 0 : i32
    %c0_i32_1 = arith.constant 0 : i32
    return %c0_i32, %c0_i32_0 : i32, i32
  }
  func.func @transform_2(%arg0: i32) -> (i32, i32) {
    %c0_i32 = arith.constant 0 : i32
    %c0_i32_0 = arith.constant 0 : i32
    %c0_i32_1 = arith.constant 0 : i32
    return %c0_i32, %c0_i32_0 : i32, i32
  }
  func.func @transform_3(%arg0: i32) -> (i32, i32) {
    %c0_i32 = arith.constant 0 : i32
    %c0_i32_0 = arith.constant 0 : i32
    return %arg0, %c0_i32 : i32, i32
  }
}

module attributes {stable_mosaic.version = 11 : i64} {
  func.func @_fused_latent_kernel(%arg0: i32, %arg1: memref<2x3136xbf16, #tpu.memory_space<vmem>>, %arg2: memref<3136x32xbf16, #tpu.memory_space<vmem>>, %arg3: memref<1x32xf32, #tpu.memory_space<vmem>>, %arg4: memref<2x32xf32, #tpu.memory_space<vmem>>, %arg5: memref<2x32xf32, #tpu.memory_space<vmem>>, %arg6: memref<2x32xf32, #tpu.memory_space<vmem>>) attributes {dimension_semantics = [#tpu.dimension_semantics<parallel>], iteration_bounds = array<i64: 1>, scalar_prefetch = 0 : i64, scratch_operands = 0 : i64, tpu.core_type = #tpu.core_type<tc>, window_params = [{pipeline_mode = #tpu.pipeline_mode<synchronous>, transform_indices = @transform_0, window_bounds = array<i64: 2, 3136>}, {pipeline_mode = #tpu.pipeline_mode<synchronous>, transform_indices = @transform_1, window_bounds = array<i64: 3136, 32>}, {pipeline_mode = #tpu.pipeline_mode<synchronous>, transform_indices = @transform_2, window_bounds = array<i64: 1, 32>}, {pipeline_mode = #tpu.pipeline_mode<synchronous>, transform_indices = @transform_3, window_bounds = array<i64: 2, 32>}, {pipeline_mode = #tpu.pipeline_mode<synchronous>, transform_indices = @transform_4, window_bounds = array<i64: 2, 32>}, {pipeline_mode = #tpu.pipeline_mode<synchronous>, transform_indices = @transform_5, window_bounds = array<i64: 2, 32>}]} {
    %c0 = arith.constant 0 : index
    %c0_0 = arith.constant 0 : index
    %0 = vector.load %arg1[%c0, %c0_0] : memref<2x3136xbf16, #tpu.memory_space<vmem>>, vector<2x3136xbf16>
    %c0_1 = arith.constant 0 : index
    %c0_2 = arith.constant 0 : index
    %1 = vector.load %arg2[%c0_1, %c0_2] : memref<3136x32xbf16, #tpu.memory_space<vmem>>, vector<3136x32xbf16>
    %cst = arith.constant dense<0.000000e+00> : vector<2x32xf32>
    %2 = tpu.matmul %0, %1, %cst {dimension_numbers = #tpu.dot_dimension_numbers<[1], [0], [0], [1], [0, 0, 1, 1], [], []>} : vector<2x3136xbf16>, vector<3136x32xbf16>, vector<2x32xf32> -> vector<2x32xf32>
    %c0_3 = arith.constant 0 : index
    %c0_4 = arith.constant 0 : index
    %3 = vector.load %arg3[%c0_3, %c0_4] : memref<1x32xf32, #tpu.memory_space<vmem>>, vector<1x32xf32>
    %4 = vector.broadcast %3 : vector<1x32xf32> to vector<2x32xf32>
    %5 = arith.addf %2, %4 : vector<2x32xf32>
    %c0_5 = arith.constant 0 : index
    %c0_6 = arith.constant 0 : index
    %6 = vector.load %arg5[%c0_5, %c0_6] : memref<2x32xf32, #tpu.memory_space<vmem>>, vector<2x32xf32>
    tpu.vector_store %arg5[%c0_5, %c0_6], %5 {strides = array<i32>} : memref<2x32xf32, #tpu.memory_space<vmem>>, vector<2x32xf32>,
    %7 = tpu.iota {dimensions = array<i32: 1>} : vector<2x32xi32>
    %c16_i32 = arith.constant 16 : i32
    %8 = vector.broadcast %c16_i32 : i32 to vector<2x32xi32>
    %9 = arith.cmpi sge, %7, %8 : vector<2x32xi32>
    %cst_7 = arith.constant 0.000000e+00 : f32
    %10 = vector.broadcast %cst_7 : f32 to vector<2x32xf32>
    %11 = arith.select %9, %5, %10 : vector<2x32xi1>, vector<2x32xf32>
    %c0_8 = arith.constant 0 : index
    %c0_9 = arith.constant 0 : index
    %12 = vector.load %arg4[%c0_8, %c0_9] : memref<2x32xf32, #tpu.memory_space<vmem>>, vector<2x32xf32>
    %cst_10 = arith.constant 5.000000e-01 : f32
    %13 = vector.broadcast %cst_10 : f32 to vector<2x32xf32>
    %14 = arith.mulf %13, %11 : vector<2x32xf32>
    %15 = math.exp %14 : vector<2x32xf32>
    %16 = arith.mulf %12, %15 : vector<2x32xf32>
    %c0_11 = arith.constant 0 : index
    %c0_12 = arith.constant 0 : index
    %17 = vector.load %arg6[%c0_11, %c0_12] : memref<2x32xf32, #tpu.memory_space<vmem>>, vector<2x32xf32>
    tpu.vector_store %arg6[%c0_11, %c0_12], %16 {strides = array<i32>} : memref<2x32xf32, #tpu.memory_space<vmem>>, vector<2x32xf32>,
    return
  }
  func.func @transform_0(%arg0: i32) -> (i32, i32) {
    %c0_i32 = arith.constant 0 : i32
    %c0_i32_0 = arith.constant 0 : i32
    %c0_i32_1 = arith.constant 0 : i32
    return %c0_i32, %c0_i32_0 : i32, i32
  }
  func.func @transform_1(%arg0: i32) -> (i32, i32) {
    %c0_i32 = arith.constant 0 : i32
    %c0_i32_0 = arith.constant 0 : i32
    %c0_i32_1 = arith.constant 0 : i32
    return %c0_i32, %c0_i32_0 : i32, i32
  }
  func.func @transform_2(%arg0: i32) -> (i32, i32) {
    %c0_i32 = arith.constant 0 : i32
    %c0_i32_0 = arith.constant 0 : i32
    %c0_i32_1 = arith.constant 0 : i32
    return %c0_i32, %c0_i32_0 : i32, i32
  }
  func.func @transform_3(%arg0: i32) -> (i32, i32) {
    %c0_i32 = arith.constant 0 : i32
    %c0_i32_0 = arith.constant 0 : i32
    %c0_i32_1 = arith.constant 0 : i32
    return %c0_i32, %c0_i32_0 : i32, i32
  }
  func.func @transform_4(%arg0: i32) -> (i32, i32) {
    %c0_i32 = arith.constant 0 : i32
    %c0_i32_0 = arith.constant 0 : i32
    %c0_i32_1 = arith.constant 0 : i32
    return %c0_i32, %c0_i32_0 : i32, i32
  }
  func.func @transform_5(%arg0: i32) -> (i32, i32) {
    %c0_i32 = arith.constant 0 : i32
    %c0_i32_0 = arith.constant 0 : i32
    %c0_i32_1 = arith.constant 0 : i32
    return %c0_i32, %c0_i32_0 : i32, i32
  }
}

module attributes {stable_mosaic.version = 11 : i64} {
  func.func @_gemm_bias_act_kernel(%arg0: i32, %arg1: memref<2x16xbf16, #tpu.memory_space<vmem>>, %arg2: memref<16x3136xbf16, #tpu.memory_space<vmem>>, %arg3: memref<1x3136xf32, #tpu.memory_space<vmem>>, %arg4: memref<2x3136xbf16, #tpu.memory_space<vmem>>) attributes {dimension_semantics = [#tpu.dimension_semantics<parallel>], iteration_bounds = array<i64: 1>, scalar_prefetch = 0 : i64, scratch_operands = 0 : i64, tpu.core_type = #tpu.core_type<tc>, window_params = [{transform_indices = @transform_0, window_bounds = array<i64: 2, 16>}, {pipeline_mode = #tpu.pipeline_mode<synchronous>, transform_indices = @transform_1, window_bounds = array<i64: 16, 3136>}, {pipeline_mode = #tpu.pipeline_mode<synchronous>, transform_indices = @transform_2, window_bounds = array<i64: 1, 3136>}, {transform_indices = @transform_3, window_bounds = array<i64: 2, 3136>}]} {
    %c0 = arith.constant 0 : index
    %c0_0 = arith.constant 0 : index
    %0 = vector.load %arg1[%c0, %c0_0] : memref<2x16xbf16, #tpu.memory_space<vmem>>, vector<2x16xbf16>
    %c0_1 = arith.constant 0 : index
    %c0_2 = arith.constant 0 : index
    %1 = vector.load %arg2[%c0_1, %c0_2] : memref<16x3136xbf16, #tpu.memory_space<vmem>>, vector<16x3136xbf16>
    %cst = arith.constant dense<0.000000e+00> : vector<2x3136xf32>
    %2 = tpu.matmul %0, %1, %cst {dimension_numbers = #tpu.dot_dimension_numbers<[1], [0], [0], [1], [0, 0, 1, 1], [], []>} : vector<2x16xbf16>, vector<16x3136xbf16>, vector<2x3136xf32> -> vector<2x3136xf32>
    %c0_3 = arith.constant 0 : index
    %c0_4 = arith.constant 0 : index
    %3 = vector.load %arg3[%c0_3, %c0_4] : memref<1x3136xf32, #tpu.memory_space<vmem>>, vector<1x3136xf32>
    %4 = vector.broadcast %3 : vector<1x3136xf32> to vector<2x3136xf32>
    %5 = arith.addf %2, %4 : vector<2x3136xf32>
    %6 = arith.truncf %5 : vector<2x3136xf32> to vector<2x3136xbf16>
    %c0_5 = arith.constant 0 : index
    %c0_6 = arith.constant 0 : index
    %7 = vector.load %arg4[%c0_5, %c0_6] : memref<2x3136xbf16, #tpu.memory_space<vmem>>, vector<2x3136xbf16>
    tpu.vector_store %arg4[%c0_5, %c0_6], %6 {strides = array<i32>} : memref<2x3136xbf16, #tpu.memory_space<vmem>>, vector<2x3136xbf16>,
    return
  }
  func.func @transform_0(%arg0: i32) -> (i32, i32) {
    %c0_i32 = arith.constant 0 : i32
    %c0_i32_0 = arith.constant 0 : i32
    return %arg0, %c0_i32 : i32, i32
  }
  func.func @transform_1(%arg0: i32) -> (i32, i32) {
    %c0_i32 = arith.constant 0 : i32
    %c0_i32_0 = arith.constant 0 : i32
    %c0_i32_1 = arith.constant 0 : i32
    return %c0_i32, %c0_i32_0 : i32, i32
  }
  func.func @transform_2(%arg0: i32) -> (i32, i32) {
    %c0_i32 = arith.constant 0 : i32
    %c0_i32_0 = arith.constant 0 : i32
    %c0_i32_1 = arith.constant 0 : i32
    return %c0_i32, %c0_i32_0 : i32, i32
  }
  func.func @transform_3(%arg0: i32) -> (i32, i32) {
    %c0_i32 = arith.constant 0 : i32
    %c0_i32_0 = arith.constant 0 : i32
    return %arg0, %c0_i32 : i32, i32
  }
}

module attributes {stable_mosaic.version = 11 : i64} {
  func.func @_gemm_bias_act_kernel(%arg0: i32, %arg1: memref<98x256xbf16, #tpu.memory_space<vmem>>, %arg2: memref<256x256xbf16, #tpu.memory_space<vmem>>, %arg3: memref<1x256xf32, #tpu.memory_space<vmem>>, %arg4: memref<98x256xbf16, #tpu.memory_space<vmem>>) attributes {dimension_semantics = [#tpu.dimension_semantics<parallel>], iteration_bounds = array<i64: 1>, scalar_prefetch = 0 : i64, scratch_operands = 0 : i64, tpu.core_type = #tpu.core_type<tc>, window_params = [{transform_indices = @transform_0, window_bounds = array<i64: 98, 256>}, {pipeline_mode = #tpu.pipeline_mode<synchronous>, transform_indices = @transform_1, window_bounds = array<i64: 256, 256>}, {pipeline_mode = #tpu.pipeline_mode<synchronous>, transform_indices = @transform_2, window_bounds = array<i64: 1, 256>}, {transform_indices = @transform_3, window_bounds = array<i64: 98, 256>}]} {
    %c0 = arith.constant 0 : index
    %c0_0 = arith.constant 0 : index
    %0 = vector.load %arg1[%c0, %c0_0] : memref<98x256xbf16, #tpu.memory_space<vmem>>, vector<98x256xbf16>
    %c0_1 = arith.constant 0 : index
    %c0_2 = arith.constant 0 : index
    %1 = vector.load %arg2[%c0_1, %c0_2] : memref<256x256xbf16, #tpu.memory_space<vmem>>, vector<256x256xbf16>
    %cst = arith.constant dense<0.000000e+00> : vector<98x256xf32>
    %2 = tpu.matmul %0, %1, %cst {dimension_numbers = #tpu.dot_dimension_numbers<[1], [0], [0], [1], [0, 0, 1, 1], [], []>} : vector<98x256xbf16>, vector<256x256xbf16>, vector<98x256xf32> -> vector<98x256xf32>
    %c0_3 = arith.constant 0 : index
    %c0_4 = arith.constant 0 : index
    %3 = vector.load %arg3[%c0_3, %c0_4] : memref<1x256xf32, #tpu.memory_space<vmem>>, vector<1x256xf32>
    %4 = vector.broadcast %3 : vector<1x256xf32> to vector<98x256xf32>
    %5 = arith.addf %2, %4 : vector<98x256xf32>
    %cst_5 = arith.constant 0.000000e+00 : f32
    %6 = vector.broadcast %cst_5 : f32 to vector<98x256xf32>
    %7 = arith.maximumf %5, %6 : vector<98x256xf32>
    %8 = arith.truncf %7 : vector<98x256xf32> to vector<98x256xbf16>
    %c0_6 = arith.constant 0 : index
    %c0_7 = arith.constant 0 : index
    %9 = vector.load %arg4[%c0_6, %c0_7] : memref<98x256xbf16, #tpu.memory_space<vmem>>, vector<98x256xbf16>
    tpu.vector_store %arg4[%c0_6, %c0_7], %8 {strides = array<i32>} : memref<98x256xbf16, #tpu.memory_space<vmem>>, vector<98x256xbf16>,
    return
  }
  func.func @transform_0(%arg0: i32) -> (i32, i32) {
    %c0_i32 = arith.constant 0 : i32
    %c0_i32_0 = arith.constant 0 : i32
    return %arg0, %c0_i32 : i32, i32
  }
  func.func @transform_1(%arg0: i32) -> (i32, i32) {
    %c0_i32 = arith.constant 0 : i32
    %c0_i32_0 = arith.constant 0 : i32
    %c0_i32_1 = arith.constant 0 : i32
    return %c0_i32, %c0_i32_0 : i32, i32
  }
  func.func @transform_2(%arg0: i32) -> (i32, i32) {
    %c0_i32 = arith.constant 0 : i32
    %c0_i32_0 = arith.constant 0 : i32
    %c0_i32_1 = arith.constant 0 : i32
    return %c0_i32, %c0_i32_0 : i32, i32
  }
  func.func @transform_3(%arg0: i32) -> (i32, i32) {
    %c0_i32 = arith.constant 0 : i32
    %c0_i32_0 = arith.constant 0 : i32
    return %arg0, %c0_i32 : i32, i32
  }
}

module attributes {stable_mosaic.version = 11 : i64} {
  func.func @_gemm_bias_act_kernel(%arg0: i32, %arg1: memref<392x256xbf16, #tpu.memory_space<vmem>>, %arg2: memref<256x128xbf16, #tpu.memory_space<vmem>>, %arg3: memref<1x128xf32, #tpu.memory_space<vmem>>, %arg4: memref<392x128xbf16, #tpu.memory_space<vmem>>) attributes {dimension_semantics = [#tpu.dimension_semantics<parallel>], iteration_bounds = array<i64: 1>, scalar_prefetch = 0 : i64, scratch_operands = 0 : i64, tpu.core_type = #tpu.core_type<tc>, window_params = [{transform_indices = @transform_0, window_bounds = array<i64: 392, 256>}, {pipeline_mode = #tpu.pipeline_mode<synchronous>, transform_indices = @transform_1, window_bounds = array<i64: 256, 128>}, {pipeline_mode = #tpu.pipeline_mode<synchronous>, transform_indices = @transform_2, window_bounds = array<i64: 1, 128>}, {transform_indices = @transform_3, window_bounds = array<i64: 392, 128>}]} {
    %c0 = arith.constant 0 : index
    %c0_0 = arith.constant 0 : index
    %0 = vector.load %arg1[%c0, %c0_0] : memref<392x256xbf16, #tpu.memory_space<vmem>>, vector<392x256xbf16>
    %c0_1 = arith.constant 0 : index
    %c0_2 = arith.constant 0 : index
    %1 = vector.load %arg2[%c0_1, %c0_2] : memref<256x128xbf16, #tpu.memory_space<vmem>>, vector<256x128xbf16>
    %cst = arith.constant dense<0.000000e+00> : vector<392x128xf32>
    %2 = tpu.matmul %0, %1, %cst {dimension_numbers = #tpu.dot_dimension_numbers<[1], [0], [0], [1], [0, 0, 1, 1], [], []>} : vector<392x256xbf16>, vector<256x128xbf16>, vector<392x128xf32> -> vector<392x128xf32>
    %c0_3 = arith.constant 0 : index
    %c0_4 = arith.constant 0 : index
    %3 = vector.load %arg3[%c0_3, %c0_4] : memref<1x128xf32, #tpu.memory_space<vmem>>, vector<1x128xf32>
    %4 = vector.broadcast %3 : vector<1x128xf32> to vector<392x128xf32>
    %5 = arith.addf %2, %4 : vector<392x128xf32>
    %cst_5 = arith.constant 0.000000e+00 : f32
    %6 = vector.broadcast %cst_5 : f32 to vector<392x128xf32>
    %7 = arith.maximumf %5, %6 : vector<392x128xf32>
    %8 = arith.truncf %7 : vector<392x128xf32> to vector<392x128xbf16>
    %c0_6 = arith.constant 0 : index
    %c0_7 = arith.constant 0 : index
    %9 = vector.load %arg4[%c0_6, %c0_7] : memref<392x128xbf16, #tpu.memory_space<vmem>>, vector<392x128xbf16>
    tpu.vector_store %arg4[%c0_6, %c0_7], %8 {strides = array<i32>} : memref<392x128xbf16, #tpu.memory_space<vmem>>, vector<392x128xbf16>,
    return
  }
  func.func @transform_0(%arg0: i32) -> (i32, i32) {
    %c0_i32 = arith.constant 0 : i32
    %c0_i32_0 = arith.constant 0 : i32
    return %arg0, %c0_i32 : i32, i32
  }
  func.func @transform_1(%arg0: i32) -> (i32, i32) {
    %c0_i32 = arith.constant 0 : i32
    %c0_i32_0 = arith.constant 0 : i32
    %c0_i32_1 = arith.constant 0 : i32
    return %c0_i32, %c0_i32_0 : i32, i32
  }
  func.func @transform_2(%arg0: i32) -> (i32, i32) {
    %c0_i32 = arith.constant 0 : i32
    %c0_i32_0 = arith.constant 0 : i32
    %c0_i32_1 = arith.constant 0 : i32
    return %c0_i32, %c0_i32_0 : i32, i32
  }
  func.func @transform_3(%arg0: i32) -> (i32, i32) {
    %c0_i32 = arith.constant 0 : i32
    %c0_i32_0 = arith.constant 0 : i32
    return %arg0, %c0_i32 : i32, i32
  }
}

module attributes {stable_mosaic.version = 11 : i64} {
  func.func @_matvec_bias_sigmoid_kernel(%arg0: i32, %arg1: memref<112x288xbf16, #tpu.memory_space<vmem>>, %arg2: memref<1x288xf32, #tpu.memory_space<vmem>>, %arg3: memref<1x1xf32, #tpu.memory_space<vmem>>, %arg4: memref<112x1xf32, #tpu.memory_space<vmem>>) attributes {dimension_semantics = [#tpu.dimension_semantics<parallel>], iteration_bounds = array<i64: 14>, scalar_prefetch = 0 : i64, scratch_operands = 0 : i64, tpu.core_type = #tpu.core_type<tc>, window_params = [{transform_indices = @transform_0, window_bounds = array<i64: 112, 288>}, {pipeline_mode = #tpu.pipeline_mode<synchronous>, transform_indices = @transform_1, window_bounds = array<i64: 1, 288>}, {pipeline_mode = #tpu.pipeline_mode<synchronous>, transform_indices = @transform_2, window_bounds = array<i64: 1, 1>}, {transform_indices = @transform_3, window_bounds = array<i64: 112, 1>}]} {
    %c0 = arith.constant 0 : index
    %c0_0 = arith.constant 0 : index
    %0 = vector.load %arg1[%c0, %c0_0] : memref<112x288xbf16, #tpu.memory_space<vmem>>, vector<112x288xbf16>
    %1 = arith.extf %0 : vector<112x288xbf16> to vector<112x288xf32>
    %c0_1 = arith.constant 0 : index
    %c0_2 = arith.constant 0 : index
    %2 = vector.load %arg2[%c0_1, %c0_2] : memref<1x288xf32, #tpu.memory_space<vmem>>, vector<1x288xf32>
    %3 = vector.broadcast %2 : vector<1x288xf32> to vector<112x288xf32>
    %4 = arith.mulf %1, %3 : vector<112x288xf32>
    %cst = arith.constant dense<0.000000e+00> : vector<112xf32>
    %5 = vector.multi_reduction <add>, %4, %cst [1] : vector<112x288xf32> to vector<112xf32>
    %6 = vector.shape_cast %5 : vector<112xf32> to vector<112x1xf32>
    %c0_3 = arith.constant 0 : index
    %c0_4 = arith.constant 0 : index
    %7 = vector.load %arg3[%c0_3, %c0_4] : memref<1x1xf32, #tpu.memory_space<vmem>>, vector<1x1xf32>
    %8 = vector.broadcast %7 : vector<1x1xf32> to vector<112x1xf32>
    %9 = arith.addf %6, %8 : vector<112x1xf32>
    %10 = arith.negf %9 : vector<112x1xf32>
    %11 = math.exp %10 : vector<112x1xf32>
    %cst_5 = arith.constant 1.000000e+00 : f32
    %12 = vector.broadcast %cst_5 : f32 to vector<112x1xf32>
    %13 = arith.addf %12, %11 : vector<112x1xf32>
    %14 = arith.divf %12, %13 : vector<112x1xf32>
    %c0_6 = arith.constant 0 : index
    %c0_7 = arith.constant 0 : index
    %15 = vector.load %arg4[%c0_6, %c0_7] : memref<112x1xf32, #tpu.memory_space<vmem>>, vector<112x1xf32>
    tpu.vector_store %arg4[%c0_6, %c0_7], %14 {strides = array<i32>} : memref<112x1xf32, #tpu.memory_space<vmem>>, vector<112x1xf32>,
    return
  }
  func.func @transform_0(%arg0: i32) -> (i32, i32) {
    %c0_i32 = arith.constant 0 : i32
    %c0_i32_0 = arith.constant 0 : i32
    return %arg0, %c0_i32 : i32, i32
  }
  func.func @transform_1(%arg0: i32) -> (i32, i32) {
    %c0_i32 = arith.constant 0 : i32
    %c0_i32_0 = arith.constant 0 : i32
    %c0_i32_1 = arith.constant 0 : i32
    return %c0_i32, %c0_i32_0 : i32, i32
  }
  func.func @transform_2(%arg0: i32) -> (i32, i32) {
    %c0_i32 = arith.constant 0 : i32
    %c0_i32_0 = arith.constant 0 : i32
    %c0_i32_1 = arith.constant 0 : i32
    return %c0_i32, %c0_i32_0 : i32, i32
  }
  func.func @transform_3(%arg0: i32) -> (i32, i32) {
    %c0_i32 = arith.constant 0 : i32
    %c0_i32_0 = arith.constant 0 : i32
    return %arg0, %c0_i32 : i32, i32
  }
}

</mosaic_0001>

<bundles_post_ra>
// kernel: vae_forward.8
= control target key start
LH: loop header
LB: loop body
LE: loop exit
PB: predicated region body
PF: predicated region fallthrough
CT: control target
= control target key end

     0   :  { %8 = vsyncpa [#allocation3], 0  ;;  %s4047_s12 = smov [#allocation2]   ;;  %s5465_s0 = inlined_call_operand.vmem [shape: bf16[1568,9], index: 0, kind: input, shape index: {}]   ;;  %s5466_s1 = inlined_call_operand.hbm [shape: bf16[9,32], index: 1, kind: input, shape index: {}]   ;;  %s5467_s2 = inlined_call_operand.vmem [shape: f32[1,32], index: 2, kind: input, shape index: {}]   ;;  %s5468_s3 = inlined_call_operand.vmem [shape: bf16[1568,32], index: 3, kind: output, shape index: {}]  }
   0x1   :  { %s16_s13 = sshll.u32 %s4047_s12, 4  ;;  %s4023_s16 = scalar_lea.hbm %s5466_s1, 128  ;;  %s17_s13 = int_to_ptr.vmem [resolvable:$true] %s16_s13 }
   0x2   :  { %p4024_p0 = scmp.ne.s32.totalorder %s5466_s1, %s4023_s16  ;;  %p4027_p1 = scmp.lt.u32.totalorder %s4023_s16, %s5466_s1 }
   0x4   :  { %p4029_p2 = pnand %p4027_p1, %p4024_p0 }
   0x6   :  { %4032 = shalt.err (!%p4029_p2)
}
   0x7   :  { %s4033_s21 = scalar_lea.vmem %s17_s13, 128  ;;  %p4038_p4 = scmp.lt.s32.totalorder %s17_s13, %s17_s13 }
   0x8   :  { %p4034_p3 = scmp.ne.s32.totalorder %s17_s13, %s4033_s21  ;;  %p4039_p5 = scmp.lt.s32.totalorder %s4033_s21, %s4033_s21 }
   0xa   :  { %p4040_p6 = por %p4039_p5, %p4038_p4 }
   0xc   :  { %p4041_p7 = pnand %p4040_p6, %p4034_p3 }
   0xe   :  { %4044 = shalt.err (!%p4041_p7)
}
   0xf   :  { %s4048_s22 = smov 64   ;;  %s4049_s23 = smov 4  }
  0x10   :  { %22 = dma.hbm_to_vmem [thread:$0]  %s5466_s1, 128, %s17_s13, [#allocation3], %s4048_s22, %s4048_s22, %s4049_s23  }
  0x11   :  { %4045 = dma.done.wait [#allocation3], 128  }
  0x12   :  { %4046 = vsyncadd [#allocation3], 4294967168  ;;  %vm1024_vm0 = vcmask 1043456   ;;  %vm1025_vm1 = vcmask 1044480   ;;  %v4050_v0 = vmov 65535   ;;  %vm729_vm2 = vcmask 72704  }
  0x13   :  { %v1026_v1 = vsel %vm1024_vm0, 4294967295, %v4050_v0  ;;  %v3923_v3 = vld [vmem:[#allocation2] sm:$0x1f]   ;;  %v3925_v6 = vld [vmem:[%s5465_s0 + $0x8] sm:$0xff]   ;;  %v3926_v7 = vld [vmem:[%s5465_s0 + $0x190] sm:$0xff]   ;;  %vm2828_vm3 = vcmask 257024  }
  0x14   :  { %v1027_v2 = vsel %vm1025_vm1, %v1026_v1, 0  ;;  %v3924_v4 = vld [vmem:[%s5465_s0] sm:$0xff]   ;;  %v3927_v8 = vld [vmem:[%s5465_s0 + $0x198] sm:$0xff]   ;;  %v3928_v9 = vld [vmem:[%s5465_s0 + $0x10] sm:$0xff]   ;;  %3821 = vmatprep.mubr.msk.bf16.mxu1 %vm729_vm2, %v3926_v7 }
  0x15   :  { %v1029_v5 = vand.u32 %v3923_v3, %v1027_v2  ;;  %3721 = vmatprep.mubr.msk.bf16.mxu0 %vm729_vm2, %v3924_v4  ;;  %v3930_v10 = vld [vmem:[%s5465_s0 + $0x1a0] sm:$0xff]   ;;  %v3929_v11 = vld [vmem:[%s5465_s0 + $0x18] sm:$0xff]   ;;  %v3931_v12 = vld [vmem:[%s5465_s0 + $0x1a8] sm:$0xff]  }
  0x16   :  { %v3932_v13 = vld [vmem:[%s5465_s0 + $0x20] sm:$0xff]   ;;  %v3934_v14 = vld [vmem:[%s5465_s0 + $0x1b0] sm:$0xff]   ;;  %v3933_v15 = vld [vmem:[%s5465_s0 + $0x28] sm:$0xff]  }
  0x17   :  { %3719 = vmatprep.subr.bf16.mxu0 %v1029_v5  ;;  %3917 = vmatprep.subr.bf16.mxu1 %v1029_v5  ;;  %v3935_v16 = vld [vmem:[%s5465_s0 + $0x1b8] sm:$0xff]   ;;  %v3936_v17 = vld [vmem:[%s5465_s0 + $0x30] sm:$0xff]   ;;  %v3938_v18 = vld [vmem:[%s5465_s0 + $0x1c0] sm:$0xff]  }
  0x18   :  { %3720 = vmatpush3.bf16.msra.mxu0 %v1029_v5  ;;  %3918 = vmatpush3.bf16.msra.mxu1 %v1029_v5  ;;  %v3937_v19 = vld [vmem:[%s5465_s0 + $0x38] sm:$0xff]   ;;  %v3939_v20 = vld [vmem:[%s5465_s0 + $0x1c8] sm:$0xff]   ;;  %v3940_v21 = vld [vmem:[%s5465_s0 + $0x40] sm:$0xff]  }
  0x19   :  { %v3942_v22 = vld [vmem:[%s5465_s0 + $0x1d0] sm:$0xff]   ;;  %v3941_v23 = vld [vmem:[%s5465_s0 + $0x48] sm:$0xff]   ;;  %v3943_v24 = vld [vmem:[%s5465_s0 + $0x1d8] sm:$0xff]  }
  0x1a   :  { %v3944_v25 = vld [vmem:[%s5465_s0 + $0x50] sm:$0xff]   ;;  %v3946_v26 = vld [vmem:[%s5465_s0 + $0x1e0] sm:$0xff]   ;;  %v3945_v27 = vld [vmem:[%s5465_s0 + $0x58] sm:$0xff]  }
  0x1b   :  { %3722 = vmatmul.mubr.msk.bf16.vlgmr.msra.gmra.mrb[0].mxu0 %vm729_vm2, %v3925_v6  ;;  %3822 = vmatmul.mubr.msk.bf16.vlgmr.msra.gmra.mrb[0].mxu1 %vm729_vm2, %v3927_v8  ;;  %v3947_v28 = vld [vmem:[%s5465_s0 + $0x1e8] sm:$0xff]   ;;  %v3948_v29 = vld [vmem:[%s5465_s0 + $0x60] sm:$0xff]   ;;  %v3950_v30 = vld [vmem:[%s5465_s0 + $0x1f0] sm:$0xff]  }
  0x1c   :  { %3725 = vmatprep.mubr.msk.bf16.mxu0 %vm729_vm2, %v3928_v9  ;;  %3825 = vmatprep.mubr.msk.bf16.mxu1 %vm729_vm2, %v3930_v10  ;;  %v3949_v31 = vld [vmem:[%s5465_s0 + $0x68] sm:$0xff]   ;;  %v3951_v32 = vld [vmem:[%s5465_s0 + $0x1f8] sm:$0xff]   ;;  %v3952_v33 = vld [vmem:[%s5465_s0 + $0x70] sm:$0xff]  }
  0x1d   :  { %v3954_v34 = vld [vmem:[%s5465_s0 + $0x200] sm:$0xff]   ;;  %v3953_v35 = vld [vmem:[%s5465_s0 + $0x78] sm:$0xff]   ;;  %v3955_v36 = vld [vmem:[%s5465_s0 + $0x208] sm:$0xff]  }
  0x1e   :  { %v3956_v37 = vld [vmem:[%s5465_s0 + $0x80] sm:$0xff]   ;;  %v3958_v38 = vld [vmem:[%s5465_s0 + $0x210] sm:$0xff]   ;;  %v3957_v39 = vld [vmem:[%s5465_s0 + $0x88] sm:$0xff]  }
  0x1f   :  { %v3959_v40 = vld [vmem:[%s5465_s0 + $0x218] sm:$0xff]   ;;  %v3960_v41 = vld [vmem:[%s5465_s0 + $0x90] sm:$0xff]   ;;  %v3962_v42 = vld [vmem:[%s5465_s0 + $0x220] sm:$0xff]  }
  0x20   :  { %v3961_v43 = vld [vmem:[%s5465_s0 + $0x98] sm:$0xff]   ;;  %v3963_v44 = vld [vmem:[%s5465_s0 + $0x228] sm:$0xff]   ;;  %v3964_v45 = vld [vmem:[%s5465_s0 + $0xa0] sm:$0xff]  }
  0x21   :  { %v3966_v46 = vld [vmem:[%s5465_s0 + $0x230] sm:$0xff]   ;;  %v3965_v47 = vld [vmem:[%s5465_s0 + $0xa8] sm:$0xff]   ;;  %v3967_v48 = vld [vmem:[%s5465_s0 + $0x238] sm:$0xff]  }
  0x22   :  { %v3968_v49 = vld [vmem:[%s5465_s0 + $0xb0] sm:$0xff]   ;;  %v3970_v50 = vld [vmem:[%s5465_s0 + $0x240] sm:$0xff]   ;;  %v3969_v51 = vld [vmem:[%s5465_s0 + $0xb8] sm:$0xff]  }
  0x23   :  { %3726 = vmatmul.mubr.msk.bf16.gmra.mrb[4].mxu0 %vm729_vm2, %v3929_v11  ;;  %3826 = vmatmul.mubr.msk.bf16.gmra.mrb[4].mxu1 %vm729_vm2, %v3931_v12  ;;  %v3971_v52 = vld [vmem:[%s5465_s0 + $0x248] sm:$0xff]   ;;  %v3972_v53 = vld [vmem:[%s5465_s0 + $0xc0] sm:$0xff]   ;;  %v3974_v54 = vld [vmem:[%s5465_s0 + $0x250] sm:$0xff]  }
  0x24   :  { %3729 = vmatprep.mubr.msk.bf16.mxu0 %vm729_vm2, %v3932_v13  ;;  %3829 = vmatprep.mubr.msk.bf16.mxu1 %vm729_vm2, %v3934_v14  ;;  %v3973_v55 = vld [vmem:[%s5465_s0 + $0xc8] sm:$0xff]   ;;  %v3975_v56 = vld [vmem:[%s5465_s0 + $0x258] sm:$0xff]   ;;  %v3976_v57 = vld [vmem:[%s5465_s0 + $0xd0] sm:$0xff]  }
  0x25   :  { %v3978_v58 = vld [vmem:[%s5465_s0 + $0x260] sm:$0xff]   ;;  %v3977_v59 = vld [vmem:[%s5465_s0 + $0xd8] sm:$0xff]   ;;  %v3979_v60 = vld [vmem:[%s5465_s0 + $0x268] sm:$0xff]  }
  0x26   :  { %v3980_v61 = vld [vmem:[%s5465_s0 + $0xe0] sm:$0xff]   ;;  %v3982_v62 = vld [vmem:[%s5465_s0 + $0x270] sm:$0xff]   ;;  %v3981_v63 = vld [vmem:[%s5465_s0 + $0xe8] sm:$0xff]  }
  0x27   :  { %v3983_v0 = vld [vmem:[%s5465_s0 + $0x278] sm:$0xff]   ;;  %v3984_v1 = vld [vmem:[%s5465_s0 + $0xf0] sm:$0xff]   ;;  %v3986_v2 = vld [vmem:[%s5465_s0 + $0x280] sm:$0xff]  }
  0x28   :  { %v3985_v3 = vld [vmem:[%s5465_s0 + $0xf8] sm:$0xff]   ;;  %v3987_v4 = vld [vmem:[%s5465_s0 + $0x288] sm:$0xff]   ;;  %v3988_v5 = vld [vmem:[%s5465_s0 + $0x100] sm:$0xff]  }
  0x29   :  { %v3990_v6 = vld [vmem:[%s5465_s0 + $0x290] sm:$0xff]   ;;  %v3989_v7 = vld [vmem:[%s5465_s0 + $0x108] sm:$0xff]   ;;  %v3991_v8 = vld [vmem:[%s5465_s0 + $0x298] sm:$0xff]  }
  0x2a   :  { %v3992_v9 = vld [vmem:[%s5465_s0 + $0x110] sm:$0xff]   ;;  %v3994_v10 = vld [vmem:[%s5465_s0 + $0x2a0] sm:$0xff]   ;;  %v3993_v11 = vld [vmem:[%s5465_s0 + $0x118] sm:$0xff]  }
  0x2b   :  { %3730 = vmatmul.mubr.msk.bf16.gmra.mrb[8].mxu0 %vm729_vm2, %v3933_v15  ;;  %3830 = vmatmul.mubr.msk.bf16.gmra.mrb[8].mxu1 %vm729_vm2, %v3935_v16  ;;  %v3995_v12 = vld [vmem:[%s5465_s0 + $0x2a8] sm:$0xff]   ;;  %v3996_v13 = vld [vmem:[%s5465_s0 + $0x120] sm:$0xff]   ;;  %v3998_v14 = vld [vmem:[%s5465_s0 + $0x2b0] sm:$0xff]  }
  0x2c   :  { %3733 = vmatprep.mubr.msk.bf16.mxu0 %vm729_vm2, %v3936_v17  ;;  %3833 = vmatprep.mubr.msk.bf16.mxu1 %vm729_vm2, %v3938_v18  ;;  %v3997_v15 = vld [vmem:[%s5465_s0 + $0x128] sm:$0xff]   ;;  %v3999_v16 = vld [vmem:[%s5465_s0 + $0x2b8] sm:$0xff]   ;;  %v4000_v17 = vld [vmem:[%s5465_s0 + $0x130] sm:$0xff]  }
  0x2d   :  { %v4002_v18 = vld [vmem:[%s5465_s0 + $0x2c0] sm:$0xff]  }
  0x33   :  { %3734 = vmatmul.mubr.msk.bf16.gmra.mrb[12].mxu0 %vm729_vm2, %v3937_v19  ;;  %3834 = vmatmul.mubr.msk.bf16.gmra.mrb[12].mxu1 %vm729_vm2, %v3939_v20  ;;  %v4001_v19 = vld [vmem:[%s5465_s0 + $0x138] sm:$0xff]   ;;  %v4003_v20 = vld [vmem:[%s5465_s0 + $0x2c8] sm:$0xff]  }
  0x34   :  { %3737 = vmatprep.mubr.msk.bf16.mxu0 %vm729_vm2, %v3940_v21  ;;  %3837 = vmatprep.mubr.msk.bf16.mxu1 %vm729_vm2, %v3942_v22  ;;  %v4004_v21 = vld [vmem:[%s5465_s0 + $0x140] sm:$0xff]   ;;  %v4006_v22 = vld [vmem:[%s5465_s0 + $0x2d0] sm:$0xff]  }
  0x3b   :  { %3738 = vmatmul.mubr.msk.bf16.gmra.mrb[16].mxu0 %vm729_vm2, %v3941_v23  ;;  %3838 = vmatmul.mubr.msk.bf16.gmra.mrb[16].mxu1 %vm729_vm2, %v3943_v24  ;;  %v4005_v23 = vld [vmem:[%s5465_s0 + $0x148] sm:$0xff]   ;;  %v4007_v24 = vld [vmem:[%s5465_s0 + $0x2d8] sm:$0xff]  }
  0x3c   :  { %3741 = vmatprep.mubr.msk.bf16.mxu0 %vm729_vm2, %v3944_v25  ;;  %3841 = vmatprep.mubr.msk.bf16.mxu1 %vm729_vm2, %v3946_v26  ;;  %v4008_v25 = vld [vmem:[%s5465_s0 + $0x150] sm:$0xff]   ;;  %v4010_v26 = vld [vmem:[%s5465_s0 + $0x2e0] sm:$0xff]  }
  0x43   :  { %3742 = vmatmul.mubr.msk.bf16.gmra.mrb[20].mxu0 %vm729_vm2, %v3945_v27  ;;  %3842 = vmatmul.mubr.msk.bf16.gmra.mrb[20].mxu1 %vm729_vm2, %v3947_v28  ;;  %v4009_v27 = vld [vmem:[%s5465_s0 + $0x158] sm:$0xff]   ;;  %v4011_v28 = vld [vmem:[%s5465_s0 + $0x2e8] sm:$0xff]  }
  0x44   :  { %3745 = vmatprep.mubr.msk.bf16.mxu0 %vm729_vm2, %v3948_v29  ;;  %3845 = vmatprep.mubr.msk.bf16.mxu1 %vm729_vm2, %v3950_v30  ;;  %v4012_v29 = vld [vmem:[%s5465_s0 + $0x160] sm:$0xff]   ;;  %v4014_v30 = vld [vmem:[%s5465_s0 + $0x2f0] sm:$0xff]  }
  0x4b   :  { %3746 = vmatmul.mubr.msk.bf16.gmra.mrb[24].mxu0 %vm729_vm2, %v3949_v31  ;;  %3846 = vmatmul.mubr.msk.bf16.gmra.mrb[24].mxu1 %vm729_vm2, %v3951_v32  ;;  %v4013_v31 = vld [vmem:[%s5465_s0 + $0x168] sm:$0xff]   ;;  %v4015_v32 = vld [vmem:[%s5465_s0 + $0x2f8] sm:$0xff]  }
  0x4c   :  { %3749 = vmatprep.mubr.msk.bf16.mxu0 %vm729_vm2, %v3952_v33  ;;  %3849 = vmatprep.mubr.msk.bf16.mxu1 %vm729_vm2, %v3954_v34  ;;  %v4016_v33 = vld [vmem:[%s5465_s0 + $0x170] sm:$0xff]   ;;  %v4018_v34 = vld [vmem:[%s5465_s0 + $0x300] sm:$0xff]  }
  0x53   :  { %3750 = vmatmul.mubr.msk.bf16.gmra.mrb[28].mxu0 %vm729_vm2, %v3953_v35  ;;  %3850 = vmatmul.mubr.msk.bf16.gmra.mrb[28].mxu1 %vm729_vm2, %v3955_v36  ;;  %v4017_v35 = vld [vmem:[%s5465_s0 + $0x178] sm:$0xff]   ;;  %v4019_v36 = vld [vmem:[%s5465_s0 + $0x308] sm:$0xff]  }
  0x54   :  { %3753 = vmatprep.mubr.msk.bf16.mxu0 %vm729_vm2, %v3956_v37  ;;  %3853 = vmatprep.mubr.msk.bf16.mxu1 %vm729_vm2, %v3958_v38  ;;  %v4020_v37 = vld [vmem:[%s5465_s0 + $0x180] sm:$0xff]   ;;  %v4021_v38 = vld [vmem:[%s5465_s0 + $0x188] sm:$0xff]  }
  0x5b   :  { %3754 = vmatmul.mubr.msk.bf16.gmra.mrb[32].mxu0 %vm729_vm2, %v3957_v39  ;;  %3854 = vmatmul.mubr.msk.bf16.gmra.mrb[32].mxu1 %vm729_vm2, %v3959_v40  ;;  %v4478_v39 = vld [vmem:[%s5467_s2] ss:$0 sm:$0xff] }
  0x5c   :  { %3757 = vmatprep.mubr.msk.bf16.mxu0 %vm729_vm2, %v3960_v41  ;;  %3857 = vmatprep.mubr.msk.bf16.mxu1 %vm729_vm2, %v3962_v42 }
  0x63   :  { %3758 = vmatmul.mubr.msk.bf16.gmra.mrb[36].mxu0 %vm729_vm2, %v3961_v43  ;;  %3858 = vmatmul.mubr.msk.bf16.gmra.mrb[36].mxu1 %vm729_vm2, %v3963_v44 }
  0x64   :  { %3761 = vmatprep.mubr.msk.bf16.mxu0 %vm729_vm2, %v3964_v45  ;;  %3861 = vmatprep.mubr.msk.bf16.mxu1 %vm729_vm2, %v3966_v46 }
  0x6b   :  { %3762 = vmatmul.mubr.msk.bf16.gmra.mrb[40].mxu0 %vm729_vm2, %v3965_v47  ;;  %3862 = vmatmul.mubr.msk.bf16.gmra.mrb[40].mxu1 %vm729_vm2, %v3967_v48 }
  0x6c   :  { %3765 = vmatprep.mubr.msk.bf16.mxu0 %vm729_vm2, %v3968_v49  ;;  %3865 = vmatprep.mubr.msk.bf16.mxu1 %vm729_vm2, %v3970_v50 }
  0x73   :  { %3766 = vmatmul.mubr.msk.bf16.gmra.mrb[44].mxu0 %vm729_vm2, %v3969_v51  ;;  %3866 = vmatmul.mubr.msk.bf16.gmra.mrb[44].mxu1 %vm729_vm2, %v3971_v52 }
  0x74   :  { %3769 = vmatprep.mubr.msk.bf16.mxu0 %vm729_vm2, %v3972_v53  ;;  %3869 = vmatprep.mubr.msk.bf16.mxu1 %vm729_vm2, %v3974_v54 }
  0x7b   :  { %3770 = vmatmul.mubr.msk.bf16.gmra.mrb[48].mxu0 %vm729_vm2, %v3973_v55  ;;  %3870 = vmatmul.mubr.msk.bf16.gmra.mrb[48].mxu1 %vm729_vm2, %v3975_v56 }
  0x7c   :  { %3773 = vmatprep.mubr.msk.bf16.mxu0 %vm729_vm2, %v3976_v57  ;;  %3873 = vmatprep.mubr.msk.bf16.mxu1 %vm729_vm2, %v3978_v58 }
  0x83   :  { %3774 = vmatmul.mubr.msk.bf16.gmra.mrb[52].mxu0 %vm729_vm2, %v3977_v59  ;;  %3874 = vmatmul.mubr.msk.bf16.gmra.mrb[52].mxu1 %vm729_vm2, %v3979_v60 }
  0x84   :  { %3777 = vmatprep.mubr.msk.bf16.mxu0 %vm729_vm2, %v3980_v61  ;;  %3877 = vmatprep.mubr.msk.bf16.mxu1 %vm729_vm2, %v3982_v62 }
  0x8b   :  { %3778 = vmatmul.mubr.msk.bf16.gmra.mrb[56].mxu0 %vm729_vm2, %v3981_v63  ;;  %3878 = vmatmul.mubr.msk.bf16.gmra.mrb[56].mxu1 %vm729_vm2, %v3983_v0 }
  0x8c   :  { %3781 = vmatprep.mubr.msk.bf16.mxu0 %vm729_vm2, %v3984_v1  ;;  %3881 = vmatprep.mubr.msk.bf16.mxu1 %vm729_vm2, %v3986_v2 }
  0x93   :  { %3782 = vmatmul.mubr.msk.bf16.gmra.mrb[60].mxu0 %vm729_vm2, %v3985_v3  ;;  %3882 = vmatmul.mubr.msk.bf16.gmra.mrb[60].mxu1 %vm729_vm2, %v3987_v4 }
  0x94   :  { %3785 = vmatprep.mubr.msk.bf16.mxu0 %vm729_vm2, %v3988_v5  ;;  %3885 = vmatprep.mubr.msk.bf16.mxu1 %vm729_vm2, %v3990_v6 }
  0x9b   :  { %3786 = vmatmul.mubr.msk.bf16.gmra.mrb[64].mxu0 %vm729_vm2, %v3989_v7  ;;  %3886 = vmatmul.mubr.msk.bf16.gmra.mrb[64].mxu1 %vm729_vm2, %v3991_v8 }
  0x9c   :  { %3789 = vmatprep.mubr.msk.bf16.mxu0 %vm729_vm2, %v3992_v9  ;;  %3889 = vmatprep.mubr.msk.bf16.mxu1 %vm729_vm2, %v3994_v10 }
  0xa3   :  { %3790 = vmatmul.mubr.msk.bf16.gmra.mrb[68].mxu0 %vm729_vm2, %v3993_v11  ;;  %3890 = vmatmul.mubr.msk.bf16.gmra.mrb[68].mxu1 %vm729_vm2, %v3995_v12 }
  0xa4   :  { %3793 = vmatprep.mubr.msk.bf16.mxu0 %vm729_vm2, %v3996_v13  ;;  %3893 = vmatprep.mubr.msk.bf16.mxu1 %vm729_vm2, %v3998_v14 }
  0xab   :  { %3794 = vmatmul.mubr.msk.bf16.gmra.mrb[72].mxu0 %vm729_vm2, %v3997_v15  ;;  %3894 = vmatmul.mubr.msk.bf16.gmra.mrb[72].mxu1 %vm729_vm2, %v3999_v16 }
  0xac   :  { %3797 = vmatprep.mubr.msk.bf16.mxu0 %vm729_vm2, %v4000_v17  ;;  %3897 = vmatprep.mubr.msk.bf16.mxu1 %vm729_vm2, %v4002_v18 }
  0xb3   :  { %3798 = vmatmul.mubr.msk.bf16.gmra.mrb[76].mxu0 %vm729_vm2, %v4001_v19  ;;  %3898 = vmatmul.mubr.msk.bf16.gmra.mrb[76].mxu1 %vm729_vm2, %v4003_v20 }
  0xb4   :  { %3801 = vmatprep.mubr.msk.bf16.mxu0 %vm729_vm2, %v4004_v21  ;;  %3901 = vmatprep.mubr.msk.bf16.mxu1 %vm729_vm2, %v4006_v22 }
  0xbb   :  { %3802 = vmatmul.mubr.msk.bf16.gmra.mrb[80].mxu0 %vm729_vm2, %v4005_v23  ;;  %3902 = vmatmul.mubr.msk.bf16.gmra.mrb[80].mxu1 %vm729_vm2, %v4007_v24 }
  0xbc   :  { %3805 = vmatprep.mubr.msk.bf16.mxu0 %vm729_vm2, %v4008_v25  ;;  %3905 = vmatprep.mubr.msk.bf16.mxu1 %vm729_vm2, %v4010_v26 }
  0xc3   :  { %3806 = vmatmul.mubr.msk.bf16.gmra.mrb[84].mxu0 %vm729_vm2, %v4009_v27  ;;  %3906 = vmatmul.mubr.msk.bf16.gmra.mrb[84].mxu1 %vm729_vm2, %v4011_v28 }
  0xc4   :  { %3809 = vmatprep.mubr.msk.bf16.mxu0 %vm729_vm2, %v4012_v29  ;;  %3909 = vmatprep.mubr.msk.bf16.mxu1 %vm729_vm2, %v4014_v30 }
  0xcb   :  { %3810 = vmatmul.mubr.msk.bf16.gmra.mrb[88].mxu0 %vm729_vm2, %v4013_v31  ;;  %3910 = vmatmul.mubr.msk.bf16.gmra.mrb[88].mxu1 %vm729_vm2, %v4015_v32 }
  0xcc   :  { %3813 = vmatprep.mubr.msk.bf16.mxu0 %vm729_vm2, %v4016_v33  ;;  %3913 = vmatprep.mubr.msk.bf16.mxu1 %vm729_vm2, %v4018_v34 }
  0xd3   :  { %3814 = vmatmul.mubr.msk.bf16.gmra.mrb[92].mxu0 %vm729_vm2, %v4017_v35  ;;  %3914 = vmatmul.mubr.msk.bf16.gmra.mrb[92].mxu1 %vm729_vm2, %v4019_v36 }
  0xd4   :  { %3817 = vmatprep.mubr.msk.bf16.mxu0 %vm729_vm2, %v4020_v37 }
  0xdb   :  { %3818 = vmatmul.mubr.msk.bf16.gmra.mrb[96].mxu0 %vm729_vm2, %v4021_v38 }
  0xee   :  { %v3723_v40 = vpop.f32.mrb[0].mxu0  ;;  %v3823_v41 = vpop.f32.mrb[0].mxu1 }
  0xef   :  { %v1074_v42 = vadd.f32 %v3723_v40, %v4478_v39  ;;  %v1065_v43 = vpop.f32.mrb[1].mxu0  ;;  %v1474_v44 = vadd.f32 %v3823_v41, %v4478_v39  ;;  %v1465_v45 = vpop.f32.mrb[1].mxu1 }
  0xf0   :  { %v1066_v46 = vadd.f32 %v4478_v39, %v1065_v43  ;;  %v3724_v47 = vpop.f32.mrb[2].mxu0  ;;  %v1466_v48 = vadd.f32 %v4478_v39, %v1465_v45  ;;  %v3824_v49 = vpop.f32.mrb[2].mxu1 }
  0xf1   :  { %v1850_v50 = vmax.f32 %v1074_v42, 0.0  ;;  %v1077_v51 = vadd.f32 %v3724_v47, %v4478_v39  ;;  %v1068_v52 = vpop.f32.mrb[3].mxu0  ;;  %v1950_v53 = vmax.f32 %v1474_v44, 0.0  ;;  %v1477_v54 = vadd.f32 %v3824_v49, %v4478_v39  ;;  %v1468_v55 = vpop.f32.mrb[3].mxu1 }
  0xf2   :  { %v1848_v56 = vmax.f32 %v1066_v46, 0.0  ;;  %v1069_v57 = vadd.f32 %v4478_v39, %v1068_v52  ;;  %v1948_v58 = vmax.f32 %v1466_v48, 0.0  ;;  %v1469_v59 = vadd.f32 %v4478_v39, %v1468_v55 }
  0xf3   :  { %v3426_v60 = vpack.c.bf16 %v1850_v50, %v1850_v50  ;;  %v1851_v61 = vmax.f32 %v1077_v51, 0.0  ;;  %v3526_v62 = vpack.c.bf16 %v1950_v53, %v1950_v53  ;;  %v1951_v63 = vmax.f32 %v1477_v54, 0.0 }
  0xf4   :  { %v3424_v0 = vpack.c.bf16 %v1848_v56, %v1848_v56  ;;  %v1849_v1 = vmax.f32 %v1069_v57, 0.0  ;;  %v3524_v2 = vpack.c.bf16 %v1948_v58, %v1948_v58  ;;  %v1949_v3 = vmax.f32 %v1469_v59, 0.0 }
  0xf5   :  { %2831 = vst.msk [vmem:[%s5468_s3 + $0x8] sm:$0xf] %vm2828_vm3, %v3426_v60  ;;  %v3427_v4 = vpack.c.bf16 %v1851_v61, %v1851_v61  ;;  %2931 = vst.msk [vmem:[%s5468_s3 + $0x198] sm:$0xf] %vm2828_vm3, %v3526_v62  ;;  %v3527_v5 = vpack.c.bf16 %v1951_v63, %v1951_v63 }
  0xf6   :  { %2829 = vst.msk [vmem:[%s5468_s3] sm:$0xf] %vm2828_vm3, %v3424_v0  ;;  %v3425_v6 = vpack.c.bf16 %v1849_v1, %v1849_v1  ;;  %2929 = vst.msk [vmem:[%s5468_s3 + $0x190] sm:$0xf] %vm2828_vm3, %v3524_v2  ;;  %v3727_v7 = vpop.f32.mrb[4].mxu0  ;;  %v3525_v8 = vpack.c.bf16 %v1949_v3, %v1949_v3  ;;  %v3827_v9 = vpop.f32.mrb[4].mxu1 }
  0xf7   :  { %2832 = vst.msk [vmem:[%s5468_s3 + $0xc] sm:$0xf] %vm2828_vm3, %v3427_v4  ;;  %2932 = vst.msk [vmem:[%s5468_s3 + $0x19c] sm:$0xf] %vm2828_vm3, %v3527_v5  ;;  %v1090_v10 = vadd.f32 %v3727_v7, %v4478_v39  ;;  %v1081_v11 = vpop.f32.mrb[5].mxu0  ;;  %v1490_v12 = vadd.f32 %v3827_v9, %v4478_v39  ;;  %v1481_v13 = vpop.f32.mrb[5].mxu1 }
  0xf8   :  { %2830 = vst.msk [vmem:[%s5468_s3 + $0x4] sm:$0xf] %vm2828_vm3, %v3425_v6  ;;  %2930 = vst.msk [vmem:[%s5468_s3 + $0x194] sm:$0xf] %vm2828_vm3, %v3525_v8  ;;  %v1082_v14 = vadd.f32 %v4478_v39, %v1081_v11  ;;  %v3728_v15 = vpop.f32.mrb[6].mxu0  ;;  %v1482_v16 = vadd.f32 %v4478_v39, %v1481_v13  ;;  %v3828_v17 = vpop.f32.mrb[6].mxu1 }
  0xf9   :  { %v1854_v18 = vmax.f32 %v1090_v10, 0.0  ;;  %v1093_v19 = vadd.f32 %v3728_v15, %v4478_v39  ;;  %v1084_v20 = vpop.f32.mrb[7].mxu0  ;;  %v1954_v21 = vmax.f32 %v1490_v12, 0.0  ;;  %v1493_v22 = vadd.f32 %v3828_v17, %v4478_v39  ;;  %v1484_v23 = vpop.f32.mrb[7].mxu1 }
  0xfa   :  { %v1852_v24 = vmax.f32 %v1082_v14, 0.0  ;;  %v1085_v25 = vadd.f32 %v4478_v39, %v1084_v20  ;;  %v1952_v26 = vmax.f32 %v1482_v16, 0.0  ;;  %v1485_v27 = vadd.f32 %v4478_v39, %v1484_v23 }
  0xfb   :  { %v3430_v28 = vpack.c.bf16 %v1854_v18, %v1854_v18  ;;  %v1855_v29 = vmax.f32 %v1093_v19, 0.0  ;;  %v3530_v30 = vpack.c.bf16 %v1954_v21, %v1954_v21  ;;  %v1955_v31 = vmax.f32 %v1493_v22, 0.0 }
  0xfc   :  { %v3428_v32 = vpack.c.bf16 %v1852_v24, %v1852_v24  ;;  %v1853_v33 = vmax.f32 %v1085_v25, 0.0  ;;  %v3528_v34 = vpack.c.bf16 %v1952_v26, %v1952_v26  ;;  %v1953_v35 = vmax.f32 %v1485_v27, 0.0 }
  0xfd   :  { %2835 = vst.msk [vmem:[%s5468_s3 + $0x18] sm:$0xf] %vm2828_vm3, %v3430_v28  ;;  %v3431_v36 = vpack.c.bf16 %v1855_v29, %v1855_v29  ;;  %2935 = vst.msk [vmem:[%s5468_s3 + $0x1a8] sm:$0xf] %vm2828_vm3, %v3530_v30  ;;  %v3531_v37 = vpack.c.bf16 %v1955_v31, %v1955_v31 }
  0xfe   :  { %2833 = vst.msk [vmem:[%s5468_s3 + $0x10] sm:$0xf] %vm2828_vm3, %v3428_v32  ;;  %v3429_v38 = vpack.c.bf16 %v1853_v33, %v1853_v33  ;;  %2933 = vst.msk [vmem:[%s5468_s3 + $0x1a0] sm:$0xf] %vm2828_vm3, %v3528_v34  ;;  %v3731_v40 = vpop.f32.mrb[8].mxu0  ;;  %v3529_v41 = vpack.c.bf16 %v1953_v35, %v1953_v35  ;;  %v3831_v42 = vpop.f32.mrb[8].mxu1 }
  0xff   :  { %2836 = vst.msk [vmem:[%s5468_s3 + $0x1c] sm:$0xf] %vm2828_vm3, %v3431_v36  ;;  %2936 = vst.msk [vmem:[%s5468_s3 + $0x1ac] sm:$0xf] %vm2828_vm3, %v3531_v37  ;;  %v1106_v43 = vadd.f32 %v3731_v40, %v4478_v39  ;;  %v1097_v44 = vpop.f32.mrb[9].mxu0  ;;  %v1506_v45 = vadd.f32 %v3831_v42, %v4478_v39  ;;  %v1497_v46 = vpop.f32.mrb[9].mxu1 }
 0x100   :  { %2834 = vst.msk [vmem:[%s5468_s3 + $0x14] sm:$0xf] %vm2828_vm3, %v3429_v38  ;;  %2934 = vst.msk [vmem:[%s5468_s3 + $0x1a4] sm:$0xf] %vm2828_vm3, %v3529_v41  ;;  %v1098_v47 = vadd.f32 %v4478_v39, %v1097_v44  ;;  %v3732_v48 = vpop.f32.mrb[10].mxu0  ;;  %v1498_v49 = vadd.f32 %v4478_v39, %v1497_v46  ;;  %v3832_v50 = vpop.f32.mrb[10].mxu1 }
 0x101   :  { %v1858_v51 = vmax.f32 %v1106_v43, 0.0  ;;  %v1109_v52 = vadd.f32 %v3732_v48, %v4478_v39  ;;  %v1100_v53 = vpop.f32.mrb[11].mxu0  ;;  %v1958_v54 = vmax.f32 %v1506_v45, 0.0  ;;  %v1509_v55 = vadd.f32 %v3832_v50, %v4478_v39  ;;  %v1500_v56 = vpop.f32.mrb[11].mxu1 }
 0x102   :  { %v1856_v57 = vmax.f32 %v1098_v47, 0.0  ;;  %v1101_v58 = vadd.f32 %v4478_v39, %v1100_v53  ;;  %v1956_v59 = vmax.f32 %v1498_v49, 0.0  ;;  %v1501_v60 = vadd.f32 %v4478_v39, %v1500_v56 }
 0x103   :  { %v3434_v61 = vpack.c.bf16 %v1858_v51, %v1858_v51  ;;  %v1859_v62 = vmax.f32 %v1109_v52, 0.0  ;;  %v3534_v63 = vpack.c.bf16 %v1958_v54, %v1958_v54  ;;  %v1959_v0 = vmax.f32 %v1509_v55, 0.0 }
 0x104   :  { %v3432_v1 = vpack.c.bf16 %v1856_v57, %v1856_v57  ;;  %v1857_v2 = vmax.f32 %v1101_v58, 0.0  ;;  %v3532_v3 = vpack.c.bf16 %v1956_v59, %v1956_v59  ;;  %v1957_v4 = vmax.f32 %v1501_v60, 0.0 }
 0x105   :  { %2839 = vst.msk [vmem:[%s5468_s3 + $0x28] sm:$0xf] %vm2828_vm3, %v3434_v61  ;;  %v3435_v5 = vpack.c.bf16 %v1859_v62, %v1859_v62  ;;  %2939 = vst.msk [vmem:[%s5468_s3 + $0x1b8] sm:$0xf] %vm2828_vm3, %v3534_v63  ;;  %v3535_v6 = vpack.c.bf16 %v1959_v0, %v1959_v0 }
 0x106   :  { %2837 = vst.msk [vmem:[%s5468_s3 + $0x20] sm:$0xf] %vm2828_vm3, %v3432_v1  ;;  %v3433_v7 = vpack.c.bf16 %v1857_v2, %v1857_v2  ;;  %2937 = vst.msk [vmem:[%s5468_s3 + $0x1b0] sm:$0xf] %vm2828_vm3, %v3532_v3  ;;  %v3735_v8 = vpop.f32.mrb[12].mxu0  ;;  %v3533_v9 = vpack.c.bf16 %v1957_v4, %v1957_v4  ;;  %v3835_v10 = vpop.f32.mrb[12].mxu1 }
 0x107   :  { %2840 = vst.msk [vmem:[%s5468_s3 + $0x2c] sm:$0xf] %vm2828_vm3, %v3435_v5  ;;  %2940 = vst.msk [vmem:[%s5468_s3 + $0x1bc] sm:$0xf] %vm2828_vm3, %v3535_v6  ;;  %v1122_v11 = vadd.f32 %v3735_v8, %v4478_v39  ;;  %v1113_v12 = vpop.f32.mrb[13].mxu0  ;;  %v1522_v13 = vadd.f32 %v3835_v10, %v4478_v39  ;;  %v1513_v14 = vpop.f32.mrb[13].mxu1 }
 0x108   :  { %2838 = vst.msk [vmem:[%s5468_s3 + $0x24] sm:$0xf] %vm2828_vm3, %v3433_v7  ;;  %2938 = vst.msk [vmem:[%s5468_s3 + $0x1b4] sm:$0xf] %vm2828_vm3, %v3533_v9  ;;  %v1114_v15 = vadd.f32 %v4478_v39, %v1113_v12  ;;  %v3736_v16 = vpop.f32.mrb[14].mxu0  ;;  %v1514_v17 = vadd.f32 %v4478_v39, %v1513_v14  ;;  %v3836_v18 = vpop.f32.mrb[14].mxu1 }
 0x109   :  { %v1862_v19 = vmax.f32 %v1122_v11, 0.0  ;;  %v1125_v20 = vadd.f32 %v3736_v16, %v4478_v39  ;;  %v1116_v21 = vpop.f32.mrb[15].mxu0  ;;  %v1962_v22 = vmax.f32 %v1522_v13, 0.0  ;;  %v1525_v23 = vadd.f32 %v3836_v18, %v4478_v39  ;;  %v1516_v24 = vpop.f32.mrb[15].mxu1 }
 0x10a   :  { %v1860_v25 = vmax.f32 %v1114_v15, 0.0  ;;  %v1117_v26 = vadd.f32 %v4478_v39, %v1116_v21  ;;  %v1960_v27 = vmax.f32 %v1514_v17, 0.0  ;;  %v1517_v28 = vadd.f32 %v4478_v39, %v1516_v24 }
 0x10b   :  { %v3438_v29 = vpack.c.bf16 %v1862_v19, %v1862_v19  ;;  %v1863_v30 = vmax.f32 %v1125_v20, 0.0  ;;  %v3538_v31 = vpack.c.bf16 %v1962_v22, %v1962_v22  ;;  %v1963_v32 = vmax.f32 %v1525_v23, 0.0 }
 0x10c   :  { %v3436_v33 = vpack.c.bf16 %v1860_v25, %v1860_v25  ;;  %v1861_v34 = vmax.f32 %v1117_v26, 0.0  ;;  %v3536_v35 = vpack.c.bf16 %v1960_v27, %v1960_v27  ;;  %v1961_v36 = vmax.f32 %v1517_v28, 0.0 }
 0x10d   :  { %2843 = vst.msk [vmem:[%s5468_s3 + $0x38] sm:$0xf] %vm2828_vm3, %v3438_v29  ;;  %v3439_v37 = vpack.c.bf16 %v1863_v30, %v1863_v30  ;;  %2943 = vst.msk [vmem:[%s5468_s3 + $0x1c8] sm:$0xf] %vm2828_vm3, %v3538_v31  ;;  %v3539_v38 = vpack.c.bf16 %v1963_v32, %v1963_v32 }
 0x10e   :  { %2841 = vst.msk [vmem:[%s5468_s3 + $0x30] sm:$0xf] %vm2828_vm3, %v3436_v33  ;;  %v3437_v40 = vpack.c.bf16 %v1861_v34, %v1861_v34  ;;  %2941 = vst.msk [vmem:[%s5468_s3 + $0x1c0] sm:$0xf] %vm2828_vm3, %v3536_v35  ;;  %v3739_v41 = vpop.f32.mrb[16].mxu0  ;;  %v3537_v42 = vpack.c.bf16 %v1961_v36, %v1961_v36  ;;  %v3839_v43 = vpop.f32.mrb[16].mxu1 }
 0x10f   :  { %2844 = vst.msk [vmem:[%s5468_s3 + $0x3c] sm:$0xf] %vm2828_vm3, %v3439_v37  ;;  %2944 = vst.msk [vmem:[%s5468_s3 + $0x1cc] sm:$0xf] %vm2828_vm3, %v3539_v38  ;;  %v1138_v44 = vadd.f32 %v3739_v41, %v4478_v39  ;;  %v1129_v45 = vpop.f32.mrb[17].mxu0  ;;  %v1538_v46 = vadd.f32 %v3839_v43, %v4478_v39  ;;  %v1529_v47 = vpop.f32.mrb[17].mxu1 }
 0x110   :  { %2842 = vst.msk [vmem:[%s5468_s3 + $0x34] sm:$0xf] %vm2828_vm3, %v3437_v40  ;;  %2942 = vst.msk [vmem:[%s5468_s3 + $0x1c4] sm:$0xf] %vm2828_vm3, %v3537_v42  ;;  %v1130_v48 = vadd.f32 %v4478_v39, %v1129_v45  ;;  %v3740_v49 = vpop.f32.mrb[18].mxu0  ;;  %v1530_v50 = vadd.f32 %v4478_v39, %v1529_v47  ;;  %v3840_v51 = vpop.f32.mrb[18].mxu1 }
 0x111   :  { %v1866_v52 = vmax.f32 %v1138_v44, 0.0  ;;  %v1141_v53 = vadd.f32 %v3740_v49, %v4478_v39  ;;  %v1132_v54 = vpop.f32.mrb[19].mxu0  ;;  %v1966_v55 = vmax.f32 %v1538_v46, 0.0  ;;  %v1541_v56 = vadd.f32 %v3840_v51, %v4478_v39  ;;  %v1532_v57 = vpop.f32.mrb[19].mxu1 }
 0x112   :  { %v1864_v58 = vmax.f32 %v1130_v48, 0.0  ;;  %v1133_v59 = vadd.f32 %v4478_v39, %v1132_v54  ;;  %v1964_v60 = vmax.f32 %v1530_v50, 0.0  ;;  %v1533_v61 = vadd.f32 %v4478_v39, %v1532_v57 }
 0x113   :  { %v3442_v62 = vpack.c.bf16 %v1866_v52, %v1866_v52  ;;  %v1867_v63 = vmax.f32 %v1141_v53, 0.0  ;;  %v3542_v0 = vpack.c.bf16 %v1966_v55, %v1966_v55  ;;  %v1967_v1 = vmax.f32 %v1541_v56, 0.0 }
 0x114   :  { %v3440_v2 = vpack.c.bf16 %v1864_v58, %v1864_v58  ;;  %v1865_v3 = vmax.f32 %v1133_v59, 0.0  ;;  %v3540_v4 = vpack.c.bf16 %v1964_v60, %v1964_v60  ;;  %v1965_v5 = vmax.f32 %v1533_v61, 0.0 }
 0x115   :  { %2847 = vst.msk [vmem:[%s5468_s3 + $0x48] sm:$0xf] %vm2828_vm3, %v3442_v62  ;;  %v3443_v6 = vpack.c.bf16 %v1867_v63, %v1867_v63  ;;  %2947 = vst.msk [vmem:[%s5468_s3 + $0x1d8] sm:$0xf] %vm2828_vm3, %v3542_v0  ;;  %v3543_v7 = vpack.c.bf16 %v1967_v1, %v1967_v1 }
 0x116   :  { %2845 = vst.msk [vmem:[%s5468_s3 + $0x40] sm:$0xf] %vm2828_vm3, %v3440_v2  ;;  %v3441_v8 = vpack.c.bf16 %v1865_v3, %v1865_v3  ;;  %2945 = vst.msk [vmem:[%s5468_s3 + $0x1d0] sm:$0xf] %vm2828_vm3, %v3540_v4  ;;  %v3743_v9 = vpop.f32.mrb[20].mxu0  ;;  %v3541_v10 = vpack.c.bf16 %v1965_v5, %v1965_v5  ;;  %v3843_v11 = vpop.f32.mrb[20].mxu1 }
 0x117   :  { %2848 = vst.msk [vmem:[%s5468_s3 + $0x4c] sm:$0xf] %vm2828_vm3, %v3443_v6  ;;  %2948 = vst.msk [vmem:[%s5468_s3 + $0x1dc] sm:$0xf] %vm2828_vm3, %v3543_v7  ;;  %v1154_v12 = vadd.f32 %v3743_v9, %v4478_v39  ;;  %v1145_v13 = vpop.f32.mrb[21].mxu0  ;;  %v1554_v14 = vadd.f32 %v3843_v11, %v4478_v39  ;;  %v1545_v15 = vpop.f32.mrb[21].mxu1 }
 0x118   :  { %2846 = vst.msk [vmem:[%s5468_s3 + $0x44] sm:$0xf] %vm2828_vm3, %v3441_v8  ;;  %2946 = vst.msk [vmem:[%s5468_s3 + $0x1d4] sm:$0xf] %vm2828_vm3, %v3541_v10  ;;  %v1146_v16 = vadd.f32 %v4478_v39, %v1145_v13  ;;  %v3744_v17 = vpop.f32.mrb[22].mxu0  ;;  %v1546_v18 = vadd.f32 %v4478_v39, %v1545_v15  ;;  %v3844_v19 = vpop.f32.mrb[22].mxu1 }
 0x119   :  { %v1870_v20 = vmax.f32 %v1154_v12, 0.0  ;;  %v1157_v21 = vadd.f32 %v3744_v17, %v4478_v39  ;;  %v1148_v22 = vpop.f32.mrb[23].mxu0  ;;  %v1970_v23 = vmax.f32 %v1554_v14, 0.0  ;;  %v1557_v24 = vadd.f32 %v3844_v19, %v4478_v39  ;;  %v1548_v25 = vpop.f32.mrb[23].mxu1 }
 0x11a   :  { %v1868_v26 = vmax.f32 %v1146_v16, 0.0  ;;  %v1149_v27 = vadd.f32 %v4478_v39, %v1148_v22  ;;  %v1968_v28 = vmax.f32 %v1546_v18, 0.0  ;;  %v1549_v29 = vadd.f32 %v4478_v39, %v1548_v25 }
 0x11b   :  { %v3446_v30 = vpack.c.bf16 %v1870_v20, %v1870_v20  ;;  %v1871_v31 = vmax.f32 %v1157_v21, 0.0  ;;  %v3546_v32 = vpack.c.bf16 %v1970_v23, %v1970_v23  ;;  %v1971_v33 = vmax.f32 %v1557_v24, 0.0 }
 0x11c   :  { %v3444_v34 = vpack.c.bf16 %v1868_v26, %v1868_v26  ;;  %v1869_v35 = vmax.f32 %v1149_v27, 0.0  ;;  %v3544_v36 = vpack.c.bf16 %v1968_v28, %v1968_v28  ;;  %v1969_v37 = vmax.f32 %v1549_v29, 0.0 }
 0x11d   :  { %2851 = vst.msk [vmem:[%s5468_s3 + $0x58] sm:$0xf] %vm2828_vm3, %v3446_v30  ;;  %v3447_v38 = vpack.c.bf16 %v1871_v31, %v1871_v31  ;;  %2951 = vst.msk [vmem:[%s5468_s3 + $0x1e8] sm:$0xf] %vm2828_vm3, %v3546_v32  ;;  %v3547_v40 = vpack.c.bf16 %v1971_v33, %v1971_v33 }
 0x11e   :  { %2849 = vst.msk [vmem:[%s5468_s3 + $0x50] sm:$0xf] %vm2828_vm3, %v3444_v34  ;;  %v3445_v41 = vpack.c.bf16 %v1869_v35, %v1869_v35  ;;  %2949 = vst.msk [vmem:[%s5468_s3 + $0x1e0] sm:$0xf] %vm2828_vm3, %v3544_v36  ;;  %v3747_v42 = vpop.f32.mrb[24].mxu0  ;;  %v3545_v43 = vpack.c.bf16 %v1969_v37, %v1969_v37  ;;  %v3847_v44 = vpop.f32.mrb[24].mxu1 }
 0x11f   :  { %2852 = vst.msk [vmem:[%s5468_s3 + $0x5c] sm:$0xf] %vm2828_vm3, %v3447_v38  ;;  %2952 = vst.msk [vmem:[%s5468_s3 + $0x1ec] sm:$0xf] %vm2828_vm3, %v3547_v40  ;;  %v1170_v45 = vadd.f32 %v3747_v42, %v4478_v39  ;;  %v1161_v46 = vpop.f32.mrb[25].mxu0  ;;  %v1570_v47 = vadd.f32 %v3847_v44, %v4478_v39  ;;  %v1561_v48 = vpop.f32.mrb[25].mxu1 }
 0x120   :  { %2850 = vst.msk [vmem:[%s5468_s3 + $0x54] sm:$0xf] %vm2828_vm3, %v3445_v41  ;;  %2950 = vst.msk [vmem:[%s5468_s3 + $0x1e4] sm:$0xf] %vm2828_vm3, %v3545_v43  ;;  %v1162_v49 = vadd.f32 %v4478_v39, %v1161_v46  ;;  %v3748_v50 = vpop.f32.mrb[26].mxu0  ;;  %v1562_v51 = vadd.f32 %v4478_v39, %v1561_v48  ;;  %v3848_v52 = vpop.f32.mrb[26].mxu1 }
 0x121   :  { %v1874_v53 = vmax.f32 %v1170_v45, 0.0  ;;  %v1173_v54 = vadd.f32 %v3748_v50, %v4478_v39  ;;  %v1164_v55 = vpop.f32.mrb[27].mxu0  ;;  %v1974_v56 = vmax.f32 %v1570_v47, 0.0  ;;  %v1573_v57 = vadd.f32 %v3848_v52, %v4478_v39  ;;  %v1564_v58 = vpop.f32.mrb[27].mxu1 }
 0x122   :  { %v1872_v59 = vmax.f32 %v1162_v49, 0.0  ;;  %v1165_v60 = vadd.f32 %v4478_v39, %v1164_v55  ;;  %v1972_v61 = vmax.f32 %v1562_v51, 0.0  ;;  %v1565_v62 = vadd.f32 %v4478_v39, %v1564_v58 }
 0x123   :  { %v3450_v63 = vpack.c.bf16 %v1874_v53, %v1874_v53  ;;  %v1875_v0 = vmax.f32 %v1173_v54, 0.0  ;;  %v3550_v1 = vpack.c.bf16 %v1974_v56, %v1974_v56  ;;  %v1975_v2 = vmax.f32 %v1573_v57, 0.0 }
 0x124   :  { %v3448_v3 = vpack.c.bf16 %v1872_v59, %v1872_v59  ;;  %v1873_v4 = vmax.f32 %v1165_v60, 0.0  ;;  %v3548_v5 = vpack.c.bf16 %v1972_v61, %v1972_v61  ;;  %v1973_v6 = vmax.f32 %v1565_v62, 0.0 }
 0x125   :  { %2855 = vst.msk [vmem:[%s5468_s3 + $0x68] sm:$0xf] %vm2828_vm3, %v3450_v63  ;;  %v3451_v7 = vpack.c.bf16 %v1875_v0, %v1875_v0  ;;  %2955 = vst.msk [vmem:[%s5468_s3 + $0x1f8] sm:$0xf] %vm2828_vm3, %v3550_v1  ;;  %v3551_v8 = vpack.c.bf16 %v1975_v2, %v1975_v2 }
 0x126   :  { %2853 = vst.msk [vmem:[%s5468_s3 + $0x60] sm:$0xf] %vm2828_vm3, %v3448_v3  ;;  %v3449_v9 = vpack.c.bf16 %v1873_v4, %v1873_v4  ;;  %2953 = vst.msk [vmem:[%s5468_s3 + $0x1f0] sm:$0xf] %vm2828_vm3, %v3548_v5  ;;  %v3751_v10 = vpop.f32.mrb[28].mxu0  ;;  %v3549_v11 = vpack.c.bf16 %v1973_v6, %v1973_v6  ;;  %v3851_v12 = vpop.f32.mrb[28].mxu1 }
 0x127   :  { %2856 = vst.msk [vmem:[%s5468_s3 + $0x6c] sm:$0xf] %vm2828_vm3, %v3451_v7  ;;  %2956 = vst.msk [vmem:[%s5468_s3 + $0x1fc] sm:$0xf] %vm2828_vm3, %v3551_v8  ;;  %v1186_v13 = vadd.f32 %v3751_v10, %v4478_v39  ;;  %v1177_v14 = vpop.f32.mrb[29].mxu0  ;;  %v1586_v15 = vadd.f32 %v3851_v12, %v4478_v39  ;;  %v1577_v16 = vpop.f32.mrb[29].mxu1 }
 0x128   :  { %2854 = vst.msk [vmem:[%s5468_s3 + $0x64] sm:$0xf] %vm2828_vm3, %v3449_v9  ;;  %2954 = vst.msk [vmem:[%s5468_s3 + $0x1f4] sm:$0xf] %vm2828_vm3, %v3549_v11  ;;  %v1178_v17 = vadd.f32 %v4478_v39, %v1177_v14  ;;  %v3752_v18 = vpop.f32.mrb[30].mxu0  ;;  %v1578_v19 = vadd.f32 %v4478_v39, %v1577_v16  ;;  %v3852_v20 = vpop.f32.mrb[30].mxu1 }
 0x129   :  { %v1878_v21 = vmax.f32 %v1186_v13, 0.0  ;;  %v1189_v22 = vadd.f32 %v3752_v18, %v4478_v39  ;;  %v1180_v23 = vpop.f32.mrb[31].mxu0  ;;  %v1978_v24 = vmax.f32 %v1586_v15, 0.0  ;;  %v1589_v25 = vadd.f32 %v3852_v20, %v4478_v39  ;;  %v1580_v26 = vpop.f32.mrb[31].mxu1 }
 0x12a   :  { %v1876_v27 = vmax.f32 %v1178_v17, 0.0  ;;  %v1181_v28 = vadd.f32 %v4478_v39, %v1180_v23  ;;  %v1976_v29 = vmax.f32 %v1578_v19, 0.0  ;;  %v1581_v30 = vadd.f32 %v4478_v39, %v1580_v26 }
 0x12b   :  { %v3454_v31 = vpack.c.bf16 %v1878_v21, %v1878_v21  ;;  %v1879_v32 = vmax.f32 %v1189_v22, 0.0  ;;  %v3554_v33 = vpack.c.bf16 %v1978_v24, %v1978_v24  ;;  %v1979_v34 = vmax.f32 %v1589_v25, 0.0 }
 0x12c   :  { %v3452_v35 = vpack.c.bf16 %v1876_v27, %v1876_v27  ;;  %v1877_v36 = vmax.f32 %v1181_v28, 0.0  ;;  %v3552_v37 = vpack.c.bf16 %v1976_v29, %v1976_v29  ;;  %v1977_v38 = vmax.f32 %v1581_v30, 0.0 }
 0x12d   :  { %2859 = vst.msk [vmem:[%s5468_s3 + $0x78] sm:$0xf] %vm2828_vm3, %v3454_v31  ;;  %v3455_v40 = vpack.c.bf16 %v1879_v32, %v1879_v32  ;;  %2959 = vst.msk [vmem:[%s5468_s3 + $0x208] sm:$0xf] %vm2828_vm3, %v3554_v33  ;;  %v3555_v41 = vpack.c.bf16 %v1979_v34, %v1979_v34 }
 0x12e   :  { %2857 = vst.msk [vmem:[%s5468_s3 + $0x70] sm:$0xf] %vm2828_vm3, %v3452_v35  ;;  %v3453_v42 = vpack.c.bf16 %v1877_v36, %v1877_v36  ;;  %2957 = vst.msk [vmem:[%s5468_s3 + $0x200] sm:$0xf] %vm2828_vm3, %v3552_v37  ;;  %v3755_v43 = vpop.f32.mrb[32].mxu0  ;;  %v3553_v44 = vpack.c.bf16 %v1977_v38, %v1977_v38  ;;  %v3855_v45 = vpop.f32.mrb[32].mxu1 }
 0x12f   :  { %2860 = vst.msk [vmem:[%s5468_s3 + $0x7c] sm:$0xf] %vm2828_vm3, %v3455_v40  ;;  %2960 = vst.msk [vmem:[%s5468_s3 + $0x20c] sm:$0xf] %vm2828_vm3, %v3555_v41  ;;  %v1202_v46 = vadd.f32 %v3755_v43, %v4478_v39  ;;  %v1193_v47 = vpop.f32.mrb[33].mxu0  ;;  %v1602_v48 = vadd.f32 %v3855_v45, %v4478_v39  ;;  %v1593_v49 = vpop.f32.mrb[33].mxu1 }
 0x130   :  { %2858 = vst.msk [vmem:[%s5468_s3 + $0x74] sm:$0xf] %vm2828_vm3, %v3453_v42  ;;  %2958 = vst.msk [vmem:[%s5468_s3 + $0x204] sm:$0xf] %vm2828_vm3, %v3553_v44  ;;  %v1194_v50 = vadd.f32 %v4478_v39, %v1193_v47  ;;  %v3756_v51 = vpop.f32.mrb[34].mxu0  ;;  %v1594_v52 = vadd.f32 %v4478_v39, %v1593_v49  ;;  %v3856_v53 = vpop.f32.mrb[34].mxu1 }
 0x131   :  { %v1882_v54 = vmax.f32 %v1202_v46, 0.0  ;;  %v1205_v55 = vadd.f32 %v3756_v51, %v4478_v39  ;;  %v1196_v56 = vpop.f32.mrb[35].mxu0  ;;  %v1982_v57 = vmax.f32 %v1602_v48, 0.0  ;;  %v1605_v58 = vadd.f32 %v3856_v53, %v4478_v39  ;;  %v1596_v59 = vpop.f32.mrb[35].mxu1 }
 0x132   :  { %v1880_v60 = vmax.f32 %v1194_v50, 0.0  ;;  %v1197_v61 = vadd.f32 %v4478_v39, %v1196_v56  ;;  %v1980_v62 = vmax.f32 %v1594_v52, 0.0  ;;  %v1597_v63 = vadd.f32 %v4478_v39, %v1596_v59 }
 0x133   :  { %v3458_v0 = vpack.c.bf16 %v1882_v54, %v1882_v54  ;;  %v1883_v1 = vmax.f32 %v1205_v55, 0.0  ;;  %v3558_v2 = vpack.c.bf16 %v1982_v57, %v1982_v57  ;;  %v1983_v3 = vmax.f32 %v1605_v58, 0.0 }
 0x134   :  { %v3456_v4 = vpack.c.bf16 %v1880_v60, %v1880_v60  ;;  %v1881_v5 = vmax.f32 %v1197_v61, 0.0  ;;  %v3556_v6 = vpack.c.bf16 %v1980_v62, %v1980_v62  ;;  %v1981_v7 = vmax.f32 %v1597_v63, 0.0 }
 0x135   :  { %2863 = vst.msk [vmem:[%s5468_s3 + $0x88] sm:$0xf] %vm2828_vm3, %v3458_v0  ;;  %v3459_v8 = vpack.c.bf16 %v1883_v1, %v1883_v1  ;;  %2963 = vst.msk [vmem:[%s5468_s3 + $0x218] sm:$0xf] %vm2828_vm3, %v3558_v2  ;;  %v3559_v9 = vpack.c.bf16 %v1983_v3, %v1983_v3 }
 0x136   :  { %2861 = vst.msk [vmem:[%s5468_s3 + $0x80] sm:$0xf] %vm2828_vm3, %v3456_v4  ;;  %v3457_v10 = vpack.c.bf16 %v1881_v5, %v1881_v5  ;;  %2961 = vst.msk [vmem:[%s5468_s3 + $0x210] sm:$0xf] %vm2828_vm3, %v3556_v6  ;;  %v3759_v11 = vpop.f32.mrb[36].mxu0  ;;  %v3557_v12 = vpack.c.bf16 %v1981_v7, %v1981_v7  ;;  %v3859_v13 = vpop.f32.mrb[36].mxu1 }
 0x137   :  { %2864 = vst.msk [vmem:[%s5468_s3 + $0x8c] sm:$0xf] %vm2828_vm3, %v3459_v8  ;;  %2964 = vst.msk [vmem:[%s5468_s3 + $0x21c] sm:$0xf] %vm2828_vm3, %v3559_v9  ;;  %v1218_v14 = vadd.f32 %v3759_v11, %v4478_v39  ;;  %v1209_v15 = vpop.f32.mrb[37].mxu0  ;;  %v1618_v16 = vadd.f32 %v3859_v13, %v4478_v39  ;;  %v1609_v17 = vpop.f32.mrb[37].mxu1 }
 0x138   :  { %2862 = vst.msk [vmem:[%s5468_s3 + $0x84] sm:$0xf] %vm2828_vm3, %v3457_v10  ;;  %2962 = vst.msk [vmem:[%s5468_s3 + $0x214] sm:$0xf] %vm2828_vm3, %v3557_v12  ;;  %v1210_v18 = vadd.f32 %v4478_v39, %v1209_v15  ;;  %v3760_v19 = vpop.f32.mrb[38].mxu0  ;;  %v1610_v20 = vadd.f32 %v4478_v39, %v1609_v17  ;;  %v3860_v21 = vpop.f32.mrb[38].mxu1 }
 0x139   :  { %v1886_v22 = vmax.f32 %v1218_v14, 0.0  ;;  %v1221_v23 = vadd.f32 %v3760_v19, %v4478_v39  ;;  %v1212_v24 = vpop.f32.mrb[39].mxu0  ;;  %v1986_v25 = vmax.f32 %v1618_v16, 0.0  ;;  %v1621_v26 = vadd.f32 %v3860_v21, %v4478_v39  ;;  %v1612_v27 = vpop.f32.mrb[39].mxu1 }
 0x13a   :  { %v1884_v28 = vmax.f32 %v1210_v18, 0.0  ;;  %v1213_v29 = vadd.f32 %v4478_v39, %v1212_v24  ;;  %v1984_v30 = vmax.f32 %v1610_v20, 0.0  ;;  %v1613_v31 = vadd.f32 %v4478_v39, %v1612_v27 }
 0x13b   :  { %v3462_v32 = vpack.c.bf16 %v1886_v22, %v1886_v22  ;;  %v1887_v33 = vmax.f32 %v1221_v23, 0.0  ;;  %v3562_v34 = vpack.c.bf16 %v1986_v25, %v1986_v25  ;;  %v1987_v35 = vmax.f32 %v1621_v26, 0.0 }
 0x13c   :  { %v3460_v36 = vpack.c.bf16 %v1884_v28, %v1884_v28  ;;  %v1885_v37 = vmax.f32 %v1213_v29, 0.0  ;;  %v3560_v38 = vpack.c.bf16 %v1984_v30, %v1984_v30  ;;  %v1985_v40 = vmax.f32 %v1613_v31, 0.0 }
 0x13d   :  { %2867 = vst.msk [vmem:[%s5468_s3 + $0x98] sm:$0xf] %vm2828_vm3, %v3462_v32  ;;  %v3463_v41 = vpack.c.bf16 %v1887_v33, %v1887_v33  ;;  %2967 = vst.msk [vmem:[%s5468_s3 + $0x228] sm:$0xf] %vm2828_vm3, %v3562_v34  ;;  %v3563_v42 = vpack.c.bf16 %v1987_v35, %v1987_v35 }
 0x13e   :  { %2865 = vst.msk [vmem:[%s5468_s3 + $0x90] sm:$0xf] %vm2828_vm3, %v3460_v36  ;;  %v3461_v43 = vpack.c.bf16 %v1885_v37, %v1885_v37  ;;  %2965 = vst.msk [vmem:[%s5468_s3 + $0x220] sm:$0xf] %vm2828_vm3, %v3560_v38  ;;  %v3763_v44 = vpop.f32.mrb[40].mxu0  ;;  %v3561_v45 = vpack.c.bf16 %v1985_v40, %v1985_v40  ;;  %v3863_v46 = vpop.f32.mrb[40].mxu1 }
 0x13f   :  { %2868 = vst.msk [vmem:[%s5468_s3 + $0x9c] sm:$0xf] %vm2828_vm3, %v3463_v41  ;;  %2968 = vst.msk [vmem:[%s5468_s3 + $0x22c] sm:$0xf] %vm2828_vm3, %v3563_v42  ;;  %v1234_v47 = vadd.f32 %v3763_v44, %v4478_v39  ;;  %v1225_v48 = vpop.f32.mrb[41].mxu0  ;;  %v1634_v49 = vadd.f32 %v3863_v46, %v4478_v39  ;;  %v1625_v50 = vpop.f32.mrb[41].mxu1 }
 0x140   :  { %2866 = vst.msk [vmem:[%s5468_s3 + $0x94] sm:$0xf] %vm2828_vm3, %v3461_v43  ;;  %2966 = vst.msk [vmem:[%s5468_s3 + $0x224] sm:$0xf] %vm2828_vm3, %v3561_v45  ;;  %v1226_v51 = vadd.f32 %v4478_v39, %v1225_v48  ;;  %v3764_v52 = vpop.f32.mrb[42].mxu0  ;;  %v1626_v53 = vadd.f32 %v4478_v39, %v1625_v50  ;;  %v3864_v54 = vpop.f32.mrb[42].mxu1 }
 0x141   :  { %v1890_v55 = vmax.f32 %v1234_v47, 0.0  ;;  %v1237_v56 = vadd.f32 %v3764_v52, %v4478_v39  ;;  %v1228_v57 = vpop.f32.mrb[43].mxu0  ;;  %v1990_v58 = vmax.f32 %v1634_v49, 0.0  ;;  %v1637_v59 = vadd.f32 %v3864_v54, %v4478_v39  ;;  %v1628_v60 = vpop.f32.mrb[43].mxu1 }
 0x142   :  { %v1888_v61 = vmax.f32 %v1226_v51, 0.0  ;;  %v1229_v62 = vadd.f32 %v4478_v39, %v1228_v57  ;;  %v1988_v63 = vmax.f32 %v1626_v53, 0.0  ;;  %v1629_v0 = vadd.f32 %v4478_v39, %v1628_v60 }
 0x143   :  { %v3466_v1 = vpack.c.bf16 %v1890_v55, %v1890_v55  ;;  %v1891_v2 = vmax.f32 %v1237_v56, 0.0  ;;  %v3566_v3 = vpack.c.bf16 %v1990_v58, %v1990_v58  ;;  %v1991_v4 = vmax.f32 %v1637_v59, 0.0 }
 0x144   :  { %v3464_v5 = vpack.c.bf16 %v1888_v61, %v1888_v61  ;;  %v1889_v6 = vmax.f32 %v1229_v62, 0.0  ;;  %v3564_v7 = vpack.c.bf16 %v1988_v63, %v1988_v63  ;;  %v1989_v8 = vmax.f32 %v1629_v0, 0.0 }
 0x145   :  { %2871 = vst.msk [vmem:[%s5468_s3 + $0xa8] sm:$0xf] %vm2828_vm3, %v3466_v1  ;;  %v3467_v9 = vpack.c.bf16 %v1891_v2, %v1891_v2  ;;  %2971 = vst.msk [vmem:[%s5468_s3 + $0x238] sm:$0xf] %vm2828_vm3, %v3566_v3  ;;  %v3567_v10 = vpack.c.bf16 %v1991_v4, %v1991_v4 }
 0x146   :  { %2869 = vst.msk [vmem:[%s5468_s3 + $0xa0] sm:$0xf] %vm2828_vm3, %v3464_v5  ;;  %v3465_v11 = vpack.c.bf16 %v1889_v6, %v1889_v6  ;;  %2969 = vst.msk [vmem:[%s5468_s3 + $0x230] sm:$0xf] %vm2828_vm3, %v3564_v7  ;;  %v3767_v12 = vpop.f32.mrb[44].mxu0  ;;  %v3565_v13 = vpack.c.bf16 %v1989_v8, %v1989_v8  ;;  %v3867_v14 = vpop.f32.mrb[44].mxu1 }
 0x147   :  { %2872 = vst.msk [vmem:[%s5468_s3 + $0xac] sm:$0xf] %vm2828_vm3, %v3467_v9  ;;  %2972 = vst.msk [vmem:[%s5468_s3 + $0x23c] sm:$0xf] %vm2828_vm3, %v3567_v10  ;;  %v1250_v15 = vadd.f32 %v3767_v12, %v4478_v39  ;;  %v1241_v16 = vpop.f32.mrb[45].mxu0  ;;  %v1650_v17 = vadd.f32 %v3867_v14, %v4478_v39  ;;  %v1641_v18 = vpop.f32.mrb[45].mxu1 }
 0x148   :  { %2870 = vst.msk [vmem:[%s5468_s3 + $0xa4] sm:$0xf] %vm2828_vm3, %v3465_v11  ;;  %2970 = vst.msk [vmem:[%s5468_s3 + $0x234] sm:$0xf] %vm2828_vm3, %v3565_v13  ;;  %v1242_v19 = vadd.f32 %v4478_v39, %v1241_v16  ;;  %v3768_v20 = vpop.f32.mrb[46].mxu0  ;;  %v1642_v21 = vadd.f32 %v4478_v39, %v1641_v18  ;;  %v3868_v22 = vpop.f32.mrb[46].mxu1 }
 0x149   :  { %v1894_v23 = vmax.f32 %v1250_v15, 0.0  ;;  %v1253_v24 = vadd.f32 %v3768_v20, %v4478_v39  ;;  %v1244_v25 = vpop.f32.mrb[47].mxu0  ;;  %v1994_v26 = vmax.f32 %v1650_v17, 0.0  ;;  %v1653_v27 = vadd.f32 %v3868_v22, %v4478_v39  ;;  %v1644_v28 = vpop.f32.mrb[47].mxu1  ;;  %v4995_v15 = vld [vmem:[%s5467_s2] ss:$0 sm:$0xff] }
 0x14a   :  { %v1892_v29 = vmax.f32 %v1242_v19, 0.0  ;;  %v1245_v30 = vadd.f32 %v4478_v39, %v1244_v25  ;;  %v1992_v31 = vmax.f32 %v1642_v21, 0.0  ;;  %v1645_v32 = vadd.f32 %v4478_v39, %v1644_v28 }
 0x14b   :  { %v3470_v33 = vpack.c.bf16 %v1894_v23, %v1894_v23  ;;  %v1895_v34 = vmax.f32 %v1253_v24, 0.0  ;;  %v3570_v35 = vpack.c.bf16 %v1994_v26, %v1994_v26  ;;  %v1995_v36 = vmax.f32 %v1653_v27, 0.0 }
 0x14c   :  { %v3468_v37 = vpack.c.bf16 %v1892_v29, %v1892_v29  ;;  %v1893_v38 = vmax.f32 %v1245_v30, 0.0  ;;  %v3568_v40 = vpack.c.bf16 %v1992_v31, %v1992_v31  ;;  %v1993_v41 = vmax.f32 %v1645_v32, 0.0 }
 0x14d   :  { %2875 = vst.msk [vmem:[%s5468_s3 + $0xb8] sm:$0xf] %vm2828_vm3, %v3470_v33  ;;  %v3471_v42 = vpack.c.bf16 %v1895_v34, %v1895_v34  ;;  %2975 = vst.msk [vmem:[%s5468_s3 + $0x248] sm:$0xf] %vm2828_vm3, %v3570_v35  ;;  %v3571_v43 = vpack.c.bf16 %v1995_v36, %v1995_v36 }
 0x14e   :  { %2873 = vst.msk [vmem:[%s5468_s3 + $0xb0] sm:$0xf] %vm2828_vm3, %v3468_v37  ;;  %v3469_v44 = vpack.c.bf16 %v1893_v38, %v1893_v38  ;;  %2973 = vst.msk [vmem:[%s5468_s3 + $0x240] sm:$0xf] %vm2828_vm3, %v3568_v40  ;;  %v3771_v45 = vpop.f32.mrb[48].mxu0  ;;  %v3569_v46 = vpack.c.bf16 %v1993_v41, %v1993_v41  ;;  %v3871_v47 = vpop.f32.mrb[48].mxu1 }
 0x14f   :  { %2876 = vst.msk [vmem:[%s5468_s3 + $0xbc] sm:$0xf] %vm2828_vm3, %v3471_v42  ;;  %2976 = vst.msk [vmem:[%s5468_s3 + $0x24c] sm:$0xf] %vm2828_vm3, %v3571_v43  ;;  %v1266_v48 = vadd.f32 %v3771_v45, %v4478_v39  ;;  %v1257_v49 = vpop.f32.mrb[49].mxu0  ;;  %v1666_v50 = vadd.f32 %v3871_v47, %v4478_v39  ;;  %v1657_v51 = vpop.f32.mrb[49].mxu1 }
 0x150   :  { %2874 = vst.msk [vmem:[%s5468_s3 + $0xb4] sm:$0xf] %vm2828_vm3, %v3469_v44  ;;  %2974 = vst.msk [vmem:[%s5468_s3 + $0x244] sm:$0xf] %vm2828_vm3, %v3569_v46  ;;  %v1258_v52 = vadd.f32 %v4478_v39, %v1257_v49  ;;  %v3772_v53 = vpop.f32.mrb[50].mxu0  ;;  %v1658_v54 = vadd.f32 %v4478_v39, %v1657_v51  ;;  %v3872_v55 = vpop.f32.mrb[50].mxu1 }
 0x151   :  { %v1898_v56 = vmax.f32 %v1266_v48, 0.0  ;;  %v1269_v57 = vadd.f32 %v3772_v53, %v4478_v39  ;;  %v1260_v58 = vpop.f32.mrb[51].mxu0  ;;  %v1998_v59 = vmax.f32 %v1666_v50, 0.0  ;;  %v1669_v60 = vadd.f32 %v3872_v55, %v4478_v39  ;;  %v1660_v61 = vpop.f32.mrb[51].mxu1 }
 0x152   :  { %v1896_v62 = vmax.f32 %v1258_v52, 0.0  ;;  %v1261_v63 = vadd.f32 %v4478_v39, %v1260_v58  ;;  %v1996_v0 = vmax.f32 %v1658_v54, 0.0  ;;  %v1661_v1 = vadd.f32 %v4478_v39, %v1660_v61 }
 0x153   :  { %v3474_v2 = vpack.c.bf16 %v1898_v56, %v1898_v56  ;;  %v1899_v3 = vmax.f32 %v1269_v57, 0.0  ;;  %v3574_v4 = vpack.c.bf16 %v1998_v59, %v1998_v59  ;;  %v1999_v5 = vmax.f32 %v1669_v60, 0.0 }
 0x154   :  { %v3472_v6 = vpack.c.bf16 %v1896_v62, %v1896_v62  ;;  %v1897_v7 = vmax.f32 %v1261_v63, 0.0  ;;  %v3572_v8 = vpack.c.bf16 %v1996_v0, %v1996_v0  ;;  %v1997_v9 = vmax.f32 %v1661_v1, 0.0 }
 0x155   :  { %2879 = vst.msk [vmem:[%s5468_s3 + $0xc8] sm:$0xf] %vm2828_vm3, %v3474_v2  ;;  %v3475_v10 = vpack.c.bf16 %v1899_v3, %v1899_v3  ;;  %2979 = vst.msk [vmem:[%s5468_s3 + $0x258] sm:$0xf] %vm2828_vm3, %v3574_v4  ;;  %v3575_v39 = vpack.c.bf16 %v1999_v5, %v1999_v5 }
 0x156   :  { %2877 = vst.msk [vmem:[%s5468_s3 + $0xc0] sm:$0xf] %vm2828_vm3, %v3472_v6  ;;  %v3473_v11 = vpack.c.bf16 %v1897_v7, %v1897_v7  ;;  %2977 = vst.msk [vmem:[%s5468_s3 + $0x250] sm:$0xf] %vm2828_vm3, %v3572_v8  ;;  %v3775_v12 = vpop.f32.mrb[52].mxu0  ;;  %v3573_v13 = vpack.c.bf16 %v1997_v9, %v1997_v9  ;;  %v3875_v14 = vpop.f32.mrb[52].mxu1 }
 0x157   :  { %2880 = vst.msk [vmem:[%s5468_s3 + $0xcc] sm:$0xf] %vm2828_vm3, %v3475_v10  ;;  %2980 = vst.msk [vmem:[%s5468_s3 + $0x25c] sm:$0xf] %vm2828_vm3, %v3575_v39  ;;  %v1282_v16 = vadd.f32 %v4995_v15, %v3775_v12  ;;  %v1273_v17 = vpop.f32.mrb[53].mxu0  ;;  %v1682_v18 = vadd.f32 %v4995_v15, %v3875_v14  ;;  %v1673_v19 = vpop.f32.mrb[53].mxu1 }
 0x158   :  { %2878 = vst.msk [vmem:[%s5468_s3 + $0xc4] sm:$0xf] %vm2828_vm3, %v3473_v11  ;;  %2978 = vst.msk [vmem:[%s5468_s3 + $0x254] sm:$0xf] %vm2828_vm3, %v3573_v13  ;;  %v1274_v20 = vadd.f32 %v4995_v15, %v1273_v17  ;;  %v3776_v21 = vpop.f32.mrb[54].mxu0  ;;  %v1674_v22 = vadd.f32 %v4995_v15, %v1673_v19  ;;  %v3876_v23 = vpop.f32.mrb[54].mxu1 }
 0x159   :  { %v1902_v24 = vmax.f32 %v1282_v16, 0.0  ;;  %v1285_v25 = vadd.f32 %v4995_v15, %v3776_v21  ;;  %v1276_v26 = vpop.f32.mrb[55].mxu0  ;;  %v2002_v27 = vmax.f32 %v1682_v18, 0.0  ;;  %v1685_v28 = vadd.f32 %v4995_v15, %v3876_v23  ;;  %v1676_v29 = vpop.f32.mrb[55].mxu1 }
 0x15a   :  { %v1900_v30 = vmax.f32 %v1274_v20, 0.0  ;;  %v1277_v31 = vadd.f32 %v4995_v15, %v1276_v26  ;;  %v2000_v32 = vmax.f32 %v1674_v22, 0.0  ;;  %v1677_v33 = vadd.f32 %v4995_v15, %v1676_v29 }
 0x15b   :  { %v3478_v34 = vpack.c.bf16 %v1902_v24, %v1902_v24  ;;  %v1903_v35 = vmax.f32 %v1285_v25, 0.0  ;;  %v3578_v36 = vpack.c.bf16 %v2002_v27, %v2002_v27  ;;  %v2003_v37 = vmax.f32 %v1685_v28, 0.0 }
 0x15c   :  { %v3476_v38 = vpack.c.bf16 %v1900_v30, %v1900_v30  ;;  %v1901_v40 = vmax.f32 %v1277_v31, 0.0  ;;  %v3576_v41 = vpack.c.bf16 %v2000_v32, %v2000_v32  ;;  %v2001_v42 = vmax.f32 %v1677_v33, 0.0 }
 0x15d   :  { %2883 = vst.msk [vmem:[%s5468_s3 + $0xd8] sm:$0xf] %vm2828_vm3, %v3478_v34  ;;  %v3479_v43 = vpack.c.bf16 %v1903_v35, %v1903_v35  ;;  %2983 = vst.msk [vmem:[%s5468_s3 + $0x268] sm:$0xf] %vm2828_vm3, %v3578_v36  ;;  %v3579_v44 = vpack.c.bf16 %v2003_v37, %v2003_v37 }
 0x15e   :  { %2881 = vst.msk [vmem:[%s5468_s3 + $0xd0] sm:$0xf] %vm2828_vm3, %v3476_v38  ;;  %v3477_v45 = vpack.c.bf16 %v1901_v40, %v1901_v40  ;;  %2981 = vst.msk [vmem:[%s5468_s3 + $0x260] sm:$0xf] %vm2828_vm3, %v3576_v41  ;;  %v3779_v46 = vpop.f32.mrb[56].mxu0  ;;  %v3577_v47 = vpack.c.bf16 %v2001_v42, %v2001_v42  ;;  %v3879_v48 = vpop.f32.mrb[56].mxu1 }
 0x15f   :  { %2884 = vst.msk [vmem:[%s5468_s3 + $0xdc] sm:$0xf] %vm2828_vm3, %v3479_v43  ;;  %2984 = vst.msk [vmem:[%s5468_s3 + $0x26c] sm:$0xf] %vm2828_vm3, %v3579_v44  ;;  %v1298_v49 = vadd.f32 %v4995_v15, %v3779_v46  ;;  %v1289_v50 = vpop.f32.mrb[57].mxu0  ;;  %v1698_v51 = vadd.f32 %v4995_v15, %v3879_v48  ;;  %v1689_v52 = vpop.f32.mrb[57].mxu1 }
 0x160   :  { %2882 = vst.msk [vmem:[%s5468_s3 + $0xd4] sm:$0xf] %vm2828_vm3, %v3477_v45  ;;  %2982 = vst.msk [vmem:[%s5468_s3 + $0x264] sm:$0xf] %vm2828_vm3, %v3577_v47  ;;  %v1290_v53 = vadd.f32 %v4995_v15, %v1289_v50  ;;  %v3780_v54 = vpop.f32.mrb[58].mxu0  ;;  %v1690_v55 = vadd.f32 %v4995_v15, %v1689_v52  ;;  %v3880_v56 = vpop.f32.mrb[58].mxu1 }
 0x161   :  { %v1906_v57 = vmax.f32 %v1298_v49, 0.0  ;;  %v1301_v58 = vadd.f32 %v4995_v15, %v3780_v54  ;;  %v1292_v59 = vpop.f32.mrb[59].mxu0  ;;  %v2006_v60 = vmax.f32 %v1698_v51, 0.0  ;;  %v1701_v61 = vadd.f32 %v4995_v15, %v3880_v56  ;;  %v1692_v62 = vpop.f32.mrb[59].mxu1 }
 0x162   :  { %v1904_v63 = vmax.f32 %v1290_v53, 0.0  ;;  %v1293_v0 = vadd.f32 %v4995_v15, %v1292_v59  ;;  %v2004_v1 = vmax.f32 %v1690_v55, 0.0  ;;  %v1693_v2 = vadd.f32 %v4995_v15, %v1692_v62 }
 0x163   :  { %v3482_v3 = vpack.c.bf16 %v1906_v57, %v1906_v57  ;;  %v1907_v4 = vmax.f32 %v1301_v58, 0.0  ;;  %v3582_v5 = vpack.c.bf16 %v2006_v60, %v2006_v60  ;;  %v2007_v6 = vmax.f32 %v1701_v61, 0.0 }
 0x164   :  { %v3480_v7 = vpack.c.bf16 %v1904_v63, %v1904_v63  ;;  %v1905_v8 = vmax.f32 %v1293_v0, 0.0  ;;  %v3580_v9 = vpack.c.bf16 %v2004_v1, %v2004_v1  ;;  %v2005_v10 = vmax.f32 %v1693_v2, 0.0 }
 0x165   :  { %2887 = vst.msk [vmem:[%s5468_s3 + $0xe8] sm:$0xf] %vm2828_vm3, %v3482_v3  ;;  %v3483_v39 = vpack.c.bf16 %v1907_v4, %v1907_v4  ;;  %2987 = vst.msk [vmem:[%s5468_s3 + $0x278] sm:$0xf] %vm2828_vm3, %v3582_v5  ;;  %v3583_v11 = vpack.c.bf16 %v2007_v6, %v2007_v6 }
 0x166   :  { %2885 = vst.msk [vmem:[%s5468_s3 + $0xe0] sm:$0xf] %vm2828_vm3, %v3480_v7  ;;  %v3481_v12 = vpack.c.bf16 %v1905_v8, %v1905_v8  ;;  %2985 = vst.msk [vmem:[%s5468_s3 + $0x270] sm:$0xf] %vm2828_vm3, %v3580_v9  ;;  %v3783_v13 = vpop.f32.mrb[60].mxu0  ;;  %v3581_v14 = vpack.c.bf16 %v2005_v10, %v2005_v10  ;;  %v3883_v16 = vpop.f32.mrb[60].mxu1 }
 0x167   :  { %2888 = vst.msk [vmem:[%s5468_s3 + $0xec] sm:$0xf] %vm2828_vm3, %v3483_v39  ;;  %2988 = vst.msk [vmem:[%s5468_s3 + $0x27c] sm:$0xf] %vm2828_vm3, %v3583_v11  ;;  %v1314_v17 = vadd.f32 %v4995_v15, %v3783_v13  ;;  %v1305_v18 = vpop.f32.mrb[61].mxu0  ;;  %v1714_v19 = vadd.f32 %v4995_v15, %v3883_v16  ;;  %v1705_v20 = vpop.f32.mrb[61].mxu1 }
 0x168   :  { %2886 = vst.msk [vmem:[%s5468_s3 + $0xe4] sm:$0xf] %vm2828_vm3, %v3481_v12  ;;  %2986 = vst.msk [vmem:[%s5468_s3 + $0x274] sm:$0xf] %vm2828_vm3, %v3581_v14  ;;  %v1306_v21 = vadd.f32 %v4995_v15, %v1305_v18  ;;  %v3784_v22 = vpop.f32.mrb[62].mxu0  ;;  %v1706_v23 = vadd.f32 %v4995_v15, %v1705_v20  ;;  %v3884_v24 = vpop.f32.mrb[62].mxu1 }
 0x169   :  { %v1910_v25 = vmax.f32 %v1314_v17, 0.0  ;;  %v1317_v26 = vadd.f32 %v4995_v15, %v3784_v22  ;;  %v1308_v27 = vpop.f32.mrb[63].mxu0  ;;  %v2010_v28 = vmax.f32 %v1714_v19, 0.0  ;;  %v1717_v29 = vadd.f32 %v4995_v15, %v3884_v24  ;;  %v1708_v30 = vpop.f32.mrb[63].mxu1 }
 0x16a   :  { %v1908_v31 = vmax.f32 %v1306_v21, 0.0  ;;  %v1309_v32 = vadd.f32 %v4995_v15, %v1308_v27  ;;  %v2008_v33 = vmax.f32 %v1706_v23, 0.0  ;;  %v1709_v34 = vadd.f32 %v4995_v15, %v1708_v30 }
 0x16b   :  { %v3486_v35 = vpack.c.bf16 %v1910_v25, %v1910_v25  ;;  %v1911_v36 = vmax.f32 %v1317_v26, 0.0  ;;  %v3586_v37 = vpack.c.bf16 %v2010_v28, %v2010_v28  ;;  %v2011_v38 = vmax.f32 %v1717_v29, 0.0 }
 0x16c   :  { %v3484_v40 = vpack.c.bf16 %v1908_v31, %v1908_v31  ;;  %v1909_v41 = vmax.f32 %v1309_v32, 0.0  ;;  %v3584_v42 = vpack.c.bf16 %v2008_v33, %v2008_v33  ;;  %v2009_v43 = vmax.f32 %v1709_v34, 0.0 }
 0x16d   :  { %2891 = vst.msk [vmem:[%s5468_s3 + $0xf8] sm:$0xf] %vm2828_vm3, %v3486_v35  ;;  %v3487_v44 = vpack.c.bf16 %v1911_v36, %v1911_v36  ;;  %2991 = vst.msk [vmem:[%s5468_s3 + $0x288] sm:$0xf] %vm2828_vm3, %v3586_v37  ;;  %v3587_v45 = vpack.c.bf16 %v2011_v38, %v2011_v38 }
 0x16e   :  { %2889 = vst.msk [vmem:[%s5468_s3 + $0xf0] sm:$0xf] %vm2828_vm3, %v3484_v40  ;;  %v3485_v46 = vpack.c.bf16 %v1909_v41, %v1909_v41  ;;  %2989 = vst.msk [vmem:[%s5468_s3 + $0x280] sm:$0xf] %vm2828_vm3, %v3584_v42  ;;  %v3787_v47 = vpop.f32.mrb[64].mxu0  ;;  %v3585_v48 = vpack.c.bf16 %v2009_v43, %v2009_v43  ;;  %v3887_v49 = vpop.f32.mrb[64].mxu1 }
 0x16f   :  { %2892 = vst.msk [vmem:[%s5468_s3 + $0xfc] sm:$0xf] %vm2828_vm3, %v3487_v44  ;;  %2992 = vst.msk [vmem:[%s5468_s3 + $0x28c] sm:$0xf] %vm2828_vm3, %v3587_v45  ;;  %v1330_v50 = vadd.f32 %v4995_v15, %v3787_v47  ;;  %v1321_v51 = vpop.f32.mrb[65].mxu0  ;;  %v1730_v52 = vadd.f32 %v4995_v15, %v3887_v49  ;;  %v1721_v53 = vpop.f32.mrb[65].mxu1 }
 0x170   :  { %2890 = vst.msk [vmem:[%s5468_s3 + $0xf4] sm:$0xf] %vm2828_vm3, %v3485_v46  ;;  %2990 = vst.msk [vmem:[%s5468_s3 + $0x284] sm:$0xf] %vm2828_vm3, %v3585_v48  ;;  %v1322_v54 = vadd.f32 %v4995_v15, %v1321_v51  ;;  %v3788_v55 = vpop.f32.mrb[66].mxu0  ;;  %v1722_v56 = vadd.f32 %v4995_v15, %v1721_v53  ;;  %v3888_v57 = vpop.f32.mrb[66].mxu1 }
 0x171   :  { %v1914_v58 = vmax.f32 %v1330_v50, 0.0  ;;  %v1333_v59 = vadd.f32 %v4995_v15, %v3788_v55  ;;  %v1324_v60 = vpop.f32.mrb[67].mxu0  ;;  %v2014_v61 = vmax.f32 %v1730_v52, 0.0  ;;  %v1733_v62 = vadd.f32 %v4995_v15, %v3888_v57  ;;  %v1724_v63 = vpop.f32.mrb[67].mxu1 }
 0x172   :  { %v1912_v0 = vmax.f32 %v1322_v54, 0.0  ;;  %v1325_v1 = vadd.f32 %v4995_v15, %v1324_v60  ;;  %v2012_v2 = vmax.f32 %v1722_v56, 0.0  ;;  %v1725_v3 = vadd.f32 %v4995_v15, %v1724_v63 }
 0x173   :  { %v3490_v4 = vpack.c.bf16 %v1914_v58, %v1914_v58  ;;  %v1915_v5 = vmax.f32 %v1333_v59, 0.0  ;;  %v3590_v6 = vpack.c.bf16 %v2014_v61, %v2014_v61  ;;  %v2015_v7 = vmax.f32 %v1733_v62, 0.0 }
 0x174   :  { %v3488_v8 = vpack.c.bf16 %v1912_v0, %v1912_v0  ;;  %v1913_v9 = vmax.f32 %v1325_v1, 0.0  ;;  %v3588_v10 = vpack.c.bf16 %v2012_v2, %v2012_v2  ;;  %v2013_v39 = vmax.f32 %v1725_v3, 0.0 }
 0x175   :  { %2895 = vst.msk [vmem:[%s5468_s3 + $0x108] sm:$0xf] %vm2828_vm3, %v3490_v4  ;;  %v3491_v11 = vpack.c.bf16 %v1915_v5, %v1915_v5  ;;  %2995 = vst.msk [vmem:[%s5468_s3 + $0x298] sm:$0xf] %vm2828_vm3, %v3590_v6  ;;  %v3591_v12 = vpack.c.bf16 %v2015_v7, %v2015_v7 }
 0x176   :  { %2893 = vst.msk [vmem:[%s5468_s3 + $0x100] sm:$0xf] %vm2828_vm3, %v3488_v8  ;;  %v3489_v13 = vpack.c.bf16 %v1913_v9, %v1913_v9  ;;  %2993 = vst.msk [vmem:[%s5468_s3 + $0x290] sm:$0xf] %vm2828_vm3, %v3588_v10  ;;  %v3791_v14 = vpop.f32.mrb[68].mxu0  ;;  %v3589_v16 = vpack.c.bf16 %v2013_v39, %v2013_v39  ;;  %v3891_v17 = vpop.f32.mrb[68].mxu1 }
 0x177   :  { %2896 = vst.msk [vmem:[%s5468_s3 + $0x10c] sm:$0xf] %vm2828_vm3, %v3491_v11  ;;  %2996 = vst.msk [vmem:[%s5468_s3 + $0x29c] sm:$0xf] %vm2828_vm3, %v3591_v12  ;;  %v1346_v18 = vadd.f32 %v4995_v15, %v3791_v14  ;;  %v1337_v19 = vpop.f32.mrb[69].mxu0  ;;  %v1746_v20 = vadd.f32 %v4995_v15, %v3891_v17  ;;  %v1737_v21 = vpop.f32.mrb[69].mxu1 }
 0x178   :  { %2894 = vst.msk [vmem:[%s5468_s3 + $0x104] sm:$0xf] %vm2828_vm3, %v3489_v13  ;;  %2994 = vst.msk [vmem:[%s5468_s3 + $0x294] sm:$0xf] %vm2828_vm3, %v3589_v16  ;;  %v1338_v22 = vadd.f32 %v4995_v15, %v1337_v19  ;;  %v3792_v23 = vpop.f32.mrb[70].mxu0  ;;  %v1738_v24 = vadd.f32 %v4995_v15, %v1737_v21  ;;  %v3892_v25 = vpop.f32.mrb[70].mxu1 }
 0x179   :  { %v1918_v26 = vmax.f32 %v1346_v18, 0.0  ;;  %v1349_v27 = vadd.f32 %v4995_v15, %v3792_v23  ;;  %v1340_v28 = vpop.f32.mrb[71].mxu0  ;;  %v2018_v29 = vmax.f32 %v1746_v20, 0.0  ;;  %v1749_v30 = vadd.f32 %v4995_v15, %v3892_v25  ;;  %v1740_v31 = vpop.f32.mrb[71].mxu1 }
 0x17a   :  { %v1916_v32 = vmax.f32 %v1338_v22, 0.0  ;;  %v1341_v33 = vadd.f32 %v4995_v15, %v1340_v28  ;;  %v2016_v34 = vmax.f32 %v1738_v24, 0.0  ;;  %v1741_v35 = vadd.f32 %v4995_v15, %v1740_v31 }
 0x17b   :  { %v3494_v36 = vpack.c.bf16 %v1918_v26, %v1918_v26  ;;  %v1919_v37 = vmax.f32 %v1349_v27, 0.0  ;;  %v3594_v38 = vpack.c.bf16 %v2018_v29, %v2018_v29  ;;  %v2019_v40 = vmax.f32 %v1749_v30, 0.0 }
 0x17c   :  { %v3492_v41 = vpack.c.bf16 %v1916_v32, %v1916_v32  ;;  %v1917_v42 = vmax.f32 %v1341_v33, 0.0  ;;  %v3592_v43 = vpack.c.bf16 %v2016_v34, %v2016_v34  ;;  %v2017_v44 = vmax.f32 %v1741_v35, 0.0 }
 0x17d   :  { %2899 = vst.msk [vmem:[%s5468_s3 + $0x118] sm:$0xf] %vm2828_vm3, %v3494_v36  ;;  %v3495_v45 = vpack.c.bf16 %v1919_v37, %v1919_v37  ;;  %2999 = vst.msk [vmem:[%s5468_s3 + $0x2a8] sm:$0xf] %vm2828_vm3, %v3594_v38  ;;  %v3595_v46 = vpack.c.bf16 %v2019_v40, %v2019_v40 }
 0x17e   :  { %2897 = vst.msk [vmem:[%s5468_s3 + $0x110] sm:$0xf] %vm2828_vm3, %v3492_v41  ;;  %v3493_v47 = vpack.c.bf16 %v1917_v42, %v1917_v42  ;;  %2997 = vst.msk [vmem:[%s5468_s3 + $0x2a0] sm:$0xf] %vm2828_vm3, %v3592_v43  ;;  %v3795_v48 = vpop.f32.mrb[72].mxu0  ;;  %v3593_v49 = vpack.c.bf16 %v2017_v44, %v2017_v44  ;;  %v3895_v50 = vpop.f32.mrb[72].mxu1 }
 0x17f   :  { %2900 = vst.msk [vmem:[%s5468_s3 + $0x11c] sm:$0xf] %vm2828_vm3, %v3495_v45  ;;  %3000 = vst.msk [vmem:[%s5468_s3 + $0x2ac] sm:$0xf] %vm2828_vm3, %v3595_v46  ;;  %v1362_v51 = vadd.f32 %v4995_v15, %v3795_v48  ;;  %v1353_v52 = vpop.f32.mrb[73].mxu0  ;;  %v1762_v53 = vadd.f32 %v4995_v15, %v3895_v50  ;;  %v1753_v54 = vpop.f32.mrb[73].mxu1 }
 0x180   :  { %2898 = vst.msk [vmem:[%s5468_s3 + $0x114] sm:$0xf] %vm2828_vm3, %v3493_v47  ;;  %2998 = vst.msk [vmem:[%s5468_s3 + $0x2a4] sm:$0xf] %vm2828_vm3, %v3593_v49  ;;  %v1354_v55 = vadd.f32 %v4995_v15, %v1353_v52  ;;  %v3796_v56 = vpop.f32.mrb[74].mxu0  ;;  %v1754_v57 = vadd.f32 %v4995_v15, %v1753_v54  ;;  %v3896_v58 = vpop.f32.mrb[74].mxu1 }
 0x181   :  { %v1922_v59 = vmax.f32 %v1362_v51, 0.0  ;;  %v1365_v60 = vadd.f32 %v4995_v15, %v3796_v56  ;;  %v1356_v61 = vpop.f32.mrb[75].mxu0  ;;  %v2022_v62 = vmax.f32 %v1762_v53, 0.0  ;;  %v1765_v63 = vadd.f32 %v4995_v15, %v3896_v58  ;;  %v1756_v0 = vpop.f32.mrb[75].mxu1 }
 0x182   :  { %v1920_v1 = vmax.f32 %v1354_v55, 0.0  ;;  %v1357_v2 = vadd.f32 %v4995_v15, %v1356_v61  ;;  %v2020_v3 = vmax.f32 %v1754_v57, 0.0  ;;  %v1757_v4 = vadd.f32 %v4995_v15, %v1756_v0 }
 0x183   :  { %v3498_v5 = vpack.c.bf16 %v1922_v59, %v1922_v59  ;;  %v1923_v6 = vmax.f32 %v1365_v60, 0.0  ;;  %v3598_v7 = vpack.c.bf16 %v2022_v62, %v2022_v62  ;;  %v2023_v8 = vmax.f32 %v1765_v63, 0.0 }
 0x184   :  { %v3496_v9 = vpack.c.bf16 %v1920_v1, %v1920_v1  ;;  %v1921_v10 = vmax.f32 %v1357_v2, 0.0  ;;  %v3596_v39 = vpack.c.bf16 %v2020_v3, %v2020_v3  ;;  %v2021_v11 = vmax.f32 %v1757_v4, 0.0 }
 0x185   :  { %2903 = vst.msk [vmem:[%s5468_s3 + $0x128] sm:$0xf] %vm2828_vm3, %v3498_v5  ;;  %v3499_v12 = vpack.c.bf16 %v1923_v6, %v1923_v6  ;;  %3003 = vst.msk [vmem:[%s5468_s3 + $0x2b8] sm:$0xf] %vm2828_vm3, %v3598_v7  ;;  %v3599_v13 = vpack.c.bf16 %v2023_v8, %v2023_v8 }
 0x186   :  { %2901 = vst.msk [vmem:[%s5468_s3 + $0x120] sm:$0xf] %vm2828_vm3, %v3496_v9  ;;  %v3497_v14 = vpack.c.bf16 %v1921_v10, %v1921_v10  ;;  %3001 = vst.msk [vmem:[%s5468_s3 + $0x2b0] sm:$0xf] %vm2828_vm3, %v3596_v39  ;;  %v3799_v16 = vpop.f32.mrb[76].mxu0  ;;  %v3597_v17 = vpack.c.bf16 %v2021_v11, %v2021_v11  ;;  %v3899_v18 = vpop.f32.mrb[76].mxu1 }
 0x187   :  { %2904 = vst.msk [vmem:[%s5468_s3 + $0x12c] sm:$0xf] %vm2828_vm3, %v3499_v12  ;;  %3004 = vst.msk [vmem:[%s5468_s3 + $0x2bc] sm:$0xf] %vm2828_vm3, %v3599_v13  ;;  %v1378_v19 = vadd.f32 %v4995_v15, %v3799_v16  ;;  %v1369_v20 = vpop.f32.mrb[77].mxu0  ;;  %v1778_v21 = vadd.f32 %v4995_v15, %v3899_v18  ;;  %v1769_v22 = vpop.f32.mrb[77].mxu1 }
 0x188   :  { %2902 = vst.msk [vmem:[%s5468_s3 + $0x124] sm:$0xf] %vm2828_vm3, %v3497_v14  ;;  %3002 = vst.msk [vmem:[%s5468_s3 + $0x2b4] sm:$0xf] %vm2828_vm3, %v3597_v17  ;;  %v1370_v23 = vadd.f32 %v4995_v15, %v1369_v20  ;;  %v3800_v24 = vpop.f32.mrb[78].mxu0  ;;  %v1770_v25 = vadd.f32 %v4995_v15, %v1769_v22  ;;  %v3900_v26 = vpop.f32.mrb[78].mxu1 }
 0x189   :  { %v1926_v27 = vmax.f32 %v1378_v19, 0.0  ;;  %v1381_v28 = vadd.f32 %v4995_v15, %v3800_v24  ;;  %v1372_v29 = vpop.f32.mrb[79].mxu0  ;;  %v2026_v30 = vmax.f32 %v1778_v21, 0.0  ;;  %v1781_v31 = vadd.f32 %v4995_v15, %v3900_v26  ;;  %v1772_v32 = vpop.f32.mrb[79].mxu1 }
 0x18a   :  { %v1924_v33 = vmax.f32 %v1370_v23, 0.0  ;;  %v1373_v34 = vadd.f32 %v4995_v15, %v1372_v29  ;;  %v2024_v35 = vmax.f32 %v1770_v25, 0.0  ;;  %v1773_v36 = vadd.f32 %v4995_v15, %v1772_v32 }
 0x18b   :  { %v3502_v37 = vpack.c.bf16 %v1926_v27, %v1926_v27  ;;  %v1927_v38 = vmax.f32 %v1381_v28, 0.0  ;;  %v3602_v40 = vpack.c.bf16 %v2026_v30, %v2026_v30  ;;  %v2027_v41 = vmax.f32 %v1781_v31, 0.0 }
 0x18c   :  { %v3500_v42 = vpack.c.bf16 %v1924_v33, %v1924_v33  ;;  %v1925_v43 = vmax.f32 %v1373_v34, 0.0  ;;  %v3600_v44 = vpack.c.bf16 %v2024_v35, %v2024_v35  ;;  %v2025_v45 = vmax.f32 %v1773_v36, 0.0 }
 0x18d   :  { %2907 = vst.msk [vmem:[%s5468_s3 + $0x138] sm:$0xf] %vm2828_vm3, %v3502_v37  ;;  %v3503_v46 = vpack.c.bf16 %v1927_v38, %v1927_v38  ;;  %3007 = vst.msk [vmem:[%s5468_s3 + $0x2c8] sm:$0xf] %vm2828_vm3, %v3602_v40  ;;  %v3603_v47 = vpack.c.bf16 %v2027_v41, %v2027_v41 }
 0x18e   :  { %2905 = vst.msk [vmem:[%s5468_s3 + $0x130] sm:$0xf] %vm2828_vm3, %v3500_v42  ;;  %v3501_v48 = vpack.c.bf16 %v1925_v43, %v1925_v43  ;;  %3005 = vst.msk [vmem:[%s5468_s3 + $0x2c0] sm:$0xf] %vm2828_vm3, %v3600_v44  ;;  %v3803_v49 = vpop.f32.mrb[80].mxu0  ;;  %v3601_v50 = vpack.c.bf16 %v2025_v45, %v2025_v45  ;;  %v3903_v51 = vpop.f32.mrb[80].mxu1 }
 0x18f   :  { %2908 = vst.msk [vmem:[%s5468_s3 + $0x13c] sm:$0xf] %vm2828_vm3, %v3503_v46  ;;  %3008 = vst.msk [vmem:[%s5468_s3 + $0x2cc] sm:$0xf] %vm2828_vm3, %v3603_v47  ;;  %v1394_v52 = vadd.f32 %v4995_v15, %v3803_v49  ;;  %v1385_v53 = vpop.f32.mrb[81].mxu0  ;;  %v1794_v54 = vadd.f32 %v4995_v15, %v3903_v51  ;;  %v1785_v55 = vpop.f32.mrb[81].mxu1 }
 0x190   :  { %2906 = vst.msk [vmem:[%s5468_s3 + $0x134] sm:$0xf] %vm2828_vm3, %v3501_v48  ;;  %3006 = vst.msk [vmem:[%s5468_s3 + $0x2c4] sm:$0xf] %vm2828_vm3, %v3601_v50  ;;  %v1386_v56 = vadd.f32 %v4995_v15, %v1385_v53  ;;  %v3804_v57 = vpop.f32.mrb[82].mxu0  ;;  %v1786_v58 = vadd.f32 %v4995_v15, %v1785_v55  ;;  %v3904_v59 = vpop.f32.mrb[82].mxu1 }
 0x191   :  { %v1930_v60 = vmax.f32 %v1394_v52, 0.0  ;;  %v1397_v61 = vadd.f32 %v4995_v15, %v3804_v57  ;;  %v1388_v62 = vpop.f32.mrb[83].mxu0  ;;  %v2030_v63 = vmax.f32 %v1794_v54, 0.0  ;;  %v1797_v0 = vadd.f32 %v4995_v15, %v3904_v59  ;;  %v1788_v1 = vpop.f32.mrb[83].mxu1 }
 0x192   :  { %v1928_v2 = vmax.f32 %v1386_v56, 0.0  ;;  %v1389_v3 = vadd.f32 %v4995_v15, %v1388_v62  ;;  %v2028_v4 = vmax.f32 %v1786_v58, 0.0  ;;  %v1789_v5 = vadd.f32 %v4995_v15, %v1788_v1 }
 0x193   :  { %v3506_v6 = vpack.c.bf16 %v1930_v60, %v1930_v60  ;;  %v1931_v7 = vmax.f32 %v1397_v61, 0.0  ;;  %v3606_v8 = vpack.c.bf16 %v2030_v63, %v2030_v63  ;;  %v2031_v9 = vmax.f32 %v1797_v0, 0.0 }
 0x194   :  { %v3504_v10 = vpack.c.bf16 %v1928_v2, %v1928_v2  ;;  %v1929_v39 = vmax.f32 %v1389_v3, 0.0  ;;  %v3604_v11 = vpack.c.bf16 %v2028_v4, %v2028_v4  ;;  %v2029_v12 = vmax.f32 %v1789_v5, 0.0 }
 0x195   :  { %2911 = vst.msk [vmem:[%s5468_s3 + $0x148] sm:$0xf] %vm2828_vm3, %v3506_v6  ;;  %v3507_v13 = vpack.c.bf16 %v1931_v7, %v1931_v7  ;;  %3011 = vst.msk [vmem:[%s5468_s3 + $0x2d8] sm:$0xf] %vm2828_vm3, %v3606_v8  ;;  %v3607_v14 = vpack.c.bf16 %v2031_v9, %v2031_v9 }
 0x196   :  { %2909 = vst.msk [vmem:[%s5468_s3 + $0x140] sm:$0xf] %vm2828_vm3, %v3504_v10  ;;  %v3505_v16 = vpack.c.bf16 %v1929_v39, %v1929_v39  ;;  %3009 = vst.msk [vmem:[%s5468_s3 + $0x2d0] sm:$0xf] %vm2828_vm3, %v3604_v11  ;;  %v3807_v17 = vpop.f32.mrb[84].mxu0  ;;  %v3605_v18 = vpack.c.bf16 %v2029_v12, %v2029_v12  ;;  %v3907_v19 = vpop.f32.mrb[84].mxu1 }
 0x197   :  { %2912 = vst.msk [vmem:[%s5468_s3 + $0x14c] sm:$0xf] %vm2828_vm3, %v3507_v13  ;;  %3012 = vst.msk [vmem:[%s5468_s3 + $0x2dc] sm:$0xf] %vm2828_vm3, %v3607_v14  ;;  %v1410_v20 = vadd.f32 %v4995_v15, %v3807_v17  ;;  %v1401_v21 = vpop.f32.mrb[85].mxu0  ;;  %v1810_v22 = vadd.f32 %v4995_v15, %v3907_v19  ;;  %v1801_v23 = vpop.f32.mrb[85].mxu1 }
 0x198   :  { %2910 = vst.msk [vmem:[%s5468_s3 + $0x144] sm:$0xf] %vm2828_vm3, %v3505_v16  ;;  %3010 = vst.msk [vmem:[%s5468_s3 + $0x2d4] sm:$0xf] %vm2828_vm3, %v3605_v18  ;;  %v1402_v24 = vadd.f32 %v4995_v15, %v1401_v21  ;;  %v3808_v25 = vpop.f32.mrb[86].mxu0  ;;  %v1802_v26 = vadd.f32 %v4995_v15, %v1801_v23  ;;  %v3908_v27 = vpop.f32.mrb[86].mxu1 }
 0x199   :  { %v1934_v28 = vmax.f32 %v1410_v20, 0.0  ;;  %v1413_v29 = vadd.f32 %v4995_v15, %v3808_v25  ;;  %v1404_v30 = vpop.f32.mrb[87].mxu0  ;;  %v2034_v31 = vmax.f32 %v1810_v22, 0.0  ;;  %v1813_v32 = vadd.f32 %v4995_v15, %v3908_v27  ;;  %v1804_v33 = vpop.f32.mrb[87].mxu1 }
 0x19a   :  { %v1932_v34 = vmax.f32 %v1402_v24, 0.0  ;;  %v1405_v35 = vadd.f32 %v4995_v15, %v1404_v30  ;;  %v2032_v36 = vmax.f32 %v1802_v26, 0.0  ;;  %v1805_v37 = vadd.f32 %v4995_v15, %v1804_v33 }
 0x19b   :  { %v3510_v38 = vpack.c.bf16 %v1934_v28, %v1934_v28  ;;  %v1935_v40 = vmax.f32 %v1413_v29, 0.0  ;;  %v3610_v41 = vpack.c.bf16 %v2034_v31, %v2034_v31  ;;  %v2035_v42 = vmax.f32 %v1813_v32, 0.0 }
 0x19c   :  { %v3508_v43 = vpack.c.bf16 %v1932_v34, %v1932_v34  ;;  %v1933_v44 = vmax.f32 %v1405_v35, 0.0  ;;  %v3608_v45 = vpack.c.bf16 %v2032_v36, %v2032_v36  ;;  %v2033_v46 = vmax.f32 %v1805_v37, 0.0 }
 0x19d   :  { %2915 = vst.msk [vmem:[%s5468_s3 + $0x158] sm:$0xf] %vm2828_vm3, %v3510_v38  ;;  %v3511_v47 = vpack.c.bf16 %v1935_v40, %v1935_v40  ;;  %3015 = vst.msk [vmem:[%s5468_s3 + $0x2e8] sm:$0xf] %vm2828_vm3, %v3610_v41  ;;  %v3611_v48 = vpack.c.bf16 %v2035_v42, %v2035_v42 }
 0x19e   :  { %2913 = vst.msk [vmem:[%s5468_s3 + $0x150] sm:$0xf] %vm2828_vm3, %v3508_v43  ;;  %v3509_v49 = vpack.c.bf16 %v1933_v44, %v1933_v44  ;;  %3013 = vst.msk [vmem:[%s5468_s3 + $0x2e0] sm:$0xf] %vm2828_vm3, %v3608_v45  ;;  %v3811_v50 = vpop.f32.mrb[88].mxu0  ;;  %v3609_v51 = vpack.c.bf16 %v2033_v46, %v2033_v46  ;;  %v3911_v52 = vpop.f32.mrb[88].mxu1 }
 0x19f   :  { %2916 = vst.msk [vmem:[%s5468_s3 + $0x15c] sm:$0xf] %vm2828_vm3, %v3511_v47  ;;  %3016 = vst.msk [vmem:[%s5468_s3 + $0x2ec] sm:$0xf] %vm2828_vm3, %v3611_v48  ;;  %v1426_v53 = vadd.f32 %v4995_v15, %v3811_v50  ;;  %v1417_v54 = vpop.f32.mrb[89].mxu0  ;;  %v1826_v55 = vadd.f32 %v4995_v15, %v3911_v52  ;;  %v1817_v56 = vpop.f32.mrb[89].mxu1 }
 0x1a0   :  { %2914 = vst.msk [vmem:[%s5468_s3 + $0x154] sm:$0xf] %vm2828_vm3, %v3509_v49  ;;  %3014 = vst.msk [vmem:[%s5468_s3 + $0x2e4] sm:$0xf] %vm2828_vm3, %v3609_v51  ;;  %v1418_v57 = vadd.f32 %v4995_v15, %v1417_v54  ;;  %v3812_v58 = vpop.f32.mrb[90].mxu0  ;;  %v1818_v59 = vadd.f32 %v4995_v15, %v1817_v56  ;;  %v3912_v60 = vpop.f32.mrb[90].mxu1 }
 0x1a1   :  { %v1938_v61 = vmax.f32 %v1426_v53, 0.0  ;;  %v1429_v62 = vadd.f32 %v4995_v15, %v3812_v58  ;;  %v1420_v63 = vpop.f32.mrb[91].mxu0  ;;  %v2038_v0 = vmax.f32 %v1826_v55, 0.0  ;;  %v1829_v1 = vadd.f32 %v4995_v15, %v3912_v60  ;;  %v1820_v2 = vpop.f32.mrb[91].mxu1 }
 0x1a2   :  { %v1936_v3 = vmax.f32 %v1418_v57, 0.0  ;;  %v1421_v4 = vadd.f32 %v4995_v15, %v1420_v63  ;;  %v2036_v5 = vmax.f32 %v1818_v59, 0.0  ;;  %v1821_v6 = vadd.f32 %v4995_v15, %v1820_v2 }
 0x1a3   :  { %v3514_v7 = vpack.c.bf16 %v1938_v61, %v1938_v61  ;;  %v1939_v8 = vmax.f32 %v1429_v62, 0.0  ;;  %v3614_v9 = vpack.c.bf16 %v2038_v0, %v2038_v0  ;;  %v2039_v10 = vmax.f32 %v1829_v1, 0.0 }
 0x1a4   :  { %v3512_v39 = vpack.c.bf16 %v1936_v3, %v1936_v3  ;;  %v1937_v11 = vmax.f32 %v1421_v4, 0.0  ;;  %v3612_v12 = vpack.c.bf16 %v2036_v5, %v2036_v5  ;;  %v2037_v13 = vmax.f32 %v1821_v6, 0.0 }
 0x1a5   :  { %2919 = vst.msk [vmem:[%s5468_s3 + $0x168] sm:$0xf] %vm2828_vm3, %v3514_v7  ;;  %v3515_v14 = vpack.c.bf16 %v1939_v8, %v1939_v8  ;;  %3019 = vst.msk [vmem:[%s5468_s3 + $0x2f8] sm:$0xf] %vm2828_vm3, %v3614_v9  ;;  %v3615_v16 = vpack.c.bf16 %v2039_v10, %v2039_v10 }
 0x1a6   :  { %2917 = vst.msk [vmem:[%s5468_s3 + $0x160] sm:$0xf] %vm2828_vm3, %v3512_v39  ;;  %v3513_v17 = vpack.c.bf16 %v1937_v11, %v1937_v11  ;;  %3017 = vst.msk [vmem:[%s5468_s3 + $0x2f0] sm:$0xf] %vm2828_vm3, %v3612_v12  ;;  %v3815_v18 = vpop.f32.mrb[92].mxu0  ;;  %v3613_v19 = vpack.c.bf16 %v2037_v13, %v2037_v13  ;;  %v3915_v20 = vpop.f32.mrb[92].mxu1 }
 0x1a7   :  { %2920 = vst.msk [vmem:[%s5468_s3 + $0x16c] sm:$0xf] %vm2828_vm3, %v3515_v14  ;;  %3020 = vst.msk [vmem:[%s5468_s3 + $0x2fc] sm:$0xf] %vm2828_vm3, %v3615_v16  ;;  %v1442_v21 = vadd.f32 %v4995_v15, %v3815_v18  ;;  %v1433_v22 = vpop.f32.mrb[93].mxu0  ;;  %v1842_v23 = vadd.f32 %v4995_v15, %v3915_v20  ;;  %v1833_v24 = vpop.f32.mrb[93].mxu1 }
 0x1a8   :  { %2918 = vst.msk [vmem:[%s5468_s3 + $0x164] sm:$0xf] %vm2828_vm3, %v3513_v17  ;;  %3018 = vst.msk [vmem:[%s5468_s3 + $0x2f4] sm:$0xf] %vm2828_vm3, %v3613_v19  ;;  %v1434_v25 = vadd.f32 %v4995_v15, %v1433_v22  ;;  %v3816_v26 = vpop.f32.mrb[94].mxu0  ;;  %v1834_v27 = vadd.f32 %v4995_v15, %v1833_v24  ;;  %v3916_v28 = vpop.f32.mrb[94].mxu1 }
 0x1a9   :  { %v1942_v29 = vmax.f32 %v1442_v21, 0.0  ;;  %v1445_v30 = vadd.f32 %v4995_v15, %v3816_v26  ;;  %v1436_v31 = vpop.f32.mrb[95].mxu0  ;;  %v2042_v32 = vmax.f32 %v1842_v23, 0.0  ;;  %v1845_v33 = vadd.f32 %v4995_v15, %v3916_v28  ;;  %v1836_v34 = vpop.f32.mrb[95].mxu1 }
 0x1aa   :  { %v1940_v35 = vmax.f32 %v1434_v25, 0.0  ;;  %v1437_v36 = vadd.f32 %v4995_v15, %v1436_v31  ;;  %v2040_v37 = vmax.f32 %v1834_v27, 0.0  ;;  %v1837_v38 = vadd.f32 %v4995_v15, %v1836_v34 }
 0x1ab   :  { %v3518_v40 = vpack.c.bf16 %v1942_v29, %v1942_v29  ;;  %v1943_v41 = vmax.f32 %v1445_v30, 0.0  ;;  %v3618_v42 = vpack.c.bf16 %v2042_v32, %v2042_v32  ;;  %v2043_v43 = vmax.f32 %v1845_v33, 0.0 }
 0x1ac   :  { %v3516_v44 = vpack.c.bf16 %v1940_v35, %v1940_v35  ;;  %v1941_v45 = vmax.f32 %v1437_v36, 0.0  ;;  %v3616_v46 = vpack.c.bf16 %v2040_v37, %v2040_v37  ;;  %v2041_v47 = vmax.f32 %v1837_v38, 0.0 }
 0x1ad   :  { %2923 = vst.msk [vmem:[%s5468_s3 + $0x178] sm:$0xf] %vm2828_vm3, %v3518_v40  ;;  %v3519_v48 = vpack.c.bf16 %v1943_v41, %v1943_v41  ;;  %3023 = vst.msk [vmem:[%s5468_s3 + $0x308] sm:$0xf] %vm2828_vm3, %v3618_v42  ;;  %v3619_v49 = vpack.c.bf16 %v2043_v43, %v2043_v43 }
 0x1ae   :  { %2921 = vst.msk [vmem:[%s5468_s3 + $0x170] sm:$0xf] %vm2828_vm3, %v3516_v44  ;;  %v3517_v50 = vpack.c.bf16 %v1941_v45, %v1941_v45  ;;  %3021 = vst.msk [vmem:[%s5468_s3 + $0x300] sm:$0xf] %vm2828_vm3, %v3616_v46  ;;  %v3819_v51 = vpop.f32.mrb[96].mxu0  ;;  %v3617_v52 = vpack.c.bf16 %v2041_v47, %v2041_v47 }
 0x1af   :  { %2924 = vst.msk [vmem:[%s5468_s3 + $0x17c] sm:$0xf] %vm2828_vm3, %v3519_v48  ;;  %3024 = vst.msk [vmem:[%s5468_s3 + $0x30c] sm:$0xf] %vm2828_vm3, %v3619_v49  ;;  %v1458_v53 = vadd.f32 %v4995_v15, %v3819_v51  ;;  %v1449_v54 = vpop.f32.mrb[97].mxu0 }
 0x1b0   :  { %2922 = vst.msk [vmem:[%s5468_s3 + $0x174] sm:$0xf] %vm2828_vm3, %v3517_v50  ;;  %3022 = vst.msk [vmem:[%s5468_s3 + $0x304] sm:$0xf] %vm2828_vm3, %v3617_v52  ;;  %v1450_v55 = vadd.f32 %v4995_v15, %v1449_v54  ;;  %v3820_v56 = vpop.f32.mrb[98].mxu0 }
 0x1b1   :  { %v1946_v57 = vmax.f32 %v1458_v53, 0.0  ;;  %v1461_v58 = vadd.f32 %v4995_v15, %v3820_v56  ;;  %v1452_v59 = vpop.f32.mrb[99].mxu0 }
 0x1b2   :  { %v1944_v60 = vmax.f32 %v1450_v55, 0.0  ;;  %v1453_v61 = vadd.f32 %v4995_v15, %v1452_v59 }
 0x1b3   :  { %v3522_v62 = vpack.c.bf16 %v1946_v57, %v1946_v57  ;;  %v1947_v63 = vmax.f32 %v1461_v58, 0.0 }
 0x1b4   :  { %v3520_v0 = vpack.c.bf16 %v1944_v60, %v1944_v60  ;;  %v1945_v1 = vmax.f32 %v1453_v61, 0.0 }
 0x1b5   :  { %2927 = vst.msk [vmem:[%s5468_s3 + $0x188] sm:$0xf] %vm2828_vm3, %v3522_v62  ;;  %v3523_v2 = vpack.c.bf16 %v1947_v63, %v1947_v63 }
 0x1b6   :  { %2925 = vst.msk [vmem:[%s5468_s3 + $0x180] sm:$0xf] %vm2828_vm3, %v3520_v0  ;;  %v3521_v3 = vpack.c.bf16 %v1945_v1, %v1945_v1 }
 0x1b7   :  { %2928 = vst.msk [vmem:[%s5468_s3 + $0x18c] sm:$0xf] %vm2828_vm3, %v3523_v2 }
 0x1b8   :  { %2926 = vst.msk [vmem:[%s5468_s3 + $0x184] sm:$0xf] %vm2828_vm3, %v3521_v3 }
 0x1b9   :  { %3029 = vsyncpa [#allocation3], 1 }

// kernel: vae_forward.9
= control target key start
LH: loop header
LB: loop body
LE: loop exit
PB: predicated region body
PF: predicated region fallthrough
CT: control target
= control target key end

     0   :  { %v2040_v0 = vmov 0   ;;  %v2041_v2 = vmov 0.0   ;;  %vm2042_vm0 = vmmov 0   ;;  %vm634_vm1 = vcmask 261120   ;;  %s2814_s1 = inlined_call_operand.vmem [shape: bf16[288,64], index: 1, kind: input, shape index: {}]   ;;  %s2815_s0 = inlined_call_operand.vmem [shape: bf16[392,288], index: 0, kind: input, shape index: {}]   ;;  %s2816_s2 = inlined_call_operand.vmem [shape: f32[1,64], index: 2, kind: input, shape index: {}]   ;;  %s2817_s3 = inlined_call_operand.vmem [shape: bf16[392,64], index: 3, kind: output, shape index: {}]  }
   0x1   :  { %710 = vmatprep.subr.bf16.mxu1 %v2040_v0  ;;  %v1923_v1 = vld [vmem:[%s2814_s1] sm:$0xff]   ;;  %1718 = vmatprep.subr.bf16.mxu0 %v2041_v2  ;;  %v1924_v3 = vld [vmem:[%s2814_s1 + $0x8] sm:$0xff]   ;;  %v1925_v4 = vld [vmem:[%s2814_s1 + $0x10] sm:$0xff]   ;;  %vm1420_vm2 = vcmask 519168  }
   0x2   :  { %1722 = vmatprep.mubr.msk.bf16.mxu0 %vm2042_vm0, %v2041_v2  ;;  %711 = vmatpush1.bf16.msra.mxu1 %v1923_v1  ;;  %v1926_v5 = vld [vmem:[%s2814_s1 + $0x18] sm:$0xff]   ;;  %v1927_v6 = vld [vmem:[%s2814_s1 + $0x20] sm:$0xff]   ;;  %v1939_v8 = vld [vmem:[%s2814_s1 + $0x88] sm:$0xff]  }
   0x3   :  { %712 = vmatprep.subr.bf16.mxu1 %v2040_v0  ;;  %v1937_v7 = vld [vmem:[%s2814_s1 + $0x80] sm:$0xff]   ;;  %v1928_v9 = vld [vmem:[%s2814_s1 + $0x28] sm:$0xff]   ;;  %v1929_v12 = vld [vmem:[%s2814_s1 + $0x30] sm:$0xff]  }
   0x4   :  { %1719 = vmatpush3.bf16.msra.mxu0 %v1937_v7  ;;  %v1943_v10 = vld [vmem:[%s2815_s0 + $0x4] ss:$12 sps:$4 sm:$0xff]   ;;  %v1944_v11 = vld [vmem:[%s2815_s0 + $0x8] ss:$12 sps:$4 sm:$0xff]   ;;  %v1930_v13 = vld [vmem:[%s2814_s1 + $0x38] sm:$0xff]  }
   0x5   :  { %1720 = vmatprep.subr.bf16.mxu0 %v2041_v2  ;;  %742 = vmatprep.mubr.bf16.mxu1 %v1943_v10  ;;  %v1947_v14 = vld [vmem:[%s2815_s0 + $0x20] ss:$12 sps:$4 sm:$0xff]   ;;  %v1951_v17 = vld [vmem:[%s2815_s0 + $0x38] ss:$12 sps:$4 sm:$0xff]   ;;  %v1933_v18 = vld [vmem:[%s2814_s1 + $0x50] sm:$0xff]  }
   0x6   :  { %713 = vmatpush1.bf16.msra.mxu1 %v1924_v3  ;;  %v1931_v15 = vld [vmem:[%s2814_s1 + $0x40] sm:$0xff]   ;;  %v1932_v16 = vld [vmem:[%s2814_s1 + $0x48] sm:$0xff]   ;;  %v1934_v19 = vld [vmem:[%s2814_s1 + $0x58] sm:$0xff]  }
   0x7   :  { %714 = vmatprep.subr.bf16.mxu1 %v2040_v0  ;;  %v1955_v20 = vld [vmem:[%s2815_s0 + $0x50] ss:$12 sps:$4 sm:$0xff]   ;;  %v1935_v21 = vld [vmem:[%s2814_s1 + $0x60] sm:$0xff]   ;;  %v1936_v22 = vld [vmem:[%s2814_s1 + $0x68] sm:$0xff]  }
   0x8   :  { %1721 = vmatpush3.bf16.msra.mxu0 %v1939_v8  ;;  %v1959_v23 = vld [vmem:[%s2815_s0 + $0x68] ss:$12 sps:$4 sm:$0xff]   ;;  %v1940_v25 = vld [vmem:[%s2814_s1 + $0x78] sm:$0xff]   ;;  %v1963_v26 = vld [vmem:[%s2815_s0 + $0x80] ss:$12 sps:$4 sm:$0xff]  }
   0x9   :  { %v1938_v24 = vld [vmem:[%s2814_s1 + $0x70] sm:$0xff]   ;;  %v1941_v27 = vld [vmem:[%s2815_s0] ss:$12 sps:$4 sm:$0xff]   ;;  %v1945_v28 = vld [vmem:[%s2815_s0 + $0x1c] ss:$12 sps:$4 sm:$0xff]  }
   0xa   :  { %715 = vmatpush1.bf16.msra.mxu1 %v1925_v4  ;;  %v1967_v29 = vld [vmem:[%s2815_s0 + $0x98] ss:$12 sps:$4 sm:$0xff]   ;;  %v1949_v31 = vld [vmem:[%s2815_s0 + $0x34] ss:$12 sps:$4 sm:$0xff]   ;;  %v1971_v32 = vld [vmem:[%s2815_s0 + $0xb0] ss:$12 sps:$4 sm:$0xff]  }
   0xb   :  { %716 = vmatprep.subr.bf16.mxu1 %v2040_v0  ;;  %1723 = vmatmul.mubr.msk.bf16.vlgmr.msra.gmra.mrb[0].mxu0 %vm634_vm1, %v1944_v11  ;;  %v1948_v30 = vld [vmem:[%s2815_s0 + $0x18] ss:$12 sps:$4 sm:$0xff]   ;;  %v1952_v33 = vld [vmem:[%s2815_s0 + $0x30] ss:$12 sps:$4 sm:$0xff]   ;;  %v1975_v35 = vld [vmem:[%s2815_s0 + $0xc8] ss:$12 sps:$4 sm:$0xff]  }
   0xc   :  { %1726 = vmatprep.mubr.msk.bf16.mxu0 %vm2042_vm0, %v2041_v2  ;;  %v1953_v34 = vld [vmem:[%s2815_s0 + $0x4c] ss:$12 sps:$4 sm:$0xff]   ;;  %v1956_v36 = vld [vmem:[%s2815_s0 + $0x48] ss:$12 sps:$4 sm:$0xff]   ;;  %v1957_v37 = vld [vmem:[%s2815_s0 + $0x64] ss:$12 sps:$4 sm:$0xff]  }
   0xd   :  { %v1979_v38 = vld [vmem:[%s2815_s0 + $0xe0] ss:$12 sps:$4 sm:$0xff]   ;;  %v1961_v40 = vld [vmem:[%s2815_s0 + $0x7c] ss:$12 sps:$4 sm:$0xff]   ;;  %v1983_v41 = vld [vmem:[%s2815_s0 + $0xf8] ss:$12 sps:$4 sm:$0xff]  }
   0xe   :  { %717 = vmatpush1.bf16.msra.mxu1 %v1926_v5  ;;  %v1960_v39 = vld [vmem:[%s2815_s0 + $0x60] ss:$12 sps:$4 sm:$0xff]   ;;  %v1964_v42 = vld [vmem:[%s2815_s0 + $0x78] ss:$12 sps:$4 sm:$0xff]   ;;  %v1987_v44 = vld [vmem:[%s2815_s0 + $0x110] ss:$12 sps:$4 sm:$0xff]  }
   0xf   :  { %718 = vmatprep.subr.bf16.mxu1 %v2040_v0  ;;  %v1965_v43 = vld [vmem:[%s2815_s0 + $0x94] ss:$12 sps:$4 sm:$0xff]   ;;  %v1968_v45 = vld [vmem:[%s2815_s0 + $0x90] ss:$12 sps:$4 sm:$0xff]   ;;  %v1969_v46 = vld [vmem:[%s2815_s0 + $0xac] ss:$12 sps:$4 sm:$0xff]  }
  0x10   :  { %v1991_v47 = vld [vmem:[%s2815_s0 + $0x128] ss:$12 sps:$4 sm:$0xff]   ;;  %v1973_v49 = vld [vmem:[%s2815_s0 + $0xc4] ss:$12 sps:$4 sm:$0xff]   ;;  %v1995_v50 = vld [vmem:[%s2815_s0 + $0x140] ss:$12 sps:$4 sm:$0xff]  }
  0x11   :  { %v1972_v48 = vld [vmem:[%s2815_s0 + $0xa8] ss:$12 sps:$4 sm:$0xff]   ;;  %v1976_v51 = vld [vmem:[%s2815_s0 + $0xc0] ss:$12 sps:$4 sm:$0xff]   ;;  %v1999_v53 = vld [vmem:[%s2815_s0 + $0x158] ss:$12 sps:$4 sm:$0xff]  }
  0x12   :  { %719 = vmatpush1.bf16.msra.mxu1 %v1927_v6  ;;  %v1977_v52 = vld [vmem:[%s2815_s0 + $0xdc] ss:$12 sps:$4 sm:$0xff]   ;;  %v1980_v54 = vld [vmem:[%s2815_s0 + $0xd8] ss:$12 sps:$4 sm:$0xff]   ;;  %v1981_v55 = vld [vmem:[%s2815_s0 + $0xf4] ss:$12 sps:$4 sm:$0xff]  }
  0x13   :  { %720 = vmatprep.subr.bf16.mxu1 %v2040_v0  ;;  %1727 = vmatmul.mubr.msk.bf16.gmra.mrb[4].mxu0 %vm634_vm1, %v1947_v14  ;;  %v2003_v56 = vld [vmem:[%s2815_s0 + $0x170] ss:$12 sps:$4 sm:$0xff]   ;;  %v1985_v58 = vld [vmem:[%s2815_s0 + $0x10c] ss:$12 sps:$4 sm:$0xff]   ;;  %v2007_v59 = vld [vmem:[%s2815_s0 + $0x188] ss:$12 sps:$4 sm:$0xff]  }
  0x14   :  { %1730 = vmatprep.mubr.msk.bf16.mxu0 %vm2042_vm0, %v2041_v2  ;;  %v1984_v57 = vld [vmem:[%s2815_s0 + $0xf0] ss:$12 sps:$4 sm:$0xff]   ;;  %v1988_v60 = vld [vmem:[%s2815_s0 + $0x108] ss:$12 sps:$4 sm:$0xff]   ;;  %v2011_v62 = vld [vmem:[%s2815_s0 + $0x1a0] ss:$12 sps:$4 sm:$0xff]  }
  0x15   :  { %v1989_v61 = vld [vmem:[%s2815_s0 + $0x124] ss:$12 sps:$4 sm:$0xff]   ;;  %v1992_v63 = vld [vmem:[%s2815_s0 + $0x120] ss:$12 sps:$4 sm:$0xff]   ;;  %v2023_v8 = vld [vmem:[%s2815_s0 + $0x1e8] ss:$12 sps:$4 sm:$0xff]  }
  0x16   :  { %721 = vmatpush1.bf16.msra.mxu1 %v1928_v9  ;;  %v2015_v1 = vld [vmem:[%s2815_s0 + $0x1b8] ss:$12 sps:$4 sm:$0xff]   ;;  %v1997_v4 = vld [vmem:[%s2815_s0 + $0x154] ss:$12 sps:$4 sm:$0xff]   ;;  %v2019_v5 = vld [vmem:[%s2815_s0 + $0x1d0] ss:$12 sps:$4 sm:$0xff]  }
  0x17   :  { %722 = vmatprep.subr.bf16.mxu1 %v2040_v0  ;;  %v1996_v3 = vld [vmem:[%s2815_s0 + $0x138] ss:$12 sps:$4 sm:$0xff]   ;;  %v2000_v6 = vld [vmem:[%s2815_s0 + $0x150] ss:$12 sps:$4 sm:$0xff]   ;;  %v2004_v9 = vld [vmem:[%s2815_s0 + $0x168] ss:$12 sps:$4 sm:$0xff]  }
  0x18   :  { %v2001_v7 = vld [vmem:[%s2815_s0 + $0x16c] ss:$12 sps:$4 sm:$0xff]   ;;  %v2005_v10 = vld [vmem:[%s2815_s0 + $0x184] ss:$12 sps:$4 sm:$0xff]  }
  0x19   :  { %v2027_v11 = vld [vmem:[%s2815_s0 + $0x200] ss:$12 sps:$4 sm:$0xff]   ;;  %v2031_v14 = vld [vmem:[%s2815_s0 + $0x218] ss:$12 sps:$4 sm:$0xff]  }
  0x1a   :  { %723 = vmatpush1.bf16.msra.mxu1 %v1929_v12  ;;  %v2008_v12 = vld [vmem:[%s2815_s0 + $0x180] ss:$12 sps:$4 sm:$0xff]  }
  0x1b   :  { %724 = vmatprep.subr.bf16.mxu1 %v2040_v0  ;;  %1731 = vmatmul.mubr.msk.bf16.gmra.mrb[8].mxu0 %vm634_vm1, %v1951_v17  ;;  %v2035_v17 = vld [vmem:[%s2815_s0 + $0x230] ss:$12 sps:$4 sm:$0xff]  }
  0x1c   :  { %1734 = vmatprep.mubr.msk.bf16.mxu0 %vm2042_vm0, %v2041_v2 }
  0x1e   :  { %725 = vmatpush1.bf16.msra.mxu1 %v1930_v13  ;;  %v2009_v13 = vld [vmem:[%s2815_s0 + $0x19c] ss:$12 sps:$4 sm:$0xff]  }
  0x1f   :  { %726 = vmatprep.subr.bf16.mxu1 %v2040_v0 }
  0x22   :  { %727 = vmatpush1.bf16.msra.mxu1 %v1931_v15  ;;  %v2012_v15 = vld [vmem:[%s2815_s0 + $0x198] ss:$12 sps:$4 sm:$0xff]  }
  0x23   :  { %728 = vmatprep.subr.bf16.mxu1 %v2040_v0  ;;  %1735 = vmatmul.mubr.msk.bf16.gmra.mrb[12].mxu0 %vm634_vm1, %v1955_v20  ;;  %v2038_v20 = vld [vmem:[%s2815_s0 + $0x248] ss:$0 sps:$4 sm:$0xff]  }
  0x24   :  { %1738 = vmatprep.mubr.msk.bf16.mxu0 %vm2042_vm0, %v2041_v2 }
  0x26   :  { %729 = vmatpush1.bf16.msra.mxu1 %v1932_v16  ;;  %v2013_v16 = vld [vmem:[%s2815_s0 + $0x1b4] ss:$12 sps:$4 sm:$0xff]  }
  0x27   :  { %730 = vmatprep.subr.bf16.mxu1 %v2040_v0 }
  0x2a   :  { %731 = vmatpush1.bf16.msra.mxu1 %v1933_v18  ;;  %v2016_v18 = vld [vmem:[%s2815_s0 + $0x1b0] ss:$12 sps:$4 sm:$0xff]  }
  0x2b   :  { %732 = vmatprep.subr.bf16.mxu1 %v2040_v0  ;;  %1739 = vmatmul.mubr.msk.bf16.gmra.mrb[16].mxu0 %vm634_vm1, %v1959_v23  ;;  %v2025_v23 = vld [vmem:[%s2815_s0 + $0x1fc] ss:$12 sps:$4 sm:$0xff]  }
  0x2c   :  { %1742 = vmatprep.mubr.msk.bf16.mxu0 %vm2042_vm0, %v2041_v2 }
  0x2e   :  { %733 = vmatpush1.bf16.msra.mxu1 %v1934_v19  ;;  %v2017_v19 = vld [vmem:[%s2815_s0 + $0x1cc] ss:$12 sps:$4 sm:$0xff]  }
  0x2f   :  { %734 = vmatprep.subr.bf16.mxu1 %v2040_v0 }
  0x32   :  { %735 = vmatpush1.bf16.msra.mxu1 %v1935_v21  ;;  %v2020_v21 = vld [vmem:[%s2815_s0 + $0x1c8] ss:$12 sps:$4 sm:$0xff]  }
  0x33   :  { %736 = vmatprep.subr.bf16.mxu1 %v2040_v0  ;;  %1743 = vmatmul.mubr.msk.bf16.gmra.mrb[20].mxu0 %vm634_vm1, %v1963_v26 }
  0x34   :  { %1746 = vmatprep.mubr.msk.bf16.mxu0 %vm2042_vm0, %v2041_v2 }
  0x36   :  { %737 = vmatpush1.bf16.msra.mxu1 %v1936_v22  ;;  %v2021_v22 = vld [vmem:[%s2815_s0 + $0x1e4] ss:$12 sps:$4 sm:$0xff]  }
  0x37   :  { %738 = vmatprep.subr.bf16.mxu1 %v2040_v0 }
  0x3a   :  { %739 = vmatpush1.bf16.msra.mxu1 %v1938_v24  ;;  %v2028_v24 = vld [vmem:[%s2815_s0 + $0x1f8] ss:$12 sps:$4 sm:$0xff]  }
  0x3b   :  { %740 = vmatprep.subr.bf16.mxu1 %v2040_v0  ;;  %1747 = vmatmul.mubr.msk.bf16.gmra.mrb[24].mxu0 %vm634_vm1, %v1967_v29  ;;  %v1993_v0 = vld [vmem:[%s2815_s0 + $0x13c] ss:$12 sps:$4 sm:$0xff]  }
  0x3c   :  { %1750 = vmatprep.mubr.msk.bf16.mxu0 %vm2042_vm0, %v2041_v2  ;;  %v2032_v29 = vld [vmem:[%s2815_s0 + $0x210] ss:$12 sps:$4 sm:$0xff]  }
  0x3e   :  { %741 = vmatpush1.bf16.msra.mxu1 %v1940_v25  ;;  %v2029_v25 = vld [vmem:[%s2815_s0 + $0x214] ss:$12 sps:$4 sm:$0xff]  }
  0x41   :  { %743 = vmatmul.mubr.bf16.vlgmr.msra.gmra.mrb[0].mxu1 %v1941_v27 }
  0x42   :  { %750 = vmatprep.mubr.bf16.mxu1 %v1945_v28 }
  0x43   :  { %1751 = vmatmul.mubr.msk.bf16.gmra.mrb[28].mxu0 %vm634_vm1, %v1971_v32 }
  0x44   :  { %1754 = vmatprep.mubr.msk.bf16.mxu0 %vm2042_vm0, %v2041_v2 }
  0x49   :  { %751 = vmatmul.mubr.bf16.gmra.mrb[4].mxu1 %v1948_v30 }
  0x4a   :  { %758 = vmatprep.mubr.bf16.mxu1 %v1949_v31  ;;  %v2033_v31 = vld [vmem:[%s2815_s0 + $0x22c] ss:$12 sps:$4 sm:$0xff]  }
  0x4b   :  { %1755 = vmatmul.mubr.msk.bf16.gmra.mrb[32].mxu0 %vm634_vm1, %v1975_v35 }
  0x4c   :  { %1758 = vmatprep.mubr.msk.bf16.mxu0 %vm2042_vm0, %v2041_v2 }
  0x51   :  { %759 = vmatmul.mubr.bf16.gmra.mrb[8].mxu1 %v1952_v33  ;;  %v111_v33 = vld [vmem:[%s2815_s0 + $0x240] sm:$0xff] }
  0x52   :  { %766 = vmatprep.mubr.bf16.mxu1 %v1953_v34 }
  0x53   :  { %1759 = vmatmul.mubr.msk.bf16.gmra.mrb[36].mxu0 %vm634_vm1, %v1979_v38  ;;  %v1548_v38 = vcombine.high %v111_v33, %v111_v33 }
  0x54   :  { %1762 = vmatprep.mubr.msk.bf16.mxu0 %vm2042_vm0, %v2041_v2 }
  0x59   :  { %767 = vmatmul.mubr.bf16.gmra.mrb[12].mxu1 %v1956_v36  ;;  %v2036_v36 = vld [vmem:[%s2815_s0 + $0x228] ss:$12 sps:$4 sm:$0xff]  }
  0x5a   :  { %774 = vmatprep.mubr.bf16.mxu1 %v1957_v37 }
  0x5b   :  { %1763 = vmatmul.mubr.msk.bf16.gmra.mrb[40].mxu0 %vm634_vm1, %v1983_v41 }
  0x5c   :  { %1766 = vmatprep.mubr.msk.bf16.mxu0 %vm2042_vm0, %v2041_v2 }
  0x61   :  { %775 = vmatmul.mubr.bf16.gmra.mrb[16].mxu1 %v1960_v39 }
  0x62   :  { %782 = vmatprep.mubr.bf16.mxu1 %v1961_v40 }
  0x63   :  { %1767 = vmatmul.mubr.msk.bf16.gmra.mrb[44].mxu0 %vm634_vm1, %v1987_v44 }
  0x64   :  { %1770 = vmatprep.mubr.msk.bf16.mxu0 %vm2042_vm0, %v2041_v2 }
  0x69   :  { %783 = vmatmul.mubr.bf16.gmra.mrb[20].mxu1 %v1964_v42  ;;  %v1547_v42 = vcombine.low %v111_v33, %v111_v33 }
  0x6a   :  { %790 = vmatprep.mubr.bf16.mxu1 %v1965_v43 }
  0x6b   :  { %1771 = vmatmul.mubr.msk.bf16.gmra.mrb[48].mxu0 %vm634_vm1, %v1991_v47 }
  0x6c   :  { %1774 = vmatprep.mubr.msk.bf16.mxu0 %vm2042_vm0, %v2041_v2 }
  0x71   :  { %791 = vmatmul.mubr.bf16.gmra.mrb[24].mxu1 %v1968_v45 }
  0x72   :  { %798 = vmatprep.mubr.bf16.mxu1 %v1969_v46 }
  0x73   :  { %1775 = vmatmul.mubr.msk.bf16.gmra.mrb[52].mxu0 %vm634_vm1, %v1995_v50 }
  0x74   :  { %1778 = vmatprep.mubr.msk.bf16.mxu0 %vm2042_vm0, %v2041_v2 }
  0x79   :  { %799 = vmatmul.mubr.bf16.gmra.mrb[28].mxu1 %v1972_v48 }
  0x7a   :  { %806 = vmatprep.mubr.bf16.mxu1 %v1973_v49 }
  0x7b   :  { %1779 = vmatmul.mubr.msk.bf16.gmra.mrb[56].mxu0 %vm634_vm1, %v1999_v53 }
  0x7c   :  { %1782 = vmatprep.mubr.msk.bf16.mxu0 %vm2042_vm0, %v2041_v2 }
  0x81   :  { %807 = vmatmul.mubr.bf16.gmra.mrb[32].mxu1 %v1976_v51 }
  0x82   :  { %814 = vmatprep.mubr.bf16.mxu1 %v1977_v52  ;;  %v2445_v52 = vld [vmem:[%s2816_s2] ss:$0 sm:$0xff] }
  0x83   :  { %1783 = vmatmul.mubr.msk.bf16.gmra.mrb[60].mxu0 %vm634_vm1, %v2003_v56 }
  0x84   :  { %1786 = vmatprep.mubr.msk.bf16.mxu0 %vm2042_vm0, %v2041_v2 }
  0x89   :  { %815 = vmatmul.mubr.bf16.gmra.mrb[36].mxu1 %v1980_v54 }
  0x8a   :  { %822 = vmatprep.mubr.bf16.mxu1 %v1981_v55 }
  0x8b   :  { %1787 = vmatmul.mubr.msk.bf16.gmra.mrb[64].mxu0 %vm634_vm1, %v2007_v59 }
  0x8c   :  { %1790 = vmatprep.mubr.msk.bf16.mxu0 %vm2042_vm0, %v2041_v2 }
  0x91   :  { %823 = vmatmul.mubr.bf16.gmra.mrb[40].mxu1 %v1984_v57 }
  0x92   :  { %830 = vmatprep.mubr.bf16.mxu1 %v1985_v58 }
  0x93   :  { %1791 = vmatmul.mubr.msk.bf16.gmra.mrb[68].mxu0 %vm634_vm1, %v2011_v62 }
  0x94   :  { %1794 = vmatprep.mubr.msk.bf16.mxu0 %vm2042_vm0, %v2041_v2 }
  0x99   :  { %831 = vmatmul.mubr.bf16.gmra.mrb[44].mxu1 %v1988_v60 }
  0x9a   :  { %838 = vmatprep.mubr.bf16.mxu1 %v1989_v61 }
  0x9b   :  { %1795 = vmatmul.mubr.msk.bf16.gmra.mrb[72].mxu0 %vm634_vm1, %v2015_v1 }
  0x9c   :  { %1798 = vmatprep.mubr.msk.bf16.mxu0 %vm2042_vm0, %v2041_v2 }
  0xa1   :  { %839 = vmatmul.mubr.bf16.gmra.mrb[48].mxu1 %v1992_v63 }
  0xa2   :  { %846 = vmatprep.mubr.bf16.mxu1 %v1993_v0 }
  0xa3   :  { %1799 = vmatmul.mubr.msk.bf16.gmra.mrb[76].mxu0 %vm634_vm1, %v2019_v5 }
  0xa4   :  { %1802 = vmatprep.mubr.msk.bf16.mxu0 %vm2042_vm0, %v2041_v2 }
  0xa9   :  { %847 = vmatmul.mubr.bf16.gmra.mrb[52].mxu1 %v1996_v3 }
  0xaa   :  { %854 = vmatprep.mubr.bf16.mxu1 %v1997_v4 }
  0xab   :  { %1803 = vmatmul.mubr.msk.bf16.gmra.mrb[80].mxu0 %vm634_vm1, %v2023_v8 }
  0xac   :  { %1806 = vmatprep.mubr.msk.bf16.mxu0 %vm2042_vm0, %v2041_v2 }
  0xb1   :  { %855 = vmatmul.mubr.bf16.gmra.mrb[56].mxu1 %v2000_v6 }
  0xb2   :  { %862 = vmatprep.mubr.bf16.mxu1 %v2001_v7 }
  0xb3   :  { %1807 = vmatmul.mubr.msk.bf16.gmra.mrb[84].mxu0 %vm634_vm1, %v2027_v11 }
  0xb4   :  { %1810 = vmatprep.mubr.msk.bf16.mxu0 %vm2042_vm0, %v2041_v2 }
  0xb9   :  { %863 = vmatmul.mubr.bf16.gmra.mrb[60].mxu1 %v2004_v9 }
  0xba   :  { %870 = vmatprep.mubr.bf16.mxu1 %v2005_v10 }
  0xbb   :  { %1811 = vmatmul.mubr.msk.bf16.gmra.mrb[88].mxu0 %vm634_vm1, %v2031_v14 }
  0xbc   :  { %1814 = vmatprep.mubr.msk.bf16.mxu0 %vm2042_vm0, %v2041_v2 }
  0xc1   :  { %871 = vmatmul.mubr.bf16.gmra.mrb[64].mxu1 %v2008_v12 }
  0xc2   :  { %878 = vmatprep.mubr.bf16.mxu1 %v2009_v13 }
  0xc3   :  { %1815 = vmatmul.mubr.msk.bf16.gmra.mrb[92].mxu0 %vm634_vm1, %v2035_v17 }
  0xc4   :  { %1818 = vmatprep.mubr.msk.bf16.mxu0 %vm2042_vm0, %v2041_v2  ;;  %v2024_v2 = vld [vmem:[%s2815_s0 + $0x1e0] ss:$12 sps:$4 sm:$0xff]  }
  0xc9   :  { %879 = vmatmul.mubr.bf16.gmra.mrb[68].mxu1 %v2012_v15 }
  0xca   :  { %886 = vmatprep.mubr.bf16.mxu1 %v2013_v16 }
  0xcb   :  { %1819 = vmatmul.mubr.msk.bf16.gmra.mrb[96].mxu0 %vm634_vm1, %v2038_v20 }
  0xd1   :  { %887 = vmatmul.mubr.bf16.gmra.mrb[72].mxu1 %v2016_v18 }
  0xd2   :  { %894 = vmatprep.mubr.bf16.mxu1 %v2017_v19 }
  0xd9   :  { %895 = vmatmul.mubr.bf16.gmra.mrb[76].mxu1 %v2020_v21 }
  0xda   :  { %902 = vmatprep.mubr.bf16.mxu1 %v2021_v22 }
  0xde   :  { %v976_v26 = vpop.f32.mrb[0].mxu0 }
  0xdf   :  { %v1724_v27 = vpop.f32.mrb[1].mxu0 }
  0xe0   :  { %v979_v28 = vpop.f32.mrb[2].mxu0 }
  0xe1   :  { %903 = vmatmul.mubr.bf16.gmra.mrb[80].mxu1 %v2024_v2  ;;  %v1725_v30 = vpop.f32.mrb[3].mxu0 }
  0xe2   :  { %910 = vmatprep.mubr.bf16.mxu1 %v2025_v23 }
  0xe6   :  { %v984_v32 = vpop.f32.mrb[4].mxu0 }
  0xe7   :  { %v1728_v34 = vpop.f32.mrb[5].mxu0 }
  0xe8   :  { %v987_v35 = vpop.f32.mrb[6].mxu0 }
  0xe9   :  { %911 = vmatmul.mubr.bf16.gmra.mrb[84].mxu1 %v2028_v24  ;;  %v1729_v37 = vpop.f32.mrb[7].mxu0 }
  0xea   :  { %918 = vmatprep.mubr.bf16.mxu1 %v2029_v25 }
  0xee   :  { %v992_v39 = vpop.f32.mrb[8].mxu0 }
  0xef   :  { %v1732_v40 = vpop.f32.mrb[9].mxu0 }
  0xf0   :  { %v2432_v41 = vpop.f32.mrb[10].mxu0 }
  0xf1   :  { %919 = vmatmul.mubr.bf16.gmra.mrb[88].mxu1 %v2032_v29  ;;  %v1733_v43 = vpop.f32.mrb[11].mxu0 }
  0xf2   :  { %926 = vmatprep.mubr.bf16.mxu1 %v2033_v31 }
  0xf6   :  { %v2434_v44 = vpop.f32.mrb[12].mxu0 }
  0xf7   :  { %v1736_v45 = vpop.f32.mrb[13].mxu0 }
  0xf8   :  { %v2436_v46 = vpop.f32.mrb[14].mxu0 }
  0xf9   :  { %927 = vmatmul.mubr.bf16.gmra.mrb[92].mxu1 %v2036_v36  ;;  %v1737_v47 = vpop.f32.mrb[15].mxu0 }
  0xfa   :  { %934 = vmatprep.mubr.bf16.mxu1 %v1548_v38 }
  0xfe   :  { %v2438_v48 = vpop.f32.mrb[16].mxu0 }
  0xff   :  { %v1740_v49 = vpop.f32.mrb[17].mxu0 }
 0x100   :  { %v2440_v50 = vpop.f32.mrb[18].mxu0 }
 0x101   :  { %935 = vmatmul.mubr.bf16.gmra.mrb[96].mxu1 %v1547_v42  ;;  %v1741_v51 = vpop.f32.mrb[19].mxu0 }
 0x106   :  { %v2447_v53 = vpop.f32.mrb[20].mxu0 }
 0x107   :  { %v1744_v54 = vpop.f32.mrb[21].mxu0 }
 0x108   :  { %v2449_v56 = vpop.f32.mrb[22].mxu0 }
 0x109   :  { %v1745_v59 = vpop.f32.mrb[23].mxu0 }
 0x10e   :  { %v2453_v3 = vpop.f32.mrb[24].mxu0 }
 0x10f   :  { %v1748_v6 = vpop.f32.mrb[25].mxu0 }
 0x110   :  { %v2455_v8 = vpop.f32.mrb[26].mxu0 }
 0x111   :  { %v1749_v12 = vpop.f32.mrb[27].mxu0 }
 0x114   :  { %v744_v55 = vpop.f32.mrb[0].mxu1 }
 0x115   :  { %v745_v57 = vadd.f32 %v2445_v52, %v744_v55  ;;  %v746_v58 = vpop.f32.mrb[1].mxu1 }
 0x116   :  { %v747_v60 = vpop.f32.mrb[2].mxu1  ;;  %v2467_v19 = vpop.f32.mrb[28].mxu0 }
 0x117   :  { %v977_v61 = vadd.f32 %v976_v26, %v745_v57  ;;  %v748_v62 = vadd.f32 %v2445_v52, %v747_v60  ;;  %v749_v63 = vpop.f32.mrb[3].mxu1  ;;  %v1752_v22 = vpop.f32.mrb[29].mxu0 }
 0x118   :  { %v2469_v23 = vpop.f32.mrb[30].mxu0 }
 0x119   :  { %v1174_v0 = vmax.f32 %v977_v61, 0.0  ;;  %v980_v1 = vadd.f32 %v979_v28, %v748_v62  ;;  %v1753_v27 = vpop.f32.mrb[31].mxu0 }
 0x11b   :  { %v1642_v4 = vpack.c.bf16 %v1174_v0, %v1174_v0  ;;  %v1175_v5 = vmax.f32 %v980_v1, 0.0 }
 0x11c   :  { %v752_v7 = vpop.f32.mrb[4].mxu1 }
 0x11d   :  { %1421 = vst.msk [vmem:[%s2817_s3] sm:$0xf] %vm1420_vm2, %v1642_v4  ;;  %v1643_v9 = vpack.c.bf16 %v1175_v5, %v1175_v5  ;;  %v753_v10 = vadd.f32 %v2445_v52, %v752_v7  ;;  %v754_v11 = vpop.f32.mrb[5].mxu1 }
 0x11e   :  { %v755_v13 = vpop.f32.mrb[6].mxu1  ;;  %v2482_v34 = vpop.f32.mrb[32].mxu0 }
 0x11f   :  { %1422 = vst.msk [vmem:[%s2817_s3 + $0x4] sm:$0xf] %vm1420_vm2, %v1643_v9  ;;  %v985_v14 = vadd.f32 %v984_v32, %v753_v10  ;;  %v756_v15 = vadd.f32 %v2445_v52, %v755_v13  ;;  %v757_v16 = vpop.f32.mrb[7].mxu1  ;;  %v1756_v37 = vpop.f32.mrb[33].mxu0 }
 0x120   :  { %v2484_v40 = vpop.f32.mrb[34].mxu0 }
 0x121   :  { %v1176_v17 = vmax.f32 %v985_v14, 0.0  ;;  %v988_v18 = vadd.f32 %v987_v35, %v756_v15  ;;  %v1757_v45 = vpop.f32.mrb[35].mxu0 }
 0x123   :  { %v1644_v20 = vpack.c.bf16 %v1176_v17, %v1176_v17  ;;  %v1177_v21 = vmax.f32 %v988_v18, 0.0 }
 0x124   :  { %v760_v2 = vpop.f32.mrb[8].mxu1 }
 0x125   :  { %1423 = vst.msk [vmem:[%s2817_s3 + $0x8] sm:$0xf] %vm1420_vm2, %v1644_v20  ;;  %v1645_v24 = vpack.c.bf16 %v1177_v21, %v1177_v21  ;;  %v761_v25 = vadd.f32 %v2445_v52, %v760_v2  ;;  %v762_v26 = vpop.f32.mrb[9].mxu1 }
 0x126   :  { %v763_v28 = vpop.f32.mrb[10].mxu1  ;;  %v2498_v57 = vpop.f32.mrb[36].mxu0 }
 0x127   :  { %1424 = vst.msk [vmem:[%s2817_s3 + $0xc] sm:$0xf] %vm1420_vm2, %v1645_v24  ;;  %v993_v29 = vadd.f32 %v992_v39, %v761_v25  ;;  %v764_v30 = vadd.f32 %v2445_v52, %v763_v28  ;;  %v765_v31 = vpop.f32.mrb[11].mxu1  ;;  %v1760_v60 = vpop.f32.mrb[37].mxu0 }
 0x128   :  { %v2500_v62 = vpop.f32.mrb[38].mxu0 }
 0x129   :  { %v1178_v32 = vmax.f32 %v993_v29, 0.0  ;;  %v996_v33 = vadd.f32 %v2432_v41, %v764_v30  ;;  %v1761_v1 = vpop.f32.mrb[39].mxu0 }
 0x12b   :  { %v1646_v35 = vpack.c.bf16 %v1178_v32, %v1178_v32  ;;  %v1179_v36 = vmax.f32 %v996_v33, 0.0 }
 0x12c   :  { %v768_v38 = vpop.f32.mrb[12].mxu1 }
 0x12d   :  { %1425 = vst.msk [vmem:[%s2817_s3 + $0x10] sm:$0xf] %vm1420_vm2, %v1646_v35  ;;  %v1647_v39 = vpack.c.bf16 %v1179_v36, %v1179_v36  ;;  %v769_v42 = vadd.f32 %v2445_v52, %v768_v38  ;;  %v770_v43 = vpop.f32.mrb[13].mxu1 }
 0x12e   :  { %v771_v47 = vpop.f32.mrb[14].mxu1  ;;  %v2514_v10 = vpop.f32.mrb[40].mxu0 }
 0x12f   :  { %1426 = vst.msk [vmem:[%s2817_s3 + $0x14] sm:$0xf] %vm1420_vm2, %v1647_v39  ;;  %v1001_v41 = vadd.f32 %v2434_v44, %v769_v42  ;;  %v772_v49 = vadd.f32 %v2445_v52, %v771_v47  ;;  %v773_v51 = vpop.f32.mrb[15].mxu1  ;;  %v1764_v13 = vpop.f32.mrb[41].mxu0 }
 0x130   :  { %v2516_v15 = vpop.f32.mrb[42].mxu0 }
 0x131   :  { %v1180_v54 = vmax.f32 %v1001_v41, 0.0  ;;  %v1004_v55 = vadd.f32 %v2436_v46, %v772_v49  ;;  %v1765_v18 = vpop.f32.mrb[43].mxu0 }
 0x133   :  { %v1648_v58 = vpack.c.bf16 %v1180_v54, %v1180_v54  ;;  %v1181_v59 = vmax.f32 %v1004_v55, 0.0 }
 0x134   :  { %v776_v61 = vpop.f32.mrb[16].mxu1 }
 0x135   :  { %1427 = vst.msk [vmem:[%s2817_s3 + $0x18] sm:$0xf] %vm1420_vm2, %v1648_v58  ;;  %v1649_v44 = vpack.c.bf16 %v1181_v59, %v1181_v59  ;;  %v777_v63 = vadd.f32 %v2445_v52, %v776_v61  ;;  %v778_v0 = vpop.f32.mrb[17].mxu1 }
 0x136   :  { %v779_v4 = vpop.f32.mrb[18].mxu1  ;;  %v2530_v25 = vpop.f32.mrb[44].mxu0 }
 0x137   :  { %1428 = vst.msk [vmem:[%s2817_s3 + $0x1c] sm:$0xf] %vm1420_vm2, %v1649_v44  ;;  %v1009_v46 = vadd.f32 %v2438_v48, %v777_v63  ;;  %v780_v5 = vadd.f32 %v2445_v52, %v779_v4  ;;  %v781_v6 = vpop.f32.mrb[19].mxu1  ;;  %v1768_v28 = vpop.f32.mrb[45].mxu0 }
 0x138   :  { %v2532_v30 = vpop.f32.mrb[46].mxu0 }
 0x139   :  { %v1182_v7 = vmax.f32 %v1009_v46, 0.0  ;;  %v1012_v9 = vadd.f32 %v2440_v50, %v780_v5  ;;  %v1769_v33 = vpop.f32.mrb[47].mxu0 }
 0x13b   :  { %v1650_v11 = vpack.c.bf16 %v1182_v7, %v1182_v7  ;;  %v1183_v12 = vmax.f32 %v1012_v9, 0.0 }
 0x13c   :  { %v784_v14 = vpop.f32.mrb[20].mxu1 }
 0x13d   :  { %1429 = vst.msk [vmem:[%s2817_s3 + $0x20] sm:$0xf] %vm1420_vm2, %v1650_v11  ;;  %v1651_v48 = vpack.c.bf16 %v1183_v12, %v1183_v12  ;;  %v785_v16 = vadd.f32 %v2445_v52, %v784_v14  ;;  %v786_v17 = vpop.f32.mrb[21].mxu1 }
 0x13e   :  { %v787_v20 = vpop.f32.mrb[22].mxu1  ;;  %v2546_v42 = vpop.f32.mrb[48].mxu0 }
 0x13f   :  { %1430 = vst.msk [vmem:[%s2817_s3 + $0x24] sm:$0xf] %vm1420_vm2, %v1651_v48  ;;  %v1017_v50 = vadd.f32 %v2447_v53, %v785_v16  ;;  %v788_v21 = vadd.f32 %v2445_v52, %v787_v20  ;;  %v789_v22 = vpop.f32.mrb[23].mxu1  ;;  %v1772_v47 = vpop.f32.mrb[49].mxu0 }
 0x140   :  { %v2548_v49 = vpop.f32.mrb[50].mxu0 }
 0x141   :  { %v1184_v2 = vmax.f32 %v1017_v50, 0.0  ;;  %v1020_v24 = vadd.f32 %v2449_v56, %v788_v21  ;;  %v1773_v55 = vpop.f32.mrb[51].mxu0 }
 0x143   :  { %v1652_v26 = vpack.c.bf16 %v1184_v2, %v1184_v2  ;;  %v1185_v27 = vmax.f32 %v1020_v24, 0.0 }
 0x144   :  { %v792_v29 = vpop.f32.mrb[24].mxu1 }
 0x145   :  { %1431 = vst.msk [vmem:[%s2817_s3 + $0x28] sm:$0xf] %vm1420_vm2, %v1652_v26  ;;  %v1653_v53 = vpack.c.bf16 %v1185_v27, %v1185_v27  ;;  %v793_v31 = vadd.f32 %v2445_v52, %v792_v29  ;;  %v794_v32 = vpop.f32.mrb[25].mxu1 }
 0x146   :  { %v795_v35 = vpop.f32.mrb[26].mxu1  ;;  %v2562_v63 = vpop.f32.mrb[52].mxu0 }
 0x147   :  { %1432 = vst.msk [vmem:[%s2817_s3 + $0x2c] sm:$0xf] %vm1420_vm2, %v1653_v53  ;;  %v1025_v56 = vadd.f32 %v2453_v3, %v793_v31  ;;  %v796_v36 = vadd.f32 %v2445_v52, %v795_v35  ;;  %v797_v37 = vpop.f32.mrb[27].mxu1  ;;  %v1776_v4 = vpop.f32.mrb[53].mxu0 }
 0x148   :  { %v2564_v5 = vpop.f32.mrb[54].mxu0 }
 0x149   :  { %v1186_v38 = vmax.f32 %v1025_v56, 0.0  ;;  %v1028_v39 = vadd.f32 %v2455_v8, %v796_v36  ;;  %v1777_v9 = vpop.f32.mrb[55].mxu0 }
 0x14b   :  { %v1654_v43 = vpack.c.bf16 %v1186_v38, %v1186_v38  ;;  %v1187_v45 = vmax.f32 %v1028_v39, 0.0 }
 0x14c   :  { %v800_v41 = vpop.f32.mrb[28].mxu1 }
 0x14d   :  { %1433 = vst.msk [vmem:[%s2817_s3 + $0x30] sm:$0xf] %vm1420_vm2, %v1654_v43  ;;  %v1655_v3 = vpack.c.bf16 %v1187_v45, %v1187_v45  ;;  %v801_v51 = vadd.f32 %v2445_v52, %v800_v41  ;;  %v802_v54 = vpop.f32.mrb[29].mxu1 }
 0x14e   :  { %v803_v58 = vpop.f32.mrb[30].mxu1  ;;  %v2578_v16 = vpop.f32.mrb[56].mxu0 }
 0x14f   :  { %1434 = vst.msk [vmem:[%s2817_s3 + $0x34] sm:$0xf] %vm1420_vm2, %v1655_v3  ;;  %v1033_v8 = vadd.f32 %v2467_v19, %v801_v51  ;;  %v804_v59 = vadd.f32 %v2445_v52, %v803_v58  ;;  %v805_v60 = vpop.f32.mrb[31].mxu1  ;;  %v1780_v20 = vpop.f32.mrb[57].mxu0 }
 0x150   :  { %v2580_v21 = vpop.f32.mrb[58].mxu0 }
 0x151   :  { %v1188_v61 = vmax.f32 %v1033_v8, 0.0  ;;  %v1036_v44 = vadd.f32 %v2469_v23, %v804_v59  ;;  %v1781_v24 = vpop.f32.mrb[59].mxu0 }
 0x153   :  { %v1656_v0 = vpack.c.bf16 %v1188_v61, %v1188_v61  ;;  %v1189_v1 = vmax.f32 %v1036_v44, 0.0 }
 0x154   :  { %v808_v46 = vpop.f32.mrb[32].mxu1 }
 0x155   :  { %1435 = vst.msk [vmem:[%s2817_s3 + $0x38] sm:$0xf] %vm1420_vm2, %v1656_v0  ;;  %v1657_v19 = vpack.c.bf16 %v1189_v1, %v1189_v1  ;;  %v809_v6 = vadd.f32 %v2445_v52, %v808_v46  ;;  %v810_v7 = vpop.f32.mrb[33].mxu1 }
 0x156   :  { %v811_v11 = vpop.f32.mrb[34].mxu1  ;;  %v2594_v31 = vpop.f32.mrb[60].mxu0 }
 0x157   :  { %1436 = vst.msk [vmem:[%s2817_s3 + $0x3c] sm:$0xf] %vm1420_vm2, %v1657_v19  ;;  %v1041_v23 = vadd.f32 %v2482_v34, %v809_v6  ;;  %v812_v12 = vadd.f32 %v2445_v52, %v811_v11  ;;  %v813_v13 = vpop.f32.mrb[35].mxu1  ;;  %v1784_v35 = vpop.f32.mrb[61].mxu0 }
 0x158   :  { %v2596_v36 = vpop.f32.mrb[62].mxu0 }
 0x159   :  { %v1190_v14 = vmax.f32 %v1041_v23, 0.0  ;;  %v1044_v48 = vadd.f32 %v2484_v40, %v812_v12  ;;  %v1785_v39 = vpop.f32.mrb[63].mxu0 }
 0x15b   :  { %v1658_v17 = vpack.c.bf16 %v1190_v14, %v1190_v14  ;;  %v1191_v18 = vmax.f32 %v1044_v48, 0.0 }
 0x15c   :  { %v816_v50 = vpop.f32.mrb[36].mxu1 }
 0x15d   :  { %1437 = vst.msk [vmem:[%s2817_s3 + $0x40] sm:$0xf] %vm1420_vm2, %v1658_v17  ;;  %v1659_v34 = vpack.c.bf16 %v1191_v18, %v1191_v18  ;;  %v817_v22 = vadd.f32 %v2445_v52, %v816_v50  ;;  %v818_v2 = vpop.f32.mrb[37].mxu1 }
 0x15e   :  { %v819_v26 = vpop.f32.mrb[38].mxu1  ;;  %v2610_v51 = vpop.f32.mrb[64].mxu0 }
 0x15f   :  { %1438 = vst.msk [vmem:[%s2817_s3 + $0x44] sm:$0xf] %vm1420_vm2, %v1659_v34  ;;  %v1049_v40 = vadd.f32 %v2498_v57, %v817_v22  ;;  %v820_v27 = vadd.f32 %v2445_v52, %v819_v26  ;;  %v821_v28 = vpop.f32.mrb[39].mxu1  ;;  %v1788_v58 = vpop.f32.mrb[65].mxu0 }
 0x160   :  { %v2612_v59 = vpop.f32.mrb[66].mxu0 }
 0x161   :  { %v1192_v29 = vmax.f32 %v1049_v40, 0.0  ;;  %v1052_v53 = vadd.f32 %v2500_v62, %v820_v27  ;;  %v1789_v44 = vpop.f32.mrb[67].mxu0 }
 0x163   :  { %v1660_v32 = vpack.c.bf16 %v1192_v29, %v1192_v29  ;;  %v1193_v33 = vmax.f32 %v1052_v53, 0.0 }
 0x164   :  { %v824_v56 = vpop.f32.mrb[40].mxu1 }
 0x165   :  { %1439 = vst.msk [vmem:[%s2817_s3 + $0x48] sm:$0xf] %vm1420_vm2, %v1660_v32  ;;  %v1661_v57 = vpack.c.bf16 %v1193_v33, %v1193_v33  ;;  %v825_v37 = vadd.f32 %v2445_v52, %v824_v56  ;;  %v826_v38 = vpop.f32.mrb[41].mxu1 }
 0x166   :  { %v827_v43 = vpop.f32.mrb[42].mxu1  ;;  %v2626_v6 = vpop.f32.mrb[68].mxu0 }
 0x167   :  { %1440 = vst.msk [vmem:[%s2817_s3 + $0x4c] sm:$0xf] %vm1420_vm2, %v1661_v57  ;;  %v1057_v62 = vadd.f32 %v2514_v10, %v825_v37  ;;  %v828_v45 = vadd.f32 %v2445_v52, %v827_v43  ;;  %v829_v47 = vpop.f32.mrb[43].mxu1  ;;  %v1792_v11 = vpop.f32.mrb[69].mxu0 }
 0x168   :  { %v2628_v12 = vpop.f32.mrb[70].mxu0 }
 0x169   :  { %v1194_v41 = vmax.f32 %v1057_v62, 0.0  ;;  %v1060_v3 = vadd.f32 %v2516_v15, %v828_v45  ;;  %v1793_v48 = vpop.f32.mrb[71].mxu0 }
 0x16b   :  { %v1662_v54 = vpack.c.bf16 %v1194_v41, %v1194_v41  ;;  %v1195_v55 = vmax.f32 %v1060_v3, 0.0 }
 0x16c   :  { %v832_v8 = vpop.f32.mrb[44].mxu1 }
 0x16d   :  { %1441 = vst.msk [vmem:[%s2817_s3 + $0x50] sm:$0xf] %vm1420_vm2, %v1662_v54  ;;  %v1663_v10 = vpack.c.bf16 %v1195_v55, %v1195_v55  ;;  %v833_v60 = vadd.f32 %v2445_v52, %v832_v8  ;;  %v834_v61 = vpop.f32.mrb[45].mxu1 }
 0x16e   :  { %v835_v0 = vpop.f32.mrb[46].mxu1  ;;  %v2642_v22 = vpop.f32.mrb[72].mxu0 }
 0x16f   :  { %1442 = vst.msk [vmem:[%s2817_s3 + $0x54] sm:$0xf] %vm1420_vm2, %v1663_v10  ;;  %v1065_v15 = vadd.f32 %v2530_v25, %v833_v60  ;;  %v836_v1 = vadd.f32 %v2445_v52, %v835_v0  ;;  %v837_v4 = vpop.f32.mrb[47].mxu1  ;;  %v1796_v26 = vpop.f32.mrb[73].mxu0 }
 0x170   :  { %v2644_v27 = vpop.f32.mrb[74].mxu0 }
 0x171   :  { %v1196_v46 = vmax.f32 %v1065_v15, 0.0  ;;  %v1068_v19 = vadd.f32 %v2532_v30, %v836_v1  ;;  %v1797_v53 = vpop.f32.mrb[75].mxu0 }
 0x173   :  { %v1664_v7 = vpack.c.bf16 %v1196_v46, %v1196_v46  ;;  %v1197_v9 = vmax.f32 %v1068_v19, 0.0 }
 0x174   :  { %v840_v23 = vpop.f32.mrb[48].mxu1 }
 0x175   :  { %1443 = vst.msk [vmem:[%s2817_s3 + $0x58] sm:$0xf] %vm1420_vm2, %v1664_v7  ;;  %v1665_v25 = vpack.c.bf16 %v1197_v9, %v1197_v9  ;;  %v841_v13 = vadd.f32 %v2445_v52, %v840_v23  ;;  %v842_v14 = vpop.f32.mrb[49].mxu1 }
 0x176   :  { %v843_v17 = vpop.f32.mrb[50].mxu1  ;;  %v2658_v37 = vpop.f32.mrb[76].mxu0 }
 0x177   :  { %1444 = vst.msk [vmem:[%s2817_s3 + $0x5c] sm:$0xf] %vm1420_vm2, %v1665_v25  ;;  %v1073_v30 = vadd.f32 %v2546_v42, %v841_v13  ;;  %v844_v18 = vadd.f32 %v2445_v52, %v843_v17  ;;  %v845_v20 = vpop.f32.mrb[51].mxu1  ;;  %v1800_v43 = vpop.f32.mrb[77].mxu0 }
 0x178   :  { %v2660_v45 = vpop.f32.mrb[78].mxu0 }
 0x179   :  { %v1198_v50 = vmax.f32 %v1073_v30, 0.0  ;;  %v1076_v34 = vadd.f32 %v2548_v49, %v844_v18  ;;  %v1801_v3 = vpop.f32.mrb[79].mxu0 }
 0x17b   :  { %v1666_v2 = vpack.c.bf16 %v1198_v50, %v1198_v50  ;;  %v1199_v24 = vmax.f32 %v1076_v34, 0.0 }
 0x17c   :  { %v848_v40 = vpop.f32.mrb[52].mxu1 }
 0x17d   :  { %1445 = vst.msk [vmem:[%s2817_s3 + $0x60] sm:$0xf] %vm1420_vm2, %v1666_v2  ;;  %v1667_v42 = vpack.c.bf16 %v1199_v24, %v1199_v24  ;;  %v849_v28 = vadd.f32 %v2445_v52, %v848_v40  ;;  %v850_v29 = vpop.f32.mrb[53].mxu1 }
 0x17e   :  { %v851_v32 = vpop.f32.mrb[54].mxu1  ;;  %v2674_v60 = vpop.f32.mrb[80].mxu0 }
 0x17f   :  { %1446 = vst.msk [vmem:[%s2817_s3 + $0x64] sm:$0xf] %vm1420_vm2, %v1667_v42  ;;  %v1081_v49 = vadd.f32 %v2562_v63, %v849_v28  ;;  %v852_v33 = vadd.f32 %v2445_v52, %v851_v32  ;;  %v853_v35 = vpop.f32.mrb[55].mxu1  ;;  %v1804_v0 = vpop.f32.mrb[81].mxu0 }
 0x180   :  { %v2676_v1 = vpop.f32.mrb[82].mxu0 }
 0x181   :  { %v1200_v56 = vmax.f32 %v1081_v49, 0.0  ;;  %v1084_v57 = vadd.f32 %v2564_v5, %v852_v33  ;;  %v1805_v19 = vpop.f32.mrb[83].mxu0 }
 0x183   :  { %v1668_v38 = vpack.c.bf16 %v1200_v56, %v1200_v56  ;;  %v1201_v39 = vmax.f32 %v1084_v57, 0.0 }
 0x184   :  { %v856_v62 = vpop.f32.mrb[56].mxu1 }
 0x185   :  { %1447 = vst.msk [vmem:[%s2817_s3 + $0x68] sm:$0xf] %vm1420_vm2, %v1668_v38  ;;  %v1669_v63 = vpack.c.bf16 %v1201_v39, %v1201_v39  ;;  %v857_v47 = vadd.f32 %v2445_v52, %v856_v62  ;;  %v858_v41 = vpop.f32.mrb[57].mxu1 }
 0x186   :  { %v859_v54 = vpop.f32.mrb[58].mxu1  ;;  %v2690_v13 = vpop.f32.mrb[84].mxu0 }
 0x187   :  { %1448 = vst.msk [vmem:[%s2817_s3 + $0x6c] sm:$0xf] %vm1420_vm2, %v1669_v63  ;;  %v1089_v5 = vadd.f32 %v2578_v16, %v857_v47  ;;  %v860_v55 = vadd.f32 %v2445_v52, %v859_v54  ;;  %v861_v58 = vpop.f32.mrb[59].mxu1  ;;  %v1808_v17 = vpop.f32.mrb[85].mxu0 }
 0x188   :  { %v2692_v18 = vpop.f32.mrb[86].mxu0 }
 0x189   :  { %v1202_v8 = vmax.f32 %v1089_v5, 0.0  ;;  %v1092_v10 = vadd.f32 %v2580_v21, %v860_v55  ;;  %v1809_v34 = vpop.f32.mrb[87].mxu0 }
 0x18b   :  { %v1670_v61 = vpack.c.bf16 %v1202_v8, %v1202_v8  ;;  %v1203_v44 = vmax.f32 %v1092_v10, 0.0 }
 0x18c   :  { %v864_v15 = vpop.f32.mrb[60].mxu1 }
 0x18d   :  { %1449 = vst.msk [vmem:[%s2817_s3 + $0x70] sm:$0xf] %vm1420_vm2, %v1670_v61  ;;  %v1671_v16 = vpack.c.bf16 %v1203_v44, %v1203_v44  ;;  %v865_v4 = vadd.f32 %v2445_v52, %v864_v15  ;;  %v866_v46 = vpop.f32.mrb[61].mxu1 }
 0x18e   :  { %v867_v7 = vpop.f32.mrb[62].mxu1  ;;  %v2706_v28 = vpop.f32.mrb[88].mxu0 }
 0x18f   :  { %1450 = vst.msk [vmem:[%s2817_s3 + $0x74] sm:$0xf] %vm1420_vm2, %v1671_v16  ;;  %v1097_v21 = vadd.f32 %v2594_v31, %v865_v4  ;;  %v868_v9 = vadd.f32 %v2445_v52, %v867_v7  ;;  %v869_v11 = vpop.f32.mrb[63].mxu1  ;;  %v1812_v32 = vpop.f32.mrb[89].mxu0 }
 0x190   :  { %v2708_v33 = vpop.f32.mrb[90].mxu0 }
 0x191   :  { %v1204_v23 = vmax.f32 %v1097_v21, 0.0  ;;  %v1100_v25 = vadd.f32 %v2596_v36, %v868_v9  ;;  %v1813_v57 = vpop.f32.mrb[91].mxu0 }
 0x193   :  { %v1672_v14 = vpack.c.bf16 %v1204_v23, %v1204_v23  ;;  %v1205_v48 = vmax.f32 %v1100_v25, 0.0 }
 0x194   :  { %v872_v30 = vpop.f32.mrb[64].mxu1 }
 0x195   :  { %1451 = vst.msk [vmem:[%s2817_s3 + $0x78] sm:$0xf] %vm1420_vm2, %v1672_v14  ;;  %v1673_v31 = vpack.c.bf16 %v1205_v48, %v1205_v48  ;;  %v873_v20 = vadd.f32 %v2445_v52, %v872_v30  ;;  %v874_v50 = vpop.f32.mrb[65].mxu1 }
 0x196   :  { %v875_v2 = vpop.f32.mrb[66].mxu1  ;;  %v2722_v47 = vpop.f32.mrb[92].mxu0 }
 0x197   :  { %1452 = vst.msk [vmem:[%s2817_s3 + $0x7c] sm:$0xf] %vm1420_vm2, %v1673_v31  ;;  %v1105_v36 = vadd.f32 %v2610_v51, %v873_v20  ;;  %v876_v24 = vadd.f32 %v2445_v52, %v875_v2  ;;  %v877_v26 = vpop.f32.mrb[67].mxu1  ;;  %v1816_v54 = vpop.f32.mrb[93].mxu0 }
 0x198   :  { %v2724_v55 = vpop.f32.mrb[94].mxu0 }
 0x199   :  { %v1206_v40 = vmax.f32 %v1105_v36, 0.0  ;;  %v1108_v42 = vadd.f32 %v2612_v59, %v876_v24  ;;  %v1817_v10 = vpop.f32.mrb[95].mxu0 }
 0x19b   :  { %v1674_v29 = vpack.c.bf16 %v1206_v40, %v1206_v40  ;;  %v1207_v53 = vmax.f32 %v1108_v42, 0.0 }
 0x19c   :  { %v880_v49 = vpop.f32.mrb[68].mxu1 }
 0x19d   :  { %1453 = vst.msk [vmem:[%s2817_s3 + $0x80] sm:$0xf] %vm1420_vm2, %v1674_v29  ;;  %v1675_v51 = vpack.c.bf16 %v1207_v53, %v1207_v53  ;;  %v881_v35 = vadd.f32 %v2445_v52, %v880_v49  ;;  %v882_v56 = vpop.f32.mrb[69].mxu1 }
 0x19e   :  { %v883_v38 = vpop.f32.mrb[70].mxu1  ;;  %v2738_v4 = vpop.f32.mrb[96].mxu0 }
 0x19f   :  { %1454 = vst.msk [vmem:[%s2817_s3 + $0x84] sm:$0xf] %vm1420_vm2, %v1675_v51  ;;  %v1113_v59 = vadd.f32 %v2626_v6, %v881_v35  ;;  %v884_v39 = vadd.f32 %v2445_v52, %v883_v38  ;;  %v885_v43 = vpop.f32.mrb[71].mxu1  ;;  %v1820_v7 = vpop.f32.mrb[97].mxu0 }
 0x1a0   :  { %v1171_v9 = vpop.f32.mrb[98].mxu0 }
 0x1a1   :  { %v1208_v62 = vmax.f32 %v1113_v59, 0.0  ;;  %v1116_v63 = vadd.f32 %v2628_v12, %v884_v39  ;;  %v1821_v25 = vpop.f32.mrb[99].mxu0 }
 0x1a3   :  { %v1676_v41 = vpack.c.bf16 %v1208_v62, %v1208_v62  ;;  %v1209_v3 = vmax.f32 %v1116_v63, 0.0 }
 0x1a4   :  { %v888_v5 = vpop.f32.mrb[72].mxu1 }
 0x1a5   :  { %1455 = vst.msk [vmem:[%s2817_s3 + $0x88] sm:$0xf] %vm1420_vm2, %v1676_v41  ;;  %v1677_v6 = vpack.c.bf16 %v1209_v3, %v1209_v3  ;;  %v889_v58 = vadd.f32 %v2445_v52, %v888_v5  ;;  %v890_v8 = vpop.f32.mrb[73].mxu1 }
 0x1a6   :  { %v891_v61 = vpop.f32.mrb[74].mxu1 }
 0x1a7   :  { %1456 = vst.msk [vmem:[%s2817_s3 + $0x8c] sm:$0xf] %vm1420_vm2, %v1677_v6  ;;  %v1121_v12 = vadd.f32 %v2642_v22, %v889_v58  ;;  %v892_v44 = vadd.f32 %v2445_v52, %v891_v61  ;;  %v893_v0 = vpop.f32.mrb[75].mxu1 }
 0x1a9   :  { %v1210_v15 = vmax.f32 %v1121_v12, 0.0  ;;  %v1124_v16 = vadd.f32 %v2644_v27, %v892_v44 }
 0x1ab   :  { %v1678_v46 = vpack.c.bf16 %v1210_v15, %v1210_v15  ;;  %v1211_v19 = vmax.f32 %v1124_v16, 0.0 }
 0x1ac   :  { %v896_v21 = vpop.f32.mrb[76].mxu1 }
 0x1ad   :  { %1457 = vst.msk [vmem:[%s2817_s3 + $0x90] sm:$0xf] %vm1420_vm2, %v1678_v46  ;;  %v1679_v11 = vpack.c.bf16 %v1211_v19, %v1211_v19  ;;  %v897_v22 = vadd.f32 %v2445_v52, %v896_v21  ;;  %v898_v23 = vpop.f32.mrb[77].mxu1 }
 0x1ae   :  { %v899_v14 = vpop.f32.mrb[78].mxu1 }
 0x1af   :  { %1458 = vst.msk [vmem:[%s2817_s3 + $0x94] sm:$0xf] %vm1420_vm2, %v1679_v11  ;;  %v1129_v27 = vadd.f32 %v2658_v37, %v897_v22  ;;  %v900_v48 = vadd.f32 %v2445_v52, %v899_v14  ;;  %v901_v17 = vpop.f32.mrb[79].mxu1 }
 0x1b1   :  { %v1212_v30 = vmax.f32 %v1129_v27, 0.0  ;;  %v1132_v31 = vadd.f32 %v2660_v45, %v900_v48 }
 0x1b3   :  { %v1680_v20 = vpack.c.bf16 %v1212_v30, %v1212_v30  ;;  %v1213_v50 = vmax.f32 %v1132_v31, 0.0 }
 0x1b4   :  { %v904_v34 = vpop.f32.mrb[80].mxu1 }
 0x1b5   :  { %1459 = vst.msk [vmem:[%s2817_s3 + $0x98] sm:$0xf] %vm1420_vm2, %v1680_v20  ;;  %v1681_v2 = vpack.c.bf16 %v1213_v50, %v1213_v50  ;;  %v905_v36 = vadd.f32 %v2445_v52, %v904_v34  ;;  %v906_v24 = vpop.f32.mrb[81].mxu1 }
 0x1b6   :  { %v907_v26 = vpop.f32.mrb[82].mxu1 }
 0x1b7   :  { %1460 = vst.msk [vmem:[%s2817_s3 + $0x9c] sm:$0xf] %vm1420_vm2, %v1681_v2  ;;  %v1137_v37 = vadd.f32 %v2674_v60, %v905_v36  ;;  %v908_v45 = vadd.f32 %v2445_v52, %v907_v26  ;;  %v909_v40 = vpop.f32.mrb[83].mxu1 }
 0x1b9   :  { %v1214_v42 = vmax.f32 %v1137_v37, 0.0  ;;  %v1140_v29 = vadd.f32 %v2676_v1, %v908_v45 }
 0x1bb   :  { %v1682_v53 = vpack.c.bf16 %v1214_v42, %v1214_v42  ;;  %v1215_v32 = vmax.f32 %v1140_v29, 0.0 }
 0x1bc   :  { %v912_v49 = vpop.f32.mrb[84].mxu1 }
 0x1bd   :  { %1461 = vst.msk [vmem:[%s2817_s3 + $0xa0] sm:$0xf] %vm1420_vm2, %v1682_v53  ;;  %v1683_v51 = vpack.c.bf16 %v1215_v32, %v1215_v32  ;;  %v913_v35 = vadd.f32 %v2445_v52, %v912_v49  ;;  %v914_v56 = vpop.f32.mrb[85].mxu1 }
 0x1be   :  { %v915_v57 = vpop.f32.mrb[86].mxu1 }
 0x1bf   :  { %1462 = vst.msk [vmem:[%s2817_s3 + $0xa4] sm:$0xf] %vm1420_vm2, %v1683_v51  ;;  %v1145_v60 = vadd.f32 %v2690_v13, %v913_v35  ;;  %v916_v1 = vadd.f32 %v2445_v52, %v915_v57  ;;  %v917_v38 = vpop.f32.mrb[87].mxu1 }
 0x1c1   :  { %v1216_v59 = vmax.f32 %v1145_v60, 0.0  ;;  %v1148_v39 = vadd.f32 %v2692_v18, %v916_v1 }
 0x1c3   :  { %v1684_v43 = vpack.c.bf16 %v1216_v59, %v1216_v59  ;;  %v1217_v62 = vmax.f32 %v1148_v39, 0.0 }
 0x1c4   :  { %v920_v63 = vpop.f32.mrb[88].mxu1 }
 0x1c5   :  { %1463 = vst.msk [vmem:[%s2817_s3 + $0xa8] sm:$0xf] %vm1420_vm2, %v1684_v43  ;;  %v1685_v41 = vpack.c.bf16 %v1217_v62, %v1217_v62  ;;  %v921_v3 = vadd.f32 %v2445_v52, %v920_v63  ;;  %v922_v54 = vpop.f32.mrb[89].mxu1 }
 0x1c6   :  { %v923_v5 = vpop.f32.mrb[90].mxu1 }
 0x1c7   :  { %1464 = vst.msk [vmem:[%s2817_s3 + $0xac] sm:$0xf] %vm1420_vm2, %v1685_v41  ;;  %v1153_v13 = vadd.f32 %v2706_v28, %v921_v3  ;;  %v924_v18 = vadd.f32 %v2445_v52, %v923_v5  ;;  %v925_v6 = vpop.f32.mrb[91].mxu1 }
 0x1c9   :  { %v1218_v58 = vmax.f32 %v1153_v13, 0.0  ;;  %v1156_v8 = vadd.f32 %v2708_v33, %v924_v18 }
 0x1cb   :  { %v1686_v10 = vpack.c.bf16 %v1218_v58, %v1218_v58  ;;  %v1219_v61 = vmax.f32 %v1156_v8, 0.0 }
 0x1cc   :  { %v928_v12 = vpop.f32.mrb[92].mxu1 }
 0x1cd   :  { %1465 = vst.msk [vmem:[%s2817_s3 + $0xb0] sm:$0xf] %vm1420_vm2, %v1686_v10  ;;  %v1687_v44 = vpack.c.bf16 %v1219_v61, %v1219_v61  ;;  %v929_v0 = vadd.f32 %v2445_v52, %v928_v12  ;;  %v930_v15 = vpop.f32.mrb[93].mxu1 }
 0x1ce   :  { %v931_v16 = vpop.f32.mrb[94].mxu1 }
 0x1cf   :  { %1466 = vst.msk [vmem:[%s2817_s3 + $0xb4] sm:$0xf] %vm1420_vm2, %v1687_v44  ;;  %v1161_v28 = vadd.f32 %v2722_v47, %v929_v0  ;;  %v932_v33 = vadd.f32 %v2445_v52, %v931_v16  ;;  %v933_v46 = vpop.f32.mrb[95].mxu1 }
 0x1d1   :  { %v1220_v19 = vmax.f32 %v1161_v28, 0.0  ;;  %v1164_v7 = vadd.f32 %v2724_v55, %v932_v33 }
 0x1d3   :  { %v1688_v21 = vpack.c.bf16 %v1220_v19, %v1220_v19  ;;  %v1221_v9 = vmax.f32 %v1164_v7, 0.0 }
 0x1d4   :  { %v936_v11 = vpop.f32.mrb[96].mxu1 }
 0x1d5   :  { %1467 = vst.msk [vmem:[%s2817_s3 + $0xb8] sm:$0xf] %vm1420_vm2, %v1688_v21  ;;  %v1689_v22 = vpack.c.bf16 %v1221_v9, %v1221_v9  ;;  %v937_v23 = vadd.f32 %v2445_v52, %v936_v11  ;;  %v938_v25 = vpop.f32.mrb[97].mxu1 }
 0x1d6   :  { %v939_v14 = vpop.f32.mrb[98].mxu1 }
 0x1d7   :  { %1468 = vst.msk [vmem:[%s2817_s3 + $0xbc] sm:$0xf] %vm1420_vm2, %v1689_v22  ;;  %v1169_v47 = vadd.f32 %v2738_v4, %v937_v23  ;;  %v940_v55 = vpop.f32.mrb[99].mxu1 }
 0x1d9   :  { %v1222_v27 = vmax.f32 %v1169_v47, 0.0 }
 0x1db   :  { %v1690_v48 = vpack.c.bf16 %v1222_v27, %v1222_v27 }
 0x1dd   :  { %1469 = vst.msk [vmem:[%s2817_s3 + $0xc0] sm:$0xf] %vm1420_vm2, %v1690_v48 }

// kernel: vae_forward.10
= control target key start
LH: loop header
LB: loop body
LE: loop exit
PB: predicated region body
PF: predicated region fallthrough
CT: control target
= control target key end

     0   :  { %v1248_v34 = vmov 0.0   ;;  %vm1249_vm0 = vmmov 0   ;;  %vm516_vm1 = vcmask 523264   ;;  %vm868_vm2 = vcmask 519168   ;;  %s1599_s1 = inlined_call_operand.vmem [shape: bf16[576,64], index: 1, kind: input, shape index: {}]   ;;  %s1600_s0 = inlined_call_operand.vmem [shape: bf16[98,576], index: 0, kind: input, shape index: {}]   ;;  %s1601_s2 = inlined_call_operand.vmem [shape: f32[1,64], index: 2, kind: input, shape index: {}]   ;;  %s1602_s3 = inlined_call_operand.vmem [shape: bf16[98,64], index: 3, kind: output, shape index: {}]  }
   0x1   :  { %v1165_v0 = vld [vmem:[%s1599_s1 + $0x40] sm:$0xff]   ;;  %v1169_v4 = vld [vmem:[%s1599_s1 + $0x48] sm:$0xff]   ;;  %v1173_v8 = vld [vmem:[%s1599_s1 + $0x50] sm:$0xff]   ;;  %vm881_vm3 = vcmask 516096  }
   0x2   :  { %v1166_v1 = vld [vmem:[%s1599_s1 + $0xc0] sm:$0xff]   ;;  %992 = vmatprep.subr.bf16.mxu0 %v1165_v0  ;;  %v1170_v5 = vld [vmem:[%s1599_s1 + $0xc8] sm:$0xff]   ;;  %v1174_v9 = vld [vmem:[%s1599_s1 + $0xd0] sm:$0xff]  }
   0x3   :  { %v1167_v2 = vld [vmem:[%s1599_s1] sm:$0xff]   ;;  %1050 = vmatprep.subr.bf16.mxu1 %v1166_v1  ;;  %v1171_v6 = vld [vmem:[%s1599_s1 + $0x8] sm:$0xff]   ;;  %v1175_v10 = vld [vmem:[%s1599_s1 + $0x10] sm:$0xff]  }
   0x4   :  { %v1168_v3 = vld [vmem:[%s1599_s1 + $0x80] sm:$0xff]   ;;  %993 = vmatpush3.bf16.msra.mxu0 %v1167_v2  ;;  %v1172_v7 = vld [vmem:[%s1599_s1 + $0x88] sm:$0xff]   ;;  %v1176_v11 = vld [vmem:[%s1599_s1 + $0x90] sm:$0xff]  }
   0x5   :  { %1051 = vmatpush3.bf16.msra.mxu1 %v1168_v3  ;;  %994 = vmatprep.subr.bf16.mxu0 %v1169_v4  ;;  %v1177_v12 = vld [vmem:[%s1599_s1 + $0x58] sm:$0xff]   ;;  %v1181_v16 = vld [vmem:[%s1599_s1 + $0x60] sm:$0xff]   ;;  %v1185_v20 = vld [vmem:[%s1599_s1 + $0x68] sm:$0xff]  }
   0x6   :  { %1052 = vmatprep.subr.bf16.mxu1 %v1170_v5  ;;  %v1178_v13 = vld [vmem:[%s1599_s1 + $0xd8] sm:$0xff]   ;;  %v1182_v17 = vld [vmem:[%s1599_s1 + $0xe0] sm:$0xff]   ;;  %v1186_v21 = vld [vmem:[%s1599_s1 + $0xe8] sm:$0xff]  }
   0x7   :  { %v1179_v14 = vld [vmem:[%s1599_s1 + $0x18] sm:$0xff]   ;;  %v1183_v18 = vld [vmem:[%s1599_s1 + $0x20] sm:$0xff]   ;;  %v1187_v22 = vld [vmem:[%s1599_s1 + $0x28] sm:$0xff]  }
   0x8   :  { %995 = vmatpush3.bf16.msra.mxu0 %v1171_v6  ;;  %v1180_v15 = vld [vmem:[%s1599_s1 + $0x98] sm:$0xff]   ;;  %v1184_v19 = vld [vmem:[%s1599_s1 + $0xa0] sm:$0xff]   ;;  %v1188_v23 = vld [vmem:[%s1599_s1 + $0xa8] sm:$0xff]  }
   0x9   :  { %1053 = vmatpush3.bf16.msra.mxu1 %v1172_v7  ;;  %996 = vmatprep.subr.bf16.mxu0 %v1173_v8  ;;  %v1189_v24 = vld [vmem:[%s1599_s1 + $0x70] sm:$0xff]   ;;  %v1193_v28 = vld [vmem:[%s1599_s1 + $0x78] sm:$0xff]   ;;  %v1202_v36 = vld [vmem:[%s1600_s0 + $0xc] ss:$20 sps:$4 sm:$0xff]  }
   0xa   :  { %1054 = vmatprep.subr.bf16.mxu1 %v1174_v9  ;;  %v1190_v25 = vld [vmem:[%s1599_s1 + $0xf0] sm:$0xff]   ;;  %v1194_v29 = vld [vmem:[%s1599_s1 + $0xf8] sm:$0xff]   ;;  %v1203_v37 = vld [vmem:[%s1599_s1 + $0x100] sm:$0xff]   ;;  %658 = vmatprep.mubr.bf16.mxu1 %v1202_v36 }
   0xb   :  { %v1191_v26 = vld [vmem:[%s1599_s1 + $0x30] sm:$0xff]   ;;  %v1195_v30 = vld [vmem:[%s1599_s1 + $0x38] sm:$0xff]   ;;  %v1204_v38 = vld [vmem:[%s1600_s0 + $0x2c] ss:$20 sps:$4 sm:$0xff]  }
   0xc   :  { %997 = vmatpush3.bf16.msra.mxu0 %v1175_v10  ;;  %v1192_v27 = vld [vmem:[%s1599_s1 + $0xb0] sm:$0xff]   ;;  %v1196_v31 = vld [vmem:[%s1599_s1 + $0xb8] sm:$0xff]   ;;  %v1214_v43 = vld [vmem:[%s1599_s1 + $0x108] sm:$0xff]  }
   0xd   :  { %1055 = vmatpush3.bf16.msra.mxu1 %v1176_v11  ;;  %998 = vmatprep.subr.bf16.mxu0 %v1177_v12  ;;  %v1197_v32 = vld [vmem:[%s1600_s0] ss:$20 sps:$4 sm:$0xff]   ;;  %v1199_v33 = vld [vmem:[%s1600_s0 + $0x4] ss:$20 sps:$4 sm:$0xff]   ;;  %v1200_v35 = vld [vmem:[%s1600_s0 + $0x8] ss:$20 sps:$4 sm:$0xff]  }
   0xe   :  { %1056 = vmatprep.subr.bf16.mxu1 %v1178_v13  ;;  %570 = vmatprep.mubr.bf16.mxu0 %v1199_v33  ;;  %v1206_v39 = vld [vmem:[%s1600_s0 + $0x34] ss:$20 sps:$4 sm:$0xff]   ;;  %v1209_v41 = vld [vmem:[%s1600_s0 + $0x30] ss:$20 sps:$4 sm:$0xff]   ;;  %v1216_v47 = vld [vmem:[%s1600_s0 + $0x58] ss:$20 sps:$4 sm:$0xff]  }
   0xf   :  { %v1208_v40 = vld [vmem:[%s1600_s0 + $0x28] ss:$20 sps:$4 sm:$0xff]   ;;  %v1223_v45 = vld [vmem:[%s1599_s1 + $0x110] sm:$0xff]   ;;  %v1219_v49 = vld [vmem:[%s1600_s0 + $0x84] ss:$20 sps:$4 sm:$0xff]  }
  0x10   :  { %999 = vmatpush3.bf16.msra.mxu0 %v1179_v14  ;;  %v1210_v42 = vld [vmem:[%s1600_s0 + $0x54] ss:$20 sps:$4 sm:$0xff]   ;;  %v1212_v44 = vld [vmem:[%s1600_s0 + $0x5c] ss:$20 sps:$4 sm:$0xff]   ;;  %v1221_v51 = vld [vmem:[%s1600_s0 + $0x78] ss:$20 sps:$4 sm:$0xff]  }
  0x11   :  { %1057 = vmatpush3.bf16.msra.mxu1 %v1180_v15  ;;  %1000 = vmatprep.subr.bf16.mxu0 %v1181_v16  ;;  %v1215_v46 = vld [vmem:[%s1600_s0 + $0x50] ss:$20 sps:$4 sm:$0xff]   ;;  %v1236_v50 = vld [vmem:[%s1599_s1 + $0x118] sm:$0xff]   ;;  %v1222_v52 = vld [vmem:[%s1600_s0 + $0x80] ss:$20 sps:$4 sm:$0xff]  }
  0x12   :  { %1058 = vmatprep.subr.bf16.mxu1 %v1182_v17  ;;  %v1217_v48 = vld [vmem:[%s1600_s0 + $0x7c] ss:$20 sps:$4 sm:$0xff]   ;;  %v1224_v53 = vld [vmem:[%s1600_s0 + $0xa4] ss:$20 sps:$4 sm:$0xff]   ;;  %v1226_v54 = vld [vmem:[%s1600_s0 + $0xac] ss:$20 sps:$4 sm:$0xff]  }
  0x13   :  { %v1228_v55 = vld [vmem:[%s1600_s0 + $0xa0] ss:$20 sps:$4 sm:$0xff]   ;;  %v1229_v56 = vld [vmem:[%s1600_s0 + $0xa8] ss:$20 sps:$4 sm:$0xff]   ;;  %v1235_v62 = vld [vmem:[%s1600_s0 + $0xd0] ss:$20 sps:$4 sm:$0xff]  }
  0x14   :  { %1001 = vmatpush3.bf16.msra.mxu0 %v1183_v18  ;;  %v1230_v57 = vld [vmem:[%s1600_s0 + $0xcc] ss:$20 sps:$4 sm:$0xff]   ;;  %v1232_v58 = vld [vmem:[%s1600_s0 + $0xd4] ss:$20 sps:$4 sm:$0xff]   ;;  %v52_v60 = vld [vmem:[%s1600_s0 + $0xf8] sm:$0x11] }
  0x15   :  { %1059 = vmatpush3.bf16.msra.mxu1 %v1184_v19  ;;  %1002 = vmatprep.subr.bf16.mxu0 %v1185_v20  ;;  %v51_v59 = vld [vmem:[%s1600_s0 + $0xf0] sm:$0x11]  ;;  %v1234_v61 = vld [vmem:[%s1600_s0 + $0xc8] ss:$20 sps:$4 sm:$0xff]   ;;  %v921_v0 = vcombine.high %v52_v60, %v52_v60  ;;  %v920_v2 = vcombine.low %v52_v60, %v52_v60  ;;  %v1243_v5 = vld [vmem:[%s1600_s0 + $0x38] ss:$20 sps:$4 sm:$0xff]  }
  0x16   :  { %1060 = vmatprep.subr.bf16.mxu1 %v1186_v21  ;;  %v919_v63 = vcombine.high %v51_v59, %v51_v59  ;;  %v918_v1 = vcombine.low %v51_v59, %v51_v59  ;;  %v1241_v3 = vld [vmem:[%s1600_s0 + $0x10] ss:$20 sps:$4 sm:$0xff]   ;;  %v1244_v6 = vld [vmem:[%s1600_s0 + $0xd8] ss:$20 sps:$4 sm:$0xff]   ;;  %v1245_v7 = vld [vmem:[%s1600_s0 + $0x60] ss:$20 sps:$4 sm:$0xff]  }
  0x17   :  { %v1242_v4 = vld [vmem:[%s1600_s0 + $0xb0] ss:$20 sps:$4 sm:$0xff]   ;;  %v1246_v8 = vld [vmem:[%s1600_s0 + $0x100] ss:$0 sps:$4 sm:$0x11]  }
  0x18   :  { %1003 = vmatpush3.bf16.msra.mxu0 %v1187_v22  ;;  %v1247_v9 = vld [vmem:[%s1600_s0 + $0x88] ss:$20 sps:$4 sm:$0xff]   ;;  %v1509_v11 = vld [vmem:[%s1601_s2] ss:$0 sm:$0xff] }
  0x19   :  { %1061 = vmatpush3.bf16.msra.mxu1 %v1188_v23  ;;  %1004 = vmatprep.subr.bf16.mxu0 %v1189_v24 }
  0x1a   :  { %1062 = vmatprep.subr.bf16.mxu1 %v1190_v25 }
  0x1c   :  { %1005 = vmatpush3.bf16.msra.mxu0 %v1191_v26 }
  0x1d   :  { %1063 = vmatpush3.bf16.msra.mxu1 %v1192_v27  ;;  %1006 = vmatprep.subr.bf16.mxu0 %v1193_v28 }
  0x1e   :  { %1064 = vmatprep.subr.bf16.mxu1 %v1194_v29 }
  0x20   :  { %1007 = vmatpush3.bf16.msra.mxu0 %v1195_v30 }
  0x21   :  { %1065 = vmatpush3.bf16.msra.mxu1 %v1196_v31  ;;  %1119 = vmatprep.subr.bf16.mxu0 %v1248_v34 }
  0x22   :  { %1155 = vmatprep.subr.bf16.mxu1 %v1248_v34 }
  0x23   :  { %571 = vmatmul.mubr.bf16.vlgmr.msra.gmra.mrb[0].mxu0 %v1197_v32 }
  0x24   :  { %659 = vmatmul.mubr.bf16.vlgmr.msra.gmra.mrb[0].mxu1 %v1200_v35  ;;  %1120 = vmatpush3.bf16.msra.mxu0 %v1203_v37 }
  0x25   :  { %578 = vmatprep.mubr.bf16.mxu0 %v1204_v38  ;;  %1159 = vmatpush3.bf16.msra.mxu1 %v1203_v37 }
  0x26   :  { %666 = vmatprep.mubr.bf16.mxu1 %v1206_v39  ;;  %1121 = vmatprep.subr.bf16.mxu0 %v1248_v34 }
  0x27   :  { %1156 = vmatprep.subr.bf16.mxu1 %v1248_v34 }
  0x28   :  { %1122 = vmatpush3.bf16.msra.mxu0 %v1214_v43 }
  0x29   :  { %1160 = vmatpush3.bf16.msra.mxu1 %v1214_v43  ;;  %1123 = vmatprep.subr.bf16.mxu0 %v1248_v34 }
  0x2a   :  { %1157 = vmatprep.subr.bf16.mxu1 %v1248_v34 }
  0x2b   :  { %579 = vmatmul.mubr.bf16.gmra.mrb[4].mxu0 %v1208_v40 }
  0x2c   :  { %667 = vmatmul.mubr.bf16.gmra.mrb[4].mxu1 %v1209_v41  ;;  %586 = vmatprep.mubr.bf16.mxu0 %v1210_v42 }
  0x2d   :  { %674 = vmatprep.mubr.bf16.mxu1 %v1212_v44  ;;  %1124 = vmatpush3.bf16.msra.mxu0 %v1223_v45 }
  0x2e   :  { %1161 = vmatpush3.bf16.msra.mxu1 %v1223_v45  ;;  %1125 = vmatprep.subr.bf16.mxu0 %v1248_v34 }
  0x2f   :  { %1158 = vmatprep.subr.bf16.mxu1 %v1248_v34 }
  0x31   :  { %1126 = vmatpush3.bf16.msra.mxu0 %v1236_v50 }
  0x32   :  { %1162 = vmatpush3.bf16.msra.mxu1 %v1236_v50 }
  0x33   :  { %587 = vmatmul.mubr.bf16.gmra.mrb[8].mxu0 %v1215_v46 }
  0x34   :  { %675 = vmatmul.mubr.bf16.gmra.mrb[8].mxu1 %v1216_v47  ;;  %594 = vmatprep.mubr.bf16.mxu0 %v1217_v48 }
  0x35   :  { %682 = vmatprep.mubr.bf16.mxu1 %v1219_v49 }
  0x3b   :  { %595 = vmatmul.mubr.bf16.gmra.mrb[12].mxu0 %v1221_v51 }
  0x3c   :  { %683 = vmatmul.mubr.bf16.gmra.mrb[12].mxu1 %v1222_v52  ;;  %602 = vmatprep.mubr.bf16.mxu0 %v1224_v53 }
  0x3d   :  { %690 = vmatprep.mubr.bf16.mxu1 %v1226_v54 }
  0x43   :  { %603 = vmatmul.mubr.bf16.gmra.mrb[16].mxu0 %v1228_v55 }
  0x44   :  { %691 = vmatmul.mubr.bf16.gmra.mrb[16].mxu1 %v1229_v56  ;;  %610 = vmatprep.mubr.bf16.mxu0 %v1230_v57 }
  0x45   :  { %698 = vmatprep.mubr.bf16.mxu1 %v1232_v58 }
  0x4b   :  { %611 = vmatmul.mubr.bf16.gmra.mrb[20].mxu0 %v1234_v61 }
  0x4c   :  { %699 = vmatmul.mubr.bf16.gmra.mrb[20].mxu1 %v1235_v62  ;;  %618 = vmatprep.mubr.bf16.mxu0 %v919_v63 }
  0x4d   :  { %706 = vmatprep.mubr.bf16.mxu1 %v921_v0 }
  0x53   :  { %619 = vmatmul.mubr.bf16.gmra.mrb[24].mxu0 %v918_v1 }
  0x54   :  { %707 = vmatmul.mubr.bf16.gmra.mrb[24].mxu1 %v920_v2  ;;  %1127 = vmatprep.mubr.msk.bf16.mxu0 %vm1249_vm0, %v1248_v34 }
  0x55   :  { %1143 = vmatprep.mubr.msk.bf16.mxu1 %vm1249_vm0, %v1248_v34 }
  0x5b   :  { %1128 = vmatmul.mubr.msk.bf16.vlgmr.msra.gmra.mrb[28].mxu0 %vm516_vm1, %v1241_v3 }
  0x5c   :  { %1144 = vmatmul.mubr.msk.bf16.vlgmr.msra.gmra.mrb[28].mxu1 %vm516_vm1, %v1242_v4  ;;  %1131 = vmatprep.mubr.msk.bf16.mxu0 %vm1249_vm0, %v1248_v34 }
  0x5d   :  { %1147 = vmatprep.mubr.msk.bf16.mxu1 %vm1249_vm0, %v1248_v34 }
  0x63   :  { %1132 = vmatmul.mubr.msk.bf16.gmra.mrb[32].mxu0 %vm516_vm1, %v1243_v5 }
  0x64   :  { %1148 = vmatmul.mubr.msk.bf16.gmra.mrb[32].mxu1 %vm516_vm1, %v1244_v6  ;;  %1135 = vmatprep.mubr.msk.bf16.mxu0 %vm1249_vm0, %v1248_v34 }
  0x65   :  { %1151 = vmatprep.mubr.msk.bf16.mxu1 %vm1249_vm0, %v1248_v34 }
  0x6b   :  { %1136 = vmatmul.mubr.msk.bf16.gmra.mrb[36].mxu0 %vm516_vm1, %v1245_v7 }
  0x6c   :  { %1152 = vmatmul.mubr.msk.bf16.gmra.mrb[36].mxu1 %vm516_vm1, %v1246_v8  ;;  %1139 = vmatprep.mubr.msk.bf16.mxu0 %vm1249_vm0, %v1248_v34 }
  0x73   :  { %1140 = vmatmul.mubr.msk.bf16.gmra.mrb[40].mxu0 %vm516_vm1, %v1247_v9 }
  0xf6   :  { %v1008_v10 = vpop.f32.mrb[0].mxu0 }
  0xf7   :  { %v1009_v12 = vpop.f32.mrb[1].mxu0  ;;  %v1066_v13 = vpop.f32.mrb[0].mxu1 }
  0xf8   :  { %v1010_v14 = vadd.f32 %v1009_v12, %v1008_v10  ;;  %v1011_v15 = vpop.f32.mrb[2].mxu0  ;;  %v1067_v16 = vpop.f32.mrb[1].mxu1 }
  0xf9   :  { %v1012_v17 = vpop.f32.mrb[3].mxu0  ;;  %v1068_v18 = vadd.f32 %v1067_v16, %v1066_v13  ;;  %v1069_v19 = vpop.f32.mrb[2].mxu1 }
  0xfa   :  { %v573_v20 = vadd.f32 %v1010_v14, %v1509_v11  ;;  %v1013_v21 = vadd.f32 %v1012_v17, %v1011_v15  ;;  %v1070_v22 = vpop.f32.mrb[3].mxu1 }
  0xfb   :  { %v1071_v23 = vadd.f32 %v1070_v22, %v1069_v19 }
  0xfc   :  { %v576_v24 = vadd.f32 %v1013_v21, %v1509_v11  ;;  %v1513_v25 = vadd.f32 %v1068_v18, %v573_v20 }
  0xfe   :  { %v1014_v26 = vpop.f32.mrb[4].mxu0  ;;  %v1515_v27 = vadd.f32 %v1071_v23, %v576_v24 }
  0xff   :  { %v1015_v28 = vpop.f32.mrb[5].mxu0  ;;  %v1072_v29 = vpop.f32.mrb[4].mxu1 }
 0x100   :  { %v1016_v30 = vadd.f32 %v1015_v28, %v1014_v26  ;;  %v1017_v31 = vpop.f32.mrb[6].mxu0  ;;  %v1073_v32 = vpop.f32.mrb[5].mxu1 }
 0x101   :  { %v1018_v33 = vpop.f32.mrb[7].mxu0  ;;  %v1074_v34 = vadd.f32 %v1073_v32, %v1072_v29  ;;  %v1075_v35 = vpop.f32.mrb[6].mxu1 }
 0x102   :  { %v581_v36 = vadd.f32 %v1016_v30, %v1509_v11  ;;  %v1019_v37 = vadd.f32 %v1018_v33, %v1017_v31  ;;  %v1076_v38 = vpop.f32.mrb[7].mxu1 }
 0x103   :  { %v1077_v39 = vadd.f32 %v1076_v38, %v1075_v35 }
 0x104   :  { %v584_v40 = vadd.f32 %v1019_v37, %v1509_v11  ;;  %v1519_v41 = vadd.f32 %v1074_v34, %v581_v36 }
 0x106   :  { %v1020_v42 = vpop.f32.mrb[8].mxu0  ;;  %v1521_v43 = vadd.f32 %v1077_v39, %v584_v40 }
 0x107   :  { %v1021_v44 = vpop.f32.mrb[9].mxu0  ;;  %v1078_v45 = vpop.f32.mrb[8].mxu1 }
 0x108   :  { %v1022_v46 = vadd.f32 %v1021_v44, %v1020_v42  ;;  %v1023_v47 = vpop.f32.mrb[10].mxu0  ;;  %v1079_v48 = vpop.f32.mrb[9].mxu1 }
 0x109   :  { %v1024_v49 = vpop.f32.mrb[11].mxu0  ;;  %v1080_v50 = vadd.f32 %v1079_v48, %v1078_v45  ;;  %v1081_v51 = vpop.f32.mrb[10].mxu1 }
 0x10a   :  { %v589_v52 = vadd.f32 %v1022_v46, %v1509_v11  ;;  %v1025_v53 = vadd.f32 %v1024_v49, %v1023_v47  ;;  %v1082_v54 = vpop.f32.mrb[11].mxu1 }
 0x10b   :  { %v1083_v55 = vadd.f32 %v1082_v54, %v1081_v51 }
 0x10c   :  { %v592_v56 = vadd.f32 %v1025_v53, %v1509_v11  ;;  %v1525_v57 = vadd.f32 %v1080_v50, %v589_v52 }
 0x10e   :  { %v1026_v58 = vpop.f32.mrb[12].mxu0  ;;  %v1527_v59 = vadd.f32 %v1083_v55, %v592_v56 }
 0x10f   :  { %v1027_v60 = vpop.f32.mrb[13].mxu0  ;;  %v1084_v61 = vpop.f32.mrb[12].mxu1 }
 0x110   :  { %v1028_v62 = vadd.f32 %v1027_v60, %v1026_v58  ;;  %v1029_v63 = vpop.f32.mrb[14].mxu0  ;;  %v1085_v0 = vpop.f32.mrb[13].mxu1 }
 0x111   :  { %v1030_v1 = vpop.f32.mrb[15].mxu0  ;;  %v1086_v2 = vadd.f32 %v1085_v0, %v1084_v61  ;;  %v1087_v3 = vpop.f32.mrb[14].mxu1 }
 0x112   :  { %v597_v4 = vadd.f32 %v1028_v62, %v1509_v11  ;;  %v1031_v5 = vadd.f32 %v1030_v1, %v1029_v63  ;;  %v1088_v6 = vpop.f32.mrb[15].mxu1 }
 0x113   :  { %v1089_v7 = vadd.f32 %v1088_v6, %v1087_v3 }
 0x114   :  { %v600_v8 = vadd.f32 %v1031_v5, %v1509_v11  ;;  %v1531_v9 = vadd.f32 %v1086_v2, %v597_v4 }
 0x116   :  { %v1032_v10 = vpop.f32.mrb[16].mxu0  ;;  %v1533_v12 = vadd.f32 %v1089_v7, %v600_v8 }
 0x117   :  { %v1033_v13 = vpop.f32.mrb[17].mxu0  ;;  %v1090_v14 = vpop.f32.mrb[16].mxu1 }
 0x118   :  { %v1034_v15 = vadd.f32 %v1033_v13, %v1032_v10  ;;  %v1035_v16 = vpop.f32.mrb[18].mxu0  ;;  %v1091_v17 = vpop.f32.mrb[17].mxu1 }
 0x119   :  { %v1036_v18 = vpop.f32.mrb[19].mxu0  ;;  %v1092_v19 = vadd.f32 %v1091_v17, %v1090_v14  ;;  %v1093_v20 = vpop.f32.mrb[18].mxu1 }
 0x11a   :  { %v605_v21 = vadd.f32 %v1034_v15, %v1509_v11  ;;  %v1037_v22 = vadd.f32 %v1036_v18, %v1035_v16  ;;  %v1094_v23 = vpop.f32.mrb[19].mxu1 }
 0x11b   :  { %v1095_v24 = vadd.f32 %v1094_v23, %v1093_v20 }
 0x11c   :  { %v608_v26 = vadd.f32 %v1037_v22, %v1509_v11  ;;  %v693_v28 = vadd.f32 %v1092_v19, %v605_v21 }
 0x11e   :  { %v1038_v29 = vpop.f32.mrb[20].mxu0  ;;  %v696_v30 = vadd.f32 %v1095_v24, %v608_v26 }
 0x11f   :  { %v1039_v31 = vpop.f32.mrb[21].mxu0  ;;  %v1096_v32 = vpop.f32.mrb[20].mxu1 }
 0x120   :  { %v1040_v33 = vadd.f32 %v1039_v31, %v1038_v29  ;;  %v1041_v34 = vpop.f32.mrb[22].mxu0  ;;  %v1097_v35 = vpop.f32.mrb[21].mxu1 }
 0x121   :  { %v1042_v36 = vpop.f32.mrb[23].mxu0  ;;  %v1098_v37 = vadd.f32 %v1097_v35, %v1096_v32  ;;  %v1099_v38 = vpop.f32.mrb[22].mxu1 }
 0x122   :  { %v613_v39 = vadd.f32 %v1040_v33, %v1509_v11  ;;  %v1043_v40 = vadd.f32 %v1042_v36, %v1041_v34  ;;  %v1100_v42 = vpop.f32.mrb[23].mxu1 }
 0x123   :  { %v1101_v44 = vadd.f32 %v1100_v42, %v1099_v38 }
 0x124   :  { %v616_v45 = vadd.f32 %v1043_v40, %v1509_v11  ;;  %v701_v46 = vadd.f32 %v1098_v37, %v613_v39 }
 0x126   :  { %v1044_v47 = vpop.f32.mrb[24].mxu0  ;;  %v704_v48 = vadd.f32 %v1101_v44, %v616_v45 }
 0x127   :  { %v1045_v49 = vpop.f32.mrb[25].mxu0  ;;  %v1102_v50 = vpop.f32.mrb[24].mxu1 }
 0x128   :  { %v1046_v51 = vadd.f32 %v1045_v49, %v1044_v47  ;;  %v1047_v52 = vpop.f32.mrb[26].mxu0  ;;  %v1103_v53 = vpop.f32.mrb[25].mxu1 }
 0x129   :  { %v1048_v54 = vpop.f32.mrb[27].mxu0  ;;  %v1104_v55 = vadd.f32 %v1103_v53, %v1102_v50  ;;  %v1105_v56 = vpop.f32.mrb[26].mxu1 }
 0x12a   :  { %v621_v58 = vadd.f32 %v1046_v51, %v1509_v11  ;;  %v1106_v60 = vpop.f32.mrb[27].mxu1 }
 0x12c   :  { %v709_v61 = vadd.f32 %v1104_v55, %v621_v58 }
 0x12e   :  { %v748_v62 = vpop.f32.mrb[28].mxu0 }
 0x12f   :  { %v749_v63 = vadd.f32 %v748_v62, %v1513_v25  ;;  %v780_v0 = vpop.f32.mrb[28].mxu1  ;;  %v1129_v1 = vpop.f32.mrb[29].mxu0 }
 0x130   :  { %v781_v2 = vadd.f32 %v780_v0, %v693_v28  ;;  %v1145_v3 = vpop.f32.mrb[29].mxu1  ;;  %v751_v4 = vpop.f32.mrb[30].mxu0 }
 0x131   :  { %v802_v5 = vmax.f32 %v749_v63, 0.0  ;;  %v752_v6 = vadd.f32 %v751_v4, %v1515_v27  ;;  %v783_v7 = vpop.f32.mrb[30].mxu1  ;;  %v1130_v8 = vpop.f32.mrb[31].mxu0 }
 0x132   :  { %v810_v10 = vmax.f32 %v781_v2, 0.0  ;;  %v784_v13 = vadd.f32 %v783_v7, %v696_v30  ;;  %v1146_v14 = vpop.f32.mrb[31].mxu1 }
 0x133   :  { %v979_v11 = vpack.c.bf16 %v802_v5, %v802_v5  ;;  %v803_v15 = vmax.f32 %v752_v6, 0.0 }
 0x134   :  { %v987_v16 = vpack.c.bf16 %v810_v10, %v810_v10  ;;  %v811_v17 = vmax.f32 %v784_v13, 0.0 }
 0x135   :  { %869 = vst.msk [vmem:[%s1602_s3] sm:$0xf] %vm868_vm2, %v979_v11  ;;  %v980_v25 = vpack.c.bf16 %v803_v15, %v803_v15 }
 0x136   :  { %877 = vst.msk [vmem:[%s1602_s3 + $0x20] sm:$0xf] %vm868_vm2, %v987_v16  ;;  %v988_v27 = vpack.c.bf16 %v811_v17, %v811_v17  ;;  %v756_v18 = vpop.f32.mrb[32].mxu0 }
 0x137   :  { %870 = vst.msk [vmem:[%s1602_s3 + $0x4] sm:$0xf] %vm868_vm2, %v980_v25  ;;  %v757_v19 = vadd.f32 %v756_v18, %v1519_v41  ;;  %v788_v20 = vpop.f32.mrb[32].mxu1  ;;  %v1133_v21 = vpop.f32.mrb[33].mxu0 }
 0x138   :  { %878 = vst.msk [vmem:[%s1602_s3 + $0x24] sm:$0xf] %vm868_vm2, %v988_v27  ;;  %v789_v22 = vadd.f32 %v788_v20, %v701_v46  ;;  %v1149_v23 = vpop.f32.mrb[33].mxu1  ;;  %v759_v24 = vpop.f32.mrb[34].mxu0 }
 0x139   :  { %v804_v26 = vmax.f32 %v757_v19, 0.0  ;;  %v760_v28 = vadd.f32 %v759_v24, %v1521_v43  ;;  %v791_v29 = vpop.f32.mrb[34].mxu1  ;;  %v1134_v30 = vpop.f32.mrb[35].mxu0 }
 0x13a   :  { %v812_v31 = vmax.f32 %v789_v22, 0.0  ;;  %v792_v32 = vadd.f32 %v791_v29, %v704_v48  ;;  %v1150_v33 = vpop.f32.mrb[35].mxu1 }
 0x13b   :  { %v981_v34 = vpack.c.bf16 %v804_v26, %v804_v26  ;;  %v805_v41 = vmax.f32 %v760_v28, 0.0 }
 0x13c   :  { %v989_v35 = vpack.c.bf16 %v812_v31, %v812_v31  ;;  %v813_v36 = vmax.f32 %v792_v32, 0.0 }
 0x13d   :  { %871 = vst.msk [vmem:[%s1602_s3 + $0x8] sm:$0xf] %vm868_vm2, %v981_v34  ;;  %v982_v37 = vpack.c.bf16 %v805_v41, %v805_v41 }
 0x13e   :  { %879 = vst.msk [vmem:[%s1602_s3 + $0x28] sm:$0xf] %vm868_vm2, %v989_v35  ;;  %v990_v43 = vpack.c.bf16 %v813_v36, %v813_v36  ;;  %v764_v38 = vpop.f32.mrb[36].mxu0 }
 0x13f   :  { %872 = vst.msk [vmem:[%s1602_s3 + $0xc] sm:$0xf] %vm868_vm2, %v982_v37  ;;  %v765_v39 = vadd.f32 %v764_v38, %v1525_v57  ;;  %v796_v40 = vpop.f32.mrb[36].mxu1  ;;  %v1137_v42 = vpop.f32.mrb[37].mxu0 }
 0x140   :  { %880 = vst.msk [vmem:[%s1602_s3 + $0x2c] sm:$0xf] %vm868_vm2, %v990_v43  ;;  %v797_v44 = vadd.f32 %v796_v40, %v709_v61  ;;  %v767_v45 = vpop.f32.mrb[38].mxu0  ;;  %v1153_v46 = vpop.f32.mrb[37].mxu1 }
 0x141   :  { %v806_v47 = vmax.f32 %v765_v39, 0.0  ;;  %v768_v48 = vadd.f32 %v767_v45, %v1527_v59  ;;  %v1138_v49 = vpop.f32.mrb[39].mxu0  ;;  %v799_v50 = vpop.f32.mrb[38].mxu1 }
 0x142   :  { %v814_v51 = vmax.f32 %v797_v44, 0.0  ;;  %v1154_v52 = vpop.f32.mrb[39].mxu1 }
 0x143   :  { %v983_v53 = vpack.c.bf16 %v806_v47, %v806_v47  ;;  %v807_v57 = vmax.f32 %v768_v48, 0.0 }
 0x144   :  { %v991_v54 = vpack.c.bf16 %v814_v51, %v814_v51 }
 0x145   :  { %873 = vst.msk [vmem:[%s1602_s3 + $0x10] sm:$0xf] %vm868_vm2, %v983_v53  ;;  %v984_v55 = vpack.c.bf16 %v807_v57, %v807_v57 }
 0x146   :  { %882 = vst.msk [vmem:[%s1602_s3 + $0x30] sm:$0x1] %vm881_vm3, %v991_v54  ;;  %v772_v56 = vpop.f32.mrb[40].mxu0 }
 0x147   :  { %874 = vst.msk [vmem:[%s1602_s3 + $0x14] sm:$0xf] %vm868_vm2, %v984_v55  ;;  %v773_v59 = vadd.f32 %v772_v56, %v1531_v9  ;;  %v1141_v58 = vpop.f32.mrb[41].mxu0 }
 0x148   :  { %v775_v60 = vpop.f32.mrb[42].mxu0 }
 0x149   :  { %v808_v61 = vmax.f32 %v773_v59, 0.0  ;;  %v776_v62 = vadd.f32 %v775_v60, %v1533_v12  ;;  %v1142_v63 = vpop.f32.mrb[43].mxu0 }
 0x14b   :  { %v985_v0 = vpack.c.bf16 %v808_v61, %v808_v61  ;;  %v809_v1 = vmax.f32 %v776_v62, 0.0 }
 0x14d   :  { %875 = vst.msk [vmem:[%s1602_s3 + $0x18] sm:$0xf] %vm868_vm2, %v985_v0  ;;  %v986_v2 = vpack.c.bf16 %v809_v1, %v809_v1 }
 0x14f   :  { %876 = vst.msk [vmem:[%s1602_s3 + $0x1c] sm:$0xf] %vm868_vm2, %v986_v2 }

// kernel: vae_forward.12
= control target key start
LH: loop header
LB: loop body
LE: loop exit
PB: predicated region body
PF: predicated region fallthrough
CT: control target
= control target key end

     0   :  { %v1161_v1 = vmov 0   ;;  %vm301_vm0 = vcmask 130048   ;;  %v1162_v26 = vmov 0.0   ;;  %vm1163_vm1 = vmmov 0   ;;  %s1389_s1 = inlined_call_operand.vmem [shape: bf16[16,3136], index: 1, kind: input, shape index: {}]   ;;  %s1390_s0 = inlined_call_operand.vmem [shape: bf16[2,16], index: 0, kind: input, shape index: {}]   ;;  %s1391_s2 = inlined_call_operand.vmem [shape: f32[1,3136], index: 2, kind: input, shape index: {}]   ;;  %s1392_s3 = inlined_call_operand.vmem [shape: bf16[2,3136], index: 3, kind: output, shape index: {}]  }
   0x1   :  { %v1124_v0 = vld [vmem:[%s1389_s1 + $0x4] ss:$100 sps:$4 sm:$0xff]   ;;  %337 = vmatprep.mubr.bf16.mxu0 %v1161_v1  ;;  %378 = vmatprep.mubr.bf16.mxu1 %v1161_v1  ;;  %v1126_v2 = vld [vmem:[%s1389_s1 + $0xc] ss:$100 sps:$4 sm:$0xff]   ;;  %v1202_v5 = vld [vmem:[%s1390_s0] sm:$0x1]  ;;  %v50_v28 = vlaneseq }
   0x2   :  { %305 = vmatprep.subr.bf16.mxu0 %v1124_v0  ;;  %v1128_v3 = vld [vmem:[%s1389_s1] ss:$100 sps:$4 sm:$0xff]   ;;  %v1129_v4 = vld [vmem:[%s1389_s1 + $0x8] ss:$100 sps:$4 sm:$0xff]   ;;  %346 = vmatprep.subr.bf16.mxu1 %v1126_v2  ;;  %v1130_v6 = vld [vmem:[%s1389_s1 + $0x10] ss:$100 sps:$4 sm:$0xff]  }
   0x3   :  { %306 = vmatpush1.bf16.msra.mxu0 %v1128_v3  ;;  %347 = vmatpush1.bf16.msra.mxu1 %v1129_v4  ;;  %v1132_v7 = vld [vmem:[%s1389_s1 + $0x14] ss:$100 sps:$4 sm:$0xff]   ;;  %v1135_v9 = vld [vmem:[%s1389_s1 + $0x1c] ss:$100 sps:$4 sm:$0xff]   ;;  %v1138_v10 = vld [vmem:[%s1389_s1 + $0x24] ss:$100 sps:$4 sm:$0xff]  }
   0x4   :  { %v1133_v8 = vld [vmem:[%s1389_s1 + $0x18] ss:$100 sps:$4 sm:$0xff]   ;;  %387 = vmatprep.subr.bf16.mxu0 %v1132_v7  ;;  %428 = vmatprep.subr.bf16.mxu1 %v1135_v9  ;;  %v1141_v11 = vld [vmem:[%s1389_s1 + $0x2c] ss:$100 sps:$4 sm:$0xff]   ;;  %v1136_v12 = vld [vmem:[%s1389_s1 + $0x20] ss:$100 sps:$4 sm:$0xff]  }
   0x5   :  { %v1139_v13 = vld [vmem:[%s1389_s1 + $0x28] ss:$100 sps:$4 sm:$0xff]   ;;  %v1144_v14 = vld [vmem:[%s1389_s1 + $0x34] ss:$100 sps:$4 sm:$0xff]   ;;  %v1147_v15 = vld [vmem:[%s1389_s1 + $0x3c] ss:$100 sps:$4 sm:$0xff]  }
   0x6   :  { %1087 = vmatmul.mubr.msk.bf16.vlgmr.msra.gmra.mrb[0].mxu0 %vm301_vm0, %v1202_v5  ;;  %1088 = vmatmul.mubr.msk.bf16.vlgmr.msra.gmra.mrb[0].mxu1 %vm301_vm0, %v1202_v5  ;;  %v1142_v16 = vld [vmem:[%s1389_s1 + $0x30] ss:$100 sps:$4 sm:$0xff]   ;;  %v1145_v17 = vld [vmem:[%s1389_s1 + $0x38] ss:$100 sps:$4 sm:$0xff]   ;;  %v1150_v18 = vld [vmem:[%s1389_s1 + $0x44] ss:$100 sps:$4 sm:$0xff]  }
   0x7   :  { %388 = vmatpush1.bf16.msra.mxu0 %v1130_v6  ;;  %429 = vmatpush1.bf16.msra.mxu1 %v1133_v8  ;;  %v1153_v19 = vld [vmem:[%s1389_s1 + $0x4c] ss:$100 sps:$4 sm:$0xff]   ;;  %v1148_v20 = vld [vmem:[%s1389_s1 + $0x40] ss:$100 sps:$4 sm:$0xff]   ;;  %v1156_v22 = vld [vmem:[%s1389_s1 + $0x54] ss:$100 sps:$4 sm:$0xff]  }
   0x8   :  { %419 = vmatprep.mubr.bf16.mxu0 %v1161_v1  ;;  %460 = vmatprep.mubr.bf16.mxu1 %v1161_v1  ;;  %v1151_v21 = vld [vmem:[%s1389_s1 + $0x48] ss:$100 sps:$4 sm:$0xff]   ;;  %v1159_v23 = vld [vmem:[%s1389_s1 + $0x5c] ss:$100 sps:$4 sm:$0xff]   ;;  %v1154_v24 = vld [vmem:[%s1389_s1 + $0x50] ss:$100 sps:$4 sm:$0xff]  }
   0x9   :  { %469 = vmatprep.subr.bf16.mxu0 %v1138_v10  ;;  %510 = vmatprep.subr.bf16.mxu1 %v1141_v11  ;;  %v1157_v25 = vld [vmem:[%s1389_s1 + $0x58] ss:$100 sps:$4 sm:$0xff]   ;;  %v1160_v27 = vld [vmem:[%s1389_s1 + $0x60] ss:$100 sps:$4 sm:$0xff]   ;;  %v51_v29 = vshrl.u32 %v50_v28, 7  ;;  %vm1055_vm2 = vcmask 516096  }
   0xa   :  { %v1164_v30 = vmov 1966171168   ;;  %v42_v34 = vld [vmem:[%s1391_s2] sm:$0xff] }
   0xb   :  { %v892_v31 = vunpack.c.l.s4 %v1164_v30  ;;  %v1303_v32 = vsub.s32 0, %v51_v29  ;;  %v1305_v33 = vsub.s32 2, %v51_v29  ;;  %v1310_v35 = vsub.s32 1, %v51_v29 }
   0xc   :  { %v1312_v36 = vsub.s32 3, %v51_v29  ;;  %v1320_v49 = vsub.s32 4, %v51_v29  ;;  %v1322_v50 = vsub.s32 6, %v51_v29  ;;  %v1324_v55 = vsub.s32 5, %v51_v29 }
   0xd   :  { %v893_v37 = vunpack.c.0.s8 %v892_v31  ;;  %v53_v38 = vrot.slane %v42_v34, %v1303_v32  ;;  %v61_v39 = vrot.slane %v42_v34, %v1305_v33  ;;  %v57_v40 = vrot.slane %v42_v34, %v1310_v35 }
   0xe   :  { %1089 = vmatmul.mubr.msk.bf16.vlgmr.msra.gmra.mrb[4].mxu0 %vm301_vm0, %v1202_v5  ;;  %1090 = vmatmul.mubr.msk.bf16.vlgmr.msra.gmra.mrb[4].mxu1 %vm301_vm0, %v1202_v5  ;;  %v65_v41 = vrot.slane %v42_v34, %v1312_v36  ;;  %v1326_v56 = vsub.s32 7, %v51_v29  ;;  %v69_v61 = vrot.slane %v42_v34, %v1320_v49  ;;  %v77_v62 = vrot.slane %v42_v34, %v1322_v50 }
   0xf   :  { %470 = vmatpush1.bf16.msra.mxu0 %v1136_v12  ;;  %511 = vmatpush1.bf16.msra.mxu1 %v1139_v13  ;;  %v1318_v44 = vsub.s32 %v893_v37, %v51_v29 }
  0x10   :  { %501 = vmatprep.mubr.bf16.mxu0 %v1161_v1  ;;  %542 = vmatprep.mubr.bf16.mxu1 %v1161_v1  ;;  %v81_v2 = vrot.slane %v42_v34, %v1326_v56 }
  0x11   :  { %551 = vmatprep.subr.bf16.mxu0 %v1144_v14  ;;  %592 = vmatprep.subr.bf16.mxu1 %v1147_v15  ;;  %v43_v14 = vld [vmem:[%s1391_s2 + $0x8] sm:$0xff] }
  0x16   :  { %1091 = vmatmul.mubr.msk.bf16.vlgmr.msra.gmra.mrb[8].mxu0 %vm301_vm0, %v1202_v5  ;;  %1092 = vmatmul.mubr.msk.bf16.vlgmr.msra.gmra.mrb[8].mxu1 %vm301_vm0, %v1202_v5 }
  0x17   :  { %552 = vmatpush1.bf16.msra.mxu0 %v1142_v16  ;;  %593 = vmatpush1.bf16.msra.mxu1 %v1145_v17 }
  0x18   :  { %583 = vmatprep.mubr.bf16.mxu0 %v1161_v1  ;;  %624 = vmatprep.mubr.bf16.mxu1 %v1161_v1 }
  0x19   :  { %633 = vmatprep.subr.bf16.mxu0 %v1150_v18  ;;  %674 = vmatprep.subr.bf16.mxu1 %v1153_v19  ;;  %v85_v19 = vrot.slane %v43_v14, %v1303_v32 }
  0x1e   :  { %1093 = vmatmul.mubr.msk.bf16.vlgmr.msra.gmra.mrb[12].mxu0 %vm301_vm0, %v1202_v5  ;;  %1094 = vmatmul.mubr.msk.bf16.vlgmr.msra.gmra.mrb[12].mxu1 %vm301_vm0, %v1202_v5 }
  0x1f   :  { %634 = vmatpush1.bf16.msra.mxu0 %v1148_v20  ;;  %675 = vmatpush1.bf16.msra.mxu1 %v1151_v21  ;;  %v93_v20 = vrot.slane %v43_v14, %v1305_v33 }
  0x20   :  { %665 = vmatprep.mubr.bf16.mxu0 %v1161_v1  ;;  %706 = vmatprep.mubr.bf16.mxu1 %v1161_v1 }
  0x21   :  { %715 = vmatprep.subr.bf16.mxu0 %v1156_v22  ;;  %756 = vmatprep.subr.bf16.mxu1 %v1159_v23  ;;  %v89_v23 = vrot.slane %v43_v14, %v1310_v35 }
  0x26   :  { %1095 = vmatmul.mubr.msk.bf16.vlgmr.msra.gmra.mrb[16].mxu0 %vm301_vm0, %v1202_v5  ;;  %1096 = vmatmul.mubr.msk.bf16.vlgmr.msra.gmra.mrb[16].mxu1 %vm301_vm0, %v1202_v5 }
  0x27   :  { %716 = vmatpush1.bf16.msra.mxu0 %v1154_v24  ;;  %757 = vmatpush1.bf16.msra.mxu1 %v1157_v25  ;;  %v97_v24 = vrot.slane %v43_v14, %v1312_v36 }
  0x28   :  { %747 = vmatprep.mubr.bf16.mxu0 %v1161_v1  ;;  %788 = vmatprep.mubr.bf16.mxu1 %v1161_v1  ;;  %v73_v1 = vrot.slane %v42_v34, %v1324_v55 }
  0x29   :  { %1114 = vmatprep.subr.bf16.mxu0 %v1162_v26 }
  0x2e   :  { %1097 = vmatmul.mubr.msk.bf16.vlgmr.msra.gmra.mrb[20].mxu0 %vm301_vm0, %v1202_v5  ;;  %1098 = vmatmul.mubr.msk.bf16.vlgmr.msra.gmra.mrb[20].mxu1 %vm301_vm0, %v1202_v5 }
  0x2f   :  { %1115 = vmatpush3.bf16.msra.mxu0 %v1160_v27  ;;  %1116 = vmatprep.mubr.msk.bf16.mxu0 %vm1163_vm1, %v1162_v26 }
  0x36   :  { %1117 = vmatmul.mubr.msk.bf16.vlgmr.msra.gmra.mrb[24].mxu0 %vm301_vm0, %v1202_v5 }
  0xd9   :  { %v339_v42 = vpop.f32.mrb[0].mxu0  ;;  %v380_v43 = vpop.f32.mrb[0].mxu1 }
  0xda   :  { %v340_v45 = vadd.f32 %v339_v42, %v53_v38  ;;  %v381_v46 = vadd.f32 %v380_v43, %v61_v39  ;;  %v341_v47 = vpop.f32.mrb[1].mxu0  ;;  %v382_v48 = vpop.f32.mrb[1].mxu1 }
  0xdb   :  { %v342_v51 = vadd.f32 %v341_v47, %v57_v40  ;;  %v383_v52 = vadd.f32 %v382_v48, %v65_v41  ;;  %v343_v53 = vpop.f32.mrb[2].mxu0  ;;  %v384_v54 = vpop.f32.mrb[2].mxu1  ;;  %v101_v48 = vrot.slane %v43_v14, %v1320_v49 }
  0xdc   :  { %v344_v57 = vpop.f32.mrb[3].mxu0  ;;  %v385_v58 = vpop.f32.mrb[3].mxu1  ;;  %v105_v54 = vrot.slane %v43_v14, %v1324_v55 }
  0xdd   :  { %v1100_v59 = vpack.c.bf16 %v342_v51, %v340_v45  ;;  %v1101_v60 = vpack.c.bf16 %v383_v52, %v381_v46  ;;  %v109_v51 = vrot.slane %v43_v14, %v1322_v50  ;;  %v113_v57 = vrot.slane %v43_v14, %v1326_v56 }
  0xdf   :  { %v897_v63 = vrot.slane %v1100_v59, %v1318_v44  ;;  %v904_v0 = vrot.slane %v1101_v60, %v1318_v44 }
  0xe1   :  { %v919_v3 = vcombine.low %v897_v63, %v904_v0  ;;  %v421_v4 = vpop.f32.mrb[4].mxu0  ;;  %v462_v5 = vpop.f32.mrb[4].mxu1 }
  0xe2   :  { %v422_v6 = vadd.f32 %v421_v4, %v69_v61  ;;  %v463_v7 = vadd.f32 %v462_v5, %v77_v62  ;;  %v423_v8 = vpop.f32.mrb[5].mxu0  ;;  %v464_v9 = vpop.f32.mrb[5].mxu1  ;;  %v44_v5 = vld [vmem:[%s1391_s2 + $0x10] sm:$0xff] }
  0xe3   :  { %v424_v10 = vadd.f32 %v423_v8, %v73_v1  ;;  %v465_v11 = vadd.f32 %v464_v9, %v81_v2  ;;  %v425_v12 = vpop.f32.mrb[6].mxu0  ;;  %v466_v13 = vpop.f32.mrb[6].mxu1  ;;  %v927_v34 = vrot.slane %v919_v3, %v1318_v44  ;;  %v121_v14 = vrot.slane %v44_v5, %v1310_v35 }
  0xe4   :  { %v426_v15 = vpop.f32.mrb[7].mxu0  ;;  %v467_v16 = vpop.f32.mrb[7].mxu1 }
  0xe5   :  { %v1102_v17 = vpack.c.bf16 %v424_v10, %v422_v6  ;;  %v1103_v18 = vpack.c.bf16 %v465_v11, %v463_v7  ;;  %v117_v10 = vrot.slane %v44_v5, %v1303_v32  ;;  %v125_v11 = vrot.slane %v44_v5, %v1305_v33 }
  0xe6   :  { %v129_v15 = vrot.slane %v44_v5, %v1312_v36 }
  0xe7   :  { %v911_v21 = vrot.slane %v1102_v17, %v1318_v44  ;;  %v918_v22 = vrot.slane %v1103_v18, %v1318_v44 }
  0xe9   :  { %v920_v25 = vcombine.low %v911_v21, %v918_v22  ;;  %v503_v26 = vpop.f32.mrb[8].mxu0  ;;  %v544_v27 = vpop.f32.mrb[8].mxu1 }
  0xea   :  { %v504_v28 = vadd.f32 %v503_v26, %v85_v19  ;;  %v545_v29 = vadd.f32 %v544_v27, %v93_v20  ;;  %v505_v30 = vpop.f32.mrb[9].mxu0  ;;  %v546_v31 = vpop.f32.mrb[9].mxu1 }
  0xeb   :  { %v934_v37 = vrot.slane %v920_v25, %v1318_v44  ;;  %v506_v38 = vadd.f32 %v505_v30, %v89_v23  ;;  %v547_v39 = vadd.f32 %v546_v31, %v97_v24  ;;  %v507_v40 = vpop.f32.mrb[10].mxu0  ;;  %v548_v41 = vpop.f32.mrb[10].mxu1  ;;  %v133_v30 = vrot.slane %v44_v5, %v1320_v49 }
  0xec   :  { %v508_v42 = vpop.f32.mrb[11].mxu0  ;;  %v549_v43 = vpop.f32.mrb[11].mxu1  ;;  %v141_v31 = vrot.slane %v44_v5, %v1322_v50 }
  0xed   :  { %v935_v45 = vcombine.low %v927_v34, %v934_v37  ;;  %v1104_v46 = vpack.c.bf16 %v506_v38, %v504_v28  ;;  %v1105_v47 = vpack.c.bf16 %v547_v39, %v545_v29  ;;  %v137_v38 = vrot.slane %v44_v5, %v1324_v55 }
  0xee   :  { %v145_v39 = vrot.slane %v44_v5, %v1326_v56  ;;  %v1061_v56 = vld [vmem:[%s1391_s2 + $0x18] ss:$0 sm:$0xff] }
  0xef   :  { %1052 = vst [vmem:[%s1392_s3] sm:$0xff] %v935_v45  ;;  %v946_v52 = vrot.slane %v1104_v46, %v1318_v44  ;;  %v953_v53 = vrot.slane %v1105_v47, %v1318_v44 }
  0xf1   :  { %v968_v58 = vcombine.low %v946_v52, %v953_v53  ;;  %v585_v59 = vpop.f32.mrb[12].mxu0  ;;  %v626_v60 = vpop.f32.mrb[12].mxu1 }
  0xf2   :  { %v586_v61 = vadd.f32 %v585_v59, %v101_v48  ;;  %v627_v62 = vadd.f32 %v626_v60, %v109_v51  ;;  %v587_v63 = vpop.f32.mrb[13].mxu0  ;;  %v628_v0 = vpop.f32.mrb[13].mxu1 }
  0xf3   :  { %v588_v1 = vadd.f32 %v587_v63, %v105_v54  ;;  %v629_v2 = vadd.f32 %v628_v0, %v113_v57  ;;  %v589_v3 = vpop.f32.mrb[14].mxu0  ;;  %v630_v4 = vpop.f32.mrb[14].mxu1  ;;  %v976_v23 = vrot.slane %v968_v58, %v1318_v44 }
  0xf4   :  { %v590_v6 = vpop.f32.mrb[15].mxu0  ;;  %v631_v7 = vpop.f32.mrb[15].mxu1 }
  0xf5   :  { %v1106_v8 = vpack.c.bf16 %v588_v1, %v586_v61  ;;  %v1107_v9 = vpack.c.bf16 %v629_v2, %v627_v62 }
  0xf7   :  { %v960_v12 = vrot.slane %v1106_v8, %v1318_v44  ;;  %v967_v13 = vrot.slane %v1107_v9, %v1318_v44 }
  0xf9   :  { %v969_v16 = vcombine.low %v960_v12, %v967_v13  ;;  %v667_v17 = vpop.f32.mrb[16].mxu0  ;;  %v708_v18 = vpop.f32.mrb[16].mxu1 }
  0xfa   :  { %v668_v19 = vadd.f32 %v667_v17, %v117_v10  ;;  %v709_v20 = vadd.f32 %v708_v18, %v125_v11  ;;  %v669_v21 = vpop.f32.mrb[17].mxu0  ;;  %v710_v22 = vpop.f32.mrb[17].mxu1 }
  0xfb   :  { %v983_v32 = vrot.slane %v969_v16, %v1318_v44  ;;  %v670_v33 = vadd.f32 %v669_v21, %v121_v14  ;;  %v711_v24 = vadd.f32 %v710_v22, %v129_v15  ;;  %v671_v25 = vpop.f32.mrb[18].mxu0  ;;  %v712_v26 = vpop.f32.mrb[18].mxu1 }
  0xfc   :  { %v672_v27 = vpop.f32.mrb[19].mxu0  ;;  %v713_v28 = vpop.f32.mrb[19].mxu1 }
  0xfd   :  { %v984_v35 = vcombine.low %v976_v23, %v983_v32  ;;  %v1108_v29 = vpack.c.bf16 %v670_v33, %v668_v19  ;;  %v1109_v36 = vpack.c.bf16 %v711_v24, %v709_v20 }
  0xff   :  { %1053 = vst [vmem:[%s1392_s3 + $0x8] sm:$0xff] %v984_v35  ;;  %v995_v34 = vrot.slane %v1108_v29, %v1318_v44  ;;  %v1002_v37 = vrot.slane %v1109_v36, %v1318_v44 }
 0x101   :  { %v1017_v40 = vcombine.low %v995_v34, %v1002_v37  ;;  %v749_v41 = vpop.f32.mrb[20].mxu0  ;;  %v790_v42 = vpop.f32.mrb[20].mxu1 }
 0x102   :  { %v750_v43 = vadd.f32 %v749_v41, %v133_v30  ;;  %v791_v45 = vadd.f32 %v790_v42, %v141_v31  ;;  %v751_v49 = vpop.f32.mrb[21].mxu0  ;;  %v792_v46 = vpop.f32.mrb[21].mxu1 }
 0x103   :  { %v752_v50 = vadd.f32 %v751_v49, %v137_v38  ;;  %v793_v47 = vadd.f32 %v792_v46, %v145_v39  ;;  %v753_v48 = vpop.f32.mrb[22].mxu0  ;;  %v794_v51 = vpop.f32.mrb[22].mxu1  ;;  %v1025_v63 = vrot.slane %v1017_v40, %v1318_v44 }
 0x104   :  { %v754_v52 = vpop.f32.mrb[23].mxu0  ;;  %v795_v53 = vpop.f32.mrb[23].mxu1 }
 0x105   :  { %v1110_v54 = vpack.c.bf16 %v752_v50, %v750_v43  ;;  %v1111_v57 = vpack.c.bf16 %v793_v47, %v791_v45 }
 0x107   :  { %v1009_v58 = vrot.slane %v1110_v54, %v1318_v44  ;;  %v1016_v55 = vrot.slane %v1111_v57, %v1318_v44 }
 0x109   :  { %v1018_v59 = vcombine.low %v1009_v58, %v1016_v55  ;;  %v831_v60 = vpop.f32.mrb[24].mxu0 }
 0x10a   :  { %v832_v61 = vadd.f32 %v1061_v56, %v831_v60  ;;  %v1118_v62 = vpop.f32.mrb[25].mxu0 }
 0x10b   :  { %v1032_v0 = vrot.slane %v1018_v59, %v1318_v44  ;;  %v834_v1 = vpop.f32.mrb[26].mxu0 }
 0x10c   :  { %v861_v2 = vpack.c.bf16 %v832_v61, %v832_v61  ;;  %v1119_v3 = vpop.f32.mrb[27].mxu0 }
 0x10d   :  { %v1033_v4 = vcombine.low %v1025_v63, %v1032_v0 }
 0x10e   :  { %v1040_v5 = vrot.slane %v861_v2, %v1318_v44 }
 0x10f   :  { %1054 = vst [vmem:[%s1392_s3 + $0x10] sm:$0xff] %v1033_v4 }
 0x110   :  { %v1047_v6 = vrot.slane %v1040_v5, %v1318_v44 }
 0x112   :  { %1056 = vst.msk [vmem:[%s1392_s3 + $0x18] sm:$0x1] %vm1055_vm2, %v1047_v6 }

// kernel: vae_forward.11
= control target key start
LH: loop header
LB: loop body
LE: loop exit
PB: predicated region body
PF: predicated region fallthrough
CT: control target
= control target key end

     0   :  { %v3016_v21 = vmov 1966171168   ;;  %v431_v23 = vlaneseq  ;;  %vm3018_vm0 = vmmov 0   ;;  %vm1788_vm1 = vcmask 523264   ;;  %s3701_s1 = inlined_call_operand.vmem [shape: bf16[3136,32], index: 1, kind: input, shape index: {}]   ;;  %s3702_s0 = inlined_call_operand.vmem [shape: bf16[2,3136], index: 0, kind: input, shape index: {}]   ;;  %s3703_s2 = inlined_call_operand.vmem [shape: f32[1,32], index: 2, kind: input, shape index: {}]   ;;  %s3704_s4 = inlined_call_operand.vmem [shape: f32[2,32], index: 4, kind: output, shape index: {0}]   ;;  %s3705_s3 = inlined_call_operand.vmem [shape: f32[2,32], index: 3, kind: input, shape index: {}]   ;;  %s3706_s5 = inlined_call_operand.vmem [shape: f32[2,32], index: 5, kind: output, shape index: {1}]  }
   0x1   :  { %v2815_v0 = vld [vmem:[%s3701_s1 + $0x40] sm:$0xff]   ;;  %v2819_v4 = vld [vmem:[%s3701_s1 + $0x48] sm:$0xff]   ;;  %v2823_v8 = vld [vmem:[%s3701_s1 + $0x50] sm:$0xff]   ;;  %v429_v22 = vunpack.c.l.s4 %v3016_v21  ;;  %vm2312_vm2 = vcmask 254976  }
   0x2   :  { %v2816_v1 = vld [vmem:[%s3701_s1] sm:$0xff]   ;;  %2531 = vmatprep.subr.bf16.mxu0 %v2815_v0  ;;  %v2820_v5 = vld [vmem:[%s3701_s1 + $0x8] sm:$0xff]   ;;  %v2824_v9 = vld [vmem:[%s3701_s1 + $0x10] sm:$0xff]   ;;  %v432_v29 = vshrl.u32 %v431_v23, 7 }
   0x3   :  { %v2817_v2 = vld [vmem:[%s3701_s1 + $0xc0] sm:$0xff]   ;;  %2532 = vmatpush3.bf16.msra.mxu0 %v2816_v1  ;;  %v2821_v6 = vld [vmem:[%s3701_s1 + $0xc8] sm:$0xff]   ;;  %v2825_v10 = vld [vmem:[%s3701_s1 + $0xd0] sm:$0xff]   ;;  %v430_v28 = vunpack.c.0.s8 %v429_v22 }
   0x4   :  { %v2818_v3 = vld [vmem:[%s3701_s1 + $0x80] sm:$0xff]   ;;  %2553 = vmatprep.subr.bf16.mxu1 %v2817_v2  ;;  %2533 = vmatprep.subr.bf16.mxu0 %v2819_v4  ;;  %v2822_v7 = vld [vmem:[%s3701_s1 + $0x88] sm:$0xff]   ;;  %v2826_v11 = vld [vmem:[%s3701_s1 + $0x90] sm:$0xff]  }
   0x5   :  { %2554 = vmatpush3.bf16.msra.mxu1 %v2818_v3  ;;  %v2827_v12 = vld [vmem:[%s3701_s1 + $0x58] sm:$0xff]   ;;  %v2831_v16 = vld [vmem:[%s3701_s1 + $0x60] sm:$0xff]   ;;  %v2835_v20 = vld [vmem:[%s3701_s1 + $0x68] sm:$0xff]   ;;  %v3137_v34 = vsub.s32 %v430_v28, %v432_v29 }
   0x6   :  { %2555 = vmatprep.subr.bf16.mxu1 %v2821_v6  ;;  %v2828_v13 = vld [vmem:[%s3701_s1 + $0x18] sm:$0xff]   ;;  %v2832_v17 = vld [vmem:[%s3701_s1 + $0x20] sm:$0xff]   ;;  %v2836_v24 = vld [vmem:[%s3701_s1 + $0x28] sm:$0xff]  }
   0x7   :  { %2534 = vmatpush3.bf16.msra.mxu0 %v2820_v5  ;;  %v2829_v14 = vld [vmem:[%s3701_s1 + $0xd8] sm:$0xff]   ;;  %v2833_v18 = vld [vmem:[%s3701_s1 + $0xe0] sm:$0xff]   ;;  %v2837_v25 = vld [vmem:[%s3701_s1 + $0xe8] sm:$0xff]  }
   0x8   :  { %2535 = vmatprep.subr.bf16.mxu0 %v2823_v8  ;;  %v2830_v15 = vld [vmem:[%s3701_s1 + $0x98] sm:$0xff]   ;;  %v2834_v19 = vld [vmem:[%s3701_s1 + $0xa0] sm:$0xff]   ;;  %v2838_v26 = vld [vmem:[%s3701_s1 + $0xa8] sm:$0xff]  }
   0x9   :  { %2556 = vmatpush3.bf16.msra.mxu1 %v2822_v7  ;;  %v2839_v27 = vld [vmem:[%s3701_s1 + $0x70] sm:$0xff]   ;;  %v2843_v33 = vld [vmem:[%s3701_s1 + $0x78] sm:$0xff]   ;;  %v20_v37 = vld [vmem:[%s3702_s0] sm:$0xff] }
   0xa   :  { %2557 = vmatprep.subr.bf16.mxu1 %v2825_v10  ;;  %v2840_v30 = vld [vmem:[%s3701_s1 + $0x30] sm:$0xff]   ;;  %v2844_v35 = vld [vmem:[%s3701_s1 + $0x38] sm:$0xff]   ;;  %v427_v38 = vcombine.high %v20_v37, %v20_v37  ;;  %v434_v39 = vrot.slane %v20_v37, %v3137_v34  ;;  %v2848_v41 = vld [vmem:[%s3701_s1 + $0x140] sm:$0xff]  }
   0xb   :  { %2536 = vmatpush3.bf16.msra.mxu0 %v2824_v9  ;;  %v2841_v31 = vld [vmem:[%s3701_s1 + $0xf0] sm:$0xff]   ;;  %v2845_v36 = vld [vmem:[%s3701_s1 + $0xf8] sm:$0xff]   ;;  %v2850_v45 = vld [vmem:[%s3701_s1 + $0x1c0] sm:$0xff]  }
   0xc   :  { %2537 = vmatprep.subr.bf16.mxu0 %v2827_v12  ;;  %v2842_v32 = vld [vmem:[%s3701_s1 + $0xb0] sm:$0xff]   ;;  %v2847_v40 = vld [vmem:[%s3701_s1 + $0xb8] sm:$0xff]   ;;  %v442_v42 = vcombine.high %v434_v39, %v434_v39  ;;  %v450_v43 = vrot.slane %v434_v39, %v3137_v34  ;;  %v3157_v44 = vrot.slane %v427_v38, %v3137_v34  ;;  %v2849_v47 = vld [vmem:[%s3701_s1 + $0x100] sm:$0xff]  }
   0xd   :  { %2558 = vmatpush3.bf16.msra.mxu1 %v2826_v11  ;;  %v2852_v50 = vld [vmem:[%s3701_s1 + $0x148] sm:$0xff]   ;;  %v2851_v52 = vld [vmem:[%s3701_s1 + $0x180] sm:$0xff]   ;;  %v2856_v57 = vld [vmem:[%s3701_s1 + $0x150] sm:$0xff]  }
   0xe   :  { %2559 = vmatprep.subr.bf16.mxu1 %v2829_v14  ;;  %v464_v46 = vrot.slane %v442_v42, %v3137_v34  ;;  %v443_v48 = vcombine.high %v3157_v44, %v3157_v44  ;;  %v472_v49 = vcombine.high %v450_v43, %v450_v43  ;;  %v2854_v54 = vld [vmem:[%s3701_s1 + $0x1c8] sm:$0xff]   ;;  %v2858_v59 = vld [vmem:[%s3701_s1 + $0x1d0] sm:$0xff]   ;;  %v2860_v61 = vld [vmem:[%s3701_s1 + $0x158] sm:$0xff]  }
   0xf   :  { %2538 = vmatpush3.bf16.msra.mxu0 %v2828_v13  ;;  %v2853_v55 = vld [vmem:[%s3701_s1 + $0x108] sm:$0xff]   ;;  %v2857_v60 = vld [vmem:[%s3701_s1 + $0x110] sm:$0xff]   ;;  %v2862_v63 = vld [vmem:[%s3701_s1 + $0x1d8] sm:$0xff]  }
  0x10   :  { %2539 = vmatprep.subr.bf16.mxu0 %v2831_v16  ;;  %1824 = vmatprep.mubr.bf16.mxu0 %v464_v46  ;;  %v474_v51 = vcombine.high %v464_v46, %v464_v46  ;;  %v471_v53 = vrot.slane %v443_v48, %v3137_v34  ;;  %v2855_v58 = vld [vmem:[%s3701_s1 + $0x188] sm:$0xff]   ;;  %v2859_v62 = vld [vmem:[%s3701_s1 + $0x190] sm:$0xff]   ;;  %v2861_v0 = vld [vmem:[%s3701_s1 + $0x118] sm:$0xff]  }
  0x11   :  { %2560 = vmatpush3.bf16.msra.mxu1 %v2830_v15  ;;  %v2864_v1 = vld [vmem:[%s3701_s1 + $0x160] sm:$0xff]   ;;  %v2863_v2 = vld [vmem:[%s3701_s1 + $0x198] sm:$0xff]   ;;  %v2868_v5 = vld [vmem:[%s3701_s1 + $0x168] sm:$0xff]  }
  0x12   :  { %2561 = vmatprep.subr.bf16.mxu1 %v2833_v18  ;;  %1864 = vmatprep.mubr.bf16.mxu1 %v474_v51  ;;  %v475_v56 = vcombine.high %v471_v53, %v471_v53  ;;  %v2866_v3 = vld [vmem:[%s3701_s1 + $0x1e0] sm:$0xff]   ;;  %v2870_v7 = vld [vmem:[%s3701_s1 + $0x1e8] sm:$0xff]   ;;  %v2872_v9 = vld [vmem:[%s3701_s1 + $0x170] sm:$0xff]  }
  0x13   :  { %2540 = vmatpush3.bf16.msra.mxu0 %v2832_v17  ;;  %v2865_v4 = vld [vmem:[%s3701_s1 + $0x120] sm:$0xff]   ;;  %v2869_v8 = vld [vmem:[%s3701_s1 + $0x128] sm:$0xff]   ;;  %v2874_v11 = vld [vmem:[%s3701_s1 + $0x1f0] sm:$0xff]   ;;  %v457_v17 = vrot.slane %v3157_v44, %v3137_v34 }
  0x14   :  { %2541 = vmatprep.subr.bf16.mxu0 %v2835_v20  ;;  %v2867_v6 = vld [vmem:[%s3701_s1 + $0x1a0] sm:$0xff]   ;;  %v2871_v10 = vld [vmem:[%s3701_s1 + $0x1a8] sm:$0xff]   ;;  %v2873_v12 = vld [vmem:[%s3701_s1 + $0x130] sm:$0xff]  }
  0x15   :  { %2562 = vmatpush3.bf16.msra.mxu1 %v2834_v19  ;;  %v2876_v13 = vld [vmem:[%s3701_s1 + $0x178] sm:$0xff]   ;;  %v2875_v14 = vld [vmem:[%s3701_s1 + $0x1b0] sm:$0xff]   ;;  %v2880_v18 = vld [vmem:[%s3701_s1 + $0x240] sm:$0xff]   ;;  %v473_v22 = vcombine.high %v457_v17, %v457_v17 }
  0x16   :  { %2563 = vmatprep.subr.bf16.mxu1 %v2837_v25  ;;  %v2878_v15 = vld [vmem:[%s3701_s1 + $0x1f8] sm:$0xff]   ;;  %v2882_v20 = vld [vmem:[%s3701_s1 + $0x2c0] sm:$0xff]   ;;  %v2888_v28 = vld [vmem:[%s3701_s1 + $0x250] sm:$0xff]  }
  0x17   :  { %2542 = vmatpush3.bf16.msra.mxu0 %v2836_v24  ;;  %v2877_v16 = vld [vmem:[%s3701_s1 + $0x138] sm:$0xff]   ;;  %v2881_v21 = vld [vmem:[%s3701_s1 + $0x200] sm:$0xff]   ;;  %v2884_v24 = vld [vmem:[%s3701_s1 + $0x248] sm:$0xff]  }
  0x18   :  { %2543 = vmatprep.subr.bf16.mxu0 %v2839_v27  ;;  %v2879_v19 = vld [vmem:[%s3701_s1 + $0x1b8] sm:$0xff]   ;;  %v2883_v25 = vld [vmem:[%s3701_s1 + $0x280] sm:$0xff]   ;;  %v2885_v27 = vld [vmem:[%s3701_s1 + $0x208] sm:$0xff]  }
  0x19   :  { %2564 = vmatpush3.bf16.msra.mxu1 %v2838_v26  ;;  %v2886_v26 = vld [vmem:[%s3701_s1 + $0x2c8] sm:$0xff]   ;;  %v2896_v37 = vld [vmem:[%s3701_s1 + $0x260] sm:$0xff]   ;;  %v2895_v38 = vld [vmem:[%s3701_s1 + $0x298] sm:$0xff]  }
  0x1a   :  { %2565 = vmatprep.subr.bf16.mxu1 %v2841_v31  ;;  %v2887_v29 = vld [vmem:[%s3701_s1 + $0x288] sm:$0xff]   ;;  %v2889_v31 = vld [vmem:[%s3701_s1 + $0x210] sm:$0xff]   ;;  %v2898_v39 = vld [vmem:[%s3701_s1 + $0x2e0] sm:$0xff]  }
  0x1b   :  { %2544 = vmatpush3.bf16.msra.mxu0 %v2840_v30  ;;  %v2890_v30 = vld [vmem:[%s3701_s1 + $0x2d0] sm:$0xff]   ;;  %v2899_v42 = vld [vmem:[%s3701_s1 + $0x2a0] sm:$0xff]   ;;  %v2901_v44 = vld [vmem:[%s3701_s1 + $0x228] sm:$0xff]  }
  0x1c   :  { %2545 = vmatprep.subr.bf16.mxu0 %v2843_v33  ;;  %v2891_v33 = vld [vmem:[%s3701_s1 + $0x290] sm:$0xff]   ;;  %v2903_v46 = vld [vmem:[%s3701_s1 + $0x2a8] sm:$0xff]   ;;  %v2910_v51 = vld [vmem:[%s3701_s1 + $0x2f8] sm:$0xff]  }
  0x1d   :  { %2566 = vmatpush3.bf16.msra.mxu1 %v2842_v32  ;;  %v2892_v32 = vld [vmem:[%s3701_s1 + $0x258] sm:$0xff]   ;;  %v2905_v48 = vld [vmem:[%s3701_s1 + $0x230] sm:$0xff]  }
  0x1e   :  { %2567 = vmatprep.subr.bf16.mxu1 %v2845_v36  ;;  %v2893_v36 = vld [vmem:[%s3701_s1 + $0x218] sm:$0xff]  }
  0x1f   :  { %2546 = vmatpush3.bf16.msra.mxu0 %v2844_v35  ;;  %v2894_v35 = vld [vmem:[%s3701_s1 + $0x2d8] sm:$0xff]  }
  0x20   :  { %2575 = vmatprep.subr.bf16.mxu0 %v2848_v41  ;;  %v2900_v41 = vld [vmem:[%s3701_s1 + $0x268] sm:$0xff]  }
  0x21   :  { %2568 = vmatpush3.bf16.msra.mxu1 %v2847_v40  ;;  %v2897_v40 = vld [vmem:[%s3701_s1 + $0x220] sm:$0xff]  }
  0x22   :  { %2597 = vmatprep.subr.bf16.mxu1 %v2850_v45  ;;  %1825 = vmatmul.mubr.bf16.vlgmr.msra.gmra.mrb[0].mxu0 %v450_v43  ;;  %v2902_v43 = vld [vmem:[%s3701_s1 + $0x2e8] sm:$0xff]   ;;  %v2904_v45 = vld [vmem:[%s3701_s1 + $0x270] sm:$0xff]  }
  0x23   :  { %2576 = vmatpush3.bf16.msra.mxu0 %v2849_v47  ;;  %1904 = vmatprep.mubr.bf16.mxu0 %v471_v53  ;;  %v2906_v47 = vld [vmem:[%s3701_s1 + $0x2f0] sm:$0xff]   ;;  %v2909_v53 = vld [vmem:[%s3701_s1 + $0x238] sm:$0xff]  }
  0x24   :  { %1865 = vmatmul.mubr.bf16.vlgmr.msra.gmra.mrb[0].mxu1 %v472_v49  ;;  %2577 = vmatprep.subr.bf16.mxu0 %v2852_v50  ;;  %v2908_v49 = vld [vmem:[%s3701_s1 + $0x278] sm:$0xff]   ;;  %v2907_v50 = vld [vmem:[%s3701_s1 + $0x2b0] sm:$0xff]  }
  0x25   :  { %2598 = vmatpush3.bf16.msra.mxu1 %v2851_v52  ;;  %1944 = vmatprep.mubr.bf16.mxu1 %v475_v56  ;;  %v21_v52 = vld [vmem:[%s3702_s0 + $0x8] sm:$0xff]  ;;  %v2912_v56 = vld [vmem:[%s3701_s1 + $0x340] sm:$0xff]  }
  0x26   :  { %2599 = vmatprep.subr.bf16.mxu1 %v2854_v54  ;;  %v483_v54 = vrot.slane %v21_v52, %v3137_v34 }
  0x27   :  { %2578 = vmatpush3.bf16.msra.mxu0 %v2853_v55  ;;  %v476_v55 = vcombine.high %v21_v52, %v21_v52  ;;  %v2958_v52 = vld [vmem:[%s3701_s1 + $0x418] sm:$0xff]  }
  0x28   :  { %2579 = vmatprep.subr.bf16.mxu0 %v2856_v57  ;;  %v491_v57 = vcombine.high %v483_v54, %v483_v54 }
  0x29   :  { %2600 = vmatpush3.bf16.msra.mxu1 %v2855_v58  ;;  %v2911_v58 = vld [vmem:[%s3701_s1 + $0x2b8] sm:$0xff]  }
  0x2a   :  { %2601 = vmatprep.subr.bf16.mxu1 %v2858_v59  ;;  %v499_v59 = vrot.slane %v483_v54, %v3137_v34  ;;  %v2960_v54 = vld [vmem:[%s3701_s1 + $0x498] sm:$0xff]  }
  0x2b   :  { %2580 = vmatpush3.bf16.msra.mxu0 %v2857_v60  ;;  %v3363_v60 = vrot.slane %v476_v55, %v3137_v34  ;;  %v2963_v55 = vld [vmem:[%s3701_s1 + $0x4e0] sm:$0xff]  }
  0x2c   :  { %2581 = vmatprep.subr.bf16.mxu0 %v2860_v61  ;;  %v2914_v61 = vld [vmem:[%s3701_s1 + $0x3c0] sm:$0xff]  }
  0x2d   :  { %2602 = vmatpush3.bf16.msra.mxu1 %v2859_v62  ;;  %v513_v62 = vrot.slane %v491_v57, %v3137_v34  ;;  %v2965_v57 = vld [vmem:[%s3701_s1 + $0x468] sm:$0xff]  }
  0x2e   :  { %2603 = vmatprep.subr.bf16.mxu1 %v2862_v63  ;;  %v2913_v63 = vld [vmem:[%s3701_s1 + $0x300] sm:$0xff]  }
  0x2f   :  { %2582 = vmatpush3.bf16.msra.mxu0 %v2861_v0  ;;  %v492_v0 = vcombine.high %v3363_v60, %v3363_v60 }
  0x30   :  { %2583 = vmatprep.subr.bf16.mxu0 %v2864_v1  ;;  %v521_v1 = vcombine.high %v499_v59, %v499_v59 }
  0x31   :  { %2604 = vmatpush3.bf16.msra.mxu1 %v2863_v2  ;;  %v2916_v2 = vld [vmem:[%s3701_s1 + $0x348] sm:$0xff]  }
  0x32   :  { %2605 = vmatprep.subr.bf16.mxu1 %v2866_v3  ;;  %v523_v3 = vcombine.high %v513_v62, %v513_v62 }
  0x33   :  { %2584 = vmatpush3.bf16.msra.mxu0 %v2865_v4  ;;  %v2915_v4 = vld [vmem:[%s3701_s1 + $0x380] sm:$0xff]  }
  0x34   :  { %2585 = vmatprep.subr.bf16.mxu0 %v2868_v5  ;;  %v520_v5 = vrot.slane %v492_v0, %v3137_v34  ;;  %v2970_v0 = vld [vmem:[%s3701_s1 + $0x430] sm:$0xff]  }
  0x35   :  { %2606 = vmatpush3.bf16.msra.mxu1 %v2867_v6  ;;  %v2918_v6 = vld [vmem:[%s3701_s1 + $0x3c8] sm:$0xff]  }
  0x36   :  { %2607 = vmatprep.subr.bf16.mxu1 %v2870_v7  ;;  %v2917_v7 = vld [vmem:[%s3701_s1 + $0x308] sm:$0xff]  }
  0x37   :  { %2586 = vmatpush3.bf16.msra.mxu0 %v2869_v8  ;;  %v524_v8 = vcombine.high %v520_v5, %v520_v5 }
  0x38   :  { %2587 = vmatprep.subr.bf16.mxu0 %v2872_v9  ;;  %v2920_v9 = vld [vmem:[%s3701_s1 + $0x350] sm:$0xff]  }
  0x39   :  { %2608 = vmatpush3.bf16.msra.mxu1 %v2871_v10  ;;  %v2919_v10 = vld [vmem:[%s3701_s1 + $0x388] sm:$0xff]  }
  0x3a   :  { %2609 = vmatprep.subr.bf16.mxu1 %v2874_v11  ;;  %v2922_v11 = vld [vmem:[%s3701_s1 + $0x3d0] sm:$0xff]  }
  0x3b   :  { %2588 = vmatpush3.bf16.msra.mxu0 %v2873_v12  ;;  %v2921_v12 = vld [vmem:[%s3701_s1 + $0x310] sm:$0xff]  }
  0x3c   :  { %2589 = vmatprep.subr.bf16.mxu0 %v2876_v13  ;;  %v2924_v13 = vld [vmem:[%s3701_s1 + $0x358] sm:$0xff]  }
  0x3d   :  { %2610 = vmatpush3.bf16.msra.mxu1 %v2875_v14  ;;  %v2923_v14 = vld [vmem:[%s3701_s1 + $0x390] sm:$0xff]  }
  0x3e   :  { %2611 = vmatprep.subr.bf16.mxu1 %v2878_v15  ;;  %v2926_v15 = vld [vmem:[%s3701_s1 + $0x3d8] sm:$0xff]  }
  0x3f   :  { %2590 = vmatpush3.bf16.msra.mxu0 %v2877_v16  ;;  %v2925_v16 = vld [vmem:[%s3701_s1 + $0x318] sm:$0xff]  }
  0x40   :  { %2619 = vmatprep.subr.bf16.mxu0 %v2880_v18  ;;  %v2927_v18 = vld [vmem:[%s3701_s1 + $0x398] sm:$0xff]  }
  0x41   :  { %2612 = vmatpush3.bf16.msra.mxu1 %v2879_v19  ;;  %v2930_v19 = vld [vmem:[%s3701_s1 + $0x3e0] sm:$0xff]  }
  0x42   :  { %1905 = vmatmul.mubr.bf16.vlgmr.msra.gmra.mrb[4].mxu0 %v457_v17  ;;  %2641 = vmatprep.subr.bf16.mxu1 %v2882_v20  ;;  %v2928_v17 = vld [vmem:[%s3701_s1 + $0x360] sm:$0xff]  }
  0x43   :  { %2620 = vmatpush3.bf16.msra.mxu0 %v2881_v21  ;;  %1984 = vmatprep.mubr.bf16.mxu0 %v513_v62  ;;  %v2929_v20 = vld [vmem:[%s3701_s1 + $0x320] sm:$0xff]   ;;  %v2932_v21 = vld [vmem:[%s3701_s1 + $0x368] sm:$0xff]  }
  0x44   :  { %1945 = vmatmul.mubr.bf16.vlgmr.msra.gmra.mrb[4].mxu1 %v473_v22  ;;  %2621 = vmatprep.subr.bf16.mxu0 %v2884_v24  ;;  %v2931_v22 = vld [vmem:[%s3701_s1 + $0x3a0] sm:$0xff]   ;;  %v2934_v24 = vld [vmem:[%s3701_s1 + $0x3e8] sm:$0xff]  }
  0x45   :  { %2642 = vmatpush3.bf16.msra.mxu1 %v2883_v25  ;;  %2024 = vmatprep.mubr.bf16.mxu1 %v523_v3  ;;  %v2933_v25 = vld [vmem:[%s3701_s1 + $0x328] sm:$0xff]   ;;  %v2975_v3 = vld [vmem:[%s3701_s1 + $0x4f8] sm:$0xff]  }
  0x46   :  { %2643 = vmatprep.subr.bf16.mxu1 %v2886_v26  ;;  %v2936_v26 = vld [vmem:[%s3701_s1 + $0x370] sm:$0xff]   ;;  %v2968_v62 = vld [vmem:[%s3701_s1 + $0x4a8] sm:$0xff]  }
  0x47   :  { %2622 = vmatpush3.bf16.msra.mxu0 %v2885_v27  ;;  %v2935_v27 = vld [vmem:[%s3701_s1 + $0x3a8] sm:$0xff]  }
  0x48   :  { %2623 = vmatprep.subr.bf16.mxu0 %v2888_v28  ;;  %v2938_v28 = vld [vmem:[%s3701_s1 + $0x3f0] sm:$0xff]  }
  0x49   :  { %2644 = vmatpush3.bf16.msra.mxu1 %v2887_v29  ;;  %v2937_v29 = vld [vmem:[%s3701_s1 + $0x330] sm:$0xff]  }
  0x4a   :  { %2645 = vmatprep.subr.bf16.mxu1 %v2890_v30  ;;  %v2940_v30 = vld [vmem:[%s3701_s1 + $0x378] sm:$0xff]  }
  0x4b   :  { %2624 = vmatpush3.bf16.msra.mxu0 %v2889_v31  ;;  %v2939_v31 = vld [vmem:[%s3701_s1 + $0x3b0] sm:$0xff]  }
  0x4c   :  { %2625 = vmatprep.subr.bf16.mxu0 %v2892_v32  ;;  %v2942_v32 = vld [vmem:[%s3701_s1 + $0x3f8] sm:$0xff]  }
  0x4d   :  { %2646 = vmatpush3.bf16.msra.mxu1 %v2891_v33  ;;  %v2941_v33 = vld [vmem:[%s3701_s1 + $0x338] sm:$0xff]  }
  0x4e   :  { %2647 = vmatprep.subr.bf16.mxu1 %v2894_v35  ;;  %v506_v35 = vrot.slane %v3363_v60, %v3137_v34  ;;  %v2966_v60 = vld [vmem:[%s3701_s1 + $0x428] sm:$0xff]  }
  0x4f   :  { %2626 = vmatpush3.bf16.msra.mxu0 %v2893_v36  ;;  %v2945_v36 = vld [vmem:[%s3701_s1 + $0x440] sm:$0xff]  }
  0x50   :  { %2627 = vmatprep.subr.bf16.mxu0 %v2896_v37  ;;  %v2944_v37 = vld [vmem:[%s3701_s1 + $0x3b8] sm:$0xff]  }
  0x51   :  { %2648 = vmatpush3.bf16.msra.mxu1 %v2895_v38  ;;  %v2947_v38 = vld [vmem:[%s3701_s1 + $0x4c0] sm:$0xff]  }
  0x52   :  { %2649 = vmatprep.subr.bf16.mxu1 %v2898_v39  ;;  %v2946_v39 = vld [vmem:[%s3701_s1 + $0x400] sm:$0xff]  }
  0x53   :  { %2628 = vmatpush3.bf16.msra.mxu0 %v2897_v40  ;;  %v522_v40 = vcombine.high %v506_v35, %v506_v35 }
  0x54   :  { %2629 = vmatprep.subr.bf16.mxu0 %v2900_v41  ;;  %v2949_v41 = vld [vmem:[%s3701_s1 + $0x448] sm:$0xff]  }
  0x55   :  { %2650 = vmatpush3.bf16.msra.mxu1 %v2899_v42  ;;  %v2948_v42 = vld [vmem:[%s3701_s1 + $0x480] sm:$0xff]  }
  0x56   :  { %2651 = vmatprep.subr.bf16.mxu1 %v2902_v43  ;;  %v2951_v43 = vld [vmem:[%s3701_s1 + $0x4c8] sm:$0xff]  }
  0x57   :  { %2630 = vmatpush3.bf16.msra.mxu0 %v2901_v44  ;;  %v2950_v44 = vld [vmem:[%s3701_s1 + $0x408] sm:$0xff]  }
  0x58   :  { %2631 = vmatprep.subr.bf16.mxu0 %v2904_v45  ;;  %v2953_v45 = vld [vmem:[%s3701_s1 + $0x450] sm:$0xff]  }
  0x59   :  { %2652 = vmatpush3.bf16.msra.mxu1 %v2903_v46  ;;  %v2952_v46 = vld [vmem:[%s3701_s1 + $0x488] sm:$0xff]  }
  0x5a   :  { %2653 = vmatprep.subr.bf16.mxu1 %v2906_v47  ;;  %v2955_v47 = vld [vmem:[%s3701_s1 + $0x4d0] sm:$0xff]  }
  0x5b   :  { %2632 = vmatpush3.bf16.msra.mxu0 %v2905_v48  ;;  %v2954_v48 = vld [vmem:[%s3701_s1 + $0x410] sm:$0xff]  }
  0x5c   :  { %2633 = vmatprep.subr.bf16.mxu0 %v2908_v49  ;;  %v2957_v49 = vld [vmem:[%s3701_s1 + $0x458] sm:$0xff]  }
  0x5d   :  { %2654 = vmatpush3.bf16.msra.mxu1 %v2907_v50  ;;  %v2956_v50 = vld [vmem:[%s3701_s1 + $0x490] sm:$0xff]  }
  0x5e   :  { %2655 = vmatprep.subr.bf16.mxu1 %v2910_v51  ;;  %v2959_v51 = vld [vmem:[%s3701_s1 + $0x4d8] sm:$0xff]  }
  0x5f   :  { %2634 = vmatpush3.bf16.msra.mxu0 %v2909_v53  ;;  %v2961_v53 = vld [vmem:[%s3701_s1 + $0x460] sm:$0xff]  }
  0x60   :  { %2663 = vmatprep.subr.bf16.mxu0 %v2912_v56  ;;  %v2962_v56 = vld [vmem:[%s3701_s1 + $0x420] sm:$0xff]  }
  0x61   :  { %2656 = vmatpush3.bf16.msra.mxu1 %v2911_v58  ;;  %v2964_v58 = vld [vmem:[%s3701_s1 + $0x4a0] sm:$0xff]  }
  0x62   :  { %1985 = vmatmul.mubr.bf16.vlgmr.msra.gmra.mrb[8].mxu0 %v499_v59  ;;  %2685 = vmatprep.subr.bf16.mxu1 %v2914_v61  ;;  %v2967_v59 = vld [vmem:[%s3701_s1 + $0x4e8] sm:$0xff]   ;;  %v2969_v61 = vld [vmem:[%s3701_s1 + $0x470] sm:$0xff]  }
  0x63   :  { %2664 = vmatpush3.bf16.msra.mxu0 %v2913_v63  ;;  %2064 = vmatprep.mubr.bf16.mxu0 %v520_v5  ;;  %v2971_v63 = vld [vmem:[%s3701_s1 + $0x4f0] sm:$0xff]   ;;  %v2974_v5 = vld [vmem:[%s3701_s1 + $0x438] sm:$0xff]  }
  0x64   :  { %2025 = vmatmul.mubr.bf16.vlgmr.msra.gmra.mrb[8].mxu1 %v521_v1  ;;  %2665 = vmatprep.subr.bf16.mxu0 %v2916_v2  ;;  %v2973_v1 = vld [vmem:[%s3701_s1 + $0x478] sm:$0xff]   ;;  %v2972_v2 = vld [vmem:[%s3701_s1 + $0x4b0] sm:$0xff]  }
  0x65   :  { %2686 = vmatpush3.bf16.msra.mxu1 %v2915_v4  ;;  %2104 = vmatprep.mubr.bf16.mxu1 %v524_v8  ;;  %v22_v4 = vld [vmem:[%s3702_s0 + $0x10] sm:$0xff]  ;;  %v2977_v8 = vld [vmem:[%s3701_s1 + $0x540] sm:$0xff]  }
  0x66   :  { %2687 = vmatprep.subr.bf16.mxu1 %v2918_v6  ;;  %v532_v6 = vrot.slane %v22_v4, %v3137_v34 }
  0x67   :  { %2666 = vmatpush3.bf16.msra.mxu0 %v2917_v7  ;;  %v525_v7 = vcombine.high %v22_v4, %v22_v4 }
  0x68   :  { %2667 = vmatprep.subr.bf16.mxu0 %v2920_v9  ;;  %v540_v9 = vcombine.high %v532_v6, %v532_v6 }
  0x69   :  { %2688 = vmatpush3.bf16.msra.mxu1 %v2919_v10  ;;  %v2976_v10 = vld [vmem:[%s3701_s1 + $0x4b8] sm:$0xff]  }
  0x6a   :  { %2689 = vmatprep.subr.bf16.mxu1 %v2922_v11  ;;  %v548_v11 = vrot.slane %v532_v6, %v3137_v34 }
  0x6b   :  { %2668 = vmatpush3.bf16.msra.mxu0 %v2921_v12  ;;  %v3569_v12 = vrot.slane %v525_v7, %v3137_v34 }
  0x6c   :  { %2669 = vmatprep.subr.bf16.mxu0 %v2924_v13  ;;  %v2979_v13 = vld [vmem:[%s3701_s1 + $0x5c0] sm:$0xff]  }
  0x6d   :  { %2690 = vmatpush3.bf16.msra.mxu1 %v2923_v14  ;;  %v562_v14 = vrot.slane %v540_v9, %v3137_v34 }
  0x6e   :  { %2691 = vmatprep.subr.bf16.mxu1 %v2926_v15  ;;  %v2978_v15 = vld [vmem:[%s3701_s1 + $0x500] sm:$0xff]  }
  0x6f   :  { %2670 = vmatpush3.bf16.msra.mxu0 %v2925_v16  ;;  %v541_v16 = vcombine.high %v3569_v12, %v3569_v12 }
  0x70   :  { %2671 = vmatprep.subr.bf16.mxu0 %v2928_v17  ;;  %v570_v17 = vcombine.high %v548_v11, %v548_v11 }
  0x71   :  { %2692 = vmatpush3.bf16.msra.mxu1 %v2927_v18  ;;  %v2981_v18 = vld [vmem:[%s3701_s1 + $0x548] sm:$0xff]  }
  0x72   :  { %2693 = vmatprep.subr.bf16.mxu1 %v2930_v19  ;;  %v572_v19 = vcombine.high %v562_v14, %v562_v14 }
  0x73   :  { %2672 = vmatpush3.bf16.msra.mxu0 %v2929_v20  ;;  %v2980_v20 = vld [vmem:[%s3701_s1 + $0x580] sm:$0xff]  }
  0x74   :  { %2673 = vmatprep.subr.bf16.mxu0 %v2932_v21  ;;  %v569_v21 = vrot.slane %v541_v16, %v3137_v34 }
  0x75   :  { %2694 = vmatpush3.bf16.msra.mxu1 %v2931_v22  ;;  %v2983_v22 = vld [vmem:[%s3701_s1 + $0x5c8] sm:$0xff]  }
  0x76   :  { %2695 = vmatprep.subr.bf16.mxu1 %v2934_v24  ;;  %v2982_v24 = vld [vmem:[%s3701_s1 + $0x508] sm:$0xff]  }
  0x77   :  { %2674 = vmatpush3.bf16.msra.mxu0 %v2933_v25  ;;  %v573_v25 = vcombine.high %v569_v21, %v569_v21 }
  0x78   :  { %2675 = vmatprep.subr.bf16.mxu0 %v2936_v26  ;;  %v2985_v26 = vld [vmem:[%s3701_s1 + $0x550] sm:$0xff]  }
  0x79   :  { %2696 = vmatpush3.bf16.msra.mxu1 %v2935_v27  ;;  %v2984_v27 = vld [vmem:[%s3701_s1 + $0x588] sm:$0xff]  }
  0x7a   :  { %2697 = vmatprep.subr.bf16.mxu1 %v2938_v28  ;;  %v2987_v28 = vld [vmem:[%s3701_s1 + $0x5d0] sm:$0xff]  }
  0x7b   :  { %2676 = vmatpush3.bf16.msra.mxu0 %v2937_v29  ;;  %v2986_v29 = vld [vmem:[%s3701_s1 + $0x510] sm:$0xff]  }
  0x7c   :  { %2677 = vmatprep.subr.bf16.mxu0 %v2940_v30  ;;  %v2989_v30 = vld [vmem:[%s3701_s1 + $0x558] sm:$0xff]  }
  0x7d   :  { %2698 = vmatpush3.bf16.msra.mxu1 %v2939_v31  ;;  %v2988_v31 = vld [vmem:[%s3701_s1 + $0x590] sm:$0xff]  }
  0x7e   :  { %2699 = vmatprep.subr.bf16.mxu1 %v2942_v32  ;;  %v2991_v32 = vld [vmem:[%s3701_s1 + $0x5d8] sm:$0xff]  }
  0x7f   :  { %2678 = vmatpush3.bf16.msra.mxu0 %v2941_v33  ;;  %v2990_v33 = vld [vmem:[%s3701_s1 + $0x518] sm:$0xff]  }
  0x80   :  { %2707 = vmatprep.subr.bf16.mxu0 %v2945_v36  ;;  %v2992_v36 = vld [vmem:[%s3701_s1 + $0x598] sm:$0xff]  }
  0x81   :  { %2700 = vmatpush3.bf16.msra.mxu1 %v2944_v37  ;;  %v2995_v37 = vld [vmem:[%s3701_s1 + $0x5e0] sm:$0xff]  }
  0x82   :  { %2065 = vmatmul.mubr.bf16.vlgmr.msra.gmra.mrb[12].mxu0 %v506_v35  ;;  %2729 = vmatprep.subr.bf16.mxu1 %v2947_v38  ;;  %v2993_v35 = vld [vmem:[%s3701_s1 + $0x560] sm:$0xff]  }
  0x83   :  { %2708 = vmatpush3.bf16.msra.mxu0 %v2946_v39  ;;  %2144 = vmatprep.mubr.bf16.mxu0 %v562_v14  ;;  %v2994_v38 = vld [vmem:[%s3701_s1 + $0x520] sm:$0xff]   ;;  %v2997_v39 = vld [vmem:[%s3701_s1 + $0x568] sm:$0xff]  }
  0x84   :  { %2105 = vmatmul.mubr.bf16.vlgmr.msra.gmra.mrb[12].mxu1 %v522_v40  ;;  %2709 = vmatprep.subr.bf16.mxu0 %v2949_v41  ;;  %v2996_v40 = vld [vmem:[%s3701_s1 + $0x5a0] sm:$0xff]   ;;  %v2999_v41 = vld [vmem:[%s3701_s1 + $0x5e8] sm:$0xff]  }
  0x85   :  { %2730 = vmatpush3.bf16.msra.mxu1 %v2948_v42  ;;  %2184 = vmatprep.mubr.bf16.mxu1 %v572_v19  ;;  %v2998_v42 = vld [vmem:[%s3701_s1 + $0x528] sm:$0xff]  }
  0x86   :  { %2731 = vmatprep.subr.bf16.mxu1 %v2951_v43  ;;  %v3001_v43 = vld [vmem:[%s3701_s1 + $0x570] sm:$0xff]  }
  0x87   :  { %2710 = vmatpush3.bf16.msra.mxu0 %v2950_v44  ;;  %v3000_v44 = vld [vmem:[%s3701_s1 + $0x5a8] sm:$0xff]  }
  0x88   :  { %2711 = vmatprep.subr.bf16.mxu0 %v2953_v45  ;;  %v3003_v45 = vld [vmem:[%s3701_s1 + $0x5f0] sm:$0xff]  }
  0x89   :  { %2732 = vmatpush3.bf16.msra.mxu1 %v2952_v46  ;;  %v3002_v46 = vld [vmem:[%s3701_s1 + $0x530] sm:$0xff]  }
  0x8a   :  { %2733 = vmatprep.subr.bf16.mxu1 %v2955_v47  ;;  %v3005_v47 = vld [vmem:[%s3701_s1 + $0x578] sm:$0xff]  }
  0x8b   :  { %2712 = vmatpush3.bf16.msra.mxu0 %v2954_v48  ;;  %v3004_v48 = vld [vmem:[%s3701_s1 + $0x5b0] sm:$0xff]  }
  0x8c   :  { %2713 = vmatprep.subr.bf16.mxu0 %v2957_v49  ;;  %v3007_v49 = vld [vmem:[%s3701_s1 + $0x5f8] sm:$0xff]  }
  0x8d   :  { %2734 = vmatpush3.bf16.msra.mxu1 %v2956_v50  ;;  %v3006_v50 = vld [vmem:[%s3701_s1 + $0x538] sm:$0xff]  }
  0x8e   :  { %2735 = vmatprep.subr.bf16.mxu1 %v2959_v51  ;;  %v555_v51 = vrot.slane %v3569_v12, %v3137_v34 }
  0x8f   :  { %2714 = vmatpush3.bf16.msra.mxu0 %v2958_v52  ;;  %v3009_v52 = vld [vmem:[%s3701_s1 + $0x5b8] sm:$0xff]  }
  0x90   :  { %2715 = vmatprep.subr.bf16.mxu0 %v2961_v53  ;;  %v3010_v53 = vld [vmem:[%s3701_s1 + $0x600] sm:$0xff]  }
  0x91   :  { %2736 = vmatpush3.bf16.msra.mxu1 %v2960_v54  ;;  %v3017_v54 = vmov 0.0  }
  0x92   :  { %2737 = vmatprep.subr.bf16.mxu1 %v2963_v55  ;;  %v571_v55 = vcombine.high %v555_v51, %v555_v51 }
  0x93   :  { %2716 = vmatpush3.bf16.msra.mxu0 %v2962_v56  ;;  %v3011_v56 = vld [vmem:[%s3701_s1 + $0x608] sm:$0xff]  }
  0x94   :  { %2717 = vmatprep.subr.bf16.mxu0 %v2965_v57  ;;  %v3012_v57 = vld [vmem:[%s3701_s1 + $0x610] sm:$0xff]  }
  0x95   :  { %2738 = vmatpush3.bf16.msra.mxu1 %v2964_v58  ;;  %v3013_v58 = vld [vmem:[%s3701_s1 + $0x618] sm:$0xff]  }
  0x96   :  { %2739 = vmatprep.subr.bf16.mxu1 %v2967_v59  ;;  %v2333_v59 = vld.sshfl [vmem:[%s3702_s0 + $0x18] sm:$0x1 pattern:$0x75316420] }
  0x97   :  { %2718 = vmatpush3.bf16.msra.mxu0 %v2966_v60  ;;  %v587_v60 = vrot.slane %v2333_v59, %v3137_v34 }
  0x98   :  { %2719 = vmatprep.subr.bf16.mxu0 %v2969_v61 }
  0x99   :  { %2740 = vmatpush3.bf16.msra.mxu1 %v2968_v62  ;;  %v2332_v62 = vld [vmem:[%s3703_s2] ss:$0 sm:$0xff] }
  0x9a   :  { %2741 = vmatprep.subr.bf16.mxu1 %v2971_v63 }
  0x9b   :  { %2720 = vmatpush3.bf16.msra.mxu0 %v2970_v0 }
  0x9c   :  { %2721 = vmatprep.subr.bf16.mxu0 %v2973_v1 }
  0x9d   :  { %2742 = vmatpush3.bf16.msra.mxu1 %v2972_v2 }
  0x9e   :  { %2743 = vmatprep.subr.bf16.mxu1 %v2975_v3 }
  0x9f   :  { %2722 = vmatpush3.bf16.msra.mxu0 %v2974_v5 }
  0xa0   :  { %2751 = vmatprep.subr.bf16.mxu0 %v2977_v8 }
  0xa1   :  { %2744 = vmatpush3.bf16.msra.mxu1 %v2976_v10 }
  0xa2   :  { %2145 = vmatmul.mubr.bf16.vlgmr.msra.gmra.mrb[16].mxu0 %v548_v11  ;;  %2773 = vmatprep.subr.bf16.mxu1 %v2979_v13 }
  0xa3   :  { %2752 = vmatpush3.bf16.msra.mxu0 %v2978_v15  ;;  %2224 = vmatprep.mubr.bf16.mxu0 %v569_v21 }
  0xa4   :  { %2185 = vmatmul.mubr.bf16.vlgmr.msra.gmra.mrb[16].mxu1 %v570_v17  ;;  %2753 = vmatprep.subr.bf16.mxu0 %v2981_v18 }
  0xa5   :  { %2774 = vmatpush3.bf16.msra.mxu1 %v2980_v20  ;;  %2264 = vmatprep.mubr.bf16.mxu1 %v573_v25 }
  0xa6   :  { %2775 = vmatprep.subr.bf16.mxu1 %v2983_v22 }
  0xa7   :  { %2754 = vmatpush3.bf16.msra.mxu0 %v2982_v24 }
  0xa8   :  { %2755 = vmatprep.subr.bf16.mxu0 %v2985_v26 }
  0xa9   :  { %2776 = vmatpush3.bf16.msra.mxu1 %v2984_v27 }
  0xaa   :  { %2777 = vmatprep.subr.bf16.mxu1 %v2987_v28 }
  0xab   :  { %2756 = vmatpush3.bf16.msra.mxu0 %v2986_v29 }
  0xac   :  { %2757 = vmatprep.subr.bf16.mxu0 %v2989_v30 }
  0xad   :  { %2778 = vmatpush3.bf16.msra.mxu1 %v2988_v31 }
  0xae   :  { %2779 = vmatprep.subr.bf16.mxu1 %v2991_v32 }
  0xaf   :  { %2758 = vmatpush3.bf16.msra.mxu0 %v2990_v33 }
  0xb0   :  { %2759 = vmatprep.subr.bf16.mxu0 %v2993_v35 }
  0xb1   :  { %2780 = vmatpush3.bf16.msra.mxu1 %v2992_v36 }
  0xb2   :  { %2781 = vmatprep.subr.bf16.mxu1 %v2995_v37 }
  0xb3   :  { %2760 = vmatpush3.bf16.msra.mxu0 %v2994_v38 }
  0xb4   :  { %2761 = vmatprep.subr.bf16.mxu0 %v2997_v39 }
  0xb5   :  { %2782 = vmatpush3.bf16.msra.mxu1 %v2996_v40 }
  0xb6   :  { %2783 = vmatprep.subr.bf16.mxu1 %v2999_v41 }
  0xb7   :  { %2762 = vmatpush3.bf16.msra.mxu0 %v2998_v42 }
  0xb8   :  { %2763 = vmatprep.subr.bf16.mxu0 %v3001_v43 }
  0xb9   :  { %2784 = vmatpush3.bf16.msra.mxu1 %v3000_v44 }
  0xba   :  { %2785 = vmatprep.subr.bf16.mxu1 %v3003_v45 }
  0xbb   :  { %2764 = vmatpush3.bf16.msra.mxu0 %v3002_v46 }
  0xbc   :  { %2765 = vmatprep.subr.bf16.mxu0 %v3005_v47 }
  0xbd   :  { %2786 = vmatpush3.bf16.msra.mxu1 %v3004_v48 }
  0xbe   :  { %2787 = vmatprep.subr.bf16.mxu1 %v3007_v49 }
  0xbf   :  { %2766 = vmatpush3.bf16.msra.mxu0 %v3006_v50 }
  0xc0   :  { %2800 = vmatprep.subr.bf16.mxu0 %v3017_v54 }
  0xc1   :  { %2788 = vmatpush3.bf16.msra.mxu1 %v3009_v52 }
  0xc2   :  { %2225 = vmatmul.mubr.bf16.vlgmr.msra.gmra.mrb[20].mxu0 %v555_v51 }
  0xc3   :  { %2801 = vmatpush3.bf16.msra.mxu0 %v3010_v53  ;;  %2808 = vmatprep.mubr.msk.bf16.mxu0 %vm3018_vm0, %v3017_v54 }
  0xc4   :  { %2265 = vmatmul.mubr.bf16.vlgmr.msra.gmra.mrb[20].mxu1 %v571_v55  ;;  %2802 = vmatprep.subr.bf16.mxu0 %v3017_v54 }
  0xc7   :  { %2803 = vmatpush3.bf16.msra.mxu0 %v3011_v56 }
  0xc8   :  { %2804 = vmatprep.subr.bf16.mxu0 %v3017_v54 }
  0xcb   :  { %2805 = vmatpush3.bf16.msra.mxu0 %v3012_v57 }
  0xcc   :  { %2806 = vmatprep.subr.bf16.mxu0 %v3017_v54 }
  0xcf   :  { %2807 = vmatpush3.bf16.msra.mxu0 %v3013_v58 }
  0xd2   :  { %2809 = vmatmul.mubr.msk.bf16.vlgmr.msra.gmra.mrb[24].mxu0 %vm1788_vm1, %v587_v60 }
  0xf5   :  { %v2547_v61 = vpop.f32.mrb[0].mxu0 }
  0xf6   :  { %v2548_v63 = vpop.f32.mrb[1].mxu0 }
  0xf7   :  { %v2549_v0 = vadd.f32 %v2548_v63, %v2547_v61  ;;  %v2550_v1 = vpop.f32.mrb[2].mxu0  ;;  %v2569_v2 = vpop.f32.mrb[0].mxu1 }
  0xf8   :  { %v2551_v3 = vpop.f32.mrb[3].mxu0  ;;  %v2570_v4 = vpop.f32.mrb[1].mxu1 }
  0xf9   :  { %v1827_v5 = vadd.f32 %v2549_v0, %v2332_v62  ;;  %v2571_v6 = vadd.f32 %v2570_v4, %v2569_v2  ;;  %v2572_v7 = vpop.f32.mrb[2].mxu1 }
  0xfa   :  { %v2573_v8 = vpop.f32.mrb[3].mxu1  ;;  %v2315_v7 = vand.u32 127, %v431_v23  ;;  %v2318_v23 = vld [vmem:[%s3705_s3] sm:$0x3] }
  0xfb   :  { %v1867_v9 = vadd.f32 %v2571_v6, %v1827_v5 }
  0xfc   :  { %vm2316_vm3 = vcmp.ge.s32.totalorder %v2315_v7, 16 }
 0x115   :  { %v2591_v34 = vpop.f32.mrb[4].mxu0 }
 0x116   :  { %v2592_v10 = vpop.f32.mrb[5].mxu0 }
 0x117   :  { %v2593_v11 = vadd.f32 %v2592_v10, %v2591_v34  ;;  %v2594_v12 = vpop.f32.mrb[6].mxu0  ;;  %v2613_v13 = vpop.f32.mrb[4].mxu1 }
 0x118   :  { %v2595_v14 = vpop.f32.mrb[7].mxu0  ;;  %v2614_v15 = vpop.f32.mrb[5].mxu1 }
 0x119   :  { %v1907_v16 = vadd.f32 %v2593_v11, %v1867_v9  ;;  %v2615_v17 = vadd.f32 %v2614_v15, %v2613_v13  ;;  %v2616_v18 = vpop.f32.mrb[6].mxu1 }
 0x11a   :  { %v2617_v19 = vpop.f32.mrb[7].mxu1 }
 0x11b   :  { %v1947_v20 = vadd.f32 %v2615_v17, %v1907_v16 }
 0x135   :  { %v2635_v21 = vpop.f32.mrb[8].mxu0 }
 0x136   :  { %v2636_v22 = vpop.f32.mrb[9].mxu0 }
 0x137   :  { %v2637_v24 = vadd.f32 %v2636_v22, %v2635_v21  ;;  %v2638_v25 = vpop.f32.mrb[10].mxu0  ;;  %v2657_v26 = vpop.f32.mrb[8].mxu1 }
 0x138   :  { %v2639_v27 = vpop.f32.mrb[11].mxu0  ;;  %v2658_v28 = vpop.f32.mrb[9].mxu1 }
 0x139   :  { %v1987_v29 = vadd.f32 %v2637_v24, %v1947_v20  ;;  %v2659_v30 = vadd.f32 %v2658_v28, %v2657_v26  ;;  %v2660_v31 = vpop.f32.mrb[10].mxu1 }
 0x13a   :  { %v2661_v32 = vpop.f32.mrb[11].mxu1 }
 0x13b   :  { %v2027_v33 = vadd.f32 %v2659_v30, %v1987_v29 }
 0x155   :  { %v2679_v35 = vpop.f32.mrb[12].mxu0 }
 0x156   :  { %v2680_v36 = vpop.f32.mrb[13].mxu0 }
 0x157   :  { %v2681_v37 = vadd.f32 %v2680_v36, %v2679_v35  ;;  %v2682_v38 = vpop.f32.mrb[14].mxu0  ;;  %v2701_v39 = vpop.f32.mrb[12].mxu1 }
 0x158   :  { %v2683_v40 = vpop.f32.mrb[15].mxu0  ;;  %v2702_v41 = vpop.f32.mrb[13].mxu1 }
 0x159   :  { %v2067_v42 = vadd.f32 %v2681_v37, %v2027_v33  ;;  %v2703_v43 = vadd.f32 %v2702_v41, %v2701_v39  ;;  %v2704_v44 = vpop.f32.mrb[14].mxu1 }
 0x15a   :  { %v2705_v45 = vpop.f32.mrb[15].mxu1 }
 0x15b   :  { %v2107_v46 = vadd.f32 %v2703_v43, %v2067_v42 }
 0x175   :  { %v2723_v47 = vpop.f32.mrb[16].mxu0 }
 0x176   :  { %v2724_v48 = vpop.f32.mrb[17].mxu0 }
 0x177   :  { %v2725_v49 = vadd.f32 %v2724_v48, %v2723_v47  ;;  %v2726_v50 = vpop.f32.mrb[18].mxu0  ;;  %v2745_v51 = vpop.f32.mrb[16].mxu1 }
 0x178   :  { %v2727_v52 = vpop.f32.mrb[19].mxu0  ;;  %v2746_v53 = vpop.f32.mrb[17].mxu1 }
 0x179   :  { %v2147_v54 = vadd.f32 %v2725_v49, %v2107_v46  ;;  %v2747_v55 = vadd.f32 %v2746_v53, %v2745_v51  ;;  %v2748_v56 = vpop.f32.mrb[18].mxu1 }
 0x17a   :  { %v2749_v57 = vpop.f32.mrb[19].mxu1 }
 0x17b   :  { %v2187_v58 = vadd.f32 %v2747_v55, %v2147_v54 }
 0x195   :  { %v2767_v59 = vpop.f32.mrb[20].mxu0 }
 0x196   :  { %v2768_v60 = vpop.f32.mrb[21].mxu0 }
 0x197   :  { %v2769_v61 = vadd.f32 %v2768_v60, %v2767_v59  ;;  %v2770_v62 = vpop.f32.mrb[22].mxu0  ;;  %v2789_v63 = vpop.f32.mrb[20].mxu1 }
 0x198   :  { %v2771_v0 = vpop.f32.mrb[23].mxu0  ;;  %v2790_v1 = vpop.f32.mrb[21].mxu1 }
 0x199   :  { %v2227_v2 = vadd.f32 %v2769_v61, %v2187_v58  ;;  %v2791_v3 = vadd.f32 %v2790_v1, %v2789_v63  ;;  %v2792_v4 = vpop.f32.mrb[22].mxu1 }
 0x19a   :  { %v2793_v5 = vpop.f32.mrb[23].mxu1 }
 0x19b   :  { %v2267_v6 = vadd.f32 %v2791_v3, %v2227_v2 }
 0x1a5   :  { %v2306_v8 = vpop.f32.mrb[24].mxu0 }
 0x1a6   :  { %v2307_v9 = vadd.f32 %v2306_v8, %v2267_v6  ;;  %v2810_v34 = vpop.f32.mrb[25].mxu0 }
 0x1a7   :  { %v2309_v10 = vpop.f32.mrb[26].mxu0 }
 0x1a8   :  { %2313 = vst.msk [vmem:[%s3704_s4] sm:$0x3] %vm2312_vm2, %v2307_v9  ;;  %v2317_v11 = vsel %vm2316_vm3, %v2307_v9, 0.0  ;;  %v2811_v12 = vpop.f32.mrb[27].mxu0 }
 0x1a9   :  { %v2319_v13 = vmul.f32 0.5, %v2317_v11 }
 0x1ab   :  { %v2320_v14 = vmul.f32 1.442695, %v2319_v13 }
 0x1ad   :  { %3014 = vpow2.f32 %v2320_v14 }
 0x1b7   :  { %v3015_v15 = vpop.eup %3014 }
 0x1b8   :  { %v2322_v16 = vmul.f32 %v3015_v15, %v2318_v23 }
 0x1ba   :  { %2323 = vst.msk [vmem:[%s3706_s5] sm:$0x3] %vm2312_vm2, %v2322_v16 }

// kernel: vae_forward.13
= control target key start
LH: loop header
LB: loop body
LE: loop exit
PB: predicated region body
PF: predicated region fallthrough
CT: control target
= control target key end

     0   :  { %v61_v47 = vlaneseq  ;;  %s921_s1 = inlined_call_operand.vmem [shape: bf16[256,256], index: 1, kind: input, shape index: {}]   ;;  %s922_s0 = inlined_call_operand.vmem [shape: bf16[98,256], index: 0, kind: input, shape index: {}]   ;;  %s923_s2 = inlined_call_operand.vmem [shape: f32[1,256], index: 2, kind: input, shape index: {}]   ;;  %s924_s3 = inlined_call_operand.vmem [shape: bf16[98,256], index: 3, kind: output, shape index: {}]  }
   0x1   :  { %v626_v0 = vld [vmem:[%s921_s1 + $0x4] ss:$8 sps:$4 sm:$0xff]   ;;  %v628_v1 = vld [vmem:[%s921_s1] ss:$8 sps:$4 sm:$0xff]   ;;  %v629_v2 = vld [vmem:[%s921_s1 + $0x14] ss:$8 sps:$4 sm:$0xff]  }
   0x2   :  { %298 = vmatprep.subr.bf16.mxu0 %v626_v0  ;;  %594 = vmatprep.subr.bf16.mxu1 %v626_v0  ;;  %v631_v3 = vld [vmem:[%s921_s1 + $0x10] ss:$8 sps:$4 sm:$0xff]   ;;  %v632_v4 = vld [vmem:[%s921_s1 + $0x24] ss:$8 sps:$4 sm:$0xff]   ;;  %v634_v5 = vld [vmem:[%s921_s1 + $0x20] ss:$8 sps:$4 sm:$0xff]  }
   0x3   :  { %299 = vmatpush1.bf16.msra.mxu0 %v628_v1  ;;  %610 = vmatpush1.bf16.msra.mxu1 %v628_v1  ;;  %v635_v6 = vld [vmem:[%s921_s1 + $0x34] ss:$8 sps:$4 sm:$0xff]   ;;  %v637_v7 = vld [vmem:[%s921_s1 + $0x30] ss:$8 sps:$4 sm:$0xff]   ;;  %v638_v8 = vld [vmem:[%s921_s1 + $0x44] ss:$8 sps:$4 sm:$0xff]  }
   0x4   :  { %300 = vmatprep.subr.bf16.mxu0 %v629_v2  ;;  %595 = vmatprep.subr.bf16.mxu1 %v629_v2  ;;  %v640_v9 = vld [vmem:[%s921_s1 + $0x40] ss:$8 sps:$4 sm:$0xff]   ;;  %v641_v10 = vld [vmem:[%s921_s1 + $0x54] ss:$8 sps:$4 sm:$0xff]   ;;  %v643_v11 = vld [vmem:[%s921_s1 + $0x50] ss:$8 sps:$4 sm:$0xff]  }
   0x5   :  { %v644_v12 = vld [vmem:[%s921_s1 + $0x64] ss:$8 sps:$4 sm:$0xff]   ;;  %v646_v14 = vld [vmem:[%s921_s1 + $0x60] ss:$8 sps:$4 sm:$0xff]   ;;  %v647_v16 = vld [vmem:[%s921_s1 + $0x74] ss:$8 sps:$4 sm:$0xff]  }
   0x6   :  { %v676_v13 = vld [vmem:[%s922_s0 + $0x4] ss:$8 sps:$4 sm:$0xff]   ;;  %v649_v17 = vld [vmem:[%s921_s1 + $0x70] ss:$8 sps:$4 sm:$0xff]   ;;  %v652_v19 = vld [vmem:[%s921_s1 + $0x80] ss:$8 sps:$4 sm:$0xff]  }
   0x7   :  { %301 = vmatpush1.bf16.msra.mxu0 %v631_v3  ;;  %611 = vmatpush1.bf16.msra.mxu1 %v631_v3  ;;  %v679_v15 = vld [vmem:[%s922_s0 + $0x44] ss:$8 sps:$4 sm:$0xff]   ;;  %v653_v20 = vld [vmem:[%s921_s1 + $0x94] ss:$8 sps:$4 sm:$0xff]   ;;  %v655_v21 = vld [vmem:[%s921_s1 + $0x90] ss:$8 sps:$4 sm:$0xff]  }
   0x8   :  { %302 = vmatprep.subr.bf16.mxu0 %v632_v4  ;;  %596 = vmatprep.subr.bf16.mxu1 %v632_v4  ;;  %v650_v18 = vld [vmem:[%s921_s1 + $0x84] ss:$8 sps:$4 sm:$0xff]   ;;  %v658_v23 = vld [vmem:[%s921_s1 + $0xa0] ss:$8 sps:$4 sm:$0xff]   ;;  %v659_v24 = vld [vmem:[%s921_s1 + $0xb4] ss:$8 sps:$4 sm:$0xff]  }
   0x9   :  { %330 = vmatprep.mubr.bf16.mxu0 %v676_v13  ;;  %370 = vmatprep.mubr.bf16.mxu1 %v679_v15  ;;  %v656_v22 = vld [vmem:[%s921_s1 + $0xa4] ss:$8 sps:$4 sm:$0xff]   ;;  %v661_v25 = vld [vmem:[%s921_s1 + $0xb0] ss:$8 sps:$4 sm:$0xff]   ;;  %v664_v27 = vld [vmem:[%s921_s1 + $0xc0] ss:$8 sps:$4 sm:$0xff]  }
   0xa   :  { %v662_v26 = vld [vmem:[%s921_s1 + $0xc4] ss:$8 sps:$4 sm:$0xff]   ;;  %v665_v28 = vld [vmem:[%s921_s1 + $0xd4] ss:$8 sps:$4 sm:$0xff]   ;;  %v667_v29 = vld [vmem:[%s921_s1 + $0xd0] ss:$8 sps:$4 sm:$0xff]  }
   0xb   :  { %303 = vmatpush1.bf16.msra.mxu0 %v634_v5  ;;  %612 = vmatpush1.bf16.msra.mxu1 %v634_v5  ;;  %v668_v30 = vld [vmem:[%s921_s1 + $0xe4] ss:$8 sps:$4 sm:$0xff]   ;;  %v670_v31 = vld [vmem:[%s921_s1 + $0xe0] ss:$8 sps:$4 sm:$0xff]   ;;  %v671_v32 = vld [vmem:[%s921_s1 + $0xf4] ss:$8 sps:$4 sm:$0xff]  }
   0xc   :  { %304 = vmatprep.subr.bf16.mxu0 %v635_v6  ;;  %597 = vmatprep.subr.bf16.mxu1 %v635_v6  ;;  %v673_v33 = vld [vmem:[%s921_s1 + $0xf0] ss:$8 sps:$4 sm:$0xff]   ;;  %v674_v34 = vld [vmem:[%s922_s0] ss:$8 sps:$4 sm:$0xff]   ;;  %v680_v36 = vld [vmem:[%s922_s0 + $0x14] ss:$8 sps:$4 sm:$0xff]  }
   0xd   :  { %v677_v35 = vld [vmem:[%s922_s0 + $0x40] ss:$8 sps:$4 sm:$0xff]   ;;  %v683_v37 = vld [vmem:[%s922_s0 + $0x54] ss:$8 sps:$4 sm:$0xff]   ;;  %v682_v39 = vld [vmem:[%s922_s0 + $0x10] ss:$8 sps:$4 sm:$0xff]  }
   0xe   :  { %v26_v38 = vld [vmem:[%s922_s0 + $0x60] sm:$0x11]  ;;  %v687_v40 = vld [vmem:[%s922_s0 + $0x50] ss:$8 sps:$4 sm:$0xff]   ;;  %v690_v45 = vld [vmem:[%s922_s0 + $0x34] ss:$8 sps:$4 sm:$0xff]  }
   0xf   :  { %305 = vmatpush1.bf16.msra.mxu0 %v637_v7  ;;  %613 = vmatpush1.bf16.msra.mxu1 %v637_v7  ;;  %v685_v41 = vld [vmem:[%s922_s0 + $0x24] ss:$8 sps:$4 sm:$0xff]   ;;  %v535_v42 = vcombine.high %v26_v38, %v26_v38  ;;  %v688_v43 = vld [vmem:[%s922_s0 + $0x20] ss:$8 sps:$4 sm:$0xff]   ;;  %v534_v44 = vcombine.low %v26_v38, %v26_v38  ;;  %v693_v46 = vld [vmem:[%s922_s0 + $0x30] ss:$8 sps:$4 sm:$0xff]  }
  0x10   :  { %306 = vmatprep.subr.bf16.mxu0 %v638_v8  ;;  %598 = vmatprep.subr.bf16.mxu1 %v638_v8  ;;  %v62_v48 = vshrl.u32 %v61_v47, 7  ;;  %v59_v50 = vld [vmem:[%s923_s2] sm:$0x3] }
  0x12   :  { %v63_v49 = vsub.s32 0, %v62_v48  ;;  %v67_v51 = vsub.s32 1, %v62_v48 }
  0x13   :  { %307 = vmatpush1.bf16.msra.mxu0 %v640_v9  ;;  %614 = vmatpush1.bf16.msra.mxu1 %v640_v9 }
  0x14   :  { %308 = vmatprep.subr.bf16.mxu0 %v641_v10  ;;  %599 = vmatprep.subr.bf16.mxu1 %v641_v10  ;;  %v852_v52 = vrot.slane %v59_v50, %v63_v49  ;;  %v854_v53 = vrot.slane %v59_v50, %v67_v51 }
  0x17   :  { %309 = vmatpush1.bf16.msra.mxu0 %v643_v11  ;;  %615 = vmatpush1.bf16.msra.mxu1 %v643_v11 }
  0x18   :  { %310 = vmatprep.subr.bf16.mxu0 %v644_v12  ;;  %600 = vmatprep.subr.bf16.mxu1 %v644_v12 }
  0x1b   :  { %311 = vmatpush1.bf16.msra.mxu0 %v646_v14  ;;  %616 = vmatpush1.bf16.msra.mxu1 %v646_v14 }
  0x1c   :  { %312 = vmatprep.subr.bf16.mxu0 %v647_v16  ;;  %601 = vmatprep.subr.bf16.mxu1 %v647_v16 }
  0x1f   :  { %313 = vmatpush1.bf16.msra.mxu0 %v649_v17  ;;  %617 = vmatpush1.bf16.msra.mxu1 %v649_v17 }
  0x20   :  { %314 = vmatprep.subr.bf16.mxu0 %v650_v18  ;;  %602 = vmatprep.subr.bf16.mxu1 %v650_v18 }
  0x23   :  { %315 = vmatpush1.bf16.msra.mxu0 %v652_v19  ;;  %618 = vmatpush1.bf16.msra.mxu1 %v652_v19 }
  0x24   :  { %316 = vmatprep.subr.bf16.mxu0 %v653_v20  ;;  %603 = vmatprep.subr.bf16.mxu1 %v653_v20 }
  0x27   :  { %317 = vmatpush1.bf16.msra.mxu0 %v655_v21  ;;  %619 = vmatpush1.bf16.msra.mxu1 %v655_v21 }
  0x28   :  { %318 = vmatprep.subr.bf16.mxu0 %v656_v22  ;;  %604 = vmatprep.subr.bf16.mxu1 %v656_v22 }
  0x2b   :  { %319 = vmatpush1.bf16.msra.mxu0 %v658_v23  ;;  %620 = vmatpush1.bf16.msra.mxu1 %v658_v23 }
  0x2c   :  { %320 = vmatprep.subr.bf16.mxu0 %v659_v24  ;;  %605 = vmatprep.subr.bf16.mxu1 %v659_v24 }
  0x2f   :  { %321 = vmatpush1.bf16.msra.mxu0 %v661_v25  ;;  %621 = vmatpush1.bf16.msra.mxu1 %v661_v25 }
  0x30   :  { %322 = vmatprep.subr.bf16.mxu0 %v662_v26  ;;  %606 = vmatprep.subr.bf16.mxu1 %v662_v26 }
  0x33   :  { %323 = vmatpush1.bf16.msra.mxu0 %v664_v27  ;;  %622 = vmatpush1.bf16.msra.mxu1 %v664_v27 }
  0x34   :  { %324 = vmatprep.subr.bf16.mxu0 %v665_v28  ;;  %607 = vmatprep.subr.bf16.mxu1 %v665_v28 }
  0x37   :  { %325 = vmatpush1.bf16.msra.mxu0 %v667_v29  ;;  %623 = vmatpush1.bf16.msra.mxu1 %v667_v29 }
  0x38   :  { %326 = vmatprep.subr.bf16.mxu0 %v668_v30  ;;  %608 = vmatprep.subr.bf16.mxu1 %v668_v30 }
  0x3b   :  { %327 = vmatpush1.bf16.msra.mxu0 %v670_v31  ;;  %624 = vmatpush1.bf16.msra.mxu1 %v670_v31 }
  0x3c   :  { %328 = vmatprep.subr.bf16.mxu0 %v671_v32  ;;  %609 = vmatprep.subr.bf16.mxu1 %v671_v32 }
  0x3f   :  { %329 = vmatpush1.bf16.msra.mxu0 %v673_v33  ;;  %625 = vmatpush1.bf16.msra.mxu1 %v673_v33 }
  0x42   :  { %331 = vmatmul.mubr.bf16.vlgmr.msra.gmra.mrb[0].mxu0 %v674_v34  ;;  %371 = vmatmul.mubr.bf16.vlgmr.msra.gmra.mrb[0].mxu1 %v677_v35 }
  0x43   :  { %340 = vmatprep.mubr.bf16.mxu0 %v680_v36  ;;  %380 = vmatprep.mubr.bf16.mxu1 %v683_v37 }
  0x4a   :  { %341 = vmatmul.mubr.bf16.gmra.mrb[4].mxu0 %v682_v39  ;;  %381 = vmatmul.mubr.bf16.gmra.mrb[4].mxu1 %v687_v40 }
  0x4b   :  { %350 = vmatprep.mubr.bf16.mxu0 %v685_v41  ;;  %390 = vmatprep.mubr.bf16.mxu1 %v535_v42 }
  0x52   :  { %351 = vmatmul.mubr.bf16.gmra.mrb[8].mxu0 %v688_v43  ;;  %391 = vmatmul.mubr.bf16.gmra.mrb[8].mxu1 %v534_v44 }
  0x53   :  { %360 = vmatprep.mubr.bf16.mxu0 %v690_v45 }
  0x5a   :  { %361 = vmatmul.mubr.bf16.gmra.mrb[12].mxu0 %v693_v46 }
 0x115   :  { %v332_v54 = vpop.f32.mrb[0].mxu0  ;;  %v372_v55 = vpop.f32.mrb[0].mxu1 }
 0x116   :  { %v333_v56 = vadd.f32 %v332_v54, %v852_v52  ;;  %v334_v57 = vpop.f32.mrb[1].mxu0  ;;  %v373_v58 = vadd.f32 %v372_v55, %v852_v52  ;;  %v374_v59 = vpop.f32.mrb[1].mxu1 }
 0x117   :  { %v335_v60 = vadd.f32 %v334_v57, %v854_v53  ;;  %v336_v61 = vpop.f32.mrb[2].mxu0  ;;  %v375_v62 = vadd.f32 %v374_v59, %v854_v53  ;;  %v376_v63 = vpop.f32.mrb[2].mxu1 }
 0x118   :  { %v399_v0 = vmax.f32 %v333_v56, 0.0  ;;  %v337_v1 = vadd.f32 %v336_v61, %v852_v52  ;;  %v338_v2 = vpop.f32.mrb[3].mxu0  ;;  %v415_v3 = vmax.f32 %v373_v58, 0.0  ;;  %v377_v4 = vadd.f32 %v376_v63, %v852_v52  ;;  %v378_v5 = vpop.f32.mrb[3].mxu1 }
 0x119   :  { %v400_v6 = vmax.f32 %v335_v60, 0.0  ;;  %v339_v7 = vadd.f32 %v338_v2, %v854_v53  ;;  %v416_v8 = vmax.f32 %v375_v62, 0.0  ;;  %v379_v9 = vadd.f32 %v378_v5, %v854_v53 }
 0x11a   :  { %v401_v10 = vmax.f32 %v337_v1, 0.0  ;;  %v417_v11 = vmax.f32 %v377_v4, 0.0 }
 0x11b   :  { %v581_v12 = vpack.c.bf16 %v400_v6, %v399_v0  ;;  %v402_v13 = vmax.f32 %v339_v7, 0.0  ;;  %v589_v14 = vpack.c.bf16 %v416_v8, %v415_v3  ;;  %v418_v15 = vmax.f32 %v379_v9, 0.0 }
 0x11d   :  { %505 = vst [vmem:[%s924_s3] sm:$0xff] %v581_v12  ;;  %v582_v16 = vpack.c.bf16 %v402_v13, %v401_v10  ;;  %v342_v17 = vpop.f32.mrb[4].mxu0  ;;  %513 = vst [vmem:[%s924_s3 + $0x40] sm:$0xff] %v589_v14  ;;  %v590_v18 = vpack.c.bf16 %v418_v15, %v417_v11  ;;  %v382_v19 = vpop.f32.mrb[4].mxu1 }
 0x11e   :  { %v343_v20 = vadd.f32 %v342_v17, %v852_v52  ;;  %v344_v21 = vpop.f32.mrb[5].mxu0  ;;  %v383_v22 = vadd.f32 %v382_v19, %v852_v52  ;;  %v384_v23 = vpop.f32.mrb[5].mxu1 }
 0x11f   :  { %506 = vst [vmem:[%s924_s3 + $0x8] sm:$0xff] %v582_v16  ;;  %v345_v24 = vadd.f32 %v344_v21, %v854_v53  ;;  %v346_v25 = vpop.f32.mrb[6].mxu0  ;;  %514 = vst [vmem:[%s924_s3 + $0x48] sm:$0xff] %v590_v18  ;;  %v385_v26 = vadd.f32 %v384_v23, %v854_v53  ;;  %v386_v27 = vpop.f32.mrb[6].mxu1 }
 0x120   :  { %v403_v28 = vmax.f32 %v343_v20, 0.0  ;;  %v347_v29 = vadd.f32 %v346_v25, %v852_v52  ;;  %v348_v30 = vpop.f32.mrb[7].mxu0  ;;  %v419_v31 = vmax.f32 %v383_v22, 0.0  ;;  %v387_v32 = vadd.f32 %v386_v27, %v852_v52  ;;  %v388_v33 = vpop.f32.mrb[7].mxu1 }
 0x121   :  { %v404_v34 = vmax.f32 %v345_v24, 0.0  ;;  %v349_v35 = vadd.f32 %v348_v30, %v854_v53  ;;  %v420_v36 = vmax.f32 %v385_v26, 0.0  ;;  %v389_v37 = vadd.f32 %v388_v33, %v854_v53 }
 0x122   :  { %v405_v38 = vmax.f32 %v347_v29, 0.0  ;;  %v421_v39 = vmax.f32 %v387_v32, 0.0 }
 0x123   :  { %v583_v40 = vpack.c.bf16 %v404_v34, %v403_v28  ;;  %v406_v41 = vmax.f32 %v349_v35, 0.0  ;;  %v591_v42 = vpack.c.bf16 %v420_v36, %v419_v31  ;;  %v422_v43 = vmax.f32 %v389_v37, 0.0 }
 0x125   :  { %507 = vst [vmem:[%s924_s3 + $0x10] sm:$0xff] %v583_v40  ;;  %v584_v44 = vpack.c.bf16 %v406_v41, %v405_v38  ;;  %v352_v45 = vpop.f32.mrb[8].mxu0  ;;  %515 = vst [vmem:[%s924_s3 + $0x50] sm:$0xff] %v591_v42  ;;  %v592_v46 = vpack.c.bf16 %v422_v43, %v421_v39  ;;  %v392_v47 = vpop.f32.mrb[8].mxu1 }
 0x126   :  { %v353_v48 = vadd.f32 %v352_v45, %v852_v52  ;;  %v354_v49 = vpop.f32.mrb[9].mxu0  ;;  %v393_v50 = vadd.f32 %v392_v47, %v852_v52  ;;  %v394_v51 = vpop.f32.mrb[9].mxu1 }
 0x127   :  { %508 = vst [vmem:[%s924_s3 + $0x18] sm:$0xff] %v584_v44  ;;  %v355_v54 = vadd.f32 %v354_v49, %v854_v53  ;;  %v356_v55 = vpop.f32.mrb[10].mxu0  ;;  %516 = vst [vmem:[%s924_s3 + $0x58] sm:$0xff] %v592_v46  ;;  %v395_v56 = vadd.f32 %v394_v51, %v854_v53  ;;  %v396_v57 = vpop.f32.mrb[10].mxu1 }
 0x128   :  { %v407_v58 = vmax.f32 %v353_v48, 0.0  ;;  %v357_v59 = vadd.f32 %v356_v55, %v852_v52  ;;  %v358_v60 = vpop.f32.mrb[11].mxu0  ;;  %v423_v61 = vmax.f32 %v393_v50, 0.0  ;;  %v397_v62 = vpop.f32.mrb[11].mxu1 }
 0x129   :  { %v408_v63 = vmax.f32 %v355_v54, 0.0  ;;  %v359_v0 = vadd.f32 %v358_v60, %v854_v53  ;;  %v424_v1 = vmax.f32 %v395_v56, 0.0 }
 0x12a   :  { %v409_v2 = vmax.f32 %v357_v59, 0.0 }
 0x12b   :  { %v585_v3 = vpack.c.bf16 %v408_v63, %v407_v58  ;;  %v410_v4 = vmax.f32 %v359_v0, 0.0  ;;  %v593_v5 = vpack.c.bf16 %v424_v1, %v423_v61 }
 0x12d   :  { %509 = vst [vmem:[%s924_s3 + $0x20] sm:$0xff] %v585_v3  ;;  %v586_v6 = vpack.c.bf16 %v410_v4, %v409_v2  ;;  %v362_v7 = vpop.f32.mrb[12].mxu0  ;;  %517 = vst [vmem:[%s924_s3 + $0x60] sm:$0x11] %v593_v5 }
 0x12e   :  { %v363_v8 = vadd.f32 %v362_v7, %v852_v52  ;;  %v364_v9 = vpop.f32.mrb[13].mxu0 }
 0x12f   :  { %510 = vst [vmem:[%s924_s3 + $0x28] sm:$0xff] %v586_v6  ;;  %v365_v10 = vadd.f32 %v364_v9, %v854_v53  ;;  %v366_v11 = vpop.f32.mrb[14].mxu0 }
 0x130   :  { %v411_v12 = vmax.f32 %v363_v8, 0.0  ;;  %v367_v13 = vadd.f32 %v366_v11, %v852_v52  ;;  %v368_v14 = vpop.f32.mrb[15].mxu0 }
 0x131   :  { %v412_v15 = vmax.f32 %v365_v10, 0.0  ;;  %v369_v16 = vadd.f32 %v368_v14, %v854_v53 }
 0x132   :  { %v413_v17 = vmax.f32 %v367_v13, 0.0 }
 0x133   :  { %v587_v18 = vpack.c.bf16 %v412_v15, %v411_v12  ;;  %v414_v19 = vmax.f32 %v369_v16, 0.0 }
 0x135   :  { %511 = vst [vmem:[%s924_s3 + $0x30] sm:$0xff] %v587_v18  ;;  %v588_v20 = vpack.c.bf16 %v414_v19, %v413_v17 }
 0x137   :  { %512 = vst [vmem:[%s924_s3 + $0x38] sm:$0xff] %v588_v20 }

// kernel: vae_forward.14
= control target key start
LH: loop header
LB: loop body
LE: loop exit
PB: predicated region body
PF: predicated region fallthrough
CT: control target
= control target key end

     0   :  { %v1408_v0 = vmov 0   ;;  %s1785_s1 = inlined_call_operand.vmem [shape: bf16[256,128], index: 1, kind: input, shape index: {}]   ;;  %s1786_s0 = inlined_call_operand.vmem [shape: bf16[392,256], index: 0, kind: input, shape index: {}]   ;;  %s1787_s2 = inlined_call_operand.vmem [shape: f32[1,128], index: 2, kind: input, shape index: {}]   ;;  %s1788_s3 = inlined_call_operand.vmem [shape: bf16[392,128], index: 3, kind: output, shape index: {}]  }
   0x1   :  { %446 = vmatprep.subr.bf16.mxu0 %v1408_v0  ;;  %v1318_v1 = vld [vmem:[%s1785_s1] sm:$0xff]   ;;  %1285 = vmatprep.subr.bf16.mxu1 %v1408_v0  ;;  %v1319_v2 = vld [vmem:[%s1785_s1 + $0x8] sm:$0xff]   ;;  %v1320_v3 = vld [vmem:[%s1785_s1 + $0x10] sm:$0xff]  }
   0x2   :  { %447 = vmatpush1.bf16.msra.mxu0 %v1318_v1  ;;  %1301 = vmatpush1.bf16.msra.mxu1 %v1318_v1  ;;  %v1321_v4 = vld [vmem:[%s1785_s1 + $0x18] sm:$0xff]   ;;  %v1322_v5 = vld [vmem:[%s1785_s1 + $0x20] sm:$0xff]   ;;  %v1323_v7 = vld [vmem:[%s1785_s1 + $0x28] sm:$0xff]  }
   0x3   :  { %448 = vmatprep.subr.bf16.mxu0 %v1408_v0  ;;  %1286 = vmatprep.subr.bf16.mxu1 %v1408_v0  ;;  %v1336_v6 = vld [vmem:[%s1786_s0 + $0x4] ss:$8 sps:$4 sm:$0xff]   ;;  %v1339_v8 = vld [vmem:[%s1786_s0 + $0xd4] ss:$8 sps:$4 sm:$0xff]   ;;  %v1334_v19 = vld [vmem:[%s1786_s0] ss:$8 sps:$4 sm:$0xff]  }
   0x4   :  { %478 = vmatprep.mubr.bf16.mxu0 %v1336_v6  ;;  %582 = vmatprep.mubr.bf16.mxu1 %v1339_v8  ;;  %v1324_v9 = vld [vmem:[%s1785_s1 + $0x30] sm:$0xff]   ;;  %v1325_v10 = vld [vmem:[%s1785_s1 + $0x38] sm:$0xff]   ;;  %v1326_v11 = vld [vmem:[%s1785_s1 + $0x40] sm:$0xff]  }
   0x5   :  { %v1327_v12 = vld [vmem:[%s1785_s1 + $0x48] sm:$0xff]   ;;  %v1328_v13 = vld [vmem:[%s1785_s1 + $0x50] sm:$0xff]   ;;  %v1329_v14 = vld [vmem:[%s1785_s1 + $0x58] sm:$0xff]  }
   0x6   :  { %449 = vmatpush1.bf16.msra.mxu0 %v1319_v2  ;;  %1302 = vmatpush1.bf16.msra.mxu1 %v1319_v2  ;;  %v1330_v15 = vld [vmem:[%s1785_s1 + $0x60] sm:$0xff]   ;;  %v1331_v16 = vld [vmem:[%s1785_s1 + $0x68] sm:$0xff]   ;;  %v1332_v17 = vld [vmem:[%s1785_s1 + $0x70] sm:$0xff]  }
   0x7   :  { %450 = vmatprep.subr.bf16.mxu0 %v1408_v0  ;;  %1287 = vmatprep.subr.bf16.mxu1 %v1408_v0  ;;  %v1333_v18 = vld [vmem:[%s1785_s1 + $0x78] sm:$0xff]   ;;  %v1343_v22 = vld [vmem:[%s1786_s0 + $0xe4] ss:$8 sps:$4 sm:$0xff]   ;;  %v1347_v24 = vld [vmem:[%s1786_s0 + $0xe0] ss:$8 sps:$4 sm:$0xff]  }
   0x8   :  { %v1337_v20 = vld [vmem:[%s1786_s0 + $0xd0] ss:$8 sps:$4 sm:$0xff]   ;;  %v1340_v21 = vld [vmem:[%s1786_s0 + $0x14] ss:$8 sps:$4 sm:$0xff]   ;;  %v1345_v25 = vld [vmem:[%s1786_s0 + $0x24] ss:$8 sps:$4 sm:$0xff]  }
   0x9   :  { %v1342_v23 = vld [vmem:[%s1786_s0 + $0x10] ss:$8 sps:$4 sm:$0xff]   ;;  %v1349_v26 = vld [vmem:[%s1786_s0 + $0xf4] ss:$8 sps:$4 sm:$0xff]   ;;  %v1348_v27 = vld [vmem:[%s1786_s0 + $0x20] ss:$8 sps:$4 sm:$0xff]  }
   0xa   :  { %451 = vmatpush1.bf16.msra.mxu0 %v1320_v3  ;;  %1303 = vmatpush1.bf16.msra.mxu1 %v1320_v3  ;;  %v1353_v28 = vld [vmem:[%s1786_s0 + $0xf0] ss:$8 sps:$4 sm:$0xff]   ;;  %v1351_v29 = vld [vmem:[%s1786_s0 + $0x34] ss:$8 sps:$4 sm:$0xff]   ;;  %v1355_v30 = vld [vmem:[%s1786_s0 + $0x104] ss:$8 sps:$4 sm:$0xff]  }
   0xb   :  { %452 = vmatprep.subr.bf16.mxu0 %v1408_v0  ;;  %1288 = vmatprep.subr.bf16.mxu1 %v1408_v0  ;;  %v1354_v31 = vld [vmem:[%s1786_s0 + $0x30] ss:$8 sps:$4 sm:$0xff]   ;;  %v1359_v32 = vld [vmem:[%s1786_s0 + $0x100] ss:$8 sps:$4 sm:$0xff]   ;;  %v1357_v33 = vld [vmem:[%s1786_s0 + $0x44] ss:$8 sps:$4 sm:$0xff]  }
   0xc   :  { %v1361_v34 = vld [vmem:[%s1786_s0 + $0x114] ss:$8 sps:$4 sm:$0xff]   ;;  %v1360_v35 = vld [vmem:[%s1786_s0 + $0x40] ss:$8 sps:$4 sm:$0xff]   ;;  %v1365_v36 = vld [vmem:[%s1786_s0 + $0x110] ss:$8 sps:$4 sm:$0xff]  }
   0xd   :  { %v1363_v37 = vld [vmem:[%s1786_s0 + $0x54] ss:$8 sps:$4 sm:$0xff]   ;;  %v1367_v38 = vld [vmem:[%s1786_s0 + $0x124] ss:$8 sps:$4 sm:$0xff]   ;;  %v1366_v39 = vld [vmem:[%s1786_s0 + $0x50] ss:$8 sps:$4 sm:$0xff]  }
   0xe   :  { %453 = vmatpush1.bf16.msra.mxu0 %v1321_v4  ;;  %1304 = vmatpush1.bf16.msra.mxu1 %v1321_v4  ;;  %v1371_v40 = vld [vmem:[%s1786_s0 + $0x120] ss:$8 sps:$4 sm:$0xff]   ;;  %v1369_v41 = vld [vmem:[%s1786_s0 + $0x64] ss:$8 sps:$4 sm:$0xff]   ;;  %v1373_v42 = vld [vmem:[%s1786_s0 + $0x134] ss:$8 sps:$4 sm:$0xff]  }
   0xf   :  { %454 = vmatprep.subr.bf16.mxu0 %v1408_v0  ;;  %1289 = vmatprep.subr.bf16.mxu1 %v1408_v0  ;;  %v1372_v43 = vld [vmem:[%s1786_s0 + $0x60] ss:$8 sps:$4 sm:$0xff]   ;;  %v1377_v44 = vld [vmem:[%s1786_s0 + $0x130] ss:$8 sps:$4 sm:$0xff]   ;;  %v1375_v45 = vld [vmem:[%s1786_s0 + $0x74] ss:$8 sps:$4 sm:$0xff]  }
  0x10   :  { %v1379_v46 = vld [vmem:[%s1786_s0 + $0x144] ss:$8 sps:$4 sm:$0xff]   ;;  %v1378_v47 = vld [vmem:[%s1786_s0 + $0x70] ss:$8 sps:$4 sm:$0xff]   ;;  %v1383_v48 = vld [vmem:[%s1786_s0 + $0x140] ss:$8 sps:$4 sm:$0xff]  }
  0x11   :  { %v1381_v49 = vld [vmem:[%s1786_s0 + $0x84] ss:$8 sps:$4 sm:$0xff]   ;;  %v1385_v50 = vld [vmem:[%s1786_s0 + $0x154] ss:$8 sps:$4 sm:$0xff]   ;;  %v1384_v51 = vld [vmem:[%s1786_s0 + $0x80] ss:$8 sps:$4 sm:$0xff]  }
  0x12   :  { %455 = vmatpush1.bf16.msra.mxu0 %v1322_v5  ;;  %1305 = vmatpush1.bf16.msra.mxu1 %v1322_v5  ;;  %v1389_v52 = vld [vmem:[%s1786_s0 + $0x150] ss:$8 sps:$4 sm:$0xff]   ;;  %v1387_v53 = vld [vmem:[%s1786_s0 + $0x94] ss:$8 sps:$4 sm:$0xff]   ;;  %v1391_v54 = vld [vmem:[%s1786_s0 + $0x164] ss:$8 sps:$4 sm:$0xff]  }
  0x13   :  { %456 = vmatprep.subr.bf16.mxu0 %v1408_v0  ;;  %1290 = vmatprep.subr.bf16.mxu1 %v1408_v0  ;;  %v1390_v55 = vld [vmem:[%s1786_s0 + $0x90] ss:$8 sps:$4 sm:$0xff]   ;;  %v1395_v56 = vld [vmem:[%s1786_s0 + $0x160] ss:$8 sps:$4 sm:$0xff]   ;;  %v1393_v57 = vld [vmem:[%s1786_s0 + $0xa4] ss:$8 sps:$4 sm:$0xff]  }
  0x14   :  { %v1397_v58 = vld [vmem:[%s1786_s0 + $0x174] ss:$8 sps:$4 sm:$0xff]   ;;  %v63_v59 = vld [vmem:[%s1786_s0 + $0x180] sm:$0xff]  ;;  %v1401_v61 = vld [vmem:[%s1786_s0 + $0x170] ss:$8 sps:$4 sm:$0xff]  }
  0x15   :  { %v1396_v60 = vld [vmem:[%s1786_s0 + $0xa0] ss:$8 sps:$4 sm:$0xff]   ;;  %v1399_v62 = vld [vmem:[%s1786_s0 + $0xb4] ss:$8 sps:$4 sm:$0xff]   ;;  %v1027_v63 = vcombine.high %v63_v59, %v63_v59  ;;  %v1026_v1 = vcombine.low %v63_v59, %v63_v59  ;;  %v1404_v2 = vld [vmem:[%s1786_s0 + $0xc4] ss:$8 sps:$4 sm:$0xff]  }
  0x16   :  { %457 = vmatpush1.bf16.msra.mxu0 %v1323_v7  ;;  %1306 = vmatpush1.bf16.msra.mxu1 %v1323_v7  ;;  %v1407_v3 = vld [vmem:[%s1786_s0 + $0xc0] ss:$8 sps:$4 sm:$0xff]  }
  0x17   :  { %458 = vmatprep.subr.bf16.mxu0 %v1408_v0  ;;  %1291 = vmatprep.subr.bf16.mxu1 %v1408_v0  ;;  %v1659_v4 = vld [vmem:[%s1787_s2] ss:$0 sm:$0xff] }
  0x1a   :  { %459 = vmatpush1.bf16.msra.mxu0 %v1324_v9  ;;  %1307 = vmatpush1.bf16.msra.mxu1 %v1324_v9 }
  0x1b   :  { %460 = vmatprep.subr.bf16.mxu0 %v1408_v0  ;;  %1292 = vmatprep.subr.bf16.mxu1 %v1408_v0 }
  0x1e   :  { %461 = vmatpush1.bf16.msra.mxu0 %v1325_v10  ;;  %1308 = vmatpush1.bf16.msra.mxu1 %v1325_v10 }
  0x1f   :  { %462 = vmatprep.subr.bf16.mxu0 %v1408_v0  ;;  %1293 = vmatprep.subr.bf16.mxu1 %v1408_v0 }
  0x22   :  { %463 = vmatpush1.bf16.msra.mxu0 %v1326_v11  ;;  %1309 = vmatpush1.bf16.msra.mxu1 %v1326_v11 }
  0x23   :  { %464 = vmatprep.subr.bf16.mxu0 %v1408_v0  ;;  %1294 = vmatprep.subr.bf16.mxu1 %v1408_v0 }
  0x26   :  { %465 = vmatpush1.bf16.msra.mxu0 %v1327_v12  ;;  %1310 = vmatpush1.bf16.msra.mxu1 %v1327_v12 }
  0x27   :  { %466 = vmatprep.subr.bf16.mxu0 %v1408_v0  ;;  %1295 = vmatprep.subr.bf16.mxu1 %v1408_v0 }
  0x2a   :  { %467 = vmatpush1.bf16.msra.mxu0 %v1328_v13  ;;  %1311 = vmatpush1.bf16.msra.mxu1 %v1328_v13 }
  0x2b   :  { %468 = vmatprep.subr.bf16.mxu0 %v1408_v0  ;;  %1296 = vmatprep.subr.bf16.mxu1 %v1408_v0 }
  0x2e   :  { %469 = vmatpush1.bf16.msra.mxu0 %v1329_v14  ;;  %1312 = vmatpush1.bf16.msra.mxu1 %v1329_v14 }
  0x2f   :  { %470 = vmatprep.subr.bf16.mxu0 %v1408_v0  ;;  %1297 = vmatprep.subr.bf16.mxu1 %v1408_v0 }
  0x32   :  { %471 = vmatpush1.bf16.msra.mxu0 %v1330_v15  ;;  %1313 = vmatpush1.bf16.msra.mxu1 %v1330_v15 }
  0x33   :  { %472 = vmatprep.subr.bf16.mxu0 %v1408_v0  ;;  %1298 = vmatprep.subr.bf16.mxu1 %v1408_v0 }
  0x36   :  { %473 = vmatpush1.bf16.msra.mxu0 %v1331_v16  ;;  %1314 = vmatpush1.bf16.msra.mxu1 %v1331_v16 }
  0x37   :  { %474 = vmatprep.subr.bf16.mxu0 %v1408_v0  ;;  %1299 = vmatprep.subr.bf16.mxu1 %v1408_v0 }
  0x3a   :  { %475 = vmatpush1.bf16.msra.mxu0 %v1332_v17  ;;  %1315 = vmatpush1.bf16.msra.mxu1 %v1332_v17 }
  0x3b   :  { %476 = vmatprep.subr.bf16.mxu0 %v1408_v0  ;;  %1300 = vmatprep.subr.bf16.mxu1 %v1408_v0  ;;  %v1402_v0 = vld [vmem:[%s1786_s0 + $0xb0] ss:$8 sps:$4 sm:$0xff]  }
  0x3e   :  { %477 = vmatpush1.bf16.msra.mxu0 %v1333_v18  ;;  %1316 = vmatpush1.bf16.msra.mxu1 %v1333_v18 }
  0x41   :  { %479 = vmatmul.mubr.bf16.vlgmr.msra.gmra.mrb[0].mxu0 %v1334_v19  ;;  %583 = vmatmul.mubr.bf16.vlgmr.msra.gmra.mrb[0].mxu1 %v1337_v20 }
  0x42   :  { %486 = vmatprep.mubr.bf16.mxu0 %v1340_v21  ;;  %590 = vmatprep.mubr.bf16.mxu1 %v1343_v22 }
  0x49   :  { %487 = vmatmul.mubr.bf16.gmra.mrb[4].mxu0 %v1342_v23  ;;  %591 = vmatmul.mubr.bf16.gmra.mrb[4].mxu1 %v1347_v24 }
  0x4a   :  { %494 = vmatprep.mubr.bf16.mxu0 %v1345_v25  ;;  %598 = vmatprep.mubr.bf16.mxu1 %v1349_v26 }
  0x51   :  { %495 = vmatmul.mubr.bf16.gmra.mrb[8].mxu0 %v1348_v27  ;;  %599 = vmatmul.mubr.bf16.gmra.mrb[8].mxu1 %v1353_v28 }
  0x52   :  { %502 = vmatprep.mubr.bf16.mxu0 %v1351_v29  ;;  %606 = vmatprep.mubr.bf16.mxu1 %v1355_v30 }
  0x59   :  { %503 = vmatmul.mubr.bf16.gmra.mrb[12].mxu0 %v1354_v31  ;;  %607 = vmatmul.mubr.bf16.gmra.mrb[12].mxu1 %v1359_v32 }
  0x5a   :  { %510 = vmatprep.mubr.bf16.mxu0 %v1357_v33  ;;  %614 = vmatprep.mubr.bf16.mxu1 %v1361_v34 }
  0x61   :  { %511 = vmatmul.mubr.bf16.gmra.mrb[16].mxu0 %v1360_v35  ;;  %615 = vmatmul.mubr.bf16.gmra.mrb[16].mxu1 %v1365_v36 }
  0x62   :  { %518 = vmatprep.mubr.bf16.mxu0 %v1363_v37  ;;  %622 = vmatprep.mubr.bf16.mxu1 %v1367_v38 }
  0x69   :  { %519 = vmatmul.mubr.bf16.gmra.mrb[20].mxu0 %v1366_v39  ;;  %623 = vmatmul.mubr.bf16.gmra.mrb[20].mxu1 %v1371_v40 }
  0x6a   :  { %526 = vmatprep.mubr.bf16.mxu0 %v1369_v41  ;;  %630 = vmatprep.mubr.bf16.mxu1 %v1373_v42 }
  0x71   :  { %527 = vmatmul.mubr.bf16.gmra.mrb[24].mxu0 %v1372_v43  ;;  %631 = vmatmul.mubr.bf16.gmra.mrb[24].mxu1 %v1377_v44 }
  0x72   :  { %534 = vmatprep.mubr.bf16.mxu0 %v1375_v45  ;;  %638 = vmatprep.mubr.bf16.mxu1 %v1379_v46 }
  0x79   :  { %535 = vmatmul.mubr.bf16.gmra.mrb[28].mxu0 %v1378_v47  ;;  %639 = vmatmul.mubr.bf16.gmra.mrb[28].mxu1 %v1383_v48 }
  0x7a   :  { %542 = vmatprep.mubr.bf16.mxu0 %v1381_v49  ;;  %646 = vmatprep.mubr.bf16.mxu1 %v1385_v50 }
  0x81   :  { %543 = vmatmul.mubr.bf16.gmra.mrb[32].mxu0 %v1384_v51  ;;  %647 = vmatmul.mubr.bf16.gmra.mrb[32].mxu1 %v1389_v52 }
  0x82   :  { %550 = vmatprep.mubr.bf16.mxu0 %v1387_v53  ;;  %654 = vmatprep.mubr.bf16.mxu1 %v1391_v54 }
  0x89   :  { %551 = vmatmul.mubr.bf16.gmra.mrb[36].mxu0 %v1390_v55  ;;  %655 = vmatmul.mubr.bf16.gmra.mrb[36].mxu1 %v1395_v56 }
  0x8a   :  { %558 = vmatprep.mubr.bf16.mxu0 %v1393_v57  ;;  %662 = vmatprep.mubr.bf16.mxu1 %v1397_v58 }
  0x91   :  { %559 = vmatmul.mubr.bf16.gmra.mrb[40].mxu0 %v1396_v60  ;;  %663 = vmatmul.mubr.bf16.gmra.mrb[40].mxu1 %v1401_v61 }
  0x92   :  { %566 = vmatprep.mubr.bf16.mxu0 %v1399_v62  ;;  %670 = vmatprep.mubr.bf16.mxu1 %v1027_v63 }
  0x99   :  { %567 = vmatmul.mubr.bf16.gmra.mrb[44].mxu0 %v1402_v0  ;;  %671 = vmatmul.mubr.bf16.gmra.mrb[44].mxu1 %v1026_v1 }
  0x9a   :  { %574 = vmatprep.mubr.bf16.mxu0 %v1404_v2 }
  0xa1   :  { %575 = vmatmul.mubr.bf16.gmra.mrb[48].mxu0 %v1407_v3 }
 0x114   :  { %v480_v5 = vpop.f32.mrb[0].mxu0  ;;  %v584_v6 = vpop.f32.mrb[0].mxu1 }
 0x115   :  { %v481_v7 = vadd.f32 %v1659_v4, %v480_v5  ;;  %v482_v8 = vpop.f32.mrb[1].mxu0  ;;  %v585_v9 = vadd.f32 %v1659_v4, %v584_v6  ;;  %v586_v10 = vpop.f32.mrb[1].mxu1 }
 0x116   :  { %v483_v11 = vpop.f32.mrb[2].mxu0  ;;  %v587_v12 = vpop.f32.mrb[2].mxu1 }
 0x117   :  { %v484_v13 = vadd.f32 %v1659_v4, %v483_v11  ;;  %v485_v14 = vpop.f32.mrb[3].mxu0  ;;  %v704_v15 = vmax.f32 %v585_v9, 0.0  ;;  %v588_v16 = vadd.f32 %v1659_v4, %v587_v12  ;;  %v589_v17 = vpop.f32.mrb[3].mxu1  ;;  %v678_v18 = vmax.f32 %v481_v7, 0.0 }
 0x119   :  { %v679_v19 = vmax.f32 %v484_v13, 0.0  ;;  %v705_v20 = vmax.f32 %v588_v16, 0.0 }
 0x11b   :  { %v1145_v21 = vpack.c.bf16 %v679_v19, %v678_v18  ;;  %v1210_v22 = vpack.c.bf16 %v705_v20, %v704_v15 }
 0x11c   :  { %v488_v23 = vpop.f32.mrb[4].mxu0  ;;  %v592_v24 = vpop.f32.mrb[4].mxu1 }
 0x11d   :  { %1146 = vst [vmem:[%s1788_s3] sm:$0xff] %v1145_v21   ;;  %v489_v25 = vadd.f32 %v1659_v4, %v488_v23  ;;  %v490_v26 = vpop.f32.mrb[5].mxu0  ;;  %1274 = vst [vmem:[%s1788_s3 + $0x68] sm:$0xff] %v1210_v22   ;;  %v593_v27 = vadd.f32 %v1659_v4, %v592_v24  ;;  %v594_v28 = vpop.f32.mrb[5].mxu1 }
 0x11e   :  { %v491_v29 = vpop.f32.mrb[6].mxu0  ;;  %v595_v30 = vpop.f32.mrb[6].mxu1 }
 0x11f   :  { %v492_v31 = vadd.f32 %v1659_v4, %v491_v29  ;;  %v493_v32 = vpop.f32.mrb[7].mxu0  ;;  %v706_v33 = vmax.f32 %v593_v27, 0.0  ;;  %v596_v34 = vadd.f32 %v1659_v4, %v595_v30  ;;  %v597_v35 = vpop.f32.mrb[7].mxu1  ;;  %v680_v36 = vmax.f32 %v489_v25, 0.0 }
 0x121   :  { %v681_v37 = vmax.f32 %v492_v31, 0.0  ;;  %v707_v38 = vmax.f32 %v596_v34, 0.0 }
 0x123   :  { %v1150_v39 = vpack.c.bf16 %v681_v37, %v680_v36  ;;  %v1215_v40 = vpack.c.bf16 %v707_v38, %v706_v33 }
 0x124   :  { %v496_v41 = vpop.f32.mrb[8].mxu0  ;;  %v600_v42 = vpop.f32.mrb[8].mxu1 }
 0x125   :  { %1262 = vst [vmem:[%s1788_s3 + $0x8] sm:$0xff] %v1150_v39   ;;  %v497_v43 = vadd.f32 %v1659_v4, %v496_v41  ;;  %v498_v44 = vpop.f32.mrb[9].mxu0  ;;  %1275 = vst [vmem:[%s1788_s3 + $0x70] sm:$0xff] %v1215_v40   ;;  %v601_v45 = vadd.f32 %v1659_v4, %v600_v42  ;;  %v602_v46 = vpop.f32.mrb[9].mxu1 }
 0x126   :  { %v499_v47 = vpop.f32.mrb[10].mxu0  ;;  %v603_v48 = vpop.f32.mrb[10].mxu1 }
 0x127   :  { %v500_v49 = vadd.f32 %v1659_v4, %v499_v47  ;;  %v501_v50 = vpop.f32.mrb[11].mxu0  ;;  %v708_v51 = vmax.f32 %v601_v45, 0.0  ;;  %v604_v52 = vadd.f32 %v1659_v4, %v603_v48  ;;  %v605_v53 = vpop.f32.mrb[11].mxu1  ;;  %v682_v54 = vmax.f32 %v497_v43, 0.0 }
 0x129   :  { %v683_v55 = vmax.f32 %v500_v49, 0.0  ;;  %v709_v56 = vmax.f32 %v604_v52, 0.0 }
 0x12b   :  { %v1155_v57 = vpack.c.bf16 %v683_v55, %v682_v54  ;;  %v1220_v58 = vpack.c.bf16 %v709_v56, %v708_v51 }
 0x12c   :  { %v504_v59 = vpop.f32.mrb[12].mxu0  ;;  %v608_v60 = vpop.f32.mrb[12].mxu1 }
 0x12d   :  { %1263 = vst [vmem:[%s1788_s3 + $0x10] sm:$0xff] %v1155_v57   ;;  %v505_v61 = vadd.f32 %v1659_v4, %v504_v59  ;;  %v506_v62 = vpop.f32.mrb[13].mxu0  ;;  %1276 = vst [vmem:[%s1788_s3 + $0x78] sm:$0xff] %v1220_v58   ;;  %v609_v63 = vadd.f32 %v1659_v4, %v608_v60  ;;  %v610_v0 = vpop.f32.mrb[13].mxu1 }
 0x12e   :  { %v507_v1 = vpop.f32.mrb[14].mxu0  ;;  %v611_v2 = vpop.f32.mrb[14].mxu1 }
 0x12f   :  { %v508_v3 = vadd.f32 %v1659_v4, %v507_v1  ;;  %v509_v5 = vpop.f32.mrb[15].mxu0  ;;  %v710_v6 = vmax.f32 %v609_v63, 0.0  ;;  %v612_v7 = vadd.f32 %v1659_v4, %v611_v2  ;;  %v613_v8 = vpop.f32.mrb[15].mxu1  ;;  %v684_v9 = vmax.f32 %v505_v61, 0.0 }
 0x131   :  { %v685_v10 = vmax.f32 %v508_v3, 0.0  ;;  %v711_v11 = vmax.f32 %v612_v7, 0.0 }
 0x133   :  { %v1160_v12 = vpack.c.bf16 %v685_v10, %v684_v9  ;;  %v1225_v13 = vpack.c.bf16 %v711_v11, %v710_v6 }
 0x134   :  { %v512_v14 = vpop.f32.mrb[16].mxu0  ;;  %v616_v15 = vpop.f32.mrb[16].mxu1 }
 0x135   :  { %1264 = vst [vmem:[%s1788_s3 + $0x18] sm:$0xff] %v1160_v12   ;;  %v513_v16 = vadd.f32 %v1659_v4, %v512_v14  ;;  %v514_v17 = vpop.f32.mrb[17].mxu0  ;;  %1277 = vst [vmem:[%s1788_s3 + $0x80] sm:$0xff] %v1225_v13   ;;  %v617_v18 = vadd.f32 %v1659_v4, %v616_v15  ;;  %v618_v19 = vpop.f32.mrb[17].mxu1 }
 0x136   :  { %v515_v20 = vpop.f32.mrb[18].mxu0  ;;  %v619_v21 = vpop.f32.mrb[18].mxu1 }
 0x137   :  { %v516_v22 = vadd.f32 %v1659_v4, %v515_v20  ;;  %v517_v23 = vpop.f32.mrb[19].mxu0  ;;  %v712_v24 = vmax.f32 %v617_v18, 0.0  ;;  %v620_v25 = vadd.f32 %v1659_v4, %v619_v21  ;;  %v621_v26 = vpop.f32.mrb[19].mxu1  ;;  %v686_v27 = vmax.f32 %v513_v16, 0.0 }
 0x139   :  { %v687_v28 = vmax.f32 %v516_v22, 0.0  ;;  %v713_v29 = vmax.f32 %v620_v25, 0.0 }
 0x13b   :  { %v1165_v30 = vpack.c.bf16 %v687_v28, %v686_v27  ;;  %v1230_v31 = vpack.c.bf16 %v713_v29, %v712_v24 }
 0x13c   :  { %v520_v32 = vpop.f32.mrb[20].mxu0  ;;  %v624_v33 = vpop.f32.mrb[20].mxu1 }
 0x13d   :  { %1265 = vst [vmem:[%s1788_s3 + $0x20] sm:$0xff] %v1165_v30   ;;  %v521_v34 = vadd.f32 %v1659_v4, %v520_v32  ;;  %v522_v35 = vpop.f32.mrb[21].mxu0  ;;  %1278 = vst [vmem:[%s1788_s3 + $0x88] sm:$0xff] %v1230_v31   ;;  %v625_v36 = vadd.f32 %v1659_v4, %v624_v33  ;;  %v626_v37 = vpop.f32.mrb[21].mxu1 }
 0x13e   :  { %v523_v38 = vpop.f32.mrb[22].mxu0  ;;  %v627_v39 = vpop.f32.mrb[22].mxu1 }
 0x13f   :  { %v524_v40 = vadd.f32 %v1659_v4, %v523_v38  ;;  %v525_v41 = vpop.f32.mrb[23].mxu0  ;;  %v714_v42 = vmax.f32 %v625_v36, 0.0  ;;  %v628_v43 = vadd.f32 %v1659_v4, %v627_v39  ;;  %v629_v44 = vpop.f32.mrb[23].mxu1  ;;  %v688_v45 = vmax.f32 %v521_v34, 0.0 }
 0x141   :  { %v689_v46 = vmax.f32 %v524_v40, 0.0  ;;  %v715_v47 = vmax.f32 %v628_v43, 0.0 }
 0x143   :  { %v1170_v48 = vpack.c.bf16 %v689_v46, %v688_v45  ;;  %v1235_v49 = vpack.c.bf16 %v715_v47, %v714_v42 }
 0x144   :  { %v528_v50 = vpop.f32.mrb[24].mxu0  ;;  %v632_v51 = vpop.f32.mrb[24].mxu1 }
 0x145   :  { %1266 = vst [vmem:[%s1788_s3 + $0x28] sm:$0xff] %v1170_v48   ;;  %v529_v52 = vadd.f32 %v1659_v4, %v528_v50  ;;  %v530_v53 = vpop.f32.mrb[25].mxu0  ;;  %1279 = vst [vmem:[%s1788_s3 + $0x90] sm:$0xff] %v1235_v49   ;;  %v633_v54 = vadd.f32 %v1659_v4, %v632_v51  ;;  %v634_v55 = vpop.f32.mrb[25].mxu1 }
 0x146   :  { %v531_v56 = vpop.f32.mrb[26].mxu0  ;;  %v635_v57 = vpop.f32.mrb[26].mxu1 }
 0x147   :  { %v532_v58 = vadd.f32 %v1659_v4, %v531_v56  ;;  %v533_v59 = vpop.f32.mrb[27].mxu0  ;;  %v716_v60 = vmax.f32 %v633_v54, 0.0  ;;  %v636_v61 = vadd.f32 %v1659_v4, %v635_v57  ;;  %v637_v62 = vpop.f32.mrb[27].mxu1  ;;  %v690_v63 = vmax.f32 %v529_v52, 0.0 }
 0x149   :  { %v691_v0 = vmax.f32 %v532_v58, 0.0  ;;  %v717_v1 = vmax.f32 %v636_v61, 0.0 }
 0x14b   :  { %v1175_v2 = vpack.c.bf16 %v691_v0, %v690_v63  ;;  %v1240_v3 = vpack.c.bf16 %v717_v1, %v716_v60 }
 0x14c   :  { %v536_v5 = vpop.f32.mrb[28].mxu0  ;;  %v640_v6 = vpop.f32.mrb[28].mxu1 }
 0x14d   :  { %1267 = vst [vmem:[%s1788_s3 + $0x30] sm:$0xff] %v1175_v2   ;;  %v537_v7 = vadd.f32 %v1659_v4, %v536_v5  ;;  %v538_v8 = vpop.f32.mrb[29].mxu0  ;;  %1280 = vst [vmem:[%s1788_s3 + $0x98] sm:$0xff] %v1240_v3   ;;  %v641_v9 = vadd.f32 %v1659_v4, %v640_v6  ;;  %v642_v10 = vpop.f32.mrb[29].mxu1 }
 0x14e   :  { %v539_v11 = vpop.f32.mrb[30].mxu0  ;;  %v643_v12 = vpop.f32.mrb[30].mxu1 }
 0x14f   :  { %v540_v13 = vadd.f32 %v1659_v4, %v539_v11  ;;  %v541_v14 = vpop.f32.mrb[31].mxu0  ;;  %v718_v15 = vmax.f32 %v641_v9, 0.0  ;;  %v644_v16 = vadd.f32 %v1659_v4, %v643_v12  ;;  %v645_v17 = vpop.f32.mrb[31].mxu1  ;;  %v692_v18 = vmax.f32 %v537_v7, 0.0 }
 0x151   :  { %v693_v19 = vmax.f32 %v540_v13, 0.0  ;;  %v719_v20 = vmax.f32 %v644_v16, 0.0 }
 0x153   :  { %v1180_v21 = vpack.c.bf16 %v693_v19, %v692_v18  ;;  %v1245_v22 = vpack.c.bf16 %v719_v20, %v718_v15 }
 0x154   :  { %v544_v23 = vpop.f32.mrb[32].mxu0  ;;  %v648_v24 = vpop.f32.mrb[32].mxu1 }
 0x155   :  { %1268 = vst [vmem:[%s1788_s3 + $0x38] sm:$0xff] %v1180_v21   ;;  %v545_v25 = vadd.f32 %v1659_v4, %v544_v23  ;;  %v546_v26 = vpop.f32.mrb[33].mxu0  ;;  %1281 = vst [vmem:[%s1788_s3 + $0xa0] sm:$0xff] %v1245_v22   ;;  %v649_v27 = vadd.f32 %v1659_v4, %v648_v24  ;;  %v650_v28 = vpop.f32.mrb[33].mxu1 }
 0x156   :  { %v547_v29 = vpop.f32.mrb[34].mxu0  ;;  %v651_v30 = vpop.f32.mrb[34].mxu1 }
 0x157   :  { %v548_v31 = vadd.f32 %v1659_v4, %v547_v29  ;;  %v549_v32 = vpop.f32.mrb[35].mxu0  ;;  %v720_v33 = vmax.f32 %v649_v27, 0.0  ;;  %v652_v34 = vadd.f32 %v1659_v4, %v651_v30  ;;  %v653_v35 = vpop.f32.mrb[35].mxu1  ;;  %v694_v36 = vmax.f32 %v545_v25, 0.0 }
 0x159   :  { %v695_v37 = vmax.f32 %v548_v31, 0.0  ;;  %v721_v38 = vmax.f32 %v652_v34, 0.0 }
 0x15b   :  { %v1185_v39 = vpack.c.bf16 %v695_v37, %v694_v36  ;;  %v1250_v40 = vpack.c.bf16 %v721_v38, %v720_v33 }
 0x15c   :  { %v552_v41 = vpop.f32.mrb[36].mxu0  ;;  %v656_v42 = vpop.f32.mrb[36].mxu1 }
 0x15d   :  { %1269 = vst [vmem:[%s1788_s3 + $0x40] sm:$0xff] %v1185_v39   ;;  %v553_v43 = vadd.f32 %v1659_v4, %v552_v41  ;;  %v554_v44 = vpop.f32.mrb[37].mxu0  ;;  %1282 = vst [vmem:[%s1788_s3 + $0xa8] sm:$0xff] %v1250_v40   ;;  %v657_v45 = vadd.f32 %v1659_v4, %v656_v42  ;;  %v658_v46 = vpop.f32.mrb[37].mxu1 }
 0x15e   :  { %v555_v47 = vpop.f32.mrb[38].mxu0  ;;  %v659_v48 = vpop.f32.mrb[38].mxu1 }
 0x15f   :  { %v556_v49 = vadd.f32 %v1659_v4, %v555_v47  ;;  %v557_v50 = vpop.f32.mrb[39].mxu0  ;;  %v722_v51 = vmax.f32 %v657_v45, 0.0  ;;  %v660_v52 = vadd.f32 %v1659_v4, %v659_v48  ;;  %v661_v53 = vpop.f32.mrb[39].mxu1  ;;  %v696_v54 = vmax.f32 %v553_v43, 0.0 }
 0x161   :  { %v697_v55 = vmax.f32 %v556_v49, 0.0  ;;  %v723_v56 = vmax.f32 %v660_v52, 0.0 }
 0x163   :  { %v1190_v57 = vpack.c.bf16 %v697_v55, %v696_v54  ;;  %v1255_v58 = vpack.c.bf16 %v723_v56, %v722_v51 }
 0x164   :  { %v560_v59 = vpop.f32.mrb[40].mxu0  ;;  %v664_v60 = vpop.f32.mrb[40].mxu1 }
 0x165   :  { %1270 = vst [vmem:[%s1788_s3 + $0x48] sm:$0xff] %v1190_v57   ;;  %v561_v61 = vadd.f32 %v1659_v4, %v560_v59  ;;  %v562_v62 = vpop.f32.mrb[41].mxu0  ;;  %1283 = vst [vmem:[%s1788_s3 + $0xb0] sm:$0xff] %v1255_v58   ;;  %v665_v63 = vadd.f32 %v1659_v4, %v664_v60  ;;  %v666_v0 = vpop.f32.mrb[41].mxu1 }
 0x166   :  { %v563_v1 = vpop.f32.mrb[42].mxu0  ;;  %v667_v2 = vpop.f32.mrb[42].mxu1 }
 0x167   :  { %v564_v3 = vadd.f32 %v1659_v4, %v563_v1  ;;  %v565_v5 = vpop.f32.mrb[43].mxu0  ;;  %v724_v6 = vmax.f32 %v665_v63, 0.0  ;;  %v668_v7 = vadd.f32 %v1659_v4, %v667_v2  ;;  %v669_v8 = vpop.f32.mrb[43].mxu1  ;;  %v698_v9 = vmax.f32 %v561_v61, 0.0 }
 0x169   :  { %v699_v10 = vmax.f32 %v564_v3, 0.0  ;;  %v725_v11 = vmax.f32 %v668_v7, 0.0 }
 0x16b   :  { %v1195_v12 = vpack.c.bf16 %v699_v10, %v698_v9  ;;  %v1260_v13 = vpack.c.bf16 %v725_v11, %v724_v6 }
 0x16c   :  { %v568_v14 = vpop.f32.mrb[44].mxu0  ;;  %v672_v15 = vpop.f32.mrb[44].mxu1 }
 0x16d   :  { %1271 = vst [vmem:[%s1788_s3 + $0x50] sm:$0xff] %v1195_v12   ;;  %v569_v16 = vadd.f32 %v1659_v4, %v568_v14  ;;  %v570_v17 = vpop.f32.mrb[45].mxu0  ;;  %1284 = vst [vmem:[%s1788_s3 + $0xb8] sm:$0xff] %v1260_v13   ;;  %v673_v18 = vadd.f32 %v1659_v4, %v672_v15  ;;  %v674_v19 = vpop.f32.mrb[45].mxu1 }
 0x16e   :  { %v571_v20 = vpop.f32.mrb[46].mxu0  ;;  %v675_v21 = vpop.f32.mrb[46].mxu1 }
 0x16f   :  { %v572_v22 = vadd.f32 %v1659_v4, %v571_v20  ;;  %v573_v23 = vpop.f32.mrb[47].mxu0  ;;  %v726_v24 = vmax.f32 %v673_v18, 0.0  ;;  %v676_v25 = vpop.f32.mrb[47].mxu1  ;;  %v700_v26 = vmax.f32 %v569_v16, 0.0 }
 0x171   :  { %v701_v27 = vmax.f32 %v572_v22, 0.0  ;;  %v1141_v28 = vpack.c.bf16 %v726_v24, %v726_v24 }
 0x173   :  { %v1200_v29 = vpack.c.bf16 %v701_v27, %v700_v26  ;;  %972 = vst [vmem:[%s1788_s3 + $0xc0] sm:$0xf] %v1141_v28 }
 0x174   :  { %v576_v30 = vpop.f32.mrb[48].mxu0 }
 0x175   :  { %1272 = vst [vmem:[%s1788_s3 + $0x58] sm:$0xff] %v1200_v29   ;;  %v577_v31 = vadd.f32 %v1659_v4, %v576_v30  ;;  %v578_v32 = vpop.f32.mrb[49].mxu0 }
 0x176   :  { %v579_v33 = vpop.f32.mrb[50].mxu0 }
 0x177   :  { %v580_v34 = vadd.f32 %v1659_v4, %v579_v33  ;;  %v581_v35 = vpop.f32.mrb[51].mxu0  ;;  %v702_v36 = vmax.f32 %v577_v31, 0.0 }
 0x179   :  { %v703_v37 = vmax.f32 %v580_v34, 0.0 }
 0x17b   :  { %v1205_v38 = vpack.c.bf16 %v703_v37, %v702_v36 }
 0x17d   :  { %1273 = vst [vmem:[%s1788_s3 + $0x60] sm:$0xff] %v1205_v38  }

// kernel: vae_forward.15
= control target key start
LH: loop header
LB: loop body
LE: loop exit
PB: predicated region body
PF: predicated region fallthrough
CT: control target
= control target key end

     0   :  { %s675_s14 = smov 0   ;;  %s830_s0 = inlined_call_operand.vmem [shape: bf16[1568,288], index: 0, kind: input, shape index: {}]   ;;  %s831_s1 = inlined_call_operand.vmem [shape: f32[1,288], index: 1, kind: input, shape index: {}]   ;;  %s832_s2 = inlined_call_operand.<no memory space> [shape: f32[1,1], index: 2, kind: input, shape index: {}]   ;;  %s833_s3 = inlined_call_operand.vmem [shape: f32[1568,1], index: 3, kind: output, shape index: {}]  }
   0x1   :  { %v8_v0 = vstv %s832_s2 }
   0x2   :  { %9 = vst [vmem:[#allocation2] sm:$0x1] %v8_v0 }
   0x3 LB: > { %s555_s15 = sadd.s32 4294967295, %s650_s14   ;;  %p559_p0 = scmp.ge.s32.totalorder %s650_s14, 1  ;;  %s650_s14 = sphi %s675_s14, %s15_s14  }
   0x4   : > { %p141_p1 = scmp.lt.s32.totalorder %s650_s14, 15 }
   0x6   : > { %p142_p2 = pnand %p559_p0, %p141_p1 }
   0x7   : > { %s166_s16 = smul.u32 (!%p142_p2), 14, %s555_s15  ;;  %v251_v1 = vlaneseq (!%p142_p2)  ;;  %v249_v6 = vld [vmem:[%s831_s1] sm:$0x7] (!%p142_p2)  ;;  %vm309_vm0 = vcmask (!%p142_p2), 261120   ;;  %vm484_vm1 = vcmask (!%p142_p2), 7168  }
   0x8   : > { %145 = sbr.rel (%p142_p2) target bundleno = 229 (0xe5), region = 32 }
   0x9   : > { %p167_p3 = scmp.lt.s32.totalorder (!%p142_p2), %s166_s16, 195  ;;  %v252_v2 = vshrl.u32 (!%p142_p2), %v251_v1, 7 }
   0xb   : > { %v253_v3 = vsub.s32 (!%p142_p2), 0, %v252_v2  ;;  %v257_v4 = vsub.s32 (!%p142_p2), 1, %v252_v2  ;;  %v261_v5 = vsub.s32 (!%p142_p2), 2, %v252_v2 }
   0xd   : > { %v694_v7 = vrot.slane (!%p142_p2), %v249_v6, %v253_v3  ;;  %v696_v8 = vrot.slane (!%p142_p2), %v249_v6, %v257_v4  ;;  %v698_v9 = vrot.slane (!%p142_p2), %v249_v6, %v261_v5 }
   0xf   : > { %s835_s16 = smov (!%p167_p3, %s166_s16), 195 }
  0x10   : > { %s579_s18 = smul.u32 12, %s835_s16  ;;  %s561_s22 = sshll.u32 %s835_s16, 3 }
  0x11   : > { %s795_s25 = scalar_lea.vmem %s833_s3, %s561_s22 }
  0x12   : > { %s692_s21 = scalar_lea.vmem %s830_s0, %s579_s18 }
  0x13   : > { %v183_v10 = vld [vmem:[%s692_s21 + $0x18] sm:$0xff]  ;;  %v184_v11 = vld [vmem:[%s692_s21 + $0x8] ss:$24 sps:$4 sm:$0xff]   ;;  %v186_v18 = vld [vmem:[%s692_s21 + $0x14] ss:$24 sps:$4 sm:$0xff]  }
  0x14   : > { %v179_v12 = vld [vmem:[%s692_s21] sm:$0xff]  ;;  %v213_v13 = vunpack.c.l.bf16 %v183_v10  ;;  %v214_v14 = vunpack.c.h.bf16 %v183_v10  ;;  %v215_v15 = vunpack.c.h.bf16 %v184_v11  ;;  %v209_v20 = vunpack.c.l.bf16 %v184_v11  ;;  %v181_v23 = vld [vmem:[%s692_s21 + $0xc] sm:$0xff]  ;;  %v193_v55 = vld [vmem:[%s692_s21 + $0x54] sm:$0xff] }
  0x15   : > { %v207_v16 = vunpack.c.l.bf16 %v179_v12  ;;  %v185_v17 = vld [vmem:[%s692_s21 + $0x24] sm:$0xff]  ;;  %v208_v19 = vunpack.c.h.bf16 %v179_v12  ;;  %v218_v30 = vunpack.c.h.bf16 %v186_v18  ;;  %v210_v35 = vunpack.c.l.bf16 %v181_v23  ;;  %v189_v36 = vld [vmem:[%s692_s21 + $0x3c] sm:$0xff]  ;;  %v187_v46 = vld [vmem:[%s692_s21 + $0x30] sm:$0xff] }
  0x16   : > { %v216_v21 = vunpack.c.l.bf16 %v185_v17  ;;  %v217_v22 = vunpack.c.h.bf16 %v185_v17  ;;  %v272_v24 = vmul.f32 %v694_v7, %v213_v13  ;;  %v273_v25 = vmul.f32 %v696_v8, %v214_v14  ;;  %v190_v41 = vld [vmem:[%s692_s21 + $0x38] ss:$12 sps:$4 sm:$0xff]   ;;  %v194_v0 = vld [vmem:[%s692_s21 + $0x50] ss:$12 sps:$4 sm:$0xff]   ;;  %v191_v1 = vld [vmem:[%s692_s21 + $0x48] sm:$0xff] }
  0x17   : > { %v274_v26 = vmul.f32 %v698_v9, %v215_v15  ;;  %v266_v27 = vmul.f32 %v694_v7, %v207_v16  ;;  %v267_v28 = vmul.f32 %v696_v8, %v208_v19  ;;  %v268_v29 = vmul.f32 %v698_v9, %v209_v20  ;;  %v197_v17 = vld [vmem:[%s692_s21 + $0x6c] sm:$0xff] }
  0x18   : > { %v275_v31 = vmul.f32 %v694_v7, %v216_v21  ;;  %v319_v32 = vadd.f32 %v273_v25, %v272_v24  ;;  %v276_v34 = vmul.f32 %v696_v8, %v217_v22  ;;  %v277_v39 = vmul.f32 %v698_v9, %v218_v30  ;;  %v198_v22 = vld [vmem:[%s692_s21 + $0x68] ss:$12 sps:$4 sm:$0xff]  }
  0x19   : > { %v320_v33 = vsel %vm309_vm0, %v274_v26, 0.0  ;;  %v308_v37 = vadd.f32 %v267_v28, %v266_v27  ;;  %v310_v38 = vsel %vm309_vm0, %v268_v29, 0.0  ;;  %v211_v40 = vunpack.c.h.bf16 %v181_v23  ;;  %v195_v23 = vld [vmem:[%s692_s21 + $0x60] sm:$0xff] }
  0x1a   : > { %v321_v42 = vadd.f32 %v320_v33, %v319_v32  ;;  %v324_v43 = vadd.f32 %v276_v34, %v275_v31  ;;  %v212_v44 = vunpack.c.l.bf16 %v186_v18  ;;  %v269_v45 = vmul.f32 %v694_v7, %v210_v35 }
  0x1b   : > { %v311_v47 = vadd.f32 %v310_v38, %v308_v37  ;;  %v325_v48 = vsel %vm309_vm0, %v277_v39, 0.0  ;;  %v270_v49 = vmul.f32 %v696_v8, %v211_v40  ;;  %v222_v50 = vunpack.c.l.bf16 %v189_v36 }
  0x1c   : > { %322 = vadd.xlane.f32.xlu1 %v321_v42  ;;  %v326_v51 = vadd.f32 %v325_v48, %v324_v43  ;;  %v271_v52 = vmul.f32 %v698_v9, %v212_v44  ;;  %v223_v53 = vunpack.c.h.bf16 %v189_v36  ;;  %v224_v54 = vunpack.c.h.bf16 %v190_v41  ;;  %v201_v36 = vld [vmem:[%s692_s21 + $0x84] sm:$0xff] }
  0x1d   : > { %312 = vadd.xlane.f32.xlu0 %v311_v47  ;;  %v314_v56 = vadd.f32 %v270_v49, %v269_v45  ;;  %v281_v57 = vmul.f32 %v694_v7, %v222_v50  ;;  %v219_v58 = vunpack.c.l.bf16 %v187_v46  ;;  %v220_v59 = vunpack.c.h.bf16 %v187_v46  ;;  %v202_v45 = vld [vmem:[%s692_s21 + $0x80] ss:$12 sps:$4 sm:$0xff]   ;;  %v199_v46 = vld [vmem:[%s692_s21 + $0x78] sm:$0xff] }
  0x1e   : > { %v315_v60 = vsel %vm309_vm0, %v271_v52, 0.0  ;;  %v282_v61 = vmul.f32 %v696_v8, %v223_v53  ;;  %v283_v62 = vmul.f32 %v698_v9, %v224_v54  ;;  %v221_v63 = vunpack.c.l.bf16 %v190_v41 }
  0x1f   : > { %v316_v2 = vadd.f32 %v315_v60, %v314_v56  ;;  %v278_v3 = vmul.f32 %v694_v7, %v219_v58  ;;  %v279_v4 = vmul.f32 %v696_v8, %v220_v59  ;;  %v228_v5 = vunpack.c.l.bf16 %v193_v55 }
  0x20   : > { %327 = vadd.xlane.f32.xlu1 %v326_v51  ;;  %v334_v6 = vadd.f32 %v282_v61, %v281_v57  ;;  %v335_v10 = vsel %vm309_vm0, %v283_v62, 0.0  ;;  %v280_v11 = vmul.f32 %v698_v9, %v221_v63  ;;  %v229_v12 = vunpack.c.h.bf16 %v193_v55  ;;  %v205_v55 = vld [vmem:[%s692_s21 + $0x9c] sm:$0xff] }
  0x21   : > { %317 = vadd.xlane.f32.xlu0 %v316_v2  ;;  %v329_v13 = vadd.f32 %v279_v4, %v278_v3  ;;  %v230_v14 = vunpack.c.h.bf16 %v194_v0  ;;  %v287_v15 = vmul.f32 %v694_v7, %v228_v5  ;;  %v225_v16 = vunpack.c.l.bf16 %v191_v1  ;;  %v203_v5 = vld [vmem:[%s692_s21 + $0x90] sm:$0xff] }
  0x22   : > { %v336_v18 = vadd.f32 %v335_v10, %v334_v6  ;;  %v330_v19 = vsel %vm309_vm0, %v280_v11, 0.0  ;;  %v288_v20 = vmul.f32 %v696_v8, %v229_v12  ;;  %v226_v21 = vunpack.c.h.bf16 %v191_v1 }
  0x23   : > { %v331_v24 = vadd.f32 %v330_v19, %v329_v13  ;;  %v289_v25 = vmul.f32 %v698_v9, %v230_v14  ;;  %v227_v26 = vunpack.c.l.bf16 %v194_v0  ;;  %v284_v27 = vmul.f32 %v694_v7, %v225_v16  ;;  %v206_v0 = vld [vmem:[%s692_s21 + $0x98] ss:$12 sps:$4 sm:$0xff]  }
  0x24   : > { %337 = vadd.xlane.f32.xlu1 %v336_v18  ;;  %v344_v28 = vadd.f32 %v288_v20, %v287_v15  ;;  %v285_v29 = vmul.f32 %v696_v8, %v226_v21  ;;  %v234_v30 = vunpack.c.l.bf16 %v197_v17  ;;  %v235_v31 = vunpack.c.h.bf16 %v197_v17 }
  0x25   : > { %332 = vadd.xlane.f32.xlu0 %v331_v24  ;;  %v345_v32 = vsel %vm309_vm0, %v289_v25, 0.0  ;;  %v286_v33 = vmul.f32 %v698_v9, %v227_v26  ;;  %v236_v34 = vunpack.c.h.bf16 %v198_v22  ;;  %v231_v35 = vunpack.c.l.bf16 %v195_v23 }
  0x26   : > { %v346_v37 = vadd.f32 %v345_v32, %v344_v28  ;;  %v339_v38 = vadd.f32 %v285_v29, %v284_v27  ;;  %v293_v39 = vmul.f32 %v694_v7, %v234_v30  ;;  %v294_v40 = vmul.f32 %v696_v8, %v235_v31 }
  0x27   : > { %v340_v41 = vsel %vm309_vm0, %v286_v33, 0.0  ;;  %v295_v42 = vmul.f32 %v698_v9, %v236_v34  ;;  %v232_v43 = vunpack.c.h.bf16 %v195_v23  ;;  %v233_v44 = vunpack.c.l.bf16 %v198_v22 }
  0x28   : > { %347 = vadd.xlane.f32.xlu1 %v346_v37  ;;  %v341_v47 = vadd.f32 %v340_v41, %v339_v38  ;;  %v354_v48 = vadd.f32 %v294_v40, %v293_v39  ;;  %v290_v49 = vmul.f32 %v694_v7, %v231_v35  ;;  %v240_v50 = vunpack.c.l.bf16 %v201_v36  ;;  %v777_v35 = vld [vmem:[#allocation2] ss:$0 sm:$0xff] }
  0x29   : > { %v355_v51 = vsel %vm309_vm0, %v295_v42, 0.0  ;;  %v291_v52 = vmul.f32 %v696_v8, %v232_v43  ;;  %v292_v53 = vmul.f32 %v698_v9, %v233_v44  ;;  %v241_v54 = vunpack.c.h.bf16 %v201_v36 }
  0x2a   : > { %342 = vadd.xlane.f32.xlu0 %v341_v47  ;;  %v356_v56 = vadd.f32 %v355_v51, %v354_v48  ;;  %v242_v57 = vunpack.c.h.bf16 %v202_v45  ;;  %v299_v58 = vmul.f32 %v694_v7, %v240_v50  ;;  %v237_v59 = vunpack.c.l.bf16 %v199_v46 }
  0x2b   : > { %v349_v60 = vadd.f32 %v291_v52, %v290_v49  ;;  %v350_v61 = vsel %vm309_vm0, %v292_v53, 0.0  ;;  %v300_v62 = vmul.f32 %v696_v8, %v241_v54  ;;  %v238_v63 = vunpack.c.h.bf16 %v199_v46 }
  0x2c   : > { %357 = vadd.xlane.f32.xlu1 %v356_v56  ;;  %v301_v1 = vmul.f32 %v698_v9, %v242_v57  ;;  %v239_v2 = vunpack.c.l.bf16 %v202_v45  ;;  %v296_v3 = vmul.f32 %v694_v7, %v237_v59  ;;  %v246_v4 = vunpack.c.l.bf16 %v205_v55 }
  0x2d   : > { %v351_v6 = vadd.f32 %v350_v61, %v349_v60  ;;  %v364_v10 = vadd.f32 %v300_v62, %v299_v58  ;;  %v297_v11 = vmul.f32 %v696_v8, %v238_v63  ;;  %v247_v12 = vunpack.c.h.bf16 %v205_v55 }
  0x2e   : > { %v365_v13 = vsel %vm309_vm0, %v301_v1, 0.0  ;;  %v298_v14 = vmul.f32 %v698_v9, %v239_v2  ;;  %v248_v15 = vunpack.c.h.bf16 %v206_v0  ;;  %v305_v16 = vmul.f32 %v694_v7, %v246_v4 }
  0x2f   : > { %352 = vadd.xlane.f32.xlu0 %v351_v6  ;;  %v366_v17 = vadd.f32 %v365_v13, %v364_v10  ;;  %v359_v18 = vadd.f32 %v297_v11, %v296_v3  ;;  %v306_v19 = vmul.f32 %v696_v8, %v247_v12  ;;  %v243_v20 = vunpack.c.l.bf16 %v203_v5 }
  0x30   : > { %v360_v21 = vsel %vm309_vm0, %v298_v14, 0.0  ;;  %v307_v22 = vmul.f32 %v698_v9, %v248_v15  ;;  %v244_v23 = vunpack.c.h.bf16 %v203_v5  ;;  %v245_v24 = vunpack.c.l.bf16 %v206_v0 }
  0x31   : > { %367 = vadd.xlane.f32.xlu1 %v366_v17  ;;  %v361_v25 = vadd.f32 %v360_v21, %v359_v18  ;;  %v374_v26 = vadd.f32 %v306_v19, %v305_v16  ;;  %v302_v27 = vmul.f32 %v694_v7, %v243_v20 }
  0x32   : > { %v375_v28 = vsel %vm309_vm0, %v307_v22, 0.0  ;;  %v303_v29 = vmul.f32 %v696_v8, %v244_v23  ;;  %v304_v30 = vmul.f32 %v698_v9, %v245_v24 }
  0x33   : > { %362 = vadd.xlane.f32.xlu0 %v361_v25  ;;  %v376_v31 = vadd.f32 %v375_v28, %v374_v26 }
  0x34   : > { %v369_v32 = vadd.f32 %v303_v29, %v302_v27  ;;  %v370_v33 = vsel %vm309_vm0, %v304_v30, 0.0 }
  0x35   : > { %377 = vadd.xlane.f32.xlu1 %v376_v31 }
  0x36   : > { %v371_v34 = vadd.f32 %v370_v33, %v369_v32 }
  0x38   : > { %372 = vadd.xlane.f32.xlu0 %v371_v34 }
  0xa9   : > { %v323_v36 = vpop.xlane.xlu1 %322 }
  0xaa   : > { %v388_v37 = vadd.f32 %v777_v35, %v323_v36  ;;  %v313_v7 = vpop.xlane.xlu0 %312 }
  0xab   : > { %v386_v38 = vadd.f32 %v777_v35, %v313_v7 }
  0xac   : > { %v565_v39 = vmul.f32 -1.442695, %v388_v37 }
  0xad   : > { %v563_v8 = vmul.f32 -1.442695, %v386_v38  ;;  %v328_v40 = vpop.xlane.xlu1 %327 }
  0xae   : > { %588 = vpow2.f32 %v565_v39  ;;  %v389_v9 = vadd.f32 %v777_v35, %v328_v40  ;;  %v318_v41 = vpop.xlane.xlu0 %317 }
  0xaf   : > { %590 = vpow2.f32 %v563_v8  ;;  %v387_v42 = vadd.f32 %v777_v35, %v318_v41 }
  0xb0   : > { %v566_v43 = vmul.f32 -1.442695, %v389_v9 }
  0xb1   : > { %v564_v44 = vmul.f32 -1.442695, %v387_v42  ;;  %v338_v45 = vpop.xlane.xlu1 %337 }
  0xb2   : > { %592 = vpow2.f32 %v566_v43  ;;  %v391_v46 = vadd.f32 %v777_v35, %v338_v45  ;;  %v333_v47 = vpop.xlane.xlu0 %332 }
  0xb3   : > { %594 = vpow2.f32 %v564_v44  ;;  %v390_v48 = vadd.f32 %v777_v35, %v333_v47 }
  0xb4   : > { %v568_v49 = vmul.f32 -1.442695, %v391_v46 }
  0xb5   : > { %v567_v50 = vmul.f32 -1.442695, %v390_v48  ;;  %v348_v51 = vpop.xlane.xlu1 %347 }
  0xb6   : > { %596 = vpow2.f32 %v568_v49  ;;  %v393_v52 = vadd.f32 %v777_v35, %v348_v51 }
  0xb7   : > { %598 = vpow2.f32 %v567_v50  ;;  %v343_v53 = vpop.xlane.xlu0 %342 }
  0xb8   : > { %v589_v54 = vpop.eup %588  ;;  %v570_v55 = vmul.f32 -1.442695, %v393_v52  ;;  %v392_v56 = vadd.f32 %v777_v35, %v343_v53 }
  0xb9   : > { %v591_v57 = vpop.eup %590  ;;  %v444_v58 = vadd.f32 1.0, %v589_v54  ;;  %v358_v59 = vpop.xlane.xlu1 %357 }
  0xba   : > { %v442_v60 = vadd.f32 1.0, %v591_v57  ;;  %600 = vpow2.f32 %v570_v55  ;;  %v569_v61 = vmul.f32 -1.442695, %v392_v56  ;;  %v395_v62 = vadd.f32 %v777_v35, %v358_v59 }
  0xbb   : > { %602 = vrcp.f32 %v444_v58 }
  0xbc   : > { %v593_v63 = vpop.eup %592  ;;  %604 = vrcp.f32 %v442_v60  ;;  %v572_v0 = vmul.f32 -1.442695, %v395_v62  ;;  %v353_v1 = vpop.xlane.xlu0 %352 }
  0xbd   : > { %v595_v2 = vpop.eup %594  ;;  %v445_v3 = vadd.f32 1.0, %v593_v63  ;;  %606 = vpow2.f32 %v569_v61  ;;  %v394_v4 = vadd.f32 %v777_v35, %v353_v1 }
  0xbe   : > { %v443_v5 = vadd.f32 1.0, %v595_v2  ;;  %608 = vpow2.f32 %v572_v0  ;;  %v368_v6 = vpop.xlane.xlu1 %367 }
  0xbf   : > { %610 = vrcp.f32 %v445_v3  ;;  %v571_v10 = vmul.f32 -1.442695, %v394_v4  ;;  %v397_v11 = vadd.f32 %v777_v35, %v368_v6 }
  0xc0   : > { %v597_v12 = vpop.eup %596  ;;  %612 = vrcp.f32 %v443_v5  ;;  %v363_v13 = vpop.xlane.xlu0 %362 }
  0xc1   : > { %v599_v14 = vpop.eup %598  ;;  %v447_v15 = vadd.f32 1.0, %v597_v12  ;;  %614 = vpow2.f32 %v571_v10  ;;  %v574_v16 = vmul.f32 -1.442695, %v397_v11  ;;  %v396_v17 = vadd.f32 %v777_v35, %v363_v13 }
  0xc2   : > { %v446_v18 = vadd.f32 1.0, %v599_v14  ;;  %v378_v19 = vpop.xlane.xlu1 %377 }
  0xc3   : > { %616 = vrcp.f32 %v447_v15  ;;  %v573_v20 = vmul.f32 -1.442695, %v396_v17  ;;  %v399_v21 = vadd.f32 %v777_v35, %v378_v19 }
  0xc4   : > { %v601_v22 = vpop.eup %600  ;;  %618 = vrcp.f32 %v446_v18 }
  0xc5   : > { %v603_v23 = vpop.eup %602  ;;  %v449_v24 = vadd.f32 1.0, %v601_v22  ;;  %620 = vpow2.f32 %v574_v16  ;;  %v576_v25 = vmul.f32 -1.442695, %v399_v21  ;;  %v373_v26 = vpop.xlane.xlu0 %372 }
  0xc6   : > { %v605_v27 = vpop.eup %604  ;;  %487 = vst.msk [vmem:[%s795_s25 + $0x10] sm:$0xff] %vm484_vm1, %v603_v23  ;;  %622 = vpow2.f32 %v573_v20  ;;  %v398_v28 = vadd.f32 %v777_v35, %v373_v26 }
  0xc7   : > { %v607_v29 = vpop.eup %606  ;;  %485 = vst.msk [vmem:[%s795_s25] sm:$0xff] %vm484_vm1, %v605_v27  ;;  %624 = vrcp.f32 %v449_v24 }
  0xc8   : > { %v609_v30 = vpop.eup %608  ;;  %v448_v31 = vadd.f32 1.0, %v607_v29  ;;  %626 = vpow2.f32 %v576_v25  ;;  %v575_v32 = vmul.f32 -1.442695, %v398_v28 }
  0xc9   : > { %v611_v33 = vpop.eup %610  ;;  %v451_v34 = vadd.f32 1.0, %v609_v30 }
  0xca   : > { %v613_v36 = vpop.eup %612  ;;  %488 = vst.msk [vmem:[%s795_s25 + $0x18] sm:$0xff] %vm484_vm1, %v611_v33  ;;  %628 = vrcp.f32 %v448_v31 }
  0xcb   : > { %v615_v37 = vpop.eup %614  ;;  %486 = vst.msk [vmem:[%s795_s25 + $0x8] sm:$0xff] %vm484_vm1, %v613_v36  ;;  %630 = vrcp.f32 %v451_v34 }
  0xcc   : > { %v450_v35 = vadd.f32 1.0, %v615_v37  ;;  %632 = vpow2.f32 %v575_v32 }
  0xcd   : > { %v617_v7 = vpop.eup %616 }
  0xce   : > { %v619_v38 = vpop.eup %618  ;;  %490 = vst.msk [vmem:[%s795_s25 + $0x28] sm:$0xff] %vm484_vm1, %v617_v7  ;;  %634 = vrcp.f32 %v450_v35 }
  0xcf   : > { %v621_v39 = vpop.eup %620  ;;  %489 = vst.msk [vmem:[%s795_s25 + $0x20] sm:$0xff] %vm484_vm1, %v619_v38 }
  0xd0   : > { %v623_v8 = vpop.eup %622  ;;  %v453_v40 = vadd.f32 1.0, %v621_v39 }
  0xd1   : > { %v625_v9 = vpop.eup %624  ;;  %v452_v41 = vadd.f32 1.0, %v623_v8 }
  0xd2   : > { %v627_v42 = vpop.eup %626  ;;  %492 = vst.msk [vmem:[%s795_s25 + $0x38] sm:$0xff] %vm484_vm1, %v625_v9  ;;  %636 = vrcp.f32 %v453_v40 }
  0xd3   : > { %638 = vrcp.f32 %v452_v41  ;;  %v455_v43 = vadd.f32 1.0, %v627_v42 }
  0xd4   : > { %v629_v44 = vpop.eup %628 }
  0xd5   : > { %v631_v45 = vpop.eup %630  ;;  %491 = vst.msk [vmem:[%s795_s25 + $0x30] sm:$0xff] %vm484_vm1, %v629_v44  ;;  %640 = vrcp.f32 %v455_v43 }
  0xd6   : > { %v633_v46 = vpop.eup %632  ;;  %494 = vst.msk [vmem:[%s795_s25 + $0x48] sm:$0xff] %vm484_vm1, %v631_v45 }
  0xd7   : > { %v454_v47 = vadd.f32 1.0, %v633_v46 }
  0xd8   : > { %v635_v48 = vpop.eup %634 }
  0xd9   : > { %493 = vst.msk [vmem:[%s795_s25 + $0x40] sm:$0xff] %vm484_vm1, %v635_v48  ;;  %642 = vrcp.f32 %v454_v47 }
  0xdc   : > { %v637_v49 = vpop.eup %636 }
  0xdd   : > { %v639_v50 = vpop.eup %638  ;;  %496 = vst.msk [vmem:[%s795_s25 + $0x58] sm:$0xff] %vm484_vm1, %v637_v49 }
  0xde   : > { %495 = vst.msk [vmem:[%s795_s25 + $0x50] sm:$0xff] %vm484_vm1, %v639_v50 }
  0xdf   : > { %v641_v51 = vpop.eup %640 }
  0xe0   : > { %498 = vst.msk [vmem:[%s795_s25 + $0x68] sm:$0xff] %vm484_vm1, %v641_v51 }
  0xe3   : > { %v643_v52 = vpop.eup %642 }
  0xe4   : > { %497 = vst.msk [vmem:[%s795_s25 + $0x60] sm:$0xff] %vm484_vm1, %v643_v52 }
  0xe5 PF: > { %s15_s14 = sadd.s32 1, %s650_s14  }
  0xe6   : > { %p12_p4 = scmp.ge.s32.totalorder %s15_s14, 16  }
  0xe8   :  { %14 = sbr.rel (!%p12_p4) target bundleno = 3 (0x3), region = 62 }

</bundles_post_ra>
